<compile_context>
chip_gen: v7x
topology: tpu7x:2x2x1
jax: 0.10.0
libtpu: 0.0.40
codegen_flags: <defaults>
</compile_context>

<pallas_src>
import functools

import numpy as np
import jax
import jax.numpy as jnp
from jax.experimental import pallas as pl
from jax.experimental.pallas import tpu as pltpu


# ----------------------------------------------------------------------------
# Kernel
# ----------------------------------------------------------------------------
def _dqn_fused_kernel(x_ref, mask_ref,
                      w1_ref, b1_ref, w2_ref, b2_ref, w3_ref, b3_ref,
                      pmat_ref, wf1_ref, bf1_ref, wf2_ref, bf2_ref,
                      o_ref,
                      pad2_ref, pad3_ref, flat_ref, *, H, W):
    WP = W + 2
    M = H * WP                                    # rows of the padded-stride view
    mask = mask_ref[...]                          # (M, 1): 1 = valid col, 0 = phantom

    def conv3x3_relu(read_rows, w_ref, b_ref):
        cout = w_ref.shape[-1]
        acc = jnp.zeros((M, cout), jnp.float32)
        for dy in range(3):                       # 9 image-level matmuls
            for dx in range(3):
                acc = acc + jnp.dot(read_rows(dy * WP + dx), w_ref[dy, dx],
                                    preferred_element_type=jnp.float32)
        return jnp.maximum(acc + b_ref[...], 0.0) * mask   # (M, cout)

    # conv1: input block already padded & flattened by the wrapper.
    a1 = conv3x3_relu(lambda off: x_ref[0, pl.ds(off, M), :], w1_ref, b1_ref)
    pad2_ref[...] = jnp.zeros(pad2_ref.shape, pad2_ref.dtype)
    pad2_ref[pl.ds(WP + 1, M), :] = a1            # interior of the padded buffer

    # conv2
    a2 = conv3x3_relu(lambda off: pad2_ref[pl.ds(off, M), :], w2_ref, b2_ref)
    pad3_ref[...] = jnp.zeros(pad3_ref.shape, pad3_ref.dtype)
    pad3_ref[pl.ds(WP + 1, M), :] = a2

    # conv3 -> feeds the pool matmul directly (no writeback)
    a3 = conv3x3_relu(lambda off: pad3_ref[pl.ds(off, M), :], w3_ref, b3_ref)   # (M,128)

    # adaptive_avg_pool2d -> (6,6) as a single lane-dense matmul: (36, M) @ (M, 128)
    pooled = jnp.dot(pmat_ref[...], a3, preferred_element_type=jnp.float32)     # (36,128)

    # Flatten (36,128) -> (1, 4608) through VMEM (36 dense, 128-lane-aligned stores),
    # in (spatial k = i*6+j, channel) order matching the permuted fc1 weight.
    for k in range(36):
        flat_ref[0:1, k * 128:(k + 1) * 128] = pooled[k:k + 1, :]

    # fc1 (bf16 weight, f32 accumulation) + ReLU + fc2
    h = jnp.dot(flat_ref[...].astype(jnp.bfloat16), wf1_ref[...],
                preferred_element_type=jnp.float32)        # (1, 256)
    h = jnp.maximum(h + bf1_ref[...], 0.0)
    out = jnp.dot(h, wf2_ref[...], preferred_element_type=jnp.float32) + bf2_ref[...]
    o_ref[0] = out.astype(o_ref.dtype)


# ----------------------------------------------------------------------------
# Host-built constant operands
# ----------------------------------------------------------------------------
def _ceil_div(a, b):
    return -(-a // b)


def _pool_matrix(H, W):
    """(36, H*(W+2)) matrix implementing adaptive_avg_pool2d((6,6)) on the
    padded-stride-flattened conv3 output (PyTorch adaptive bin boundaries)."""
    WP = W + 2
    P = np.zeros((36, H * WP), np.float32)
    for i in range(6):
        h0, h1 = (i * H) // 6, _ceil_div((i + 1) * H, 6)
        for j in range(6):
            w0, w1 = (j * W) // 6, _ceil_div((j + 1) * W, 6)
            inv = 1.0 / float((h1 - h0) * (w1 - w0))
            for h in range(h0, h1):
                P[i * 6 + j, h * WP + w0: h * WP + w1] = inv
    return jnp.asarray(P)


def _col_mask(H, W):
    """(H*(W+2), 1) mask: 1 for real columns (w < W), 0 for the 2 phantom cols."""
    WP = W + 2
    m = np.zeros((H * WP, 1), np.float32)
    for h in range(H):
        m[h * WP: h * WP + W, 0] = 1.0
    return jnp.asarray(m)


# ----------------------------------------------------------------------------
# Wrapper
# ----------------------------------------------------------------------------
def dqn_forward(x_nchw, params):
    """Forward pass matching the PyTorch DQN module.  Input is NCHW."""
    N, Cin, H, W = x_nchw.shape
    HP, WP = H + 2, W + 2
    M = H * WP
    PAD_ROWS = HP * WP + 2          # 2 extra zero rows so every tap window fits
    A = params["w_fc2"].shape[-1]

    # NCHW -> NHWC, pad the 1-pixel halo of the (tiny) network input once,
    # flatten the padded grid so the kernel can use contiguous row windows.
    x = jnp.transpose(x_nchw, (0, 2, 3, 1)).astype(jnp.float32)
    x = jnp.pad(x, ((0, 0), (1, 1), (1, 1), (0, 0))).reshape(N, HP * WP, Cin)
    x = jnp.pad(x, ((0, 0), (0, 2), (0, 0)))                       # (N, PAD_ROWS, Cin)

    pmat = _pool_matrix(H, W)
    mask = _col_mask(H, W)
    b1 = params["b_conv1"].reshape(1, -1)
    b2 = params["b_conv2"].reshape(1, -1)
    b3 = params["b_conv3"].reshape(1, -1)
    bf1 = params["b_fc1"].reshape(1, -1)
    bf2 = params["b_fc2"].reshape(1, -1)

    const2 = lambda n: (0, 0)
    const4 = lambda n: (0, 0, 0, 0)

    out = pl.pallas_call(
        functools.partial(_dqn_fused_kernel, H=H, W=W),
        out_shape=jax.ShapeDtypeStruct((N, 1, A), jnp.float32),
        grid=(N,),
        in_specs=[
            pl.BlockSpec((1, PAD_ROWS, Cin), lambda n: (n, 0, 0)),   # x (per image)
            pl.BlockSpec((M, 1), const2),                            # column mask
            pl.BlockSpec((3, 3, Cin, 32), const4), pl.BlockSpec((1, 32), const2),
            pl.BlockSpec((3, 3, 32, 64), const4), pl.BlockSpec((1, 64), const2),
            pl.BlockSpec((3, 3, 64, 128), const4), pl.BlockSpec((1, 128), const2),
            pl.BlockSpec((36, M), const2),                           # pool matrix
            pl.BlockSpec((6 * 6 * 128, 256), const2),                # w_fc1 (bf16)
            pl.BlockSpec((1, 256), const2),                          # b_fc1
            pl.BlockSpec((256, A), const2),                          # w_fc2
            pl.BlockSpec((1, A), const2),                            # b_fc2
        ],
        out_specs=pl.BlockSpec((1, 1, A), lambda n: (n, 0, 0)),
        scratch_shapes=[
            pltpu.VMEM((PAD_ROWS, 32), jnp.float32),    # padded conv1 activations
            pltpu.VMEM((PAD_ROWS, 64), jnp.float32),    # padded conv2 activations
            pltpu.VMEM((1, 6 * 6 * 128), jnp.float32),  # flattened pooled features
        ],
        compiler_params=pltpu.CompilerParams(
            dimension_semantics=("parallel",)),
    )(x, mask,
      params["w_conv1"], b1, params["w_conv2"], b2, params["w_conv3"], b3,
      pmat, params["w_fc1"], bf1, params["w_fc2"], bf2)
    return out.reshape(N, A)


# ----------------------------------------------------------------------------
# Deterministic parameter initialization (shapes from the PyTorch __init__)
# ----------------------------------------------------------------------------
def init_params(key, in_channels, action_dim):
    ks = jax.random.split(key, 5)

    def conv_init(k, cin, cout):
        kw_, kb_ = jax.random.split(k)
        bound = 1.0 / np.sqrt(cin * 9)
        w_pt = jax.random.uniform(kw_, (cout, cin, 3, 3), jnp.float32, -bound, bound)  # OIHW
        b = jax.random.uniform(kb_, (cout,), jnp.float32, -bound, bound)
        return jnp.transpose(w_pt, (2, 3, 1, 0)), b     # -> HWIO

    w1, b1 = conv_init(ks[0], in_channels, 32)
    w2, b2 = conv_init(ks[1], 32, 64)
    w3, b3 = conv_init(ks[2], 64, 128)

    # fc1: PyTorch weight (256, 128*6*6) over a (C, 6, 6) flatten.  Permute to
    # (spatial k = i*6+j, channel c) row order (matching the kernel's flatten)
    # and cast to bf16 — it is by far the largest HBM transfer in the network.
    kw1, kb1 = jax.random.split(ks[3])
    bound = 1.0 / np.sqrt(128 * 6 * 6)
    wfc1_pt = jax.random.uniform(kw1, (256, 128, 6, 6), jnp.float32, -bound, bound)
    wfc1 = jnp.transpose(wfc1_pt, (2, 3, 1, 0)).reshape(6 * 6 * 128, 256)
    wfc1 = wfc1.astype(jnp.bfloat16)
    bfc1 = jax.random.uniform(kb1, (256,), jnp.float32, -bound, bound)

    kw2, kb2 = jax.random.split(ks[4])
    bound = 1.0 / np.sqrt(256)
    wfc2 = jnp.transpose(
        jax.random.uniform(kw2, (action_dim, 256), jnp.float32, -bound, bound))  # (256, A)
    bfc2 = jax.random.uniform(kb2, (action_dim,), jnp.float32, -bound, bound)

    return dict(w_conv1=w1, b_conv1=b1, w_conv2=w2, b_conv2=b2,
                w_conv3=w3, b_conv3=b3, w_fc1=wfc1, b_fc1=bfc1,
                w_fc2=wfc2, b_fc2=bfc2)


# ----------------------------------------------------------------------------
if __name__ == "__main__":
    key = jax.random.PRNGKey(0)
    k_x, k_p = jax.random.split(key)

    N, C_in, H, W = 2, 4, 16, 16      # general H,W now supported by the pool matrix
    action_dim = 4

    x = jax.random.normal(k_x, (N, C_in, H, W), jnp.float32)   # NCHW like PyTorch
    params = init_params(k_p, C_in, action_dim)

    out = jax.block_until_ready(dqn_forward(x, params))
    assert out.shape == (N, action_dim), out.shape
    assert bool(jnp.all(jnp.isfinite(out)))
    print("KERNEL_OK")
</pallas_src>

<mosaic_0001>
module attributes {stable_mosaic.version = 11 : i64} {
  func.func @_dqn_fused_kernel(%arg0: i32, %arg1: memref<1x326x4xf32, #tpu.memory_space<vmem>>, %arg2: memref<288x1xf32, #tpu.memory_space<vmem>>, %arg3: memref<3x3x4x32xf32, #tpu.memory_space<vmem>>, %arg4: memref<1x32xf32, #tpu.memory_space<vmem>>, %arg5: memref<3x3x32x64xf32, #tpu.memory_space<vmem>>, %arg6: memref<1x64xf32, #tpu.memory_space<vmem>>, %arg7: memref<3x3x64x128xf32, #tpu.memory_space<vmem>>, %arg8: memref<1x128xf32, #tpu.memory_space<vmem>>, %arg9: memref<36x288xf32, #tpu.memory_space<vmem>>, %arg10: memref<4608x256xbf16, #tpu.memory_space<vmem>>, %arg11: memref<1x256xf32, #tpu.memory_space<vmem>>, %arg12: memref<256x4xf32, #tpu.memory_space<vmem>>, %arg13: memref<1x4xf32, #tpu.memory_space<vmem>>, %arg14: memref<1x1x4xf32, #tpu.memory_space<vmem>>, %arg15: memref<326x32xf32, #tpu.memory_space<vmem>>, %arg16: memref<326x64xf32, #tpu.memory_space<vmem>>, %arg17: memref<1x4608xf32, #tpu.memory_space<vmem>>) attributes {dimension_semantics = [#tpu.dimension_semantics<parallel>], iteration_bounds = array<i64: 2>, scalar_prefetch = 0 : i64, scratch_operands = 3 : i64, tpu.core_type = #tpu.core_type<tc>, window_params = [{transform_indices = @transform_0, window_bounds = array<i64: 1, 326, 4>}, {pipeline_mode = #tpu.pipeline_mode<synchronous>, transform_indices = @transform_1, window_bounds = array<i64: 288, 1>}, {pipeline_mode = #tpu.pipeline_mode<synchronous>, transform_indices = @transform_2, window_bounds = array<i64: 3, 3, 4, 32>}, {pipeline_mode = #tpu.pipeline_mode<synchronous>, transform_indices = @transform_3, window_bounds = array<i64: 1, 32>}, {pipeline_mode = #tpu.pipeline_mode<synchronous>, transform_indices = @transform_4, window_bounds = array<i64: 3, 3, 32, 64>}, {pipeline_mode = #tpu.pipeline_mode<synchronous>, transform_indices = @transform_5, window_bounds = array<i64: 1, 64>}, {pipeline_mode = #tpu.pipeline_mode<synchronous>, transform_indices = @transform_6, window_bounds = array<i64: 3, 3, 64, 128>}, {pipeline_mode = #tpu.pipeline_mode<synchronous>, transform_indices = @transform_7, window_bounds = array<i64: 1, 128>}, {pipeline_mode = #tpu.pipeline_mode<synchronous>, transform_indices = @transform_8, window_bounds = array<i64: 36, 288>}, {pipeline_mode = #tpu.pipeline_mode<synchronous>, transform_indices = @transform_9, window_bounds = array<i64: 4608, 256>}, {pipeline_mode = #tpu.pipeline_mode<synchronous>, transform_indices = @transform_10, window_bounds = array<i64: 1, 256>}, {pipeline_mode = #tpu.pipeline_mode<synchronous>, transform_indices = @transform_11, window_bounds = array<i64: 256, 4>}, {pipeline_mode = #tpu.pipeline_mode<synchronous>, transform_indices = @transform_12, window_bounds = array<i64: 1, 4>}, {transform_indices = @transform_13, window_bounds = array<i64: 1, 1, 4>}]} {
    %c0 = arith.constant 0 : index
    %c0_0 = arith.constant 0 : index
    %0 = vector.load %arg2[%c0, %c0_0] : memref<288x1xf32, #tpu.memory_space<vmem>>, vector<288x1xf32>
    %cst = arith.constant 0.000000e+00 : f32
    %1 = vector.broadcast %cst : f32 to vector<288x32xf32>
    %c0_1 = arith.constant 0 : index
    %c0_2 = arith.constant 0 : index
    %c0_3 = arith.constant 0 : index
    %2 = vector.load %arg1[%c0_1, %c0_2, %c0_3] : memref<1x326x4xf32, #tpu.memory_space<vmem>>, vector<1x288x4xf32>
    %3 = vector.shape_cast %2 : vector<1x288x4xf32> to vector<288x4xf32>
    %c0_4 = arith.constant 0 : index
    %c0_5 = arith.constant 0 : index
    %c0_6 = arith.constant 0 : index
    %c0_7 = arith.constant 0 : index
    %4 = vector.load %arg3[%c0_4, %c0_5, %c0_6, %c0_7] : memref<3x3x4x32xf32, #tpu.memory_space<vmem>>, vector<1x1x4x32xf32>
    %5 = vector.shape_cast %4 : vector<1x1x4x32xf32> to vector<4x32xf32>
    %cst_8 = arith.constant dense<0.000000e+00> : vector<288x32xf32>
    %6 = tpu.matmul %3, %5, %cst_8 {dimension_numbers = #tpu.dot_dimension_numbers<[1], [0], [0], [1], [0, 0, 1, 1], [], []>} : vector<288x4xf32>, vector<4x32xf32>, vector<288x32xf32> -> vector<288x32xf32>
    %7 = arith.addf %1, %6 : vector<288x32xf32>
    %c0_9 = arith.constant 0 : index
    %c1 = arith.constant 1 : index
    %c0_10 = arith.constant 0 : index
    %8 = vector.load %arg1[%c0_9, %c1, %c0_10] : memref<1x326x4xf32, #tpu.memory_space<vmem>>, vector<1x288x4xf32>
    %9 = vector.shape_cast %8 : vector<1x288x4xf32> to vector<288x4xf32>
    %c0_11 = arith.constant 0 : index
    %c1_12 = arith.constant 1 : index
    %c0_13 = arith.constant 0 : index
    %c0_14 = arith.constant 0 : index
    %10 = vector.load %arg3[%c0_11, %c1_12, %c0_13, %c0_14] : memref<3x3x4x32xf32, #tpu.memory_space<vmem>>, vector<1x1x4x32xf32>
    %11 = vector.shape_cast %10 : vector<1x1x4x32xf32> to vector<4x32xf32>
    %cst_15 = arith.constant dense<0.000000e+00> : vector<288x32xf32>
    %12 = tpu.matmul %9, %11, %cst_15 {dimension_numbers = #tpu.dot_dimension_numbers<[1], [0], [0], [1], [0, 0, 1, 1], [], []>} : vector<288x4xf32>, vector<4x32xf32>, vector<288x32xf32> -> vector<288x32xf32>
    %13 = arith.addf %7, %12 : vector<288x32xf32>
    %c0_16 = arith.constant 0 : index
    %c2 = arith.constant 2 : index
    %c0_17 = arith.constant 0 : index
    %14 = vector.load %arg1[%c0_16, %c2, %c0_17] : memref<1x326x4xf32, #tpu.memory_space<vmem>>, vector<1x288x4xf32>
    %15 = vector.shape_cast %14 : vector<1x288x4xf32> to vector<288x4xf32>
    %c0_18 = arith.constant 0 : index
    %c2_19 = arith.constant 2 : index
    %c0_20 = arith.constant 0 : index
    %c0_21 = arith.constant 0 : index
    %16 = vector.load %arg3[%c0_18, %c2_19, %c0_20, %c0_21] : memref<3x3x4x32xf32, #tpu.memory_space<vmem>>, vector<1x1x4x32xf32>
    %17 = vector.shape_cast %16 : vector<1x1x4x32xf32> to vector<4x32xf32>
    %cst_22 = arith.constant dense<0.000000e+00> : vector<288x32xf32>
    %18 = tpu.matmul %15, %17, %cst_22 {dimension_numbers = #tpu.dot_dimension_numbers<[1], [0], [0], [1], [0, 0, 1, 1], [], []>} : vector<288x4xf32>, vector<4x32xf32>, vector<288x32xf32> -> vector<288x32xf32>
    %19 = arith.addf %13, %18 : vector<288x32xf32>
    %c0_23 = arith.constant 0 : index
    %c18 = arith.constant 18 : index
    %c0_24 = arith.constant 0 : index
    %20 = vector.load %arg1[%c0_23, %c18, %c0_24] : memref<1x326x4xf32, #tpu.memory_space<vmem>>, vector<1x288x4xf32>
    %21 = vector.shape_cast %20 : vector<1x288x4xf32> to vector<288x4xf32>
    %c1_25 = arith.constant 1 : index
    %c0_26 = arith.constant 0 : index
    %c0_27 = arith.constant 0 : index
    %c0_28 = arith.constant 0 : index
    %22 = vector.load %arg3[%c1_25, %c0_26, %c0_27, %c0_28] : memref<3x3x4x32xf32, #tpu.memory_space<vmem>>, vector<1x1x4x32xf32>
    %23 = vector.shape_cast %22 : vector<1x1x4x32xf32> to vector<4x32xf32>
    %cst_29 = arith.constant dense<0.000000e+00> : vector<288x32xf32>
    %24 = tpu.matmul %21, %23, %cst_29 {dimension_numbers = #tpu.dot_dimension_numbers<[1], [0], [0], [1], [0, 0, 1, 1], [], []>} : vector<288x4xf32>, vector<4x32xf32>, vector<288x32xf32> -> vector<288x32xf32>
    %25 = arith.addf %19, %24 : vector<288x32xf32>
    %c0_30 = arith.constant 0 : index
    %c19 = arith.constant 19 : index
    %c0_31 = arith.constant 0 : index
    %26 = vector.load %arg1[%c0_30, %c19, %c0_31] : memref<1x326x4xf32, #tpu.memory_space<vmem>>, vector<1x288x4xf32>
    %27 = vector.shape_cast %26 : vector<1x288x4xf32> to vector<288x4xf32>
    %c1_32 = arith.constant 1 : index
    %c1_33 = arith.constant 1 : index
    %c0_34 = arith.constant 0 : index
    %c0_35 = arith.constant 0 : index
    %28 = vector.load %arg3[%c1_32, %c1_33, %c0_34, %c0_35] : memref<3x3x4x32xf32, #tpu.memory_space<vmem>>, vector<1x1x4x32xf32>
    %29 = vector.shape_cast %28 : vector<1x1x4x32xf32> to vector<4x32xf32>
    %cst_36 = arith.constant dense<0.000000e+00> : vector<288x32xf32>
    %30 = tpu.matmul %27, %29, %cst_36 {dimension_numbers = #tpu.dot_dimension_numbers<[1], [0], [0], [1], [0, 0, 1, 1], [], []>} : vector<288x4xf32>, vector<4x32xf32>, vector<288x32xf32> -> vector<288x32xf32>
    %31 = arith.addf %25, %30 : vector<288x32xf32>
    %c0_37 = arith.constant 0 : index
    %c20 = arith.constant 20 : index
    %c0_38 = arith.constant 0 : index
    %32 = vector.load %arg1[%c0_37, %c20, %c0_38] : memref<1x326x4xf32, #tpu.memory_space<vmem>>, vector<1x288x4xf32>
    %33 = vector.shape_cast %32 : vector<1x288x4xf32> to vector<288x4xf32>
    %c1_39 = arith.constant 1 : index
    %c2_40 = arith.constant 2 : index
    %c0_41 = arith.constant 0 : index
    %c0_42 = arith.constant 0 : index
    %34 = vector.load %arg3[%c1_39, %c2_40, %c0_41, %c0_42] : memref<3x3x4x32xf32, #tpu.memory_space<vmem>>, vector<1x1x4x32xf32>
    %35 = vector.shape_cast %34 : vector<1x1x4x32xf32> to vector<4x32xf32>
    %cst_43 = arith.constant dense<0.000000e+00> : vector<288x32xf32>
    %36 = tpu.matmul %33, %35, %cst_43 {dimension_numbers = #tpu.dot_dimension_numbers<[1], [0], [0], [1], [0, 0, 1, 1], [], []>} : vector<288x4xf32>, vector<4x32xf32>, vector<288x32xf32> -> vector<288x32xf32>
    %37 = arith.addf %31, %36 : vector<288x32xf32>
    %c0_44 = arith.constant 0 : index
    %c36 = arith.constant 36 : index
    %c0_45 = arith.constant 0 : index
    %38 = vector.load %arg1[%c0_44, %c36, %c0_45] : memref<1x326x4xf32, #tpu.memory_space<vmem>>, vector<1x288x4xf32>
    %39 = vector.shape_cast %38 : vector<1x288x4xf32> to vector<288x4xf32>
    %c2_46 = arith.constant 2 : index
    %c0_47 = arith.constant 0 : index
    %c0_48 = arith.constant 0 : index
    %c0_49 = arith.constant 0 : index
    %40 = vector.load %arg3[%c2_46, %c0_47, %c0_48, %c0_49] : memref<3x3x4x32xf32, #tpu.memory_space<vmem>>, vector<1x1x4x32xf32>
    %41 = vector.shape_cast %40 : vector<1x1x4x32xf32> to vector<4x32xf32>
    %cst_50 = arith.constant dense<0.000000e+00> : vector<288x32xf32>
    %42 = tpu.matmul %39, %41, %cst_50 {dimension_numbers = #tpu.dot_dimension_numbers<[1], [0], [0], [1], [0, 0, 1, 1], [], []>} : vector<288x4xf32>, vector<4x32xf32>, vector<288x32xf32> -> vector<288x32xf32>
    %43 = arith.addf %37, %42 : vector<288x32xf32>
    %c0_51 = arith.constant 0 : index
    %c37 = arith.constant 37 : index
    %c0_52 = arith.constant 0 : index
    %44 = vector.load %arg1[%c0_51, %c37, %c0_52] : memref<1x326x4xf32, #tpu.memory_space<vmem>>, vector<1x288x4xf32>
    %45 = vector.shape_cast %44 : vector<1x288x4xf32> to vector<288x4xf32>
    %c2_53 = arith.constant 2 : index
    %c1_54 = arith.constant 1 : index
    %c0_55 = arith.constant 0 : index
    %c0_56 = arith.constant 0 : index
    %46 = vector.load %arg3[%c2_53, %c1_54, %c0_55, %c0_56] : memref<3x3x4x32xf32, #tpu.memory_space<vmem>>, vector<1x1x4x32xf32>
    %47 = vector.shape_cast %46 : vector<1x1x4x32xf32> to vector<4x32xf32>
    %cst_57 = arith.constant dense<0.000000e+00> : vector<288x32xf32>
    %48 = tpu.matmul %45, %47, %cst_57 {dimension_numbers = #tpu.dot_dimension_numbers<[1], [0], [0], [1], [0, 0, 1, 1], [], []>} : vector<288x4xf32>, vector<4x32xf32>, vector<288x32xf32> -> vector<288x32xf32>
    %49 = arith.addf %43, %48 : vector<288x32xf32>
    %c0_58 = arith.constant 0 : index
    %c38 = arith.constant 38 : index
    %c0_59 = arith.constant 0 : index
    %50 = vector.load %arg1[%c0_58, %c38, %c0_59] : memref<1x326x4xf32, #tpu.memory_space<vmem>>, vector<1x288x4xf32>
    %51 = vector.shape_cast %50 : vector<1x288x4xf32> to vector<288x4xf32>
    %c2_60 = arith.constant 2 : index
    %c2_61 = arith.constant 2 : index
    %c0_62 = arith.constant 0 : index
    %c0_63 = arith.constant 0 : index
    %52 = vector.load %arg3[%c2_60, %c2_61, %c0_62, %c0_63] : memref<3x3x4x32xf32, #tpu.memory_space<vmem>>, vector<1x1x4x32xf32>
    %53 = vector.shape_cast %52 : vector<1x1x4x32xf32> to vector<4x32xf32>
    %cst_64 = arith.constant dense<0.000000e+00> : vector<288x32xf32>
    %54 = tpu.matmul %51, %53, %cst_64 {dimension_numbers = #tpu.dot_dimension_numbers<[1], [0], [0], [1], [0, 0, 1, 1], [], []>} : vector<288x4xf32>, vector<4x32xf32>, vector<288x32xf32> -> vector<288x32xf32>
    %55 = arith.addf %49, %54 : vector<288x32xf32>
    %c0_65 = arith.constant 0 : index
    %c0_66 = arith.constant 0 : index
    %56 = vector.load %arg4[%c0_65, %c0_66] : memref<1x32xf32, #tpu.memory_space<vmem>>, vector<1x32xf32>
    %57 = vector.broadcast %56 : vector<1x32xf32> to vector<288x32xf32>
    %58 = arith.addf %55, %57 : vector<288x32xf32>
    %cst_67 = arith.constant 0.000000e+00 : f32
    %59 = vector.broadcast %cst_67 : f32 to vector<288x32xf32>
    %60 = arith.maximumf %58, %59 : vector<288x32xf32>
    %61 = vector.broadcast %0 : vector<288x1xf32> to vector<288x32xf32>
    %62 = arith.mulf %60, %61 : vector<288x32xf32>
    %cst_68 = arith.constant 0.000000e+00 : f32
    %63 = vector.broadcast %cst_68 : f32 to vector<326x32xf32>
    %c0_69 = arith.constant 0 : index
    %c0_70 = arith.constant 0 : index
    %64 = vector.load %arg15[%c0_69, %c0_70] : memref<326x32xf32, #tpu.memory_space<vmem>>, vector<326x32xf32>
    tpu.vector_store %arg15[%c0_69, %c0_70], %63 {strides = array<i32>} : memref<326x32xf32, #tpu.memory_space<vmem>>, vector<326x32xf32>,
    %c19_71 = arith.constant 19 : index
    %c0_72 = arith.constant 0 : index
    %65 = vector.load %arg15[%c19_71, %c0_72] : memref<326x32xf32, #tpu.memory_space<vmem>>, vector<288x32xf32>
    tpu.vector_store %arg15[%c19_71, %c0_72], %62 {strides = array<i32>} : memref<326x32xf32, #tpu.memory_space<vmem>>, vector<288x32xf32>,
    %cst_73 = arith.constant 0.000000e+00 : f32
    %66 = vector.broadcast %cst_73 : f32 to vector<288x64xf32>
    %c0_74 = arith.constant 0 : index
    %c0_75 = arith.constant 0 : index
    %67 = vector.load %arg15[%c0_74, %c0_75] : memref<326x32xf32, #tpu.memory_space<vmem>>, vector<288x32xf32>
    %c0_76 = arith.constant 0 : index
    %c0_77 = arith.constant 0 : index
    %c0_78 = arith.constant 0 : index
    %c0_79 = arith.constant 0 : index
    %68 = vector.load %arg5[%c0_76, %c0_77, %c0_78, %c0_79] : memref<3x3x32x64xf32, #tpu.memory_space<vmem>>, vector<1x1x32x64xf32>
    %69 = vector.shape_cast %68 : vector<1x1x32x64xf32> to vector<32x64xf32>
    %cst_80 = arith.constant dense<0.000000e+00> : vector<288x64xf32>
    %70 = tpu.matmul %67, %69, %cst_80 {dimension_numbers = #tpu.dot_dimension_numbers<[1], [0], [0], [1], [0, 0, 1, 1], [], []>} : vector<288x32xf32>, vector<32x64xf32>, vector<288x64xf32> -> vector<288x64xf32>
    %71 = arith.addf %66, %70 : vector<288x64xf32>
    %c1_81 = arith.constant 1 : index
    %c0_82 = arith.constant 0 : index
    %72 = vector.load %arg15[%c1_81, %c0_82] : memref<326x32xf32, #tpu.memory_space<vmem>>, vector<288x32xf32>
    %c0_83 = arith.constant 0 : index
    %c1_84 = arith.constant 1 : index
    %c0_85 = arith.constant 0 : index
    %c0_86 = arith.constant 0 : index
    %73 = vector.load %arg5[%c0_83, %c1_84, %c0_85, %c0_86] : memref<3x3x32x64xf32, #tpu.memory_space<vmem>>, vector<1x1x32x64xf32>
    %74 = vector.shape_cast %73 : vector<1x1x32x64xf32> to vector<32x64xf32>
    %cst_87 = arith.constant dense<0.000000e+00> : vector<288x64xf32>
    %75 = tpu.matmul %72, %74, %cst_87 {dimension_numbers = #tpu.dot_dimension_numbers<[1], [0], [0], [1], [0, 0, 1, 1], [], []>} : vector<288x32xf32>, vector<32x64xf32>, vector<288x64xf32> -> vector<288x64xf32>
    %76 = arith.addf %71, %75 : vector<288x64xf32>
    %c2_88 = arith.constant 2 : index
    %c0_89 = arith.constant 0 : index
    %77 = vector.load %arg15[%c2_88, %c0_89] : memref<326x32xf32, #tpu.memory_space<vmem>>, vector<288x32xf32>
    %c0_90 = arith.constant 0 : index
    %c2_91 = arith.constant 2 : index
    %c0_92 = arith.constant 0 : index
    %c0_93 = arith.constant 0 : index
    %78 = vector.load %arg5[%c0_90, %c2_91, %c0_92, %c0_93] : memref<3x3x32x64xf32, #tpu.memory_space<vmem>>, vector<1x1x32x64xf32>
    %79 = vector.shape_cast %78 : vector<1x1x32x64xf32> to vector<32x64xf32>
    %cst_94 = arith.constant dense<0.000000e+00> : vector<288x64xf32>
    %80 = tpu.matmul %77, %79, %cst_94 {dimension_numbers = #tpu.dot_dimension_numbers<[1], [0], [0], [1], [0, 0, 1, 1], [], []>} : vector<288x32xf32>, vector<32x64xf32>, vector<288x64xf32> -> vector<288x64xf32>
    %81 = arith.addf %76, %80 : vector<288x64xf32>
    %c18_95 = arith.constant 18 : index
    %c0_96 = arith.constant 0 : index
    %82 = vector.load %arg15[%c18_95, %c0_96] : memref<326x32xf32, #tpu.memory_space<vmem>>, vector<288x32xf32>
    %c1_97 = arith.constant 1 : index
    %c0_98 = arith.constant 0 : index
    %c0_99 = arith.constant 0 : index
    %c0_100 = arith.constant 0 : index
    %83 = vector.load %arg5[%c1_97, %c0_98, %c0_99, %c0_100] : memref<3x3x32x64xf32, #tpu.memory_space<vmem>>, vector<1x1x32x64xf32>
    %84 = vector.shape_cast %83 : vector<1x1x32x64xf32> to vector<32x64xf32>
    %cst_101 = arith.constant dense<0.000000e+00> : vector<288x64xf32>
    %85 = tpu.matmul %82, %84, %cst_101 {dimension_numbers = #tpu.dot_dimension_numbers<[1], [0], [0], [1], [0, 0, 1, 1], [], []>} : vector<288x32xf32>, vector<32x64xf32>, vector<288x64xf32> -> vector<288x64xf32>
    %86 = arith.addf %81, %85 : vector<288x64xf32>
    %c19_102 = arith.constant 19 : index
    %c0_103 = arith.constant 0 : index
    %87 = vector.load %arg15[%c19_102, %c0_103] : memref<326x32xf32, #tpu.memory_space<vmem>>, vector<288x32xf32>
    %c1_104 = arith.constant 1 : index
    %c1_105 = arith.constant 1 : index
    %c0_106 = arith.constant 0 : index
    %c0_107 = arith.constant 0 : index
    %88 = vector.load %arg5[%c1_104, %c1_105, %c0_106, %c0_107] : memref<3x3x32x64xf32, #tpu.memory_space<vmem>>, vector<1x1x32x64xf32>
    %89 = vector.shape_cast %88 : vector<1x1x32x64xf32> to vector<32x64xf32>
    %cst_108 = arith.constant dense<0.000000e+00> : vector<288x64xf32>
    %90 = tpu.matmul %87, %89, %cst_108 {dimension_numbers = #tpu.dot_dimension_numbers<[1], [0], [0], [1], [0, 0, 1, 1], [], []>} : vector<288x32xf32>, vector<32x64xf32>, vector<288x64xf32> -> vector<288x64xf32>
    %91 = arith.addf %86, %90 : vector<288x64xf32>
    %c20_109 = arith.constant 20 : index
    %c0_110 = arith.constant 0 : index
    %92 = vector.load %arg15[%c20_109, %c0_110] : memref<326x32xf32, #tpu.memory_space<vmem>>, vector<288x32xf32>
    %c1_111 = arith.constant 1 : index
    %c2_112 = arith.constant 2 : index
    %c0_113 = arith.constant 0 : index
    %c0_114 = arith.constant 0 : index
    %93 = vector.load %arg5[%c1_111, %c2_112, %c0_113, %c0_114] : memref<3x3x32x64xf32, #tpu.memory_space<vmem>>, vector<1x1x32x64xf32>
    %94 = vector.shape_cast %93 : vector<1x1x32x64xf32> to vector<32x64xf32>
    %cst_115 = arith.constant dense<0.000000e+00> : vector<288x64xf32>
    %95 = tpu.matmul %92, %94, %cst_115 {dimension_numbers = #tpu.dot_dimension_numbers<[1], [0], [0], [1], [0, 0, 1, 1], [], []>} : vector<288x32xf32>, vector<32x64xf32>, vector<288x64xf32> -> vector<288x64xf32>
    %96 = arith.addf %91, %95 : vector<288x64xf32>
    %c36_116 = arith.constant 36 : index
    %c0_117 = arith.constant 0 : index
    %97 = vector.load %arg15[%c36_116, %c0_117] : memref<326x32xf32, #tpu.memory_space<vmem>>, vector<288x32xf32>
    %c2_118 = arith.constant 2 : index
    %c0_119 = arith.constant 0 : index
    %c0_120 = arith.constant 0 : index
    %c0_121 = arith.constant 0 : index
    %98 = vector.load %arg5[%c2_118, %c0_119, %c0_120, %c0_121] : memref<3x3x32x64xf32, #tpu.memory_space<vmem>>, vector<1x1x32x64xf32>
    %99 = vector.shape_cast %98 : vector<1x1x32x64xf32> to vector<32x64xf32>
    %cst_122 = arith.constant dense<0.000000e+00> : vector<288x64xf32>
    %100 = tpu.matmul %97, %99, %cst_122 {dimension_numbers = #tpu.dot_dimension_numbers<[1], [0], [0], [1], [0, 0, 1, 1], [], []>} : vector<288x32xf32>, vector<32x64xf32>, vector<288x64xf32> -> vector<288x64xf32>
    %101 = arith.addf %96, %100 : vector<288x64xf32>
    %c37_123 = arith.constant 37 : index
    %c0_124 = arith.constant 0 : index
    %102 = vector.load %arg15[%c37_123, %c0_124] : memref<326x32xf32, #tpu.memory_space<vmem>>, vector<288x32xf32>
    %c2_125 = arith.constant 2 : index
    %c1_126 = arith.constant 1 : index
    %c0_127 = arith.constant 0 : index
    %c0_128 = arith.constant 0 : index
    %103 = vector.load %arg5[%c2_125, %c1_126, %c0_127, %c0_128] : memref<3x3x32x64xf32, #tpu.memory_space<vmem>>, vector<1x1x32x64xf32>
    %104 = vector.shape_cast %103 : vector<1x1x32x64xf32> to vector<32x64xf32>
    %cst_129 = arith.constant dense<0.000000e+00> : vector<288x64xf32>
    %105 = tpu.matmul %102, %104, %cst_129 {dimension_numbers = #tpu.dot_dimension_numbers<[1], [0], [0], [1], [0, 0, 1, 1], [], []>} : vector<288x32xf32>, vector<32x64xf32>, vector<288x64xf32> -> vector<288x64xf32>
    %106 = arith.addf %101, %105 : vector<288x64xf32>
    %c38_130 = arith.constant 38 : index
    %c0_131 = arith.constant 0 : index
    %107 = vector.load %arg15[%c38_130, %c0_131] : memref<326x32xf32, #tpu.memory_space<vmem>>, vector<288x32xf32>
    %c2_132 = arith.constant 2 : index
    %c2_133 = arith.constant 2 : index
    %c0_134 = arith.constant 0 : index
    %c0_135 = arith.constant 0 : index
    %108 = vector.load %arg5[%c2_132, %c2_133, %c0_134, %c0_135] : memref<3x3x32x64xf32, #tpu.memory_space<vmem>>, vector<1x1x32x64xf32>
    %109 = vector.shape_cast %108 : vector<1x1x32x64xf32> to vector<32x64xf32>
    %cst_136 = arith.constant dense<0.000000e+00> : vector<288x64xf32>
    %110 = tpu.matmul %107, %109, %cst_136 {dimension_numbers = #tpu.dot_dimension_numbers<[1], [0], [0], [1], [0, 0, 1, 1], [], []>} : vector<288x32xf32>, vector<32x64xf32>, vector<288x64xf32> -> vector<288x64xf32>
    %111 = arith.addf %106, %110 : vector<288x64xf32>
    %c0_137 = arith.constant 0 : index
    %c0_138 = arith.constant 0 : index
    %112 = vector.load %arg6[%c0_137, %c0_138] : memref<1x64xf32, #tpu.memory_space<vmem>>, vector<1x64xf32>
    %113 = vector.broadcast %112 : vector<1x64xf32> to vector<288x64xf32>
    %114 = arith.addf %111, %113 : vector<288x64xf32>
    %cst_139 = arith.constant 0.000000e+00 : f32
    %115 = vector.broadcast %cst_139 : f32 to vector<288x64xf32>
    %116 = arith.maximumf %114, %115 : vector<288x64xf32>
    %117 = vector.broadcast %0 : vector<288x1xf32> to vector<288x64xf32>
    %118 = arith.mulf %116, %117 : vector<288x64xf32>
    %cst_140 = arith.constant 0.000000e+00 : f32
    %119 = vector.broadcast %cst_140 : f32 to vector<326x64xf32>
    %c0_141 = arith.constant 0 : index
    %c0_142 = arith.constant 0 : index
    %120 = vector.load %arg16[%c0_141, %c0_142] : memref<326x64xf32, #tpu.memory_space<vmem>>, vector<326x64xf32>
    tpu.vector_store %arg16[%c0_141, %c0_142], %119 {strides = array<i32>} : memref<326x64xf32, #tpu.memory_space<vmem>>, vector<326x64xf32>,
    %c19_143 = arith.constant 19 : index
    %c0_144 = arith.constant 0 : index
    %121 = vector.load %arg16[%c19_143, %c0_144] : memref<326x64xf32, #tpu.memory_space<vmem>>, vector<288x64xf32>
    tpu.vector_store %arg16[%c19_143, %c0_144], %118 {strides = array<i32>} : memref<326x64xf32, #tpu.memory_space<vmem>>, vector<288x64xf32>,
    %cst_145 = arith.constant 0.000000e+00 : f32
    %122 = vector.broadcast %cst_145 : f32 to vector<288x128xf32>
    %c0_146 = arith.constant 0 : index
    %c0_147 = arith.constant 0 : index
    %123 = vector.load %arg16[%c0_146, %c0_147] : memref<326x64xf32, #tpu.memory_space<vmem>>, vector<288x64xf32>
    %c0_148 = arith.constant 0 : index
    %c0_149 = arith.constant 0 : index
    %c0_150 = arith.constant 0 : index
    %c0_151 = arith.constant 0 : index
    %124 = vector.load %arg7[%c0_148, %c0_149, %c0_150, %c0_151] : memref<3x3x64x128xf32, #tpu.memory_space<vmem>>, vector<1x1x64x128xf32>
    %125 = vector.shape_cast %124 : vector<1x1x64x128xf32> to vector<64x128xf32>
    %cst_152 = arith.constant dense<0.000000e+00> : vector<288x128xf32>
    %126 = tpu.matmul %123, %125, %cst_152 {dimension_numbers = #tpu.dot_dimension_numbers<[1], [0], [0], [1], [0, 0, 1, 1], [], []>} : vector<288x64xf32>, vector<64x128xf32>, vector<288x128xf32> -> vector<288x128xf32>
    %127 = arith.addf %122, %126 : vector<288x128xf32>
    %c1_153 = arith.constant 1 : index
    %c0_154 = arith.constant 0 : index
    %128 = vector.load %arg16[%c1_153, %c0_154] : memref<326x64xf32, #tpu.memory_space<vmem>>, vector<288x64xf32>
    %c0_155 = arith.constant 0 : index
    %c1_156 = arith.constant 1 : index
    %c0_157 = arith.constant 0 : index
    %c0_158 = arith.constant 0 : index
    %129 = vector.load %arg7[%c0_155, %c1_156, %c0_157, %c0_158] : memref<3x3x64x128xf32, #tpu.memory_space<vmem>>, vector<1x1x64x128xf32>
    %130 = vector.shape_cast %129 : vector<1x1x64x128xf32> to vector<64x128xf32>
    %cst_159 = arith.constant dense<0.000000e+00> : vector<288x128xf32>
    %131 = tpu.matmul %128, %130, %cst_159 {dimension_numbers = #tpu.dot_dimension_numbers<[1], [0], [0], [1], [0, 0, 1, 1], [], []>} : vector<288x64xf32>, vector<64x128xf32>, vector<288x128xf32> -> vector<288x128xf32>
    %132 = arith.addf %127, %131 : vector<288x128xf32>
    %c2_160 = arith.constant 2 : index
    %c0_161 = arith.constant 0 : index
    %133 = vector.load %arg16[%c2_160, %c0_161] : memref<326x64xf32, #tpu.memory_space<vmem>>, vector<288x64xf32>
    %c0_162 = arith.constant 0 : index
    %c2_163 = arith.constant 2 : index
    %c0_164 = arith.constant 0 : index
    %c0_165 = arith.constant 0 : index
    %134 = vector.load %arg7[%c0_162, %c2_163, %c0_164, %c0_165] : memref<3x3x64x128xf32, #tpu.memory_space<vmem>>, vector<1x1x64x128xf32>
    %135 = vector.shape_cast %134 : vector<1x1x64x128xf32> to vector<64x128xf32>
    %cst_166 = arith.constant dense<0.000000e+00> : vector<288x128xf32>
    %136 = tpu.matmul %133, %135, %cst_166 {dimension_numbers = #tpu.dot_dimension_numbers<[1], [0], [0], [1], [0, 0, 1, 1], [], []>} : vector<288x64xf32>, vector<64x128xf32>, vector<288x128xf32> -> vector<288x128xf32>
    %137 = arith.addf %132, %136 : vector<288x128xf32>
    %c18_167 = arith.constant 18 : index
    %c0_168 = arith.constant 0 : index
    %138 = vector.load %arg16[%c18_167, %c0_168] : memref<326x64xf32, #tpu.memory_space<vmem>>, vector<288x64xf32>
    %c1_169 = arith.constant 1 : index
    %c0_170 = arith.constant 0 : index
    %c0_171 = arith.constant 0 : index
    %c0_172 = arith.constant 0 : index
    %139 = vector.load %arg7[%c1_169, %c0_170, %c0_171, %c0_172] : memref<3x3x64x128xf32, #tpu.memory_space<vmem>>, vector<1x1x64x128xf32>
    %140 = vector.shape_cast %139 : vector<1x1x64x128xf32> to vector<64x128xf32>
    %cst_173 = arith.constant dense<0.000000e+00> : vector<288x128xf32>
    %141 = tpu.matmul %138, %140, %cst_173 {dimension_numbers = #tpu.dot_dimension_numbers<[1], [0], [0], [1], [0, 0, 1, 1], [], []>} : vector<288x64xf32>, vector<64x128xf32>, vector<288x128xf32> -> vector<288x128xf32>
    %142 = arith.addf %137, %141 : vector<288x128xf32>
    %c19_174 = arith.constant 19 : index
    %c0_175 = arith.constant 0 : index
    %143 = vector.load %arg16[%c19_174, %c0_175] : memref<326x64xf32, #tpu.memory_space<vmem>>, vector<288x64xf32>
    %c1_176 = arith.constant 1 : index
    %c1_177 = arith.constant 1 : index
    %c0_178 = arith.constant 0 : index
    %c0_179 = arith.constant 0 : index
    %144 = vector.load %arg7[%c1_176, %c1_177, %c0_178, %c0_179] : memref<3x3x64x128xf32, #tpu.memory_space<vmem>>, vector<1x1x64x128xf32>
    %145 = vector.shape_cast %144 : vector<1x1x64x128xf32> to vector<64x128xf32>
    %cst_180 = arith.constant dense<0.000000e+00> : vector<288x128xf32>
    %146 = tpu.matmul %143, %145, %cst_180 {dimension_numbers = #tpu.dot_dimension_numbers<[1], [0], [0], [1], [0, 0, 1, 1], [], []>} : vector<288x64xf32>, vector<64x128xf32>, vector<288x128xf32> -> vector<288x128xf32>
    %147 = arith.addf %142, %146 : vector<288x128xf32>
    %c20_181 = arith.constant 20 : index
    %c0_182 = arith.constant 0 : index
    %148 = vector.load %arg16[%c20_181, %c0_182] : memref<326x64xf32, #tpu.memory_space<vmem>>, vector<288x64xf32>
    %c1_183 = arith.constant 1 : index
    %c2_184 = arith.constant 2 : index
    %c0_185 = arith.constant 0 : index
    %c0_186 = arith.constant 0 : index
    %149 = vector.load %arg7[%c1_183, %c2_184, %c0_185, %c0_186] : memref<3x3x64x128xf32, #tpu.memory_space<vmem>>, vector<1x1x64x128xf32>
    %150 = vector.shape_cast %149 : vector<1x1x64x128xf32> to vector<64x128xf32>
    %cst_187 = arith.constant dense<0.000000e+00> : vector<288x128xf32>
    %151 = tpu.matmul %148, %150, %cst_187 {dimension_numbers = #tpu.dot_dimension_numbers<[1], [0], [0], [1], [0, 0, 1, 1], [], []>} : vector<288x64xf32>, vector<64x128xf32>, vector<288x128xf32> -> vector<288x128xf32>
    %152 = arith.addf %147, %151 : vector<288x128xf32>
    %c36_188 = arith.constant 36 : index
    %c0_189 = arith.constant 0 : index
    %153 = vector.load %arg16[%c36_188, %c0_189] : memref<326x64xf32, #tpu.memory_space<vmem>>, vector<288x64xf32>
    %c2_190 = arith.constant 2 : index
    %c0_191 = arith.constant 0 : index
    %c0_192 = arith.constant 0 : index
    %c0_193 = arith.constant 0 : index
    %154 = vector.load %arg7[%c2_190, %c0_191, %c0_192, %c0_193] : memref<3x3x64x128xf32, #tpu.memory_space<vmem>>, vector<1x1x64x128xf32>
    %155 = vector.shape_cast %154 : vector<1x1x64x128xf32> to vector<64x128xf32>
    %cst_194 = arith.constant dense<0.000000e+00> : vector<288x128xf32>
    %156 = tpu.matmul %153, %155, %cst_194 {dimension_numbers = #tpu.dot_dimension_numbers<[1], [0], [0], [1], [0, 0, 1, 1], [], []>} : vector<288x64xf32>, vector<64x128xf32>, vector<288x128xf32> -> vector<288x128xf32>
    %157 = arith.addf %152, %156 : vector<288x128xf32>
    %c37_195 = arith.constant 37 : index
    %c0_196 = arith.constant 0 : index
    %158 = vector.load %arg16[%c37_195, %c0_196] : memref<326x64xf32, #tpu.memory_space<vmem>>, vector<288x64xf32>
    %c2_197 = arith.constant 2 : index
    %c1_198 = arith.constant 1 : index
    %c0_199 = arith.constant 0 : index
    %c0_200 = arith.constant 0 : index
    %159 = vector.load %arg7[%c2_197, %c1_198, %c0_199, %c0_200] : memref<3x3x64x128xf32, #tpu.memory_space<vmem>>, vector<1x1x64x128xf32>
    %160 = vector.shape_cast %159 : vector<1x1x64x128xf32> to vector<64x128xf32>
    %cst_201 = arith.constant dense<0.000000e+00> : vector<288x128xf32>
    %161 = tpu.matmul %158, %160, %cst_201 {dimension_numbers = #tpu.dot_dimension_numbers<[1], [0], [0], [1], [0, 0, 1, 1], [], []>} : vector<288x64xf32>, vector<64x128xf32>, vector<288x128xf32> -> vector<288x128xf32>
    %162 = arith.addf %157, %161 : vector<288x128xf32>
    %c38_202 = arith.constant 38 : index
    %c0_203 = arith.constant 0 : index
    %163 = vector.load %arg16[%c38_202, %c0_203] : memref<326x64xf32, #tpu.memory_space<vmem>>, vector<288x64xf32>
    %c2_204 = arith.constant 2 : index
    %c2_205 = arith.constant 2 : index
    %c0_206 = arith.constant 0 : index
    %c0_207 = arith.constant 0 : index
    %164 = vector.load %arg7[%c2_204, %c2_205, %c0_206, %c0_207] : memref<3x3x64x128xf32, #tpu.memory_space<vmem>>, vector<1x1x64x128xf32>
    %165 = vector.shape_cast %164 : vector<1x1x64x128xf32> to vector<64x128xf32>
    %cst_208 = arith.constant dense<0.000000e+00> : vector<288x128xf32>
    %166 = tpu.matmul %163, %165, %cst_208 {dimension_numbers = #tpu.dot_dimension_numbers<[1], [0], [0], [1], [0, 0, 1, 1], [], []>} : vector<288x64xf32>, vector<64x128xf32>, vector<288x128xf32> -> vector<288x128xf32>
    %167 = arith.addf %162, %166 : vector<288x128xf32>
    %c0_209 = arith.constant 0 : index
    %c0_210 = arith.constant 0 : index
    %168 = vector.load %arg8[%c0_209, %c0_210] : memref<1x128xf32, #tpu.memory_space<vmem>>, vector<1x128xf32>
    %169 = vector.broadcast %168 : vector<1x128xf32> to vector<288x128xf32>
    %170 = arith.addf %167, %169 : vector<288x128xf32>
    %cst_211 = arith.constant 0.000000e+00 : f32
    %171 = vector.broadcast %cst_211 : f32 to vector<288x128xf32>
    %172 = arith.maximumf %170, %171 : vector<288x128xf32>
    %173 = vector.broadcast %0 : vector<288x1xf32> to vector<288x128xf32>
    %174 = arith.mulf %172, %173 : vector<288x128xf32>
    %c0_212 = arith.constant 0 : index
    %c0_213 = arith.constant 0 : index
    %175 = vector.load %arg9[%c0_212, %c0_213] : memref<36x288xf32, #tpu.memory_space<vmem>>, vector<36x288xf32>
    %cst_214 = arith.constant dense<0.000000e+00> : vector<36x128xf32>
    %176 = tpu.matmul %175, %174, %cst_214 {dimension_numbers = #tpu.dot_dimension_numbers<[1], [0], [0], [1], [0, 0, 1, 1], [], []>} : vector<36x288xf32>, vector<288x128xf32>, vector<36x128xf32> -> vector<36x128xf32>
    %177 = vector.extract_strided_slice %176 {offsets = [0, 0], sizes = [1, 128], strides = [1, 1]} : vector<36x128xf32> to vector<1x128xf32>
    %c0_215 = arith.constant 0 : index
    %c0_216 = arith.constant 0 : index
    %178 = vector.load %arg17[%c0_215, %c0_216] : memref<1x4608xf32, #tpu.memory_space<vmem>>, vector<1x128xf32>
    tpu.vector_store %arg17[%c0_215, %c0_216], %177 {strides = array<i32>} : memref<1x4608xf32, #tpu.memory_space<vmem>>, vector<1x128xf32>,
    %179 = vector.extract_strided_slice %176 {offsets = [1, 0], sizes = [1, 128], strides = [1, 1]} : vector<36x128xf32> to vector<1x128xf32>
    %c0_217 = arith.constant 0 : index
    %c128 = arith.constant 128 : index
    %180 = vector.load %arg17[%c0_217, %c128] : memref<1x4608xf32, #tpu.memory_space<vmem>>, vector<1x128xf32>
    tpu.vector_store %arg17[%c0_217, %c128], %179 {strides = array<i32>} : memref<1x4608xf32, #tpu.memory_space<vmem>>, vector<1x128xf32>,
    %181 = vector.extract_strided_slice %176 {offsets = [2, 0], sizes = [1, 128], strides = [1, 1]} : vector<36x128xf32> to vector<1x128xf32>
    %c0_218 = arith.constant 0 : index
    %c256 = arith.constant 256 : index
    %182 = vector.load %arg17[%c0_218, %c256] : memref<1x4608xf32, #tpu.memory_space<vmem>>, vector<1x128xf32>
    tpu.vector_store %arg17[%c0_218, %c256], %181 {strides = array<i32>} : memref<1x4608xf32, #tpu.memory_space<vmem>>, vector<1x128xf32>,
    %183 = vector.extract_strided_slice %176 {offsets = [3, 0], sizes = [1, 128], strides = [1, 1]} : vector<36x128xf32> to vector<1x128xf32>
    %c0_219 = arith.constant 0 : index
    %c384 = arith.constant 384 : index
    %184 = vector.load %arg17[%c0_219, %c384] : memref<1x4608xf32, #tpu.memory_space<vmem>>, vector<1x128xf32>
    tpu.vector_store %arg17[%c0_219, %c384], %183 {strides = array<i32>} : memref<1x4608xf32, #tpu.memory_space<vmem>>, vector<1x128xf32>,
    %185 = vector.extract_strided_slice %176 {offsets = [4, 0], sizes = [1, 128], strides = [1, 1]} : vector<36x128xf32> to vector<1x128xf32>
    %c0_220 = arith.constant 0 : index
    %c512 = arith.constant 512 : index
    %186 = vector.load %arg17[%c0_220, %c512] : memref<1x4608xf32, #tpu.memory_space<vmem>>, vector<1x128xf32>
    tpu.vector_store %arg17[%c0_220, %c512], %185 {strides = array<i32>} : memref<1x4608xf32, #tpu.memory_space<vmem>>, vector<1x128xf32>,
    %187 = vector.extract_strided_slice %176 {offsets = [5, 0], sizes = [1, 128], strides = [1, 1]} : vector<36x128xf32> to vector<1x128xf32>
    %c0_221 = arith.constant 0 : index
    %c640 = arith.constant 640 : index
    %188 = vector.load %arg17[%c0_221, %c640] : memref<1x4608xf32, #tpu.memory_space<vmem>>, vector<1x128xf32>
    tpu.vector_store %arg17[%c0_221, %c640], %187 {strides = array<i32>} : memref<1x4608xf32, #tpu.memory_space<vmem>>, vector<1x128xf32>,
    %189 = vector.extract_strided_slice %176 {offsets = [6, 0], sizes = [1, 128], strides = [1, 1]} : vector<36x128xf32> to vector<1x128xf32>
    %c0_222 = arith.constant 0 : index
    %c768 = arith.constant 768 : index
    %190 = vector.load %arg17[%c0_222, %c768] : memref<1x4608xf32, #tpu.memory_space<vmem>>, vector<1x128xf32>
    tpu.vector_store %arg17[%c0_222, %c768], %189 {strides = array<i32>} : memref<1x4608xf32, #tpu.memory_space<vmem>>, vector<1x128xf32>,
    %191 = vector.extract_strided_slice %176 {offsets = [7, 0], sizes = [1, 128], strides = [1, 1]} : vector<36x128xf32> to vector<1x128xf32>
    %c0_223 = arith.constant 0 : index
    %c896 = arith.constant 896 : index
    %192 = vector.load %arg17[%c0_223, %c896] : memref<1x4608xf32, #tpu.memory_space<vmem>>, vector<1x128xf32>
    tpu.vector_store %arg17[%c0_223, %c896], %191 {strides = array<i32>} : memref<1x4608xf32, #tpu.memory_space<vmem>>, vector<1x128xf32>,
    %193 = vector.extract_strided_slice %176 {offsets = [8, 0], sizes = [1, 128], strides = [1, 1]} : vector<36x128xf32> to vector<1x128xf32>
    %c0_224 = arith.constant 0 : index
    %c1024 = arith.constant 1024 : index
    %194 = vector.load %arg17[%c0_224, %c1024] : memref<1x4608xf32, #tpu.memory_space<vmem>>, vector<1x128xf32>
    tpu.vector_store %arg17[%c0_224, %c1024], %193 {strides = array<i32>} : memref<1x4608xf32, #tpu.memory_space<vmem>>, vector<1x128xf32>,
    %195 = vector.extract_strided_slice %176 {offsets = [9, 0], sizes = [1, 128], strides = [1, 1]} : vector<36x128xf32> to vector<1x128xf32>
    %c0_225 = arith.constant 0 : index
    %c1152 = arith.constant 1152 : index
    %196 = vector.load %arg17[%c0_225, %c1152] : memref<1x4608xf32, #tpu.memory_space<vmem>>, vector<1x128xf32>
    tpu.vector_store %arg17[%c0_225, %c1152], %195 {strides = array<i32>} : memref<1x4608xf32, #tpu.memory_space<vmem>>, vector<1x128xf32>,
    %197 = vector.extract_strided_slice %176 {offsets = [10, 0], sizes = [1, 128], strides = [1, 1]} : vector<36x128xf32> to vector<1x128xf32>
    %c0_226 = arith.constant 0 : index
    %c1280 = arith.constant 1280 : index
    %198 = vector.load %arg17[%c0_226, %c1280] : memref<1x4608xf32, #tpu.memory_space<vmem>>, vector<1x128xf32>
    tpu.vector_store %arg17[%c0_226, %c1280], %197 {strides = array<i32>} : memref<1x4608xf32, #tpu.memory_space<vmem>>, vector<1x128xf32>,
    %199 = vector.extract_strided_slice %176 {offsets = [11, 0], sizes = [1, 128], strides = [1, 1]} : vector<36x128xf32> to vector<1x128xf32>
    %c0_227 = arith.constant 0 : index
    %c1408 = arith.constant 1408 : index
    %200 = vector.load %arg17[%c0_227, %c1408] : memref<1x4608xf32, #tpu.memory_space<vmem>>, vector<1x128xf32>
    tpu.vector_store %arg17[%c0_227, %c1408], %199 {strides = array<i32>} : memref<1x4608xf32, #tpu.memory_space<vmem>>, vector<1x128xf32>,
    %201 = vector.extract_strided_slice %176 {offsets = [12, 0], sizes = [1, 128], strides = [1, 1]} : vector<36x128xf32> to vector<1x128xf32>
    %c0_228 = arith.constant 0 : index
    %c1536 = arith.constant 1536 : index
    %202 = vector.load %arg17[%c0_228, %c1536] : memref<1x4608xf32, #tpu.memory_space<vmem>>, vector<1x128xf32>
    tpu.vector_store %arg17[%c0_228, %c1536], %201 {strides = array<i32>} : memref<1x4608xf32, #tpu.memory_space<vmem>>, vector<1x128xf32>,
    %203 = vector.extract_strided_slice %176 {offsets = [13, 0], sizes = [1, 128], strides = [1, 1]} : vector<36x128xf32> to vector<1x128xf32>
    %c0_229 = arith.constant 0 : index
    %c1664 = arith.constant 1664 : index
    %204 = vector.load %arg17[%c0_229, %c1664] : memref<1x4608xf32, #tpu.memory_space<vmem>>, vector<1x128xf32>
    tpu.vector_store %arg17[%c0_229, %c1664], %203 {strides = array<i32>} : memref<1x4608xf32, #tpu.memory_space<vmem>>, vector<1x128xf32>,
    %205 = vector.extract_strided_slice %176 {offsets = [14, 0], sizes = [1, 128], strides = [1, 1]} : vector<36x128xf32> to vector<1x128xf32>
    %c0_230 = arith.constant 0 : index
    %c1792 = arith.constant 1792 : index
    %206 = vector.load %arg17[%c0_230, %c1792] : memref<1x4608xf32, #tpu.memory_space<vmem>>, vector<1x128xf32>
    tpu.vector_store %arg17[%c0_230, %c1792], %205 {strides = array<i32>} : memref<1x4608xf32, #tpu.memory_space<vmem>>, vector<1x128xf32>,
    %207 = vector.extract_strided_slice %176 {offsets = [15, 0], sizes = [1, 128], strides = [1, 1]} : vector<36x128xf32> to vector<1x128xf32>
    %c0_231 = arith.constant 0 : index
    %c1920 = arith.constant 1920 : index
    %208 = vector.load %arg17[%c0_231, %c1920] : memref<1x4608xf32, #tpu.memory_space<vmem>>, vector<1x128xf32>
    tpu.vector_store %arg17[%c0_231, %c1920], %207 {strides = array<i32>} : memref<1x4608xf32, #tpu.memory_space<vmem>>, vector<1x128xf32>,
    %209 = vector.extract_strided_slice %176 {offsets = [16, 0], sizes = [1, 128], strides = [1, 1]} : vector<36x128xf32> to vector<1x128xf32>
    %c0_232 = arith.constant 0 : index
    %c2048 = arith.constant 2048 : index
    %210 = vector.load %arg17[%c0_232, %c2048] : memref<1x4608xf32, #tpu.memory_space<vmem>>, vector<1x128xf32>
    tpu.vector_store %arg17[%c0_232, %c2048], %209 {strides = array<i32>} : memref<1x4608xf32, #tpu.memory_space<vmem>>, vector<1x128xf32>,
    %211 = vector.extract_strided_slice %176 {offsets = [17, 0], sizes = [1, 128], strides = [1, 1]} : vector<36x128xf32> to vector<1x128xf32>
    %c0_233 = arith.constant 0 : index
    %c2176 = arith.constant 2176 : index
    %212 = vector.load %arg17[%c0_233, %c2176] : memref<1x4608xf32, #tpu.memory_space<vmem>>, vector<1x128xf32>
    tpu.vector_store %arg17[%c0_233, %c2176], %211 {strides = array<i32>} : memref<1x4608xf32, #tpu.memory_space<vmem>>, vector<1x128xf32>,
    %213 = vector.extract_strided_slice %176 {offsets = [18, 0], sizes = [1, 128], strides = [1, 1]} : vector<36x128xf32> to vector<1x128xf32>
    %c0_234 = arith.constant 0 : index
    %c2304 = arith.constant 2304 : index
    %214 = vector.load %arg17[%c0_234, %c2304] : memref<1x4608xf32, #tpu.memory_space<vmem>>, vector<1x128xf32>
    tpu.vector_store %arg17[%c0_234, %c2304], %213 {strides = array<i32>} : memref<1x4608xf32, #tpu.memory_space<vmem>>, vector<1x128xf32>,
    %215 = vector.extract_strided_slice %176 {offsets = [19, 0], sizes = [1, 128], strides = [1, 1]} : vector<36x128xf32> to vector<1x128xf32>
    %c0_235 = arith.constant 0 : index
    %c2432 = arith.constant 2432 : index
    %216 = vector.load %arg17[%c0_235, %c2432] : memref<1x4608xf32, #tpu.memory_space<vmem>>, vector<1x128xf32>
    tpu.vector_store %arg17[%c0_235, %c2432], %215 {strides = array<i32>} : memref<1x4608xf32, #tpu.memory_space<vmem>>, vector<1x128xf32>,
    %217 = vector.extract_strided_slice %176 {offsets = [20, 0], sizes = [1, 128], strides = [1, 1]} : vector<36x128xf32> to vector<1x128xf32>
    %c0_236 = arith.constant 0 : index
    %c2560 = arith.constant 2560 : index
    %218 = vector.load %arg17[%c0_236, %c2560] : memref<1x4608xf32, #tpu.memory_space<vmem>>, vector<1x128xf32>
    tpu.vector_store %arg17[%c0_236, %c2560], %217 {strides = array<i32>} : memref<1x4608xf32, #tpu.memory_space<vmem>>, vector<1x128xf32>,
    %219 = vector.extract_strided_slice %176 {offsets = [21, 0], sizes = [1, 128], strides = [1, 1]} : vector<36x128xf32> to vector<1x128xf32>
    %c0_237 = arith.constant 0 : index
    %c2688 = arith.constant 2688 : index
    %220 = vector.load %arg17[%c0_237, %c2688] : memref<1x4608xf32, #tpu.memory_space<vmem>>, vector<1x128xf32>
    tpu.vector_store %arg17[%c0_237, %c2688], %219 {strides = array<i32>} : memref<1x4608xf32, #tpu.memory_space<vmem>>, vector<1x128xf32>,
    %221 = vector.extract_strided_slice %176 {offsets = [22, 0], sizes = [1, 128], strides = [1, 1]} : vector<36x128xf32> to vector<1x128xf32>
    %c0_238 = arith.constant 0 : index
    %c2816 = arith.constant 2816 : index
    %222 = vector.load %arg17[%c0_238, %c2816] : memref<1x4608xf32, #tpu.memory_space<vmem>>, vector<1x128xf32>
    tpu.vector_store %arg17[%c0_238, %c2816], %221 {strides = array<i32>} : memref<1x4608xf32, #tpu.memory_space<vmem>>, vector<1x128xf32>,
    %223 = vector.extract_strided_slice %176 {offsets = [23, 0], sizes = [1, 128], strides = [1, 1]} : vector<36x128xf32> to vector<1x128xf32>
    %c0_239 = arith.constant 0 : index
    %c2944 = arith.constant 2944 : index
    %224 = vector.load %arg17[%c0_239, %c2944] : memref<1x4608xf32, #tpu.memory_space<vmem>>, vector<1x128xf32>
    tpu.vector_store %arg17[%c0_239, %c2944], %223 {strides = array<i32>} : memref<1x4608xf32, #tpu.memory_space<vmem>>, vector<1x128xf32>,
    %225 = vector.extract_strided_slice %176 {offsets = [24, 0], sizes = [1, 128], strides = [1, 1]} : vector<36x128xf32> to vector<1x128xf32>
    %c0_240 = arith.constant 0 : index
    %c3072 = arith.constant 3072 : index
    %226 = vector.load %arg17[%c0_240, %c3072] : memref<1x4608xf32, #tpu.memory_space<vmem>>, vector<1x128xf32>
    tpu.vector_store %arg17[%c0_240, %c3072], %225 {strides = array<i32>} : memref<1x4608xf32, #tpu.memory_space<vmem>>, vector<1x128xf32>,
    %227 = vector.extract_strided_slice %176 {offsets = [25, 0], sizes = [1, 128], strides = [1, 1]} : vector<36x128xf32> to vector<1x128xf32>
    %c0_241 = arith.constant 0 : index
    %c3200 = arith.constant 3200 : index
    %228 = vector.load %arg17[%c0_241, %c3200] : memref<1x4608xf32, #tpu.memory_space<vmem>>, vector<1x128xf32>
    tpu.vector_store %arg17[%c0_241, %c3200], %227 {strides = array<i32>} : memref<1x4608xf32, #tpu.memory_space<vmem>>, vector<1x128xf32>,
    %229 = vector.extract_strided_slice %176 {offsets = [26, 0], sizes = [1, 128], strides = [1, 1]} : vector<36x128xf32> to vector<1x128xf32>
    %c0_242 = arith.constant 0 : index
    %c3328 = arith.constant 3328 : index
    %230 = vector.load %arg17[%c0_242, %c3328] : memref<1x4608xf32, #tpu.memory_space<vmem>>, vector<1x128xf32>
    tpu.vector_store %arg17[%c0_242, %c3328], %229 {strides = array<i32>} : memref<1x4608xf32, #tpu.memory_space<vmem>>, vector<1x128xf32>,
    %231 = vector.extract_strided_slice %176 {offsets = [27, 0], sizes = [1, 128], strides = [1, 1]} : vector<36x128xf32> to vector<1x128xf32>
    %c0_243 = arith.constant 0 : index
    %c3456 = arith.constant 3456 : index
    %232 = vector.load %arg17[%c0_243, %c3456] : memref<1x4608xf32, #tpu.memory_space<vmem>>, vector<1x128xf32>
    tpu.vector_store %arg17[%c0_243, %c3456], %231 {strides = array<i32>} : memref<1x4608xf32, #tpu.memory_space<vmem>>, vector<1x128xf32>,
    %233 = vector.extract_strided_slice %176 {offsets = [28, 0], sizes = [1, 128], strides = [1, 1]} : vector<36x128xf32> to vector<1x128xf32>
    %c0_244 = arith.constant 0 : index
    %c3584 = arith.constant 3584 : index
    %234 = vector.load %arg17[%c0_244, %c3584] : memref<1x4608xf32, #tpu.memory_space<vmem>>, vector<1x128xf32>
    tpu.vector_store %arg17[%c0_244, %c3584], %233 {strides = array<i32>} : memref<1x4608xf32, #tpu.memory_space<vmem>>, vector<1x128xf32>,
    %235 = vector.extract_strided_slice %176 {offsets = [29, 0], sizes = [1, 128], strides = [1, 1]} : vector<36x128xf32> to vector<1x128xf32>
    %c0_245 = arith.constant 0 : index
    %c3712 = arith.constant 3712 : index
    %236 = vector.load %arg17[%c0_245, %c3712] : memref<1x4608xf32, #tpu.memory_space<vmem>>, vector<1x128xf32>
    tpu.vector_store %arg17[%c0_245, %c3712], %235 {strides = array<i32>} : memref<1x4608xf32, #tpu.memory_space<vmem>>, vector<1x128xf32>,
    %237 = vector.extract_strided_slice %176 {offsets = [30, 0], sizes = [1, 128], strides = [1, 1]} : vector<36x128xf32> to vector<1x128xf32>
    %c0_246 = arith.constant 0 : index
    %c3840 = arith.constant 3840 : index
    %238 = vector.load %arg17[%c0_246, %c3840] : memref<1x4608xf32, #tpu.memory_space<vmem>>, vector<1x128xf32>
    tpu.vector_store %arg17[%c0_246, %c3840], %237 {strides = array<i32>} : memref<1x4608xf32, #tpu.memory_space<vmem>>, vector<1x128xf32>,
    %239 = vector.extract_strided_slice %176 {offsets = [31, 0], sizes = [1, 128], strides = [1, 1]} : vector<36x128xf32> to vector<1x128xf32>
    %c0_247 = arith.constant 0 : index
    %c3968 = arith.constant 3968 : index
    %240 = vector.load %arg17[%c0_247, %c3968] : memref<1x4608xf32, #tpu.memory_space<vmem>>, vector<1x128xf32>
    tpu.vector_store %arg17[%c0_247, %c3968], %239 {strides = array<i32>} : memref<1x4608xf32, #tpu.memory_space<vmem>>, vector<1x128xf32>,
    %241 = vector.extract_strided_slice %176 {offsets = [32, 0], sizes = [1, 128], strides = [1, 1]} : vector<36x128xf32> to vector<1x128xf32>
    %c0_248 = arith.constant 0 : index
    %c4096 = arith.constant 4096 : index
    %242 = vector.load %arg17[%c0_248, %c4096] : memref<1x4608xf32, #tpu.memory_space<vmem>>, vector<1x128xf32>
    tpu.vector_store %arg17[%c0_248, %c4096], %241 {strides = array<i32>} : memref<1x4608xf32, #tpu.memory_space<vmem>>, vector<1x128xf32>,
    %243 = vector.extract_strided_slice %176 {offsets = [33, 0], sizes = [1, 128], strides = [1, 1]} : vector<36x128xf32> to vector<1x128xf32>
    %c0_249 = arith.constant 0 : index
    %c4224 = arith.constant 4224 : index
    %244 = vector.load %arg17[%c0_249, %c4224] : memref<1x4608xf32, #tpu.memory_space<vmem>>, vector<1x128xf32>
    tpu.vector_store %arg17[%c0_249, %c4224], %243 {strides = array<i32>} : memref<1x4608xf32, #tpu.memory_space<vmem>>, vector<1x128xf32>,
    %245 = vector.extract_strided_slice %176 {offsets = [34, 0], sizes = [1, 128], strides = [1, 1]} : vector<36x128xf32> to vector<1x128xf32>
    %c0_250 = arith.constant 0 : index
    %c4352 = arith.constant 4352 : index
    %246 = vector.load %arg17[%c0_250, %c4352] : memref<1x4608xf32, #tpu.memory_space<vmem>>, vector<1x128xf32>
    tpu.vector_store %arg17[%c0_250, %c4352], %245 {strides = array<i32>} : memref<1x4608xf32, #tpu.memory_space<vmem>>, vector<1x128xf32>,
    %247 = vector.extract_strided_slice %176 {offsets = [35, 0], sizes = [1, 128], strides = [1, 1]} : vector<36x128xf32> to vector<1x128xf32>
    %c0_251 = arith.constant 0 : index
    %c4480 = arith.constant 4480 : index
    %248 = vector.load %arg17[%c0_251, %c4480] : memref<1x4608xf32, #tpu.memory_space<vmem>>, vector<1x128xf32>
    tpu.vector_store %arg17[%c0_251, %c4480], %247 {strides = array<i32>} : memref<1x4608xf32, #tpu.memory_space<vmem>>, vector<1x128xf32>,
    %c0_252 = arith.constant 0 : index
    %c0_253 = arith.constant 0 : index
    %249 = vector.load %arg17[%c0_252, %c0_253] : memref<1x4608xf32, #tpu.memory_space<vmem>>, vector<1x4608xf32>
    %250 = arith.truncf %249 : vector<1x4608xf32> to vector<1x4608xbf16>
    %c0_254 = arith.constant 0 : index
    %c0_255 = arith.constant 0 : index
    %251 = vector.load %arg10[%c0_254, %c0_255] : memref<4608x256xbf16, #tpu.memory_space<vmem>>, vector<4608x256xbf16>
    %cst_256 = arith.constant dense<0.000000e+00> : vector<1x256xf32>
    %252 = tpu.matmul %250, %251, %cst_256 {dimension_numbers = #tpu.dot_dimension_numbers<[1], [0], [0], [1], [0, 0, 1, 1], [], []>} : vector<1x4608xbf16>, vector<4608x256xbf16>, vector<1x256xf32> -> vector<1x256xf32>
    %c0_257 = arith.constant 0 : index
    %c0_258 = arith.constant 0 : index
    %253 = vector.load %arg11[%c0_257, %c0_258] : memref<1x256xf32, #tpu.memory_space<vmem>>, vector<1x256xf32>
    %254 = arith.addf %252, %253 : vector<1x256xf32>
    %cst_259 = arith.constant 0.000000e+00 : f32
    %255 = vector.broadcast %cst_259 : f32 to vector<1x256xf32>
    %256 = arith.maximumf %254, %255 : vector<1x256xf32>
    %c0_260 = arith.constant 0 : index
    %c0_261 = arith.constant 0 : index
    %257 = vector.load %arg12[%c0_260, %c0_261] : memref<256x4xf32, #tpu.memory_space<vmem>>, vector<256x4xf32>
    %cst_262 = arith.constant dense<0.000000e+00> : vector<1x4xf32>
    %258 = tpu.matmul %256, %257, %cst_262 {dimension_numbers = #tpu.dot_dimension_numbers<[1], [0], [0], [1], [0, 0, 1, 1], [], []>} : vector<1x256xf32>, vector<256x4xf32>, vector<1x4xf32> -> vector<1x4xf32>
    %c0_263 = arith.constant 0 : index
    %c0_264 = arith.constant 0 : index
    %259 = vector.load %arg13[%c0_263, %c0_264] : memref<1x4xf32, #tpu.memory_space<vmem>>, vector<1x4xf32>
    %260 = arith.addf %258, %259 : vector<1x4xf32>
    %c0_265 = arith.constant 0 : index
    %c0_266 = arith.constant 0 : index
    %c0_267 = arith.constant 0 : index
    %261 = vector.load %arg14[%c0_265, %c0_266, %c0_267] : memref<1x1x4xf32, #tpu.memory_space<vmem>>, vector<1x1x4xf32>
    %262 = vector.shape_cast %261 : vector<1x1x4xf32> to vector<1x4xf32>
    %263 = vector.shape_cast %260 : vector<1x4xf32> to vector<1x1x4xf32>
    tpu.vector_store %arg14[%c0_265, %c0_266, %c0_267], %263 {strides = array<i32>} : memref<1x1x4xf32, #tpu.memory_space<vmem>>, vector<1x1x4xf32>,
    return
  }
  func.func @transform_0(%arg0: i32) -> (i32, i32, i32) {
    %c0_i32 = arith.constant 0 : i32
    %c0_i32_0 = arith.constant 0 : i32
    %c0_i32_1 = arith.constant 0 : i32
    return %arg0, %c0_i32, %c0_i32_0 : i32, i32, i32
  }
  func.func @transform_1(%arg0: i32) -> (i32, i32) {
    %c0_i32 = arith.constant 0 : i32
    %c0_i32_0 = arith.constant 0 : i32
    %c0_i32_1 = arith.constant 0 : i32
    return %c0_i32, %c0_i32_0 : i32, i32
  }
  func.func @transform_2(%arg0: i32) -> (i32, i32, i32, i32) {
    %c0_i32 = arith.constant 0 : i32
    %c0_i32_0 = arith.constant 0 : i32
    %c0_i32_1 = arith.constant 0 : i32
    %c0_i32_2 = arith.constant 0 : i32
    %c0_i32_3 = arith.constant 0 : i32
    return %c0_i32, %c0_i32_0, %c0_i32_1, %c0_i32_2 : i32, i32, i32, i32
  }
  func.func @transform_3(%arg0: i32) -> (i32, i32) {
    %c0_i32 = arith.constant 0 : i32
    %c0_i32_0 = arith.constant 0 : i32
    %c0_i32_1 = arith.constant 0 : i32
    return %c0_i32, %c0_i32_0 : i32, i32
  }
  func.func @transform_4(%arg0: i32) -> (i32, i32, i32, i32) {
    %c0_i32 = arith.constant 0 : i32
    %c0_i32_0 = arith.constant 0 : i32
    %c0_i32_1 = arith.constant 0 : i32
    %c0_i32_2 = arith.constant 0 : i32
    %c0_i32_3 = arith.constant 0 : i32
    return %c0_i32, %c0_i32_0, %c0_i32_1, %c0_i32_2 : i32, i32, i32, i32
  }
  func.func @transform_5(%arg0: i32) -> (i32, i32) {
    %c0_i32 = arith.constant 0 : i32
    %c0_i32_0 = arith.constant 0 : i32
    %c0_i32_1 = arith.constant 0 : i32
    return %c0_i32, %c0_i32_0 : i32, i32
  }
  func.func @transform_6(%arg0: i32) -> (i32, i32, i32, i32) {
    %c0_i32 = arith.constant 0 : i32
    %c0_i32_0 = arith.constant 0 : i32
    %c0_i32_1 = arith.constant 0 : i32
    %c0_i32_2 = arith.constant 0 : i32
    %c0_i32_3 = arith.constant 0 : i32
    return %c0_i32, %c0_i32_0, %c0_i32_1, %c0_i32_2 : i32, i32, i32, i32
  }
  func.func @transform_7(%arg0: i32) -> (i32, i32) {
    %c0_i32 = arith.constant 0 : i32
    %c0_i32_0 = arith.constant 0 : i32
    %c0_i32_1 = arith.constant 0 : i32
    return %c0_i32, %c0_i32_0 : i32, i32
  }
  func.func @transform_8(%arg0: i32) -> (i32, i32) {
    %c0_i32 = arith.constant 0 : i32
    %c0_i32_0 = arith.constant 0 : i32
    %c0_i32_1 = arith.constant 0 : i32
    return %c0_i32, %c0_i32_0 : i32, i32
  }
  func.func @transform_9(%arg0: i32) -> (i32, i32) {
    %c0_i32 = arith.constant 0 : i32
    %c0_i32_0 = arith.constant 0 : i32
    %c0_i32_1 = arith.constant 0 : i32
    return %c0_i32, %c0_i32_0 : i32, i32
  }
  func.func @transform_10(%arg0: i32) -> (i32, i32) {
    %c0_i32 = arith.constant 0 : i32
    %c0_i32_0 = arith.constant 0 : i32
    %c0_i32_1 = arith.constant 0 : i32
    return %c0_i32, %c0_i32_0 : i32, i32
  }
  func.func @transform_11(%arg0: i32) -> (i32, i32) {
    %c0_i32 = arith.constant 0 : i32
    %c0_i32_0 = arith.constant 0 : i32
    %c0_i32_1 = arith.constant 0 : i32
    return %c0_i32, %c0_i32_0 : i32, i32
  }
  func.func @transform_12(%arg0: i32) -> (i32, i32) {
    %c0_i32 = arith.constant 0 : i32
    %c0_i32_0 = arith.constant 0 : i32
    %c0_i32_1 = arith.constant 0 : i32
    return %c0_i32, %c0_i32_0 : i32, i32
  }
  func.func @transform_13(%arg0: i32) -> (i32, i32, i32) {
    %c0_i32 = arith.constant 0 : i32
    %c0_i32_0 = arith.constant 0 : i32
    %c0_i32_1 = arith.constant 0 : i32
    return %arg0, %c0_i32, %c0_i32_0 : i32, i32, i32
  }
}

</mosaic_0001>

<bundles_post_ra>
// kernel: tpu_custom_call.1
= control target key start
LH: loop header
LB: loop body
LE: loop exit
PB: predicated region body
PF: predicated region fallthrough
CT: control target
= control target key end

     0   :  { %s28565_s0 = inlined_call_operand.vmem [shape: f32[2,326,4], index: 0, kind: input, shape index: {}]   ;;  %s28566_s1 = inlined_call_operand.vmem [shape: f32[288,1], index: 1, kind: input, shape index: {}]   ;;  %s28567_s2 = inlined_call_operand.hbm [shape: f32[3,3,4,32], index: 2, kind: input, shape index: {}]   ;;  %s28568_s3 = inlined_call_operand.hbm [shape: f32[1,32], index: 3, kind: input, shape index: {}]   ;;  %s28569_s4 = inlined_call_operand.hbm [shape: f32[3,3,32,64], index: 4, kind: input, shape index: {}]   ;;  %s28570_s5 = inlined_call_operand.hbm [shape: f32[1,64], index: 5, kind: input, shape index: {}]   ;;  %s28571_s6 = inlined_call_operand.hbm [shape: f32[3,3,64,128], index: 6, kind: input, shape index: {}]   ;;  %s28572_s7 = inlined_call_operand.hbm [shape: f32[1,128], index: 7, kind: input, shape index: {}]   ;;  %s28573_s8 = inlined_call_operand.hbm [shape: f32[36,288], index: 8, kind: input, shape index: {}]   ;;  %s28574_s9 = inlined_call_operand.hbm [shape: bf16[4608,256], index: 9, kind: input, shape index: {}]   ;;  %s28575_s10 = inlined_call_operand.hbm [shape: f32[1,256], index: 10, kind: input, shape index: {}]   ;;  %s28576_s11 = inlined_call_operand.vmem [shape: f32[256,4], index: 11, kind: input, shape index: {}]   ;;  %s28577_s12 = inlined_call_operand.hbm [shape: f32[1,4], index: 12, kind: input, shape index: {}]   ;;  %s28578_s13 = inlined_call_operand.hbm [shape: f32[2,1,4], index: 13, kind: output, shape index: {}]  }
   0x1   :  { %28638 = sst [smem:[#allocation59_spill]] %s28568_s3 }
   0x2   :  { %28639 = sst [smem:[#allocation60_spill]] %s28570_s5 }
   0x3   :  { %28640 = sst [smem:[#allocation61_spill]] %s28572_s7 }
   0x4   :  { %28641 = sst [smem:[#allocation62_spill]] %s28574_s9 }
   0x5   :  { %28642 = sst [smem:[#allocation63_spill]] %s28578_s13 }
   0x6   :  { %18 = vsyncpa [#allocation6], 0 }
   0x7   :  { %19 = vsyncpa [#allocation9], 0 }
   0x8   :  { %20 = vsyncpa [#allocation12], 0 }
   0x9   :  { %21 = vsyncpa [#allocation15], 0 }
   0xa   :  { %22 = vsyncpa [#allocation18], 0 }
   0xb   :  { %23 = vsyncpa [#allocation21], 0 }
   0xc   :  { %24 = vsyncpa [#allocation7], 0 }
   0xd   :  { %26 = vsyncpa [#allocation7 + $0x1], 0  ;;  %s25119_s25 = smov 0   ;;  %s25121_s26 = smov 0  }
   0xe   :  { %s25123_s27 = smov 0   ;;  %s25125_s28 = smov 0  }
   0xf LB: > { %28643 = sst [smem:[#allocation30_spill]] %s25013_s25  ;;  %s25140_s29 = sadd.s32 4294967295, %s25025_s28   ;;  %s25025_s28 = sphi %s25125_s28, %s28745_s28   ;;  %s25021_s27 = sphi %s25123_s27, %s28750_s27   ;;  %s25017_s26 = sphi %s25121_s26, %s28749_s26   ;;  %s25013_s25 = sphi %s25119_s25, %s28748_s25  }
  0x10   : > { %28644 = sst [smem:[#allocation31_spill]] %s25021_s27  ;;  %s17933_s30 = sadd.s32 4294967294, %s25025_s28  }
  0x11   : > { %28645 = sst [smem:[#allocation32_spill]] %s25025_s28  ;;  %s25144_s14 = sadd.s32 1, %s25025_s28  }
  0x12   : > { %28646 = sst [smem:[#allocation33_spill]] %s25144_s14  ;;  %s317_s15 = sadd.s32 1, %s25021_s27 }
  0x13   : > { %s314_s16 = ssub.s32 %s25025_s28, %s25144_s14  ;;  %p327_p0 = scmp.ne.s32.totalorder %s25021_s27, %s25017_s26 }
  0x14   : > { %p315_p1 = scmp.eq.s32.totalorder %s314_s16, 0  ;;  %p328_p2 = scmp.eq.s32.totalorder %s25140_s29, 1 }
  0x15   : > { %p333_p3 = scmp.ne.s32.totalorder %s25017_s26, %s25013_s25  ;;  %p334_p4 = scmp.eq.s32.totalorder %s17933_s30, 1 }
  0x16   : > { %s25155_s17 = scalar_select %p315_p1, %s25021_s27, %s317_s15  }
  0x17   : > { %p25157_p5 = por %p328_p2, %p327_p0  ;;  %p25161_p6 = por %p334_p4, %p333_p3 }
  0x18   : > { %28647 = sst [smem:[#allocation34_spill]] %s25155_s17  ;;  %p17934_p7 = scmp.ge.s32.totalorder %s25025_s28, 1 }
  0x19   : > { %s28648_s18 = scalar_select %p25157_p5, 1, 0 }
  0x1a   : > { %s28649_s19 = scalar_select %p25161_p6, 1, 0 }
  0x1b   : > { %p341_p8 = scmp.lt.s32.totalorder %s25025_s28, 3  ;;  %p28584_p9 = scmp.eq.s32.totalorder %s25140_s29, 0 }
  0x1c   : > { %28650 = sst [smem:[#allocation35_spill]] %s28649_s19  ;;  %s25027_s21 = smov [#allocation8]  }
  0x1d   : > { %p25168_p10 = pnand %p17934_p7, %p341_p8  ;;  %s370_s22 = sshll.u32 %s25027_s21, 4  ;;  %s371_s22 = int_to_ptr.vmem [resolvable:$true] %s370_s22 }
  0x1e   : > { %s25028_s23 = smov [#allocation11]   ;;  %s25029_s15 = smov [#allocation14]  }
  0x1f   : > { %s28651_s20 = scalar_select %p25168_p10, 1, 0 }
  0x20   : > { %p23682_p11 = pneg %p25168_p10  ;;  %s394_s24 = sshll.u32 %s25028_s23, 4  ;;  %s25180_s24 = int_to_ptr.vmem [resolvable:$true] %s394_s24 }
  0x21   : > { %s418_s16 = sshll.u32 %s25029_s15, 4  ;;  %s28653_s3 = sld [smem:[#allocation59_spill]]  ;;  %s25182_s16 = int_to_ptr.vmem [resolvable:$true] %s418_s16 }
  0x22   : > { %p25176_p12 = pnand %p28584_p9, %p23682_p11 }
  0x24   : > { %p25192_p0 = pneg %p25176_p12 }
  0x27   : > { %s24659_s21 = scalar_lea.hbm %s28653_s3, 16 }
  0x28   : > { %p24660_p13 = scmp.ne.s32.totalorder %s28653_s3, %s24659_s21  ;;  %p24666_p3 = scmp.lt.u32.totalorder %s24659_s21, %s28653_s3 }
  0x2a   : > { %p24662_p1 = pnand %p25192_p0, %p24660_p13 }
  0x2c   : > { %p24663_p2 = pneg %p24662_p1 }
  0x2e   : > { %p24668_p4 = pnand %p24666_p3, %p24663_p2 }
  0x30   : > { %24671 = shalt.err (!%p24668_p4)
}
  0x31   : > { %s24672_s27 = scalar_lea.vmem %s371_s22, 16  ;;  %s24679_s14 = scalar_lea.vmem %s371_s22, 32 }
  0x32   : > { %p24673_p7 = scmp.ne.s32.totalorder %s371_s22, %s24672_s27  ;;  %p24680_p9 = scmp.lt.s32.totalorder %s371_s22, %s371_s22 }
  0x33   : > { %p24681_p6 = scmp.lt.s32.totalorder %s24679_s14, %s24672_s27 }
  0x34   : > { %p24675_p8 = pnand %p24673_p7, %p25192_p0 }
  0x35   : > { %p24682_p5 = por %p24681_p6, %p24680_p9 }
  0x36   : > { %p24676_p11 = pneg %p24675_p8 }
  0x38   : > { %p24683_p10 = pnand %p24682_p5, %p24676_p11 }
  0x3a   : > { %24686 = shalt.err (!%p24683_p10)
}
  0x3b   : > { %23688 = dma.hbm_to_vmem [thread:$0]  (!%p25176_p12), %s28653_s3, 16, %s371_s22, [#allocation9]  }
  0x3c   : > { %s28655_s5 = sld [smem:[#allocation60_spill]] }
  0x42   : > { %s24687_s15 = scalar_lea.hbm %s28655_s5, 16 }
  0x43   : > { %p24688_p13 = scmp.ne.s32.totalorder %s28655_s5, %s24687_s15  ;;  %p24694_p5 = scmp.lt.u32.totalorder %s24687_s15, %s28655_s5 }
  0x45   : > { %p24690_p1 = pnand %p24688_p13, %p25192_p0 }
  0x47   : > { %p24691_p6 = pneg %p24690_p1 }
  0x49   : > { %p24696_p9 = pnand %p24694_p5, %p24691_p6 }
  0x4b   : > { %24699 = shalt.err (!%p24696_p9)
}
  0x4c   : > { %s24700_s22 = scalar_lea.vmem %s25180_s24, 16  ;;  %s24707_s13 = scalar_lea.vmem %s25180_s24, 32 }
  0x4d   : > { %p24701_p10 = scmp.ne.s32.totalorder %s25180_s24, %s24700_s22  ;;  %p24708_p4 = scmp.lt.s32.totalorder %s25180_s24, %s25180_s24 }
  0x4e   : > { %p24709_p7 = scmp.lt.s32.totalorder %s24707_s13, %s24700_s22 }
  0x4f   : > { %p24703_p2 = pnand %p24701_p10, %p25192_p0 }
  0x50   : > { %p24710_p8 = por %p24709_p7, %p24708_p4 }
  0x51   : > { %p24704_p3 = pneg %p24703_p2 }
  0x53   : > { %p24711_p11 = pnand %p24710_p8, %p24704_p3 }
  0x55   : > { %24714 = shalt.err (!%p24711_p11)
}
  0x56   : > { %23694 = dma.hbm_to_vmem [thread:$0]  (!%p25176_p12), %s28655_s5, 16, %s25180_s24, [#allocation12]  }
  0x57   : > { %s28656_s7 = sld [smem:[#allocation61_spill]] }
  0x5d   : > { %s24715_s21 = scalar_lea.hbm %s28656_s7, 16 }
  0x5e   : > { %p24716_p13 = scmp.ne.s32.totalorder %s28656_s7, %s24715_s21  ;;  %p24722_p5 = scmp.lt.u32.totalorder %s24715_s21, %s28656_s7 }
  0x60   : > { %p24718_p1 = pnand %p24716_p13, %p25192_p0 }
  0x62   : > { %p24719_p6 = pneg %p24718_p1 }
  0x64   : > { %p24724_p9 = pnand %p24722_p5, %p24719_p6 }
  0x66   : > { %24727 = shalt.err (!%p24724_p9)
}
  0x67   : > { %s24728_s24 = scalar_lea.vmem %s25182_s16, 16  ;;  %s24735_s13 = scalar_lea.vmem %s25182_s16, 32 }
  0x68   : > { %p24729_p10 = scmp.ne.s32.totalorder %s25182_s16, %s24728_s24  ;;  %p24736_p4 = scmp.lt.s32.totalorder %s25182_s16, %s25182_s16 }
  0x69   : > { %p24737_p7 = scmp.lt.s32.totalorder %s24735_s13, %s24728_s24 }
  0x6a   : > { %p24731_p2 = pnand %p24729_p10, %p25192_p0 }
  0x6b   : > { %p24738_p8 = por %p24737_p7, %p24736_p4 }
  0x6c   : > { %p24732_p3 = pneg %p24731_p2 }
  0x6e   : > { %p24739_p11 = pnand %p24738_p8, %p24732_p3 }
  0x70   : > { %24742 = shalt.err (!%p24739_p11)
}
  0x71   : > { %23700 = dma.hbm_to_vmem [thread:$0]  (!%p25176_p12), %s28656_s7, 16, %s25182_s16, [#allocation15]  }
  0x72   : > { %s25030_s19 = smov [#allocation17]   ;;  %s25031_s21 = smov [#allocation5]  }
  0x73   : > { %s441_s25 = sshll.u32 %s25030_s19, 4  ;;  %s356_s15 = sshll.u32 %s25031_s21, 4  ;;  %s442_s25 = int_to_ptr.vmem [resolvable:$true] %s441_s25  ;;  %s357_s15 = int_to_ptr.vmem [resolvable:$true] %s356_s15 }
  0x74   : > { %s28657_s9 = sld [smem:[#allocation62_spill]] }
  0x7a   : > { %s24743_s22 = scalar_lea.hbm %s28657_s9, 73728 }
  0x7b   : > { %p24744_p13 = scmp.ne.s32.totalorder %s28657_s9, %s24743_s22  ;;  %p24750_p5 = scmp.lt.u32.totalorder %s24743_s22, %s28657_s9 }
  0x7d   : > { %p24746_p1 = pnand %p24744_p13, %p25192_p0 }
  0x7f   : > { %p24747_p6 = pneg %p24746_p1 }
  0x81   : > { %p24752_p9 = pnand %p24750_p5, %p24747_p6 }
  0x83   : > { %24755 = shalt.err (!%p24752_p9)
}
  0x84   : > { %s24756_s16 = scalar_lea.vmem %s442_s25, 73728  ;;  %p24764_p4 = scmp.lt.s32.totalorder %s442_s25, %s442_s25 }
  0x85   : > { %p24757_p10 = scmp.ne.s32.totalorder %s442_s25, %s24756_s16  ;;  %p24765_p7 = scmp.lt.s32.totalorder %s24756_s16, %s24756_s16 }
  0x87   : > { %p24759_p2 = pnand %p24757_p10, %p25192_p0  ;;  %p24766_p8 = por %p24765_p7, %p24764_p4 }
  0x89   : > { %p24760_p3 = pneg %p24759_p2 }
  0x8b   : > { %p24767_p11 = pnand %p24766_p8, %p24760_p3 }
  0x8d   : > { %24770 = shalt.err (!%p24767_p11)
}
  0x8e   : > { %s28589_s17 = smov 128   ;;  %s28591_s19 = smov 8  }
  0x8f   : > { %23706 = dma.hbm_to_vmem [thread:$0]  (!%p25176_p12), %s28657_s9, 73728, %s442_s25, [#allocation18], %s28589_s17, %s28589_s17, %s28591_s19  }
  0x90   : > { %s24771_s22 = scalar_lea.hbm %s28567_s2, 576 }
  0x91   : > { %p24772_p13 = scmp.ne.s32.totalorder %s28567_s2, %s24771_s22  ;;  %p24778_p5 = scmp.lt.u32.totalorder %s24771_s22, %s28567_s2 }
  0x93   : > { %p24774_p1 = pnand %p24772_p13, %p25192_p0 }
  0x95   : > { %p24775_p6 = pneg %p24774_p1 }
  0x97   : > { %p24780_p9 = pnand %p24778_p5, %p24775_p6 }
  0x99   : > { %24783 = shalt.err (!%p24780_p9)
}
  0x9a   : > { %s24784_s3 = scalar_lea.vmem %s357_s15, 576  ;;  %p24792_p4 = scmp.lt.s32.totalorder %s357_s15, %s357_s15 }
  0x9b   : > { %p24785_p10 = scmp.ne.s32.totalorder %s357_s15, %s24784_s3  ;;  %p24793_p7 = scmp.lt.s32.totalorder %s24784_s3, %s24784_s3 }
  0x9d   : > { %p24787_p2 = pnand %p24785_p10, %p25192_p0  ;;  %p24794_p8 = por %p24793_p7, %p24792_p4 }
  0x9f   : > { %p24788_p3 = pneg %p24787_p2 }
  0xa1   : > { %p24795_p11 = pnand %p24794_p8, %p24788_p3 }
  0xa3   : > { %24798 = shalt.err (!%p24795_p11)
}
  0xa4   : > { %s25034_s25 = smov 64   ;;  %s25035_s21 = smov 4  }
  0xa5   : > { %23685 = dma.hbm_to_vmem [thread:$0]  (!%p25176_p12), %s28567_s2, 576, %s357_s15, [#allocation6], %s25034_s25, %s25034_s25, %s25035_s21  }
  0xa6   : > { %s25036_s22 = smov [#allocation10]   ;;  %s25037_s13 = smov [#allocation13]  }
  0xa7   : > { %s380_s24 = sshll.u32 %s25036_s22, 4  ;;  %s404_s28 = sshll.u32 %s25037_s13, 4  ;;  %s381_s24 = int_to_ptr.vmem [resolvable:$true] %s380_s24  ;;  %s405_s28 = int_to_ptr.vmem [resolvable:$true] %s404_s28 }
  0xa8   : > { %s24799_s3 = scalar_lea.hbm %s28569_s4, 4608 }
  0xa9   : > { %p24800_p13 = scmp.ne.s32.totalorder %s28569_s4, %s24799_s3  ;;  %p24806_p5 = scmp.lt.u32.totalorder %s24799_s3, %s28569_s4 }
  0xab   : > { %p24802_p1 = pnand %p24800_p13, %p25192_p0 }
  0xad   : > { %p24803_p6 = pneg %p24802_p1 }
  0xaf   : > { %p24808_p9 = pnand %p24806_p5, %p24803_p6 }
  0xb1   : > { %24811 = shalt.err (!%p24808_p9)
}
  0xb2   : > { %s24812_s15 = scalar_lea.vmem %s381_s24, 4608  ;;  %p24820_p4 = scmp.lt.s32.totalorder %s381_s24, %s381_s24 }
  0xb3   : > { %p24813_p10 = scmp.ne.s32.totalorder %s381_s24, %s24812_s15  ;;  %p24821_p7 = scmp.lt.s32.totalorder %s24812_s15, %s24812_s15 }
  0xb5   : > { %p24815_p2 = pnand %p24813_p10, %p25192_p0  ;;  %p24822_p8 = por %p24821_p7, %p24820_p4 }
  0xb7   : > { %p24816_p3 = pneg %p24815_p2 }
  0xb9   : > { %p24823_p11 = pnand %p24822_p8, %p24816_p3 }
  0xbb   : > { %24826 = shalt.err (!%p24823_p11)
}
  0xbc   : > { %s28658_s5 = smov 8   ;;  %s28659_s17 = smov 128  }
  0xbd   : > { %23691 = dma.hbm_to_vmem [thread:$0]  (!%p25176_p12), %s28569_s4, 4608, %s381_s24, [#allocation9], %s28659_s17, %s28659_s17, %s28658_s5  }
  0xbe   : > { %s24827_s21 = scalar_lea.hbm %s28571_s6, 9216 }
  0xbf   : > { %p24828_p13 = scmp.ne.s32.totalorder %s28571_s6, %s24827_s21  ;;  %p24834_p5 = scmp.lt.u32.totalorder %s24827_s21, %s28571_s6 }
  0xc1   : > { %p24830_p1 = pnand %p24828_p13, %p25192_p0 }
  0xc3   : > { %p24831_p6 = pneg %p24830_p1 }
  0xc5   : > { %p24836_p9 = pnand %p24834_p5, %p24831_p6 }
  0xc7   : > { %24839 = shalt.err (!%p24836_p9)
}
  0xc8   : > { %s24840_s16 = scalar_lea.vmem %s405_s28, 9216  ;;  %p24848_p4 = scmp.lt.s32.totalorder %s405_s28, %s405_s28 }
  0xc9   : > { %p24841_p10 = scmp.ne.s32.totalorder %s405_s28, %s24840_s16  ;;  %p24849_p7 = scmp.lt.s32.totalorder %s24840_s16, %s24840_s16 }
  0xcb   : > { %p24843_p2 = pnand %p24841_p10, %p25192_p0  ;;  %p24850_p8 = por %p24849_p7, %p24848_p4 }
  0xcd   : > { %p24844_p3 = pneg %p24843_p2 }
  0xcf   : > { %p24851_p11 = pnand %p24850_p8, %p24844_p3 }
  0xd1   : > { %24854 = shalt.err (!%p24851_p11)
}
  0xd2   : > { %23697 = dma.hbm_to_vmem [thread:$0]  (!%p25176_p12), %s28571_s6, 9216, %s405_s28, [#allocation12], %s28659_s17, %s28659_s17, %s28658_s5  }
  0xd3   : > { %s25038_s15 = smov [#allocation16]   ;;  %s24855_s25 = scalar_lea.hbm %s28573_s8, 1920 }
  0xd4   : > { %s428_s7 = sshll.u32 %s25038_s15, 4  ;;  %p24856_p13 = scmp.ne.s32.totalorder %s28573_s8, %s24855_s25  ;;  %s429_s7 = int_to_ptr.vmem [resolvable:$true] %s428_s7 }
  0xd5   : > { %p24862_p5 = scmp.lt.u32.totalorder %s24855_s25, %s28573_s8 }
  0xd6   : > { %p24858_p1 = pnand %p24856_p13, %p25192_p0 }
  0xd8   : > { %p24859_p6 = pneg %p24858_p1 }
  0xda   : > { %p24864_p9 = pnand %p24862_p5, %p24859_p6 }
  0xdc   : > { %24867 = shalt.err (!%p24864_p9)
}
  0xdd   : > { %s24868_s28 = scalar_lea.vmem %s429_s7, 1920  ;;  %p24876_p4 = scmp.lt.s32.totalorder %s429_s7, %s429_s7 }
  0xde   : > { %p24869_p10 = scmp.ne.s32.totalorder %s429_s7, %s24868_s28  ;;  %p24877_p7 = scmp.lt.s32.totalorder %s24868_s28, %s24868_s28 }
  0xe0   : > { %p24871_p2 = pnand %p24869_p10, %p25192_p0  ;;  %p24878_p8 = por %p24877_p7, %p24876_p4 }
  0xe2   : > { %p24872_p3 = pneg %p24871_p2 }
  0xe4   : > { %p24879_p11 = pnand %p24878_p8, %p24872_p3 }
  0xe6   : > { %24882 = shalt.err (!%p24879_p11)
}
  0xe7   : > { %s25039_s5 = smov 384   ;;  %s25040_s17 = smov 24  }
  0xe8   : > { %23703 = dma.hbm_to_vmem [thread:$0]  (!%p25176_p12), %s28573_s8, 1920, %s429_s7, [#allocation15], %s25039_s5, %s25039_s5, %s25040_s17  }
  0xe9   : > { %s25041_s24 = smov [#allocation19]   ;;  %s25042_s15 = smov [#allocation20]  }
  0xea   : > { %s455_s3 = sshll.u32 %s25041_s24, 4  ;;  %s469_s9 = sshll.u32 %s25042_s15, 4  ;;  %s456_s3 = int_to_ptr.vmem [resolvable:$true] %s455_s3  ;;  %s25355_s9 = int_to_ptr.vmem [resolvable:$true] %s469_s9 }
  0xeb   : > { %s24883_s21 = scalar_lea.hbm %s28575_s10, 32 }
  0xec   : > { %p24884_p13 = scmp.ne.s32.totalorder %s28575_s10, %s24883_s21  ;;  %p24890_p5 = scmp.lt.u32.totalorder %s24883_s21, %s28575_s10 }
  0xee   : > { %p24886_p1 = pnand %p24884_p13, %p25192_p0 }
  0xf0   : > { %p24887_p6 = pneg %p24886_p1 }
  0xf2   : > { %p24892_p9 = pnand %p24890_p5, %p24887_p6 }
  0xf4   : > { %24895 = shalt.err (!%p24892_p9)
}
  0xf5   : > { %s24896_s28 = scalar_lea.vmem %s456_s3, 32  ;;  %p24904_p4 = scmp.lt.s32.totalorder %s456_s3, %s456_s3 }
  0xf6   : > { %p24897_p10 = scmp.ne.s32.totalorder %s456_s3, %s24896_s28  ;;  %p24905_p7 = scmp.lt.s32.totalorder %s24896_s28, %s24896_s28 }
  0xf8   : > { %p24899_p2 = pnand %p24897_p10, %p25192_p0  ;;  %p24906_p8 = por %p24905_p7, %p24904_p4 }
  0xfa   : > { %p24900_p3 = pneg %p24899_p2 }
  0xfc   : > { %p24907_p11 = pnand %p24906_p8, %p24900_p3 }
  0xfe   : > { %24910 = shalt.err (!%p24907_p11)
}
  0xff   : > { %23709 = dma.hbm_to_vmem [thread:$0]  (!%p25176_p12), %s28575_s10, 32, %s456_s3, [#allocation18]  }
 0x100   : > { %s24911_s24 = scalar_lea.hbm %s28577_s12, 16 }
 0x101   : > { %p24912_p13 = scmp.ne.s32.totalorder %s28577_s12, %s24911_s24  ;;  %p24918_p5 = scmp.lt.u32.totalorder %s24911_s24, %s28577_s12 }
 0x103   : > { %p24914_p1 = pnand %p24912_p13, %p25192_p0 }
 0x105   : > { %p24915_p6 = pneg %p24914_p1 }
 0x107   : > { %p24920_p9 = pnand %p24918_p5, %p24915_p6 }
 0x109   : > { %24923 = shalt.err (!%p24920_p9)
}
 0x10a   : > { %s24924_s3 = scalar_lea.vmem %s25355_s9, 16  ;;  %s24931_s27 = scalar_lea.vmem %s25355_s9, 32 }
 0x10b   : > { %p24925_p10 = scmp.ne.s32.totalorder %s25355_s9, %s24924_s3  ;;  %p24932_p4 = scmp.lt.s32.totalorder %s25355_s9, %s25355_s9 }
 0x10c   : > { %p24933_p7 = scmp.lt.s32.totalorder %s24931_s27, %s24924_s3 }
 0x10d   : > { %p24927_p2 = pnand %p24925_p10, %p25192_p0 }
 0x10e   : > { %p24934_p8 = por %p24933_p7, %p24932_p4 }
 0x10f   : > { %p24928_p3 = pneg %p24927_p2 }
 0x111   : > { %p24935_p11 = pnand %p24934_p8, %p24928_p3 }
 0x113   : > { %24938 = shalt.err (!%p24935_p11)
}
 0x114   : > { %23712 = dma.hbm_to_vmem [thread:$0]  (!%p25176_p12), %s28577_s12, 16, %s25355_s9, [#allocation21]  }
 0x115   : > { %p28660_p13 = scmp.ne.s32.totalorder %s28651_s20, 0 }
 0x117   : > { %490 = sbr.rel (%p28660_p13) target bundleno = 4296 (0x10c8), region = 72 }
 0x11e   : > { %p28661_p0 = scmp.eq.s32.totalorder %s25140_s29, 0 }
 0x120   : > { %24984 = dma.done.wait (%p28661_p0), [#allocation6], 576   ;;  %p28662_p1 = pmov %p28661_p0 }
 0x121   : > { %p28663_p6 = pmov %p28661_p0 }
 0x122   : > { %24986 = vsyncadd (%p28662_p1), [#allocation6], 4294966720 }
 0x123   : > { %24988 = dma.done.wait (%p28663_p6), [#allocation9], 4624   ;;  %p28664_p5 = pmov %p28661_p0 }
 0x124   : > { %p28665_p9 = pmov %p28661_p0 }
 0x125   : > { %24990 = vsyncadd (%p28664_p5), [#allocation9], 4294962672 }
 0x126   : > { %24992 = dma.done.wait (%p28665_p9), [#allocation12], 9232   ;;  %p28666_p12 = pmov %p28661_p0 }
 0x127   : > { %p28667_p10 = pmov %p28661_p0 }
 0x128   : > { %24994 = vsyncadd (%p28666_p12), [#allocation12], 4294958064 }
 0x129   : > { %24996 = dma.done.wait (%p28667_p10), [#allocation15], 1936   ;;  %p28668_p2 = pmov %p28661_p0 }
 0x12a   : > { %p28669_p3 = pmov %p28661_p0 }
 0x12b   : > { %24998 = vsyncadd (%p28668_p2), [#allocation15], 4294965360 }
 0x12c   : > { %25000 = dma.done.wait (%p28669_p3), [#allocation18], 73760   ;;  %p28670_p4 = pmov %p28661_p0 }
 0x12d   : > { %p28671_p7 = pmov %p28661_p0 }
 0x12e   : > { %25002 = vsyncadd (%p28670_p4), [#allocation18], 4294893536 }
 0x12f   : > { %25004 = dma.done.wait (%p28671_p7), [#allocation21], 16   ;;  %p28672_p8 = pmov %p28661_p0 }
 0x130   : > { %p569_p11 = scmp.lt.s32.totalorder %s25140_s29, 1  ;;  %vm794_vm0 = vcmask 1043456   ;;  %vm685_vm1 = vcmask 31744   ;;  %v684_v0 = vld [vmem:[#allocation5 + $0x4] sm:$0xf]  ;;  %vm4704_vm2 = vcmask 261120  }
 0x131   : > { %25006 = vsyncadd (%p28672_p8), [#allocation21], 4294967280  ;;  %20706 = vmatprep.subr.msk.mxu0 %vm794_vm0, %v684_v0  ;;  %v646_v6 = vld [vmem:[#allocation5] sm:$0xf]  ;;  %v1436_v14 = vld [vmem:[#allocation5 + $0x8] sm:$0xf] }
 0x132   : > { %s570_s20 = scalar_select %p569_p11, %s25140_s29, 1  ;;  %20707 = vmatpush3.msk.msra.mxu0 %vm794_vm0, %v684_v0  ;;  %v25513_v42 = vld [vmem:[#allocation5 + $0xc] sm:$0xf]  ;;  %vm4745_vm3 = vcmask 259072   ;;  %vm8695_vm4 = vcmask 523264   ;;  %vm8736_vm5 = vcmask 521216  }
 0x133   : > { %20762 = vmatprep.subr.msk.mxu0 %vm794_vm0, %v646_v6  ;;  %vm25046_vm6 = vmmov 0   ;;  %s567_s15 = sand.u32 1, %s25017_s26   ;;  %s19523_s19 = sshll.u32 %s25140_s29, 4  ;;  %vm17765_vm8 = vcmask 24576  }
 0x134   : > { %s23639_s30 = smul.u32 328, %s570_s20  ;;  %s568_s25 = scalar_lea.vmem [#allocation22], %s567_s15 }
 0x135   : > { %s17780_s21 = sshll.u32 %s568_s25, 4  ;;  %s28739_s14 = sld [smem:[#allocation63_spill]]  ;;  %s28525_s21 = int_to_ptr.vmem [resolvable:$true] %s17780_s21 }
 0x136   : > { %s25430_s7 = scalar_lea.vmem %s28565_s0, %s23639_s30  ;;  %s17768_s20 = scalar_lea.sflag [#allocation7], %s567_s15 }
 0x137   : > { %v647_v1 = vld [vmem:[%s25430_s7 + $0x1] sm:$0xff]  ;;  %v648_v2 = vld [vmem:[%s25430_s7 + $0x9] sm:$0xff]  ;;  %v649_v3 = vld [vmem:[%s25430_s7 + $0x11] sm:$0xff]  ;;  %s24939_s30 = scalar_lea.vmem %s28525_s21, 16  ;;  %p28740_p0 = scmp.ne.s32.totalorder %s28648_s18, 0 }
 0x138   : > { %20708 = vmatprep.mubr.msk.f32.mxu0 %vm685_vm1, %v647_v1  ;;  %v650_v4 = vld [vmem:[%s25430_s7 + $0x19] sm:$0xff]  ;;  %v651_v5 = vld [vmem:[%s25430_s7 + $0x21] sm:$0xff]  ;;  %v652_v7 = vld [vmem:[%s25430_s7 + $0x29] sm:$0xff]  ;;  %p24940_p13 = scmp.ne.s32.totalorder %s28525_s21, %s24939_s30  ;;  %s25048_s29 = smov [#allocation22]  }
 0x139   : > { %20709 = vmatmul.mubr.msk.f32.vlgmr.msra.gmra.mrb[0].mxu0 %vm685_vm1, %v648_v2  ;;  %v653_v8 = vld [vmem:[%s25430_s7 + $0x31] sm:$0xff]  ;;  %v654_v9 = vld [vmem:[%s25430_s7 + $0x39] sm:$0xff]  ;;  %v655_v10 = vld [vmem:[%s25430_s7 + $0x41] sm:$0xff]  ;;  %s24943_s23 = sshll.u32 %s25048_s29, 4  ;;  %s24944_s23 = int_to_ptr.vmem [resolvable:$false] %s24943_s23 }
 0x13a   : > { %20711 = vmatprep.mubr.msk.f32.mxu0 %vm685_vm1, %v649_v3  ;;  %20763 = vmatpush3.msk.msra.mxu0 %vm794_vm0, %v646_v6  ;;  %v656_v11 = vld [vmem:[%s25430_s7 + $0x49] sm:$0xff]  ;;  %v657_v12 = vld [vmem:[%s25430_s7 + $0x51] sm:$0xff]  ;;  %v658_v13 = vld [vmem:[%s25430_s7 + $0x59] sm:$0xff]  ;;  %p24941_p1 = pnand %p24940_p13, %p28740_p0  ;;  %s24945_s9 = scalar_lea.vmem %s24944_s23, 32 }
 0x13b   : > { %v659_v15 = vld [vmem:[%s25430_s7 + $0x61] sm:$0xff]  ;;  %20818 = vmatprep.subr.msk.mxu0 %vm794_vm0, %v1436_v14  ;;  %v660_v16 = vld [vmem:[%s25430_s7 + $0x69] sm:$0xff]  ;;  %v661_v17 = vld [vmem:[%s25430_s7 + $0x71] sm:$0xff]  ;;  %s28523_s22 = scalar_lea.hbm %s28739_s14, %s19523_s19  ;;  %p24946_p5 = scmp.lt.s32.totalorder %s28525_s21, %s24944_s23 }
 0x13c   : > { %v662_v18 = vld [vmem:[%s25430_s7 + $0x79] sm:$0xff]  ;;  %v663_v19 = vld [vmem:[%s25430_s7 + $0x81] sm:$0xff]  ;;  %v664_v20 = vld [vmem:[%s25430_s7 + $0x89] sm:$0xff]  ;;  %p24942_p6 = pneg %p24941_p1  ;;  %p24947_p9 = scmp.lt.s32.totalorder %s24945_s9, %s24939_s30 }
 0x13d   : > { %20712 = vmatmul.mubr.msk.f32.gmra.mrb[2].mxu0 %vm685_vm1, %v650_v4  ;;  %v665_v21 = vld [vmem:[%s25430_s7 + $0x91] sm:$0xff]  ;;  %v666_v22 = vld [vmem:[%s25430_s7 + $0x99] sm:$0xff]  ;;  %v667_v23 = vld [vmem:[%s25430_s7 + $0xa1] sm:$0xff] }
 0x13e   : > { %20714 = vmatprep.mubr.msk.f32.mxu0 %vm685_vm1, %v651_v5  ;;  %v668_v24 = vld [vmem:[%s25430_s7 + $0xa9] sm:$0xff]  ;;  %v669_v25 = vld [vmem:[%s25430_s7 + $0xb1] sm:$0xff]  ;;  %v670_v26 = vld [vmem:[%s25430_s7 + $0xb9] sm:$0xff]  ;;  %p24948_p12 = por %p24947_p9, %p24946_p5 }
 0x13f   : > { %v671_v27 = vld [vmem:[%s25430_s7 + $0xc1] sm:$0xff]  ;;  %v672_v28 = vld [vmem:[%s25430_s7 + $0xc9] sm:$0xff]  ;;  %v673_v29 = vld [vmem:[%s25430_s7 + $0xd1] sm:$0xff] }
 0x140   : > { %v674_v30 = vld [vmem:[%s25430_s7 + $0xd9] sm:$0xff]  ;;  %v675_v31 = vld [vmem:[%s25430_s7 + $0xe1] sm:$0xff]  ;;  %v676_v32 = vld [vmem:[%s25430_s7 + $0xe9] sm:$0xff]  ;;  %p24949_p10 = pnand %p24948_p12, %p24942_p6 }
 0x141   : > { %20715 = vmatmul.mubr.msk.f32.gmra.mrb[4].mxu0 %vm685_vm1, %v652_v7  ;;  %v677_v33 = vld [vmem:[%s25430_s7 + $0xf1] sm:$0xff]  ;;  %v678_v34 = vld [vmem:[%s25430_s7 + $0xf9] sm:$0xff]  ;;  %v679_v35 = vld [vmem:[%s25430_s7 + $0x101] sm:$0xff] }
 0x142   : > { %20717 = vmatprep.mubr.msk.f32.mxu0 %vm685_vm1, %v653_v8  ;;  %v680_v36 = vld [vmem:[%s25430_s7 + $0x109] sm:$0xff]  ;;  %v681_v37 = vld [vmem:[%s25430_s7 + $0x111] sm:$0xff]  ;;  %v682_v38 = vld [vmem:[%s25430_s7 + $0x119] sm:$0xff] }
 0x143   : > { %v610_v39 = vld [vmem:[%s25430_s7] sm:$0xff]  ;;  %v611_v40 = vld [vmem:[%s25430_s7 + $0x8] sm:$0xff]  ;;  %v612_v41 = vld [vmem:[%s25430_s7 + $0x10] sm:$0xff] }
 0x144   : > { %v613_v43 = vld [vmem:[%s25430_s7 + $0x18] sm:$0xff]  ;;  %v614_v44 = vld [vmem:[%s25430_s7 + $0x20] sm:$0xff]  ;;  %v615_v45 = vld [vmem:[%s25430_s7 + $0x28] sm:$0xff] }
 0x145   : > { %20718 = vmatmul.mubr.msk.f32.gmra.mrb[6].mxu0 %vm685_vm1, %v654_v9  ;;  %v616_v46 = vld [vmem:[%s25430_s7 + $0x30] sm:$0xff]  ;;  %v617_v47 = vld [vmem:[%s25430_s7 + $0x38] sm:$0xff]  ;;  %v618_v48 = vld [vmem:[%s25430_s7 + $0x40] sm:$0xff] }
 0x146   : > { %20720 = vmatprep.mubr.msk.f32.mxu0 %vm685_vm1, %v655_v10  ;;  %v619_v49 = vld [vmem:[%s25430_s7 + $0x48] sm:$0xff]  ;;  %v620_v50 = vld [vmem:[%s25430_s7 + $0x50] sm:$0xff]  ;;  %v621_v51 = vld [vmem:[%s25430_s7 + $0x58] sm:$0xff] }
 0x147   : > { %v622_v52 = vld [vmem:[%s25430_s7 + $0x60] sm:$0xff]  ;;  %v623_v53 = vld [vmem:[%s25430_s7 + $0x68] sm:$0xff]  ;;  %v624_v54 = vld [vmem:[%s25430_s7 + $0x70] sm:$0xff] }
 0x148   : > { %v625_v55 = vld [vmem:[%s25430_s7 + $0x78] sm:$0xff]  ;;  %v626_v56 = vld [vmem:[%s25430_s7 + $0x80] sm:$0xff]  ;;  %v627_v57 = vld [vmem:[%s25430_s7 + $0x88] sm:$0xff] }
 0x149   : > { %20721 = vmatmul.mubr.msk.f32.gmra.mrb[8].mxu0 %vm685_vm1, %v656_v11  ;;  %v628_v58 = vld [vmem:[%s25430_s7 + $0x90] sm:$0xff]  ;;  %v629_v59 = vld [vmem:[%s25430_s7 + $0x98] sm:$0xff]  ;;  %v630_v60 = vld [vmem:[%s25430_s7 + $0xa0] sm:$0xff] }
 0x14a   : > { %20723 = vmatprep.mubr.msk.f32.mxu0 %vm685_vm1, %v657_v12  ;;  %v631_v61 = vld [vmem:[%s25430_s7 + $0xa8] sm:$0xff]  ;;  %v632_v62 = vld [vmem:[%s25430_s7 + $0xb0] sm:$0xff]  ;;  %v633_v63 = vld [vmem:[%s25430_s7 + $0xb8] sm:$0xff] }
 0x14b   : > { %v634_v0 = vld [vmem:[%s25430_s7 + $0xc0] sm:$0xff]  ;;  %v635_v1 = vld [vmem:[%s25430_s7 + $0xc8] sm:$0xff]  ;;  %v636_v2 = vld [vmem:[%s25430_s7 + $0xd0] sm:$0xff] }
 0x14c   : > { %v637_v3 = vld [vmem:[%s25430_s7 + $0xd8] sm:$0xff]  ;;  %v638_v4 = vld [vmem:[%s25430_s7 + $0xe0] sm:$0xff]  ;;  %v639_v5 = vld [vmem:[%s25430_s7 + $0xe8] sm:$0xff] }
 0x14d   : > { %20724 = vmatmul.mubr.msk.f32.gmra.mrb[10].mxu0 %vm685_vm1, %v658_v13  ;;  %v640_v6 = vld [vmem:[%s25430_s7 + $0xf0] sm:$0xff]  ;;  %v641_v7 = vld [vmem:[%s25430_s7 + $0xf8] sm:$0xff]  ;;  %v642_v8 = vld [vmem:[%s25430_s7 + $0x100] sm:$0xff] }
 0x14e   : > { %20726 = vmatprep.mubr.msk.f32.mxu0 %vm685_vm1, %v659_v15  ;;  %v643_v9 = vld [vmem:[%s25430_s7 + $0x108] sm:$0xff]  ;;  %v644_v10 = vld [vmem:[%s25430_s7 + $0x110] sm:$0xff]  ;;  %v645_v11 = vld [vmem:[%s25430_s7 + $0x118] sm:$0xff] }
 0x14f   : > { %v1399_v12 = vld [vmem:[%s25430_s7 + $0x2] sm:$0xff]  ;;  %v1400_v13 = vld [vmem:[%s25430_s7 + $0xa] sm:$0xff] }
 0x150   : > { %v25592_v15 = vld [vmem:[#allocation5 + $0x10] sm:$0xf] }
 0x151   : > { %20727 = vmatmul.mubr.msk.f32.gmra.mrb[12].mxu0 %vm685_vm1, %v660_v16  ;;  %v25595_v16 = vld [vmem:[%s25430_s7 + $0x1a] sm:$0xff] }
 0x152   : > { %20729 = vmatprep.mubr.msk.f32.mxu0 %vm685_vm1, %v661_v17  ;;  %v25599_v17 = vld [vmem:[%s25430_s7 + $0x22] sm:$0xff] }
 0x155   : > { %20730 = vmatmul.mubr.msk.f32.gmra.mrb[14].mxu0 %vm685_vm1, %v662_v18  ;;  %v25608_v18 = vld [vmem:[%s25430_s7 + $0x2a] sm:$0xff] }
 0x156   : > { %20732 = vmatprep.mubr.msk.f32.mxu0 %vm685_vm1, %v663_v19  ;;  %v25613_v19 = vld [vmem:[%s25430_s7 + $0x32] sm:$0xff] }
 0x159   : > { %20733 = vmatmul.mubr.msk.f32.gmra.mrb[16].mxu0 %vm685_vm1, %v664_v20  ;;  %v25620_v20 = vld [vmem:[%s25430_s7 + $0x3a] sm:$0xff] }
 0x15a   : > { %20735 = vmatprep.mubr.msk.f32.mxu0 %vm685_vm1, %v665_v21  ;;  %v25625_v21 = vld [vmem:[%s25430_s7 + $0x42] sm:$0xff] }
 0x15d   : > { %20736 = vmatmul.mubr.msk.f32.gmra.mrb[18].mxu0 %vm685_vm1, %v666_v22  ;;  %v25630_v22 = vld [vmem:[%s25430_s7 + $0x4a] sm:$0xff] }
 0x15e   : > { %20738 = vmatprep.mubr.msk.f32.mxu0 %vm685_vm1, %v667_v23  ;;  %v25635_v23 = vld [vmem:[%s25430_s7 + $0x52] sm:$0xff] }
 0x161   : > { %20739 = vmatmul.mubr.msk.f32.gmra.mrb[20].mxu0 %vm685_vm1, %v668_v24  ;;  %v25640_v24 = vld [vmem:[%s25430_s7 + $0x5a] sm:$0xff] }
 0x162   : > { %20741 = vmatprep.mubr.msk.f32.mxu0 %vm685_vm1, %v669_v25  ;;  %v1411_v25 = vld [vmem:[%s25430_s7 + $0x62] sm:$0xff] }
 0x165   : > { %20742 = vmatmul.mubr.msk.f32.gmra.mrb[22].mxu0 %vm685_vm1, %v670_v26  ;;  %v1412_v26 = vld [vmem:[%s25430_s7 + $0x6a] sm:$0xff] }
 0x166   : > { %20744 = vmatprep.mubr.msk.f32.mxu0 %vm685_vm1, %v671_v27  ;;  %v1413_v27 = vld [vmem:[%s25430_s7 + $0x72] sm:$0xff] }
 0x169   : > { %20745 = vmatmul.mubr.msk.f32.gmra.mrb[24].mxu0 %vm685_vm1, %v672_v28  ;;  %v1414_v28 = vld [vmem:[%s25430_s7 + $0x7a] sm:$0xff] }
 0x16a   : > { %20747 = vmatprep.mubr.msk.f32.mxu0 %vm685_vm1, %v673_v29  ;;  %v1415_v29 = vld [vmem:[%s25430_s7 + $0x82] sm:$0xff] }
 0x16d   : > { %20748 = vmatmul.mubr.msk.f32.gmra.mrb[26].mxu0 %vm685_vm1, %v674_v30  ;;  %v1416_v30 = vld [vmem:[%s25430_s7 + $0x8a] sm:$0xff] }
 0x16e   : > { %20750 = vmatprep.mubr.msk.f32.mxu0 %vm685_vm1, %v675_v31  ;;  %v1417_v31 = vld [vmem:[%s25430_s7 + $0x92] sm:$0xff] }
 0x171   : > { %20751 = vmatmul.mubr.msk.f32.gmra.mrb[28].mxu0 %vm685_vm1, %v676_v32  ;;  %v1418_v32 = vld [vmem:[%s25430_s7 + $0x9a] sm:$0xff] }
 0x172   : > { %20753 = vmatprep.mubr.msk.f32.mxu0 %vm685_vm1, %v677_v33  ;;  %v1419_v33 = vld [vmem:[%s25430_s7 + $0xa2] sm:$0xff] }
 0x175   : > { %20754 = vmatmul.mubr.msk.f32.gmra.mrb[30].mxu0 %vm685_vm1, %v678_v34  ;;  %v1420_v34 = vld [vmem:[%s25430_s7 + $0xaa] sm:$0xff] }
 0x176   : > { %20756 = vmatprep.mubr.msk.f32.mxu0 %vm685_vm1, %v679_v35  ;;  %v1421_v35 = vld [vmem:[%s25430_s7 + $0xb2] sm:$0xff] }
 0x179   : > { %20757 = vmatmul.mubr.msk.f32.gmra.mrb[32].mxu0 %vm685_vm1, %v680_v36  ;;  %v1422_v36 = vld [vmem:[%s25430_s7 + $0xba] sm:$0xff] }
 0x17a   : > { %20759 = vmatprep.mubr.msk.f32.mxu0 %vm685_vm1, %v681_v37  ;;  %v1423_v37 = vld [vmem:[%s25430_s7 + $0xc2] sm:$0xff] }
 0x17d   : > { %20760 = vmatmul.mubr.msk.f32.gmra.mrb[34].mxu0 %vm685_vm1, %v682_v38  ;;  %v1424_v38 = vld [vmem:[%s25430_s7 + $0xca] sm:$0xff] }
 0x17e   : > { %20764 = vmatprep.mubr.msk.f32.mxu0 %vm685_vm1, %v610_v39  ;;  %v1425_v39 = vld [vmem:[%s25430_s7 + $0xd2] sm:$0xff] }
 0x181   : > { %20765 = vmatmul.mubr.msk.f32.vlgmr.msra.gmra.mrb[0].mxu0 %vm685_vm1, %v611_v40  ;;  %v1426_v40 = vld [vmem:[%s25430_s7 + $0xda] sm:$0xff] }
 0x182   : > { %20767 = vmatprep.mubr.msk.f32.mxu0 %vm685_vm1, %v612_v41  ;;  %20819 = vmatpush3.msk.msra.mxu0 %vm794_vm0, %v1436_v14  ;;  %v25589_v14 = vld [vmem:[%s25430_s7 + $0x12] sm:$0xff]  ;;  %v1427_v41 = vld [vmem:[%s25430_s7 + $0xe2] sm:$0xff] }
 0x183   : > { %20874 = vmatprep.subr.msk.mxu0 %vm794_vm0, %v25513_v42 }
 0x185   : > { %20768 = vmatmul.mubr.msk.f32.gmra.mrb[2].mxu0 %vm685_vm1, %v613_v43  ;;  %v1429_v43 = vld [vmem:[%s25430_s7 + $0xf2] sm:$0xff] }
 0x186   : > { %20770 = vmatprep.mubr.msk.f32.mxu0 %vm685_vm1, %v614_v44  ;;  %v1430_v44 = vld [vmem:[%s25430_s7 + $0xfa] sm:$0xff] }
 0x189   : > { %20771 = vmatmul.mubr.msk.f32.gmra.mrb[4].mxu0 %vm685_vm1, %v615_v45  ;;  %v1431_v45 = vld [vmem:[%s25430_s7 + $0x102] sm:$0xff] }
 0x18a   : > { %20773 = vmatprep.mubr.msk.f32.mxu0 %vm685_vm1, %v616_v46  ;;  %v1432_v46 = vld [vmem:[%s25430_s7 + $0x10a] sm:$0xff] }
 0x18d   : > { %20774 = vmatmul.mubr.msk.f32.gmra.mrb[6].mxu0 %vm685_vm1, %v617_v47  ;;  %v1433_v47 = vld [vmem:[%s25430_s7 + $0x112] sm:$0xff] }
 0x18e   : > { %20776 = vmatprep.mubr.msk.f32.mxu0 %vm685_vm1, %v618_v48  ;;  %v1434_v48 = vld [vmem:[%s25430_s7 + $0x11a] sm:$0xff] }
 0x191   : > { %20777 = vmatmul.mubr.msk.f32.gmra.mrb[8].mxu0 %vm685_vm1, %v619_v49  ;;  %v2726_v49 = vld [vmem:[#allocation5 + $0x14] sm:$0xf] }
 0x192   : > { %20779 = vmatprep.mubr.msk.f32.mxu0 %vm685_vm1, %v620_v50  ;;  %v1863_v50 = vld [vmem:[%s25430_s7 + $0x122] sm:$0xff] }
 0x195   : > { %20780 = vmatmul.mubr.msk.f32.gmra.mrb[10].mxu0 %vm685_vm1, %v621_v51  ;;  %v1864_v51 = vld [vmem:[%s25430_s7 + $0x12a] sm:$0xff] }
 0x196   : > { %20782 = vmatprep.mubr.msk.f32.mxu0 %vm685_vm1, %v622_v52  ;;  %v2259_v52 = vld [vmem:[%s25430_s7 + $0x13] sm:$0xff] }
 0x199   : > { %20783 = vmatmul.mubr.msk.f32.gmra.mrb[12].mxu0 %vm685_vm1, %v623_v53  ;;  %v2260_v53 = vld [vmem:[%s25430_s7 + $0x1b] sm:$0xff] }
 0x19a   : > { %20785 = vmatprep.mubr.msk.f32.mxu0 %vm685_vm1, %v624_v54  ;;  %v2261_v54 = vld [vmem:[%s25430_s7 + $0x23] sm:$0xff] }
 0x19d   : > { %20786 = vmatmul.mubr.msk.f32.gmra.mrb[14].mxu0 %vm685_vm1, %v625_v55  ;;  %v25749_v55 = vld [vmem:[#allocation5 + $0x18] sm:$0xf] }
 0x19e   : > { %20788 = vmatprep.mubr.msk.f32.mxu0 %vm685_vm1, %v626_v56  ;;  %v2262_v56 = vld [vmem:[%s25430_s7 + $0x2b] sm:$0xff] }
 0x1a1   : > { %20789 = vmatmul.mubr.msk.f32.gmra.mrb[16].mxu0 %vm685_vm1, %v627_v57  ;;  %v2263_v57 = vld [vmem:[%s25430_s7 + $0x33] sm:$0xff] }
 0x1a2   : > { %20791 = vmatprep.mubr.msk.f32.mxu0 %vm685_vm1, %v628_v58  ;;  %v2264_v58 = vld [vmem:[%s25430_s7 + $0x3b] sm:$0xff] }
 0x1a5   : > { %20792 = vmatmul.mubr.msk.f32.gmra.mrb[18].mxu0 %vm685_vm1, %v629_v59  ;;  %v2265_v59 = vld [vmem:[%s25430_s7 + $0x43] sm:$0xff] }
 0x1a6   : > { %20794 = vmatprep.mubr.msk.f32.mxu0 %vm685_vm1, %v630_v60  ;;  %v2266_v60 = vld [vmem:[%s25430_s7 + $0x4b] sm:$0xff] }
 0x1a9   : > { %20795 = vmatmul.mubr.msk.f32.gmra.mrb[20].mxu0 %vm685_vm1, %v631_v61  ;;  %v2267_v61 = vld [vmem:[%s25430_s7 + $0x53] sm:$0xff] }
 0x1aa   : > { %20797 = vmatprep.mubr.msk.f32.mxu0 %vm685_vm1, %v632_v62  ;;  %v2268_v62 = vld [vmem:[%s25430_s7 + $0x5b] sm:$0xff] }
 0x1ad   : > { %20798 = vmatmul.mubr.msk.f32.gmra.mrb[22].mxu0 %vm685_vm1, %v633_v63  ;;  %v2269_v63 = vld [vmem:[%s25430_s7 + $0x63] sm:$0xff] }
 0x1ae   : > { %20800 = vmatprep.mubr.msk.f32.mxu0 %vm685_vm1, %v634_v0  ;;  %v2270_v0 = vld [vmem:[%s25430_s7 + $0x6b] sm:$0xff] }
 0x1b1   : > { %20801 = vmatmul.mubr.msk.f32.gmra.mrb[24].mxu0 %vm685_vm1, %v635_v1  ;;  %v2271_v1 = vld [vmem:[%s25430_s7 + $0x73] sm:$0xff] }
 0x1b2   : > { %20803 = vmatprep.mubr.msk.f32.mxu0 %vm685_vm1, %v636_v2  ;;  %v2272_v2 = vld [vmem:[%s25430_s7 + $0x7b] sm:$0xff] }
 0x1b5   : > { %20804 = vmatmul.mubr.msk.f32.gmra.mrb[26].mxu0 %vm685_vm1, %v637_v3  ;;  %v2273_v3 = vld [vmem:[%s25430_s7 + $0x83] sm:$0xff] }
 0x1b6   : > { %20806 = vmatprep.mubr.msk.f32.mxu0 %vm685_vm1, %v638_v4  ;;  %v2274_v4 = vld [vmem:[%s25430_s7 + $0x8b] sm:$0xff] }
 0x1b9   : > { %20807 = vmatmul.mubr.msk.f32.gmra.mrb[28].mxu0 %vm685_vm1, %v639_v5  ;;  %v2275_v5 = vld [vmem:[%s25430_s7 + $0x93] sm:$0xff] }
 0x1ba   : > { %20809 = vmatprep.mubr.msk.f32.mxu0 %vm685_vm1, %v640_v6  ;;  %v2276_v6 = vld [vmem:[%s25430_s7 + $0x9b] sm:$0xff] }
 0x1bd   : > { %20810 = vmatmul.mubr.msk.f32.gmra.mrb[30].mxu0 %vm685_vm1, %v641_v7  ;;  %v2277_v7 = vld [vmem:[%s25430_s7 + $0xa3] sm:$0xff] }
 0x1be   : > { %20812 = vmatprep.mubr.msk.f32.mxu0 %vm685_vm1, %v642_v8  ;;  %v2278_v8 = vld [vmem:[%s25430_s7 + $0xab] sm:$0xff] }
 0x1c1   : > { %20813 = vmatmul.mubr.msk.f32.gmra.mrb[32].mxu0 %vm685_vm1, %v643_v9  ;;  %v2279_v9 = vld [vmem:[%s25430_s7 + $0xb3] sm:$0xff] }
 0x1c2   : > { %20815 = vmatprep.mubr.msk.f32.mxu0 %vm685_vm1, %v644_v10  ;;  %v2280_v10 = vld [vmem:[%s25430_s7 + $0xbb] sm:$0xff] }
 0x1c5   : > { %20816 = vmatmul.mubr.msk.f32.gmra.mrb[34].mxu0 %vm685_vm1, %v645_v11  ;;  %v2281_v11 = vld [vmem:[%s25430_s7 + $0xc3] sm:$0xff] }
 0x1c6   : > { %20820 = vmatprep.mubr.msk.f32.mxu0 %vm685_vm1, %v1399_v12  ;;  %v2282_v12 = vld [vmem:[%s25430_s7 + $0xcb] sm:$0xff] }
 0x1c9   : > { %20821 = vmatmul.mubr.msk.f32.vlgmr.msra.gmra.mrb[0].mxu0 %vm685_vm1, %v1400_v13  ;;  %v2283_v13 = vld [vmem:[%s25430_s7 + $0xd3] sm:$0xff] }
 0x1ca   : > { %20823 = vmatprep.mubr.msk.f32.mxu0 %vm685_vm1, %v25589_v14  ;;  %20875 = vmatpush3.msk.msra.mxu0 %vm794_vm0, %v25513_v42  ;;  %v1428_v42 = vld [vmem:[%s25430_s7 + $0xea] sm:$0xff] }
 0x1cb   : > { %20930 = vmatprep.subr.msk.mxu0 %vm794_vm0, %v25592_v15 }
 0x1cd   : > { %20824 = vmatmul.mubr.msk.f32.gmra.mrb[2].mxu0 %vm685_vm1, %v25595_v16 }
 0x1ce   : > { %20826 = vmatprep.mubr.msk.f32.mxu0 %vm685_vm1, %v25599_v17 }
 0x1d1   : > { %20827 = vmatmul.mubr.msk.f32.gmra.mrb[4].mxu0 %vm685_vm1, %v25608_v18 }
 0x1d2   : > { %20829 = vmatprep.mubr.msk.f32.mxu0 %vm685_vm1, %v25613_v19 }
 0x1d5   : > { %20830 = vmatmul.mubr.msk.f32.gmra.mrb[6].mxu0 %vm685_vm1, %v25620_v20 }
 0x1d6   : > { %20832 = vmatprep.mubr.msk.f32.mxu0 %vm685_vm1, %v25625_v21 }
 0x1d9   : > { %20833 = vmatmul.mubr.msk.f32.gmra.mrb[8].mxu0 %vm685_vm1, %v25630_v22 }
 0x1da   : > { %20835 = vmatprep.mubr.msk.f32.mxu0 %vm685_vm1, %v25635_v23 }
 0x1dd   : > { %20836 = vmatmul.mubr.msk.f32.gmra.mrb[10].mxu0 %vm685_vm1, %v25640_v24 }
 0x1de   : > { %20838 = vmatprep.mubr.msk.f32.mxu0 %vm685_vm1, %v1411_v25 }
 0x1e1   : > { %20839 = vmatmul.mubr.msk.f32.gmra.mrb[12].mxu0 %vm685_vm1, %v1412_v26 }
 0x1e2   : > { %20841 = vmatprep.mubr.msk.f32.mxu0 %vm685_vm1, %v1413_v27 }
 0x1e5   : > { %20842 = vmatmul.mubr.msk.f32.gmra.mrb[14].mxu0 %vm685_vm1, %v1414_v28 }
 0x1e6   : > { %20844 = vmatprep.mubr.msk.f32.mxu0 %vm685_vm1, %v1415_v29 }
 0x1e9   : > { %20845 = vmatmul.mubr.msk.f32.gmra.mrb[16].mxu0 %vm685_vm1, %v1416_v30 }
 0x1ea   : > { %20847 = vmatprep.mubr.msk.f32.mxu0 %vm685_vm1, %v1417_v31 }
 0x1ed   : > { %20848 = vmatmul.mubr.msk.f32.gmra.mrb[18].mxu0 %vm685_vm1, %v1418_v32 }
 0x1ee   : > { %20850 = vmatprep.mubr.msk.f32.mxu0 %vm685_vm1, %v1419_v33 }
 0x1f1   : > { %20851 = vmatmul.mubr.msk.f32.gmra.mrb[20].mxu0 %vm685_vm1, %v1420_v34 }
 0x1f2   : > { %20853 = vmatprep.mubr.msk.f32.mxu0 %vm685_vm1, %v1421_v35 }
 0x1f5   : > { %20854 = vmatmul.mubr.msk.f32.gmra.mrb[22].mxu0 %vm685_vm1, %v1422_v36 }
 0x1f6   : > { %20856 = vmatprep.mubr.msk.f32.mxu0 %vm685_vm1, %v1423_v37 }
 0x1f9   : > { %20857 = vmatmul.mubr.msk.f32.gmra.mrb[24].mxu0 %vm685_vm1, %v1424_v38 }
 0x1fa   : > { %20859 = vmatprep.mubr.msk.f32.mxu0 %vm685_vm1, %v1425_v39 }
 0x1fd   : > { %20860 = vmatmul.mubr.msk.f32.gmra.mrb[26].mxu0 %vm685_vm1, %v1426_v40 }
 0x1fe   : > { %20862 = vmatprep.mubr.msk.f32.mxu0 %vm685_vm1, %v1427_v41 }
 0x201   : > { %20863 = vmatmul.mubr.msk.f32.gmra.mrb[28].mxu0 %vm685_vm1, %v1428_v42 }
 0x202   : > { %20865 = vmatprep.mubr.msk.f32.mxu0 %vm685_vm1, %v1429_v43 }
 0x205   : > { %20866 = vmatmul.mubr.msk.f32.gmra.mrb[30].mxu0 %vm685_vm1, %v1430_v44 }
 0x206   : > { %20868 = vmatprep.mubr.msk.f32.mxu0 %vm685_vm1, %v1431_v45 }
 0x209   : > { %20869 = vmatmul.mubr.msk.f32.gmra.mrb[32].mxu0 %vm685_vm1, %v1432_v46 }
 0x20a   : > { %20871 = vmatprep.mubr.msk.f32.mxu0 %vm685_vm1, %v1433_v47 }
 0x20d   : > { %20872 = vmatmul.mubr.msk.f32.gmra.mrb[34].mxu0 %vm685_vm1, %v1434_v48 }
 0x20e   : > { %20876 = vmatprep.mubr.msk.f32.mxu0 %vm685_vm1, %v25589_v14  ;;  %v2284_v14 = vld [vmem:[%s25430_s7 + $0xdb] sm:$0xff] }
 0x211   : > { %20877 = vmatmul.mubr.msk.f32.vlgmr.msra.gmra.mrb[0].mxu0 %vm685_vm1, %v25595_v16  ;;  %v2286_v16 = vld [vmem:[%s25430_s7 + $0xeb] sm:$0xff] }
 0x212   : > { %20879 = vmatprep.mubr.msk.f32.mxu0 %vm685_vm1, %v25599_v17  ;;  %20931 = vmatpush3.msk.msra.mxu0 %vm794_vm0, %v25592_v15  ;;  %v2285_v15 = vld [vmem:[%s25430_s7 + $0xe3] sm:$0xff]  ;;  %v2287_v17 = vld [vmem:[%s25430_s7 + $0xf3] sm:$0xff] }
 0x213   : > { %20986 = vmatprep.subr.msk.mxu0 %vm794_vm0, %v2726_v49 }
 0x215   : > { %20880 = vmatmul.mubr.msk.f32.gmra.mrb[2].mxu0 %vm685_vm1, %v25608_v18  ;;  %v2288_v18 = vld [vmem:[%s25430_s7 + $0xfb] sm:$0xff] }
 0x216   : > { %20882 = vmatprep.mubr.msk.f32.mxu0 %vm685_vm1, %v25613_v19  ;;  %v2289_v19 = vld [vmem:[%s25430_s7 + $0x103] sm:$0xff] }
 0x219   : > { %20883 = vmatmul.mubr.msk.f32.gmra.mrb[4].mxu0 %vm685_vm1, %v25620_v20  ;;  %v2290_v20 = vld [vmem:[%s25430_s7 + $0x10b] sm:$0xff] }
 0x21a   : > { %20885 = vmatprep.mubr.msk.f32.mxu0 %vm685_vm1, %v25625_v21  ;;  %v2291_v21 = vld [vmem:[%s25430_s7 + $0x113] sm:$0xff] }
 0x21d   : > { %20886 = vmatmul.mubr.msk.f32.gmra.mrb[6].mxu0 %vm685_vm1, %v25630_v22  ;;  %v2292_v22 = vld [vmem:[%s25430_s7 + $0x11b] sm:$0xff] }
 0x21e   : > { %20888 = vmatprep.mubr.msk.f32.mxu0 %vm685_vm1, %v25635_v23  ;;  %v2293_v23 = vld [vmem:[%s25430_s7 + $0x123] sm:$0xff] }
 0x221   : > { %20889 = vmatmul.mubr.msk.f32.gmra.mrb[8].mxu0 %vm685_vm1, %v25640_v24  ;;  %v2294_v24 = vld [vmem:[%s25430_s7 + $0x12b] sm:$0xff] }
 0x222   : > { %20891 = vmatprep.mubr.msk.f32.mxu0 %vm685_vm1, %v1411_v25  ;;  %v2689_v25 = vld [vmem:[%s25430_s7 + $0x14] sm:$0xff] }
 0x225   : > { %20892 = vmatmul.mubr.msk.f32.gmra.mrb[10].mxu0 %vm685_vm1, %v1412_v26  ;;  %v2690_v26 = vld [vmem:[%s25430_s7 + $0x1c] sm:$0xff] }
 0x226   : > { %20894 = vmatprep.mubr.msk.f32.mxu0 %vm685_vm1, %v1413_v27  ;;  %v25826_v27 = vld [vmem:[%s25430_s7 + $0x24] sm:$0xff] }
 0x229   : > { %20895 = vmatmul.mubr.msk.f32.gmra.mrb[12].mxu0 %vm685_vm1, %v1414_v28  ;;  %v25828_v28 = vld [vmem:[#allocation5 + $0x1c] sm:$0xf] }
 0x22a   : > { %20897 = vmatprep.mubr.msk.f32.mxu0 %vm685_vm1, %v1415_v29  ;;  %v25834_v29 = vld [vmem:[%s25430_s7 + $0x2c] sm:$0xff] }
 0x22d   : > { %20898 = vmatmul.mubr.msk.f32.gmra.mrb[14].mxu0 %vm685_vm1, %v1416_v30  ;;  %v25839_v30 = vld [vmem:[%s25430_s7 + $0x34] sm:$0xff] }
 0x22e   : > { %20900 = vmatprep.mubr.msk.f32.mxu0 %vm685_vm1, %v1417_v31  ;;  %v25848_v31 = vld [vmem:[%s25430_s7 + $0x3c] sm:$0xff] }
 0x231   : > { %20901 = vmatmul.mubr.msk.f32.gmra.mrb[16].mxu0 %vm685_vm1, %v1418_v32  ;;  %v25851_v32 = vld [vmem:[%s25430_s7 + $0x44] sm:$0xff] }
 0x232   : > { %20903 = vmatprep.mubr.msk.f32.mxu0 %vm685_vm1, %v1419_v33  ;;  %v25858_v33 = vld [vmem:[%s25430_s7 + $0x4c] sm:$0xff] }
 0x235   : > { %20904 = vmatmul.mubr.msk.f32.gmra.mrb[18].mxu0 %vm685_vm1, %v1420_v34  ;;  %v25861_v34 = vld [vmem:[%s25430_s7 + $0x54] sm:$0xff] }
 0x236   : > { %20906 = vmatprep.mubr.msk.f32.mxu0 %vm685_vm1, %v1421_v35  ;;  %v25868_v35 = vld [vmem:[%s25430_s7 + $0x5c] sm:$0xff] }
 0x239   : > { %20907 = vmatmul.mubr.msk.f32.gmra.mrb[20].mxu0 %vm685_vm1, %v1422_v36  ;;  %v25871_v36 = vld [vmem:[%s25430_s7 + $0x64] sm:$0xff] }
 0x23a   : > { %20909 = vmatprep.mubr.msk.f32.mxu0 %vm685_vm1, %v1423_v37  ;;  %v2700_v37 = vld [vmem:[%s25430_s7 + $0x6c] sm:$0xff] }
 0x23d   : > { %20910 = vmatmul.mubr.msk.f32.gmra.mrb[22].mxu0 %vm685_vm1, %v1424_v38  ;;  %v2701_v38 = vld [vmem:[%s25430_s7 + $0x74] sm:$0xff] }
 0x23e   : > { %20912 = vmatprep.mubr.msk.f32.mxu0 %vm685_vm1, %v1425_v39  ;;  %v2702_v39 = vld [vmem:[%s25430_s7 + $0x7c] sm:$0xff] }
 0x241   : > { %20913 = vmatmul.mubr.msk.f32.gmra.mrb[24].mxu0 %vm685_vm1, %v1426_v40  ;;  %v2703_v40 = vld [vmem:[%s25430_s7 + $0x84] sm:$0xff] }
 0x242   : > { %20915 = vmatprep.mubr.msk.f32.mxu0 %vm685_vm1, %v1427_v41  ;;  %v2704_v41 = vld [vmem:[%s25430_s7 + $0x8c] sm:$0xff] }
 0x245   : > { %20916 = vmatmul.mubr.msk.f32.gmra.mrb[26].mxu0 %vm685_vm1, %v1428_v42  ;;  %v2705_v42 = vld [vmem:[%s25430_s7 + $0x94] sm:$0xff] }
 0x246   : > { %20918 = vmatprep.mubr.msk.f32.mxu0 %vm685_vm1, %v1429_v43  ;;  %v2706_v43 = vld [vmem:[%s25430_s7 + $0x9c] sm:$0xff] }
 0x249   : > { %20919 = vmatmul.mubr.msk.f32.gmra.mrb[28].mxu0 %vm685_vm1, %v1430_v44  ;;  %v2707_v44 = vld [vmem:[%s25430_s7 + $0xa4] sm:$0xff] }
 0x24a   : > { %20921 = vmatprep.mubr.msk.f32.mxu0 %vm685_vm1, %v1431_v45  ;;  %v2708_v45 = vld [vmem:[%s25430_s7 + $0xac] sm:$0xff] }
 0x24d   : > { %20922 = vmatmul.mubr.msk.f32.gmra.mrb[30].mxu0 %vm685_vm1, %v1432_v46  ;;  %v2709_v46 = vld [vmem:[%s25430_s7 + $0xb4] sm:$0xff] }
 0x24e   : > { %20924 = vmatprep.mubr.msk.f32.mxu0 %vm685_vm1, %v1433_v47  ;;  %v2710_v47 = vld [vmem:[%s25430_s7 + $0xbc] sm:$0xff] }
 0x251   : > { %20925 = vmatmul.mubr.msk.f32.gmra.mrb[32].mxu0 %vm685_vm1, %v1434_v48  ;;  %v2711_v48 = vld [vmem:[%s25430_s7 + $0xc4] sm:$0xff] }
 0x252   : > { %20927 = vmatprep.mubr.msk.f32.mxu0 %vm685_vm1, %v1863_v50  ;;  %v2713_v50 = vld [vmem:[%s25430_s7 + $0xd4] sm:$0xff] }
 0x255   : > { %20928 = vmatmul.mubr.msk.f32.gmra.mrb[34].mxu0 %vm685_vm1, %v1864_v51  ;;  %v2714_v51 = vld [vmem:[%s25430_s7 + $0xdc] sm:$0xff] }
 0x256   : > { %20932 = vmatprep.mubr.msk.f32.mxu0 %vm685_vm1, %v2259_v52  ;;  %v25907_v52 = vld [vmem:[%s25430_s7 + $0xe4] sm:$0xff] }
 0x259   : > { %20933 = vmatmul.mubr.msk.f32.vlgmr.msra.gmra.mrb[0].mxu0 %vm685_vm1, %v2260_v53  ;;  %v25913_v53 = vld [vmem:[%s25430_s7 + $0xec] sm:$0xff] }
 0x25a   : > { %20935 = vmatprep.mubr.msk.f32.mxu0 %vm685_vm1, %v2261_v54  ;;  %20987 = vmatpush3.msk.msra.mxu0 %vm794_vm0, %v2726_v49  ;;  %v2712_v49 = vld [vmem:[%s25430_s7 + $0xcc] sm:$0xff]  ;;  %v25916_v54 = vld [vmem:[%s25430_s7 + $0xf4] sm:$0xff] }
 0x25b   : > { %21042 = vmatprep.subr.msk.mxu0 %vm794_vm0, %v25749_v55 }
 0x25d   : > { %20936 = vmatmul.mubr.msk.f32.gmra.mrb[2].mxu0 %vm685_vm1, %v2262_v56  ;;  %v25926_v56 = vld [vmem:[%s25430_s7 + $0x104] sm:$0xff] }
 0x25e   : > { %20938 = vmatprep.mubr.msk.f32.mxu0 %vm685_vm1, %v2263_v57  ;;  %v25933_v57 = vld [vmem:[%s25430_s7 + $0x10c] sm:$0xff] }
 0x261   : > { %20939 = vmatmul.mubr.msk.f32.gmra.mrb[4].mxu0 %vm685_vm1, %v2264_v58  ;;  %v25936_v58 = vld [vmem:[%s25430_s7 + $0x114] sm:$0xff] }
 0x262   : > { %20941 = vmatprep.mubr.msk.f32.mxu0 %vm685_vm1, %v2265_v59  ;;  %v25943_v59 = vld [vmem:[%s25430_s7 + $0x11c] sm:$0xff] }
 0x265   : > { %20942 = vmatmul.mubr.msk.f32.gmra.mrb[6].mxu0 %vm685_vm1, %v2266_v60  ;;  %v25946_v60 = vld [vmem:[%s25430_s7 + $0x124] sm:$0xff] }
 0x266   : > { %20944 = vmatprep.mubr.msk.f32.mxu0 %vm685_vm1, %v2267_v61  ;;  %v25953_v61 = vld [vmem:[%s25430_s7 + $0x12c] sm:$0xff] }
 0x269   : > { %20945 = vmatmul.mubr.msk.f32.gmra.mrb[8].mxu0 %vm685_vm1, %v2268_v62  ;;  %v25959_v62 = vld [vmem:[#allocation5 + $0x20] sm:$0xf] }
 0x26a   : > { %20947 = vmatprep.mubr.msk.f32.mxu0 %vm685_vm1, %v2269_v63  ;;  %v574_v63 = vld [vmem:[%s28566_s1] sm:$0xff] }
 0x26d   : > { %20948 = vmatmul.mubr.msk.f32.gmra.mrb[10].mxu0 %vm685_vm1, %v2270_v0  ;;  %v25043_v0 = vmov 0  }
 0x26e   : > { %20950 = vmatprep.mubr.msk.f32.mxu0 %vm685_vm1, %v2271_v1  ;;  %23791 = vset.pattern.permute.xlu0 %v25043_v0  ;;  %v576_v1 = vld [vmem:[%s28566_s1 + $0x10] sm:$0xff] }
 0x26f   : > { %4490 = vperm.xlu0 %23791, %v574_v63   ;;  %23792 = vset.pattern.permute.xlu1 %v25043_v0  ;;  %v3574_v63 = vld [vmem:[%s25430_s7 + $0xed] sm:$0xff]  ;;  %v3575_v0 = vld [vmem:[%s25430_s7 + $0xf5] sm:$0xff] }
 0x270   : > { %4500 = vperm.xlu1 %23792, %v576_v1   ;;  %v3576_v1 = vld [vmem:[%s25430_s7 + $0xfd] sm:$0xff] }
 0x271   : > { %20951 = vmatmul.mubr.msk.f32.gmra.mrb[12].mxu0 %vm685_vm1, %v2272_v2  ;;  %v575_v2 = vld [vmem:[%s28566_s1 + $0x8] sm:$0xff] }
 0x272   : > { %20953 = vmatprep.mubr.msk.f32.mxu0 %vm685_vm1, %v2273_v3  ;;  %v577_v3 = vld [vmem:[%s28566_s1 + $0x18] sm:$0xff] }
 0x273   : > { %4495 = vperm.xlu0 %23791, %v575_v2   ;;  %v3577_v2 = vld [vmem:[%s25430_s7 + $0x105] sm:$0xff] }
 0x274   : > { %4505 = vperm.xlu1 %23792, %v577_v3   ;;  %v3578_v3 = vld [vmem:[%s25430_s7 + $0x10d] sm:$0xff] }
 0x275   : > { %20954 = vmatmul.mubr.msk.f32.gmra.mrb[14].mxu0 %vm685_vm1, %v2274_v4  ;;  %v578_v4 = vld [vmem:[%s28566_s1 + $0x20] sm:$0xff] }
 0x276   : > { %20956 = vmatprep.mubr.msk.f32.mxu0 %vm685_vm1, %v2275_v5  ;;  %v579_v5 = vld [vmem:[%s28566_s1 + $0x28] sm:$0xff] }
 0x277   : > { %4510 = vperm.xlu0 %23791, %v578_v4   ;;  %v3579_v4 = vld [vmem:[%s25430_s7 + $0x115] sm:$0xff] }
 0x278   : > { %4515 = vperm.xlu1 %23792, %v579_v5   ;;  %v3580_v5 = vld [vmem:[%s25430_s7 + $0x11d] sm:$0xff] }
 0x279   : > { %20957 = vmatmul.mubr.msk.f32.gmra.mrb[16].mxu0 %vm685_vm1, %v2276_v6  ;;  %v580_v6 = vld [vmem:[%s28566_s1 + $0x30] sm:$0xff] }
 0x27a   : > { %20959 = vmatprep.mubr.msk.f32.mxu0 %vm685_vm1, %v2277_v7  ;;  %v581_v7 = vld [vmem:[%s28566_s1 + $0x38] sm:$0xff] }
 0x27b   : > { %4520 = vperm.xlu0 %23791, %v580_v6   ;;  %v3581_v6 = vld [vmem:[%s25430_s7 + $0x125] sm:$0xff] }
 0x27c   : > { %4525 = vperm.xlu1 %23792, %v581_v7   ;;  %v3582_v7 = vld [vmem:[%s25430_s7 + $0x12d] sm:$0xff] }
 0x27d   : > { %20960 = vmatmul.mubr.msk.f32.gmra.mrb[18].mxu0 %vm685_vm1, %v2278_v8  ;;  %v582_v8 = vld [vmem:[%s28566_s1 + $0x40] sm:$0xff] }
 0x27e   : > { %20962 = vmatprep.mubr.msk.f32.mxu0 %vm685_vm1, %v2279_v9  ;;  %v583_v9 = vld [vmem:[%s28566_s1 + $0x48] sm:$0xff] }
 0x27f   : > { %4530 = vperm.xlu0 %23791, %v582_v8   ;;  %v3583_v8 = vld [vmem:[%s25430_s7 + $0x135] sm:$0xff] }
 0x280   : > { %4535 = vperm.xlu1 %23792, %v583_v9   ;;  %v3584_v9 = vld [vmem:[%s25430_s7 + $0x13d] sm:$0xff] }
 0x281   : > { %20963 = vmatmul.mubr.msk.f32.gmra.mrb[20].mxu0 %vm685_vm1, %v2280_v10  ;;  %v584_v10 = vld [vmem:[%s28566_s1 + $0x50] sm:$0xff] }
 0x282   : > { %20965 = vmatprep.mubr.msk.f32.mxu0 %vm685_vm1, %v2281_v11  ;;  %v585_v11 = vld [vmem:[%s28566_s1 + $0x58] sm:$0xff] }
 0x283   : > { %4540 = vperm.xlu0 %23791, %v584_v10   ;;  %v3979_v10 = vld [vmem:[%s25430_s7 + $0x26] sm:$0xff] }
 0x284   : > { %4545 = vperm.xlu1 %23792, %v585_v11   ;;  %v3980_v11 = vld [vmem:[%s25430_s7 + $0x2e] sm:$0xff] }
 0x285   : > { %20966 = vmatmul.mubr.msk.f32.gmra.mrb[22].mxu0 %vm685_vm1, %v2282_v12  ;;  %v586_v12 = vld [vmem:[%s28566_s1 + $0x60] sm:$0xff] }
 0x286   : > { %20968 = vmatprep.mubr.msk.f32.mxu0 %vm685_vm1, %v2283_v13  ;;  %v587_v13 = vld [vmem:[%s28566_s1 + $0x68] sm:$0xff] }
 0x287   : > { %4550 = vperm.xlu0 %23791, %v586_v12   ;;  %v3981_v12 = vld [vmem:[%s25430_s7 + $0x36] sm:$0xff] }
 0x288   : > { %4555 = vperm.xlu1 %23792, %v587_v13   ;;  %v3982_v13 = vld [vmem:[%s25430_s7 + $0x3e] sm:$0xff] }
 0x289   : > { %20969 = vmatmul.mubr.msk.f32.gmra.mrb[24].mxu0 %vm685_vm1, %v2284_v14  ;;  %v588_v14 = vld [vmem:[%s28566_s1 + $0x70] sm:$0xff] }
 0x28a   : > { %20971 = vmatprep.mubr.msk.f32.mxu0 %vm685_vm1, %v2285_v15  ;;  %v3153_v15 = vld [vmem:[%s25430_s7 + $0x134] sm:$0xff] }
 0x28b   : > { %4560 = vperm.xlu0 %23791, %v588_v14   ;;  %v3983_v14 = vld [vmem:[%s25430_s7 + $0x46] sm:$0xff] }
 0x28d   : > { %20972 = vmatmul.mubr.msk.f32.gmra.mrb[26].mxu0 %vm685_vm1, %v2286_v16  ;;  %v589_v16 = vld [vmem:[%s28566_s1 + $0x78] sm:$0xff] }
 0x28e   : > { %20974 = vmatprep.mubr.msk.f32.mxu0 %vm685_vm1, %v2287_v17  ;;  %v590_v17 = vld [vmem:[%s28566_s1 + $0x80] sm:$0xff]  ;;  %4565 = vperm.xlu1 %23792, %v589_v16   ;;  %v3985_v16 = vld [vmem:[%s25430_s7 + $0x56] sm:$0xff] }
 0x28f   : > { %4570 = vperm.xlu0 %23791, %v590_v17   ;;  %v3986_v17 = vld [vmem:[%s25430_s7 + $0x5e] sm:$0xff] }
 0x291   : > { %20975 = vmatmul.mubr.msk.f32.gmra.mrb[28].mxu0 %vm685_vm1, %v2288_v18  ;;  %v3154_v18 = vld [vmem:[%s25430_s7 + $0x13c] sm:$0xff] }
 0x292   : > { %20977 = vmatprep.mubr.msk.f32.mxu0 %vm685_vm1, %v2289_v19  ;;  %v3549_v19 = vld [vmem:[%s25430_s7 + $0x25] sm:$0xff] }
 0x295   : > { %20978 = vmatmul.mubr.msk.f32.gmra.mrb[30].mxu0 %vm685_vm1, %v2290_v20  ;;  %v591_v20 = vld [vmem:[%s28566_s1 + $0x88] sm:$0xff] }
 0x296   : > { %20980 = vmatprep.mubr.msk.f32.mxu0 %vm685_vm1, %v2291_v21  ;;  %v592_v21 = vld [vmem:[%s28566_s1 + $0x90] sm:$0xff]  ;;  %4575 = vperm.xlu1 %23792, %v591_v20  }
 0x297   : > { %4580 = vperm.xlu0 %23791, %v592_v21   ;;  %v3989_v20 = vld [vmem:[%s25430_s7 + $0x76] sm:$0xff]  ;;  %v3990_v21 = vld [vmem:[%s25430_s7 + $0x7e] sm:$0xff] }
 0x299   : > { %20981 = vmatmul.mubr.msk.f32.gmra.mrb[32].mxu0 %vm685_vm1, %v2292_v22  ;;  %v3550_v22 = vld [vmem:[%s25430_s7 + $0x2d] sm:$0xff] }
 0x29a   : > { %20983 = vmatprep.mubr.msk.f32.mxu0 %vm685_vm1, %v2293_v23  ;;  %v3551_v23 = vld [vmem:[%s25430_s7 + $0x35] sm:$0xff] }
 0x29d   : > { %20984 = vmatmul.mubr.msk.f32.gmra.mrb[34].mxu0 %vm685_vm1, %v2294_v24  ;;  %v593_v24 = vld [vmem:[%s28566_s1 + $0x98] sm:$0xff] }
 0x29e   : > { %20988 = vmatprep.mubr.msk.f32.mxu0 %vm685_vm1, %v2689_v25  ;;  %v594_v25 = vld [vmem:[%s28566_s1 + $0xa0] sm:$0xff]  ;;  %4585 = vperm.xlu1 %23792, %v593_v24   ;;  %v3993_v24 = vld [vmem:[%s25430_s7 + $0x96] sm:$0xff] }
 0x29f   : > { %4590 = vperm.xlu0 %23791, %v594_v25   ;;  %v3994_v25 = vld [vmem:[%s25430_s7 + $0x9e] sm:$0xff] }
 0x2a1   : > { %20989 = vmatmul.mubr.msk.f32.vlgmr.msra.gmra.mrb[0].mxu0 %vm685_vm1, %v2690_v26  ;;  %v3552_v26 = vld [vmem:[%s25430_s7 + $0x3d] sm:$0xff] }
 0x2a2   : > { %20991 = vmatprep.mubr.msk.f32.mxu0 %vm685_vm1, %v25826_v27  ;;  %21043 = vmatpush3.msk.msra.mxu0 %vm794_vm0, %v25749_v55  ;;  %v25923_v55 = vld [vmem:[%s25430_s7 + $0xfc] sm:$0xff] }
 0x2a3   : > { %21098 = vmatprep.subr.msk.mxu0 %vm794_vm0, %v25828_v28 }
 0x2a5   : > { %20992 = vmatmul.mubr.msk.f32.gmra.mrb[2].mxu0 %vm685_vm1, %v25834_v29 }
 0x2a6   : > { %20994 = vmatprep.mubr.msk.f32.mxu0 %vm685_vm1, %v25839_v30 }
 0x2a9   : > { %20995 = vmatmul.mubr.msk.f32.gmra.mrb[4].mxu0 %vm685_vm1, %v25848_v31 }
 0x2aa   : > { %20997 = vmatprep.mubr.msk.f32.mxu0 %vm685_vm1, %v25851_v32 }
 0x2ad   : > { %20998 = vmatmul.mubr.msk.f32.gmra.mrb[6].mxu0 %vm685_vm1, %v25858_v33 }
 0x2ae   : > { %21000 = vmatprep.mubr.msk.f32.mxu0 %vm685_vm1, %v25861_v34 }
 0x2b1   : > { %21001 = vmatmul.mubr.msk.f32.gmra.mrb[8].mxu0 %vm685_vm1, %v25868_v35 }
 0x2b2   : > { %21003 = vmatprep.mubr.msk.f32.mxu0 %vm685_vm1, %v25871_v36 }
 0x2b5   : > { %21004 = vmatmul.mubr.msk.f32.gmra.mrb[10].mxu0 %vm685_vm1, %v2700_v37 }
 0x2b6   : > { %21006 = vmatprep.mubr.msk.f32.mxu0 %vm685_vm1, %v2701_v38 }
 0x2b9   : > { %21007 = vmatmul.mubr.msk.f32.gmra.mrb[12].mxu0 %vm685_vm1, %v2702_v39 }
 0x2ba   : > { %21009 = vmatprep.mubr.msk.f32.mxu0 %vm685_vm1, %v2703_v40 }
 0x2bd   : > { %21010 = vmatmul.mubr.msk.f32.gmra.mrb[14].mxu0 %vm685_vm1, %v2704_v41 }
 0x2be   : > { %21012 = vmatprep.mubr.msk.f32.mxu0 %vm685_vm1, %v2705_v42 }
 0x2c1   : > { %21013 = vmatmul.mubr.msk.f32.gmra.mrb[16].mxu0 %vm685_vm1, %v2706_v43 }
 0x2c2   : > { %21015 = vmatprep.mubr.msk.f32.mxu0 %vm685_vm1, %v2707_v44 }
 0x2c5   : > { %21016 = vmatmul.mubr.msk.f32.gmra.mrb[18].mxu0 %vm685_vm1, %v2708_v45 }
 0x2c6   : > { %21018 = vmatprep.mubr.msk.f32.mxu0 %vm685_vm1, %v2709_v46 }
 0x2c9   : > { %21019 = vmatmul.mubr.msk.f32.gmra.mrb[20].mxu0 %vm685_vm1, %v2710_v47 }
 0x2ca   : > { %21021 = vmatprep.mubr.msk.f32.mxu0 %vm685_vm1, %v2711_v48 }
 0x2cd   : > { %21022 = vmatmul.mubr.msk.f32.gmra.mrb[22].mxu0 %vm685_vm1, %v2712_v49 }
 0x2ce   : > { %21024 = vmatprep.mubr.msk.f32.mxu0 %vm685_vm1, %v2713_v50 }
 0x2d1   : > { %21025 = vmatmul.mubr.msk.f32.gmra.mrb[24].mxu0 %vm685_vm1, %v2714_v51 }
 0x2d2   : > { %21027 = vmatprep.mubr.msk.f32.mxu0 %vm685_vm1, %v25907_v52 }
 0x2d5   : > { %21028 = vmatmul.mubr.msk.f32.gmra.mrb[26].mxu0 %vm685_vm1, %v25913_v53 }
 0x2d6   : > { %21030 = vmatprep.mubr.msk.f32.mxu0 %vm685_vm1, %v25916_v54 }
 0x2d9   : > { %21031 = vmatmul.mubr.msk.f32.gmra.mrb[28].mxu0 %vm685_vm1, %v25923_v55 }
 0x2da   : > { %21033 = vmatprep.mubr.msk.f32.mxu0 %vm685_vm1, %v25926_v56 }
 0x2dd   : > { %21034 = vmatmul.mubr.msk.f32.gmra.mrb[30].mxu0 %vm685_vm1, %v25933_v57 }
 0x2de   : > { %21036 = vmatprep.mubr.msk.f32.mxu0 %vm685_vm1, %v25936_v58 }
 0x2e1   : > { %21037 = vmatmul.mubr.msk.f32.gmra.mrb[32].mxu0 %vm685_vm1, %v25943_v59 }
 0x2e2   : > { %21039 = vmatprep.mubr.msk.f32.mxu0 %vm685_vm1, %v25946_v60 }
 0x2e5   : > { %21040 = vmatmul.mubr.msk.f32.gmra.mrb[34].mxu0 %vm685_vm1, %v25953_v61 }
 0x2e6   : > { %21044 = vmatprep.mubr.msk.f32.mxu0 %vm685_vm1, %v25826_v27  ;;  %v3553_v27 = vld [vmem:[%s25430_s7 + $0x45] sm:$0xff] }
 0x2e9   : > { %21045 = vmatmul.mubr.msk.f32.vlgmr.msra.gmra.mrb[0].mxu0 %vm685_vm1, %v25834_v29  ;;  %v596_v29 = vld [vmem:[%s28566_s1 + $0xb0] sm:$0xff] }
 0x2ea   : > { %21047 = vmatprep.mubr.msk.f32.mxu0 %vm685_vm1, %v25839_v30  ;;  %21099 = vmatpush3.msk.msra.mxu0 %vm794_vm0, %v25828_v28  ;;  %v595_v28 = vld [vmem:[%s28566_s1 + $0xa8] sm:$0xff] }
 0x2eb   : > { %21154 = vmatprep.subr.msk.mxu0 %vm794_vm0, %v25959_v62  ;;  %v3554_v30 = vld [vmem:[%s25430_s7 + $0x4d] sm:$0xff]  ;;  %4595 = vperm.xlu1 %23792, %v595_v28   ;;  %v3997_v28 = vld [vmem:[%s25430_s7 + $0xb6] sm:$0xff] }
 0x2ec   : > { %4600 = vperm.xlu0 %23791, %v596_v29   ;;  %v3998_v29 = vld [vmem:[%s25430_s7 + $0xbe] sm:$0xff] }
 0x2ed   : > { %21048 = vmatmul.mubr.msk.f32.gmra.mrb[2].mxu0 %vm685_vm1, %v25848_v31  ;;  %v3555_v31 = vld [vmem:[%s25430_s7 + $0x55] sm:$0xff] }
 0x2ee   : > { %21050 = vmatprep.mubr.msk.f32.mxu0 %vm685_vm1, %v25851_v32  ;;  %v597_v32 = vld [vmem:[%s28566_s1 + $0xb8] sm:$0xff] }
 0x2ef   : > { %4605 = vperm.xlu1 %23792, %v597_v32   ;;  %v4001_v32 = vld [vmem:[%s25430_s7 + $0xd6] sm:$0xff] }
 0x2f1   : > { %21051 = vmatmul.mubr.msk.f32.gmra.mrb[4].mxu0 %vm685_vm1, %v25858_v33  ;;  %v598_v33 = vld [vmem:[%s28566_s1 + $0xc0] sm:$0xff] }
 0x2f2   : > { %21053 = vmatprep.mubr.msk.f32.mxu0 %vm685_vm1, %v25861_v34  ;;  %v3556_v34 = vld [vmem:[%s25430_s7 + $0x5d] sm:$0xff]  ;;  %4610 = vperm.xlu0 %23791, %v598_v33  }
 0x2f3   : > { %v4002_v33 = vld [vmem:[%s25430_s7 + $0xde] sm:$0xff] }
 0x2f5   : > { %21054 = vmatmul.mubr.msk.f32.gmra.mrb[6].mxu0 %vm685_vm1, %v25868_v35  ;;  %v3557_v35 = vld [vmem:[%s25430_s7 + $0x65] sm:$0xff] }
 0x2f6   : > { %21056 = vmatprep.mubr.msk.f32.mxu0 %vm685_vm1, %v25871_v36  ;;  %v599_v36 = vld [vmem:[%s28566_s1 + $0xc8] sm:$0xff] }
 0x2f7   : > { %4615 = vperm.xlu1 %23792, %v599_v36   ;;  %v4005_v36 = vld [vmem:[%s25430_s7 + $0xf6] sm:$0xff] }
 0x2f9   : > { %21057 = vmatmul.mubr.msk.f32.gmra.mrb[8].mxu0 %vm685_vm1, %v2700_v37  ;;  %v600_v37 = vld [vmem:[%s28566_s1 + $0xd0] sm:$0xff] }
 0x2fa   : > { %21059 = vmatprep.mubr.msk.f32.mxu0 %vm685_vm1, %v2701_v38  ;;  %v3558_v38 = vld [vmem:[%s25430_s7 + $0x6d] sm:$0xff]  ;;  %4620 = vperm.xlu0 %23791, %v600_v37   ;;  %v4006_v37 = vld [vmem:[%s25430_s7 + $0xfe] sm:$0xff] }
 0x2fd   : > { %21060 = vmatmul.mubr.msk.f32.gmra.mrb[10].mxu0 %vm685_vm1, %v2702_v39  ;;  %v3559_v39 = vld [vmem:[%s25430_s7 + $0x75] sm:$0xff] }
 0x2fe   : > { %21062 = vmatprep.mubr.msk.f32.mxu0 %vm685_vm1, %v2703_v40  ;;  %v601_v40 = vld [vmem:[%s28566_s1 + $0xd8] sm:$0xff] }
 0x2ff   : > { %4625 = vperm.xlu1 %23792, %v601_v40   ;;  %v4009_v40 = vld [vmem:[%s25430_s7 + $0x116] sm:$0xff] }
 0x301   : > { %21063 = vmatmul.mubr.msk.f32.gmra.mrb[12].mxu0 %vm685_vm1, %v2704_v41  ;;  %v602_v41 = vld [vmem:[%s28566_s1 + $0xe0] sm:$0xff] }
 0x302   : > { %21065 = vmatprep.mubr.msk.f32.mxu0 %vm685_vm1, %v2705_v42  ;;  %v3560_v42 = vld [vmem:[%s25430_s7 + $0x7d] sm:$0xff]  ;;  %4630 = vperm.xlu0 %23791, %v602_v41  }
 0x303   : > { %v4010_v41 = vld [vmem:[%s25430_s7 + $0x11e] sm:$0xff] }
 0x305   : > { %21066 = vmatmul.mubr.msk.f32.gmra.mrb[14].mxu0 %vm685_vm1, %v2706_v43  ;;  %v3561_v43 = vld [vmem:[%s25430_s7 + $0x85] sm:$0xff] }
 0x306   : > { %21068 = vmatprep.mubr.msk.f32.mxu0 %vm685_vm1, %v2707_v44  ;;  %v603_v44 = vld [vmem:[%s28566_s1 + $0xe8] sm:$0xff] }
 0x307   : > { %4635 = vperm.xlu1 %23792, %v603_v44   ;;  %v4013_v44 = vld [vmem:[%s25430_s7 + $0x136] sm:$0xff] }
 0x309   : > { %21069 = vmatmul.mubr.msk.f32.gmra.mrb[16].mxu0 %vm685_vm1, %v2708_v45  ;;  %v604_v45 = vld [vmem:[%s28566_s1 + $0xf0] sm:$0xff] }
 0x30a   : > { %21071 = vmatprep.mubr.msk.f32.mxu0 %vm685_vm1, %v2709_v46  ;;  %v3562_v46 = vld [vmem:[%s25430_s7 + $0x8d] sm:$0xff]  ;;  %4640 = vperm.xlu0 %23791, %v604_v45   ;;  %v4014_v45 = vld [vmem:[%s25430_s7 + $0x13e] sm:$0xff] }
 0x30d   : > { %21072 = vmatmul.mubr.msk.f32.gmra.mrb[18].mxu0 %vm685_vm1, %v2710_v47  ;;  %v3563_v47 = vld [vmem:[%s25430_s7 + $0x95] sm:$0xff] }
 0x30e   : > { %21074 = vmatprep.mubr.msk.f32.mxu0 %vm685_vm1, %v2711_v48  ;;  %v605_v48 = vld [vmem:[%s28566_s1 + $0xf8] sm:$0xff] }
 0x30f   : > { %4645 = vperm.xlu1 %23792, %v605_v48  }
 0x311   : > { %21075 = vmatmul.mubr.msk.f32.gmra.mrb[20].mxu0 %vm685_vm1, %v2712_v49  ;;  %v606_v49 = vld [vmem:[%s28566_s1 + $0x100] sm:$0xff] }
 0x312   : > { %21077 = vmatprep.mubr.msk.f32.mxu0 %vm685_vm1, %v2713_v50  ;;  %v3564_v50 = vld [vmem:[%s25430_s7 + $0x9d] sm:$0xff]  ;;  %4650 = vperm.xlu0 %23791, %v606_v49   ;;  %v28593_v49 = vmov 0.0  }
 0x313   : > { %4708 = vst.msk [vmem:[#allocation2 + $0x18] sm:$0xff] %vm4704_vm2, %v28593_v49  ;;  %4709 = vst.msk [vmem:[#allocation2 + $0x20] sm:$0xff] %vm4704_vm2, %v28593_v49 }
 0x314   : > { %4705 = vst.msk [vmem:[#allocation2] sm:$0xff] %vm4704_vm2, %v28593_v49  ;;  %4706 = vst.msk [vmem:[#allocation2 + $0x8] sm:$0xff] %vm4704_vm2, %v28593_v49 }
 0x315   : > { %21078 = vmatmul.mubr.msk.f32.gmra.mrb[22].mxu0 %vm685_vm1, %v2714_v51  ;;  %v3565_v51 = vld [vmem:[%s25430_s7 + $0xa5] sm:$0xff]  ;;  %4707 = vst.msk [vmem:[#allocation2 + $0x10] sm:$0xff] %vm4704_vm2, %v28593_v49  ;;  %4710 = vst.msk [vmem:[#allocation2 + $0x28] sm:$0xff] %vm4704_vm2, %v28593_v49 }
 0x316   : > { %21080 = vmatprep.mubr.msk.f32.mxu0 %vm685_vm1, %v25907_v52  ;;  %v607_v52 = vld [vmem:[%s28566_s1 + $0x108] sm:$0xff]  ;;  %4711 = vst.msk [vmem:[#allocation2 + $0x30] sm:$0xff] %vm4704_vm2, %v28593_v49  ;;  %4712 = vst.msk [vmem:[#allocation2 + $0x38] sm:$0xff] %vm4704_vm2, %v28593_v49 }
 0x317   : > { %4655 = vperm.xlu1 %23792, %v607_v52   ;;  %4713 = vst.msk [vmem:[#allocation2 + $0x40] sm:$0xff] %vm4704_vm2, %v28593_v49  ;;  %4714 = vst.msk [vmem:[#allocation2 + $0x48] sm:$0xff] %vm4704_vm2, %v28593_v49  ;;  %v6037_v52 = vld [vmem:[#allocation10 + $0x60] sm:$0xff] }
 0x318   : > { %4715 = vst.msk [vmem:[#allocation2 + $0x50] sm:$0xff] %vm4704_vm2, %v28593_v49  ;;  %4716 = vst.msk [vmem:[#allocation2 + $0x58] sm:$0xff] %vm4704_vm2, %v28593_v49 }
 0x319   : > { %21081 = vmatmul.mubr.msk.f32.gmra.mrb[24].mxu0 %vm685_vm1, %v25913_v53  ;;  %v608_v53 = vld [vmem:[%s28566_s1 + $0x110] sm:$0xff]  ;;  %4717 = vst.msk [vmem:[#allocation2 + $0x60] sm:$0xff] %vm4704_vm2, %v28593_v49  ;;  %4718 = vst.msk [vmem:[#allocation2 + $0x68] sm:$0xff] %vm4704_vm2, %v28593_v49 }
 0x31a   : > { %21083 = vmatprep.mubr.msk.f32.mxu0 %vm685_vm1, %v25916_v54  ;;  %v3566_v54 = vld [vmem:[%s25430_s7 + $0xad] sm:$0xff]  ;;  %4660 = vperm.xlu0 %23791, %v608_v53   ;;  %4719 = vst.msk [vmem:[#allocation2 + $0x70] sm:$0xff] %vm4704_vm2, %v28593_v49  ;;  %4720 = vst.msk [vmem:[#allocation2 + $0x78] sm:$0xff] %vm4704_vm2, %v28593_v49 }
 0x31b   : > { %4721 = vst.msk [vmem:[#allocation2 + $0x80] sm:$0xff] %vm4704_vm2, %v28593_v49  ;;  %4722 = vst.msk [vmem:[#allocation2 + $0x88] sm:$0xff] %vm4704_vm2, %v28593_v49 }
 0x31c   : > { %4723 = vst.msk [vmem:[#allocation2 + $0x90] sm:$0xff] %vm4704_vm2, %v28593_v49  ;;  %4724 = vst.msk [vmem:[#allocation2 + $0x98] sm:$0xff] %vm4704_vm2, %v28593_v49 }
 0x31d   : > { %21084 = vmatmul.mubr.msk.f32.gmra.mrb[26].mxu0 %vm685_vm1, %v25923_v55  ;;  %v3567_v55 = vld [vmem:[%s25430_s7 + $0xb5] sm:$0xff]  ;;  %4725 = vst.msk [vmem:[#allocation2 + $0xa0] sm:$0xff] %vm4704_vm2, %v28593_v49  ;;  %4726 = vst.msk [vmem:[#allocation2 + $0xa8] sm:$0xff] %vm4704_vm2, %v28593_v49 }
 0x31e   : > { %21086 = vmatprep.mubr.msk.f32.mxu0 %vm685_vm1, %v25926_v56  ;;  %v609_v56 = vld [vmem:[%s28566_s1 + $0x118] sm:$0xff]  ;;  %4727 = vst.msk [vmem:[#allocation2 + $0xb0] sm:$0xff] %vm4704_vm2, %v28593_v49  ;;  %4728 = vst.msk [vmem:[#allocation2 + $0xb8] sm:$0xff] %vm4704_vm2, %v28593_v49 }
 0x31f   : > { %4665 = vperm.xlu1 %23792, %v609_v56   ;;  %4729 = vst.msk [vmem:[#allocation2 + $0xc0] sm:$0xff] %vm4704_vm2, %v28593_v49  ;;  %4730 = vst.msk [vmem:[#allocation2 + $0xc8] sm:$0xff] %vm4704_vm2, %v28593_v49  ;;  %v6039_v56 = vld [vmem:[#allocation10 + $0x70] sm:$0xff] }
 0x320   : > { %4731 = vst.msk [vmem:[#allocation2 + $0xd0] sm:$0xff] %vm4704_vm2, %v28593_v49  ;;  %4732 = vst.msk [vmem:[#allocation2 + $0xd8] sm:$0xff] %vm4704_vm2, %v28593_v49 }
 0x321   : > { %21087 = vmatmul.mubr.msk.f32.gmra.mrb[28].mxu0 %vm685_vm1, %v25933_v57  ;;  %v3568_v57 = vld [vmem:[%s25430_s7 + $0xbd] sm:$0xff]  ;;  %4733 = vst.msk [vmem:[#allocation2 + $0xe0] sm:$0xff] %vm4704_vm2, %v28593_v49  ;;  %4734 = vst.msk [vmem:[#allocation2 + $0xe8] sm:$0xff] %vm4704_vm2, %v28593_v49 }
 0x322   : > { %21089 = vmatprep.mubr.msk.f32.mxu0 %vm685_vm1, %v25936_v58  ;;  %v3569_v58 = vld [vmem:[%s25430_s7 + $0xc5] sm:$0xff]  ;;  %4735 = vst.msk [vmem:[#allocation2 + $0xf0] sm:$0xff] %vm4704_vm2, %v28593_v49  ;;  %4736 = vst.msk [vmem:[#allocation2 + $0xf8] sm:$0xff] %vm4704_vm2, %v28593_v49 }
 0x323   : > { %4737 = vst.msk [vmem:[#allocation2 + $0x100] sm:$0xff] %vm4704_vm2, %v28593_v49  ;;  %4738 = vst.msk [vmem:[#allocation2 + $0x108] sm:$0xff] %vm4704_vm2, %v28593_v49 }
 0x324   : > { %4739 = vst.msk [vmem:[#allocation2 + $0x110] sm:$0xff] %vm4704_vm2, %v28593_v49  ;;  %4740 = vst.msk [vmem:[#allocation2 + $0x118] sm:$0xff] %vm4704_vm2, %v28593_v49 }
 0x325   : > { %21090 = vmatmul.mubr.msk.f32.gmra.mrb[30].mxu0 %vm685_vm1, %v25943_v59  ;;  %v3570_v59 = vld [vmem:[%s25430_s7 + $0xcd] sm:$0xff]  ;;  %4741 = vst.msk [vmem:[#allocation2 + $0x120] sm:$0xff] %vm4704_vm2, %v28593_v49  ;;  %4742 = vst.msk [vmem:[#allocation2 + $0x128] sm:$0xff] %vm4704_vm2, %v28593_v49 }
 0x326   : > { %21092 = vmatprep.mubr.msk.f32.mxu0 %vm685_vm1, %v25946_v60  ;;  %v3571_v60 = vld [vmem:[%s25430_s7 + $0xd5] sm:$0xff]  ;;  %4743 = vst.msk [vmem:[#allocation2 + $0x130] sm:$0xff] %vm4704_vm2, %v28593_v49  ;;  %4744 = vst.msk [vmem:[#allocation2 + $0x138] sm:$0xff] %vm4704_vm2, %v28593_v49 }
 0x329   : > { %21093 = vmatmul.mubr.msk.f32.gmra.mrb[32].mxu0 %vm685_vm1, %v25953_v61  ;;  %v3572_v61 = vld [vmem:[%s25430_s7 + $0xdd] sm:$0xff] }
 0x32a   : > { %21095 = vmatprep.mubr.msk.f32.mxu0 %vm685_vm1, %v3153_v15  ;;  %v3984_v15 = vld [vmem:[%s25430_s7 + $0x4e] sm:$0xff] }
 0x32d   : > { %21096 = vmatmul.mubr.msk.f32.gmra.mrb[34].mxu0 %vm685_vm1, %v3154_v18  ;;  %v3987_v18 = vld [vmem:[%s25430_s7 + $0x66] sm:$0xff] }
 0x32e   : > { %21100 = vmatprep.mubr.msk.f32.mxu0 %vm685_vm1, %v3549_v19  ;;  %v3988_v19 = vld [vmem:[%s25430_s7 + $0x6e] sm:$0xff] }
 0x331   : > { %21101 = vmatmul.mubr.msk.f32.vlgmr.msra.gmra.mrb[0].mxu0 %vm685_vm1, %v3550_v22  ;;  %v3991_v22 = vld [vmem:[%s25430_s7 + $0x86] sm:$0xff] }
 0x332   : > { %21103 = vmatprep.mubr.msk.f32.mxu0 %vm685_vm1, %v3551_v23  ;;  %21155 = vmatpush3.msk.msra.mxu0 %vm794_vm0, %v25959_v62  ;;  %v3573_v62 = vld [vmem:[%s25430_s7 + $0xe5] sm:$0xff]  ;;  %v3992_v23 = vld [vmem:[%s25430_s7 + $0x8e] sm:$0xff] }
 0x335   : > { %21104 = vmatmul.mubr.msk.f32.gmra.mrb[2].mxu0 %vm685_vm1, %v3552_v26  ;;  %v3995_v26 = vld [vmem:[%s25430_s7 + $0xa6] sm:$0xff] }
 0x336   : > { %21106 = vmatprep.mubr.msk.f32.mxu0 %vm685_vm1, %v3553_v27  ;;  %v3996_v27 = vld [vmem:[%s25430_s7 + $0xae] sm:$0xff] }
 0x339   : > { %21107 = vmatmul.mubr.msk.f32.gmra.mrb[4].mxu0 %vm685_vm1, %v3554_v30  ;;  %v3999_v30 = vld [vmem:[%s25430_s7 + $0xc6] sm:$0xff] }
 0x33a   : > { %21109 = vmatprep.mubr.msk.f32.mxu0 %vm685_vm1, %v3555_v31  ;;  %v4000_v31 = vld [vmem:[%s25430_s7 + $0xce] sm:$0xff] }
 0x33d   : > { %21110 = vmatmul.mubr.msk.f32.gmra.mrb[6].mxu0 %vm685_vm1, %v3556_v34  ;;  %v4003_v34 = vld [vmem:[%s25430_s7 + $0xe6] sm:$0xff] }
 0x33e   : > { %21112 = vmatprep.mubr.msk.f32.mxu0 %vm685_vm1, %v3557_v35  ;;  %v4004_v35 = vld [vmem:[%s25430_s7 + $0xee] sm:$0xff] }
 0x341   : > { %21113 = vmatmul.mubr.msk.f32.gmra.mrb[8].mxu0 %vm685_vm1, %v3558_v38  ;;  %v4007_v38 = vld [vmem:[%s25430_s7 + $0x106] sm:$0xff] }
 0x342   : > { %21115 = vmatprep.mubr.msk.f32.mxu0 %vm685_vm1, %v3559_v39  ;;  %v4008_v39 = vld [vmem:[%s25430_s7 + $0x10e] sm:$0xff] }
 0x345   : > { %21116 = vmatmul.mubr.msk.f32.gmra.mrb[10].mxu0 %vm685_vm1, %v3560_v42  ;;  %v4011_v42 = vld [vmem:[%s25430_s7 + $0x126] sm:$0xff] }
 0x346   : > { %21118 = vmatprep.mubr.msk.f32.mxu0 %vm685_vm1, %v3561_v43  ;;  %v4012_v43 = vld [vmem:[%s25430_s7 + $0x12e] sm:$0xff] }
 0x349   : > { %21119 = vmatmul.mubr.msk.f32.gmra.mrb[12].mxu0 %vm685_vm1, %v3562_v46  ;;  %v4860_v46 = vld [vmem:[#allocation10 + $0x20] sm:$0xff] }
 0x34a   : > { %21121 = vmatprep.mubr.msk.f32.mxu0 %vm685_vm1, %v3563_v47  ;;  %v4861_v47 = vld [vmem:[#allocation10 + $0x28] sm:$0xff] }
 0x34b   : > { %v22421_v48 = vpack.c.bf16 %v4861_v47, %v4860_v46  ;;  %v6470_v46 = vld [vmem:[#allocation10 + $0x98] sm:$0xff] }
 0x34d   : > { %21122 = vmatmul.mubr.msk.f32.gmra.mrb[14].mxu0 %vm685_vm1, %v3564_v50  ;;  %22422 = vmatprep.subr.bf16.mxu0 %v22421_v48  ;;  %v4862_v50 = vld [vmem:[#allocation10 + $0x30] sm:$0xff] }
 0x34e   : > { %21124 = vmatprep.mubr.msk.f32.mxu0 %vm685_vm1, %v3565_v51  ;;  %v4863_v51 = vld [vmem:[#allocation10 + $0x38] sm:$0xff] }
 0x34f   : > { %v22425_v53 = vpack.c.bf16 %v4863_v51, %v4862_v50 }
 0x351   : > { %21125 = vmatmul.mubr.msk.f32.gmra.mrb[16].mxu0 %vm685_vm1, %v3566_v54  ;;  %v6038_v54 = vld [vmem:[#allocation10 + $0x68] sm:$0xff] }
 0x352   : > { %21127 = vmatprep.mubr.msk.f32.mxu0 %vm685_vm1, %v3567_v55  ;;  %v22445_v55 = vpack.c.bf16 %v6038_v54, %v6037_v52 }
 0x354   : > { %22446 = vmatprep.subr.bf16.mxu1 %v22445_v55 }
 0x355   : > { %21128 = vmatmul.mubr.msk.f32.gmra.mrb[18].mxu0 %vm685_vm1, %v3568_v57  ;;  %v6040_v57 = vld [vmem:[#allocation10 + $0x78] sm:$0xff]  ;;  %22448 = vmatpush3.bf16.msra.mxu1 %v22445_v55 }
 0x356   : > { %21130 = vmatprep.mubr.msk.f32.mxu0 %vm685_vm1, %v3569_v58  ;;  %v4823_v58 = vld [vmem:[#allocation2 + $0x1] sm:$0xff] }
 0x359   : > { %21131 = vmatmul.mubr.msk.f32.gmra.mrb[20].mxu0 %vm685_vm1, %v3570_v59  ;;  %v22449_v59 = vpack.c.bf16 %v6040_v57, %v6039_v56 }
 0x35a   : > { %21133 = vmatprep.mubr.msk.f32.mxu0 %vm685_vm1, %v3571_v60  ;;  %v4824_v60 = vld [vmem:[#allocation2 + $0x9] sm:$0xff] }
 0x35b   : > { %22450 = vmatprep.subr.bf16.mxu1 %v22449_v59 }
 0x35c   : > { %22452 = vmatpush3.bf16.msra.mxu1 %v22449_v59 }
 0x35d   : > { %21134 = vmatmul.mubr.msk.f32.gmra.mrb[22].mxu0 %vm685_vm1, %v3572_v61  ;;  %v6467_v61 = vld [vmem:[#allocation10 + $0x80] sm:$0xff] }
 0x35e   : > { %21136 = vmatprep.mubr.msk.f32.mxu0 %vm685_vm1, %v3573_v62  ;;  %v6468_v62 = vld [vmem:[#allocation10 + $0x88] sm:$0xff] }
 0x361   : > { %21137 = vmatmul.mubr.msk.f32.gmra.mrb[24].mxu0 %vm685_vm1, %v3574_v63  ;;  %v26356_v63 = vpack.c.bf16 %v6468_v62, %v6467_v61  ;;  %v6897_v62 = vld [vmem:[#allocation10 + $0xa0] sm:$0xff] }
 0x362   : > { %21139 = vmatprep.mubr.msk.f32.mxu0 %vm685_vm1, %v3575_v0  ;;  %v4819_v0 = vld [vmem:[#allocation10] sm:$0xff] }
 0x363   : > { %22454 = vmatprep.subr.bf16.mxu1 %v26356_v63 }
 0x365   : > { %21140 = vmatmul.mubr.msk.f32.gmra.mrb[26].mxu0 %vm685_vm1, %v3576_v1  ;;  %v4820_v1 = vld [vmem:[#allocation10 + $0x8] sm:$0xff] }
 0x366   : > { %21142 = vmatprep.mubr.msk.f32.mxu0 %vm685_vm1, %v3577_v2  ;;  %v22429_v2 = vpack.c.bf16 %v4820_v1, %v4819_v0  ;;  %v6898_v0 = vld [vmem:[#allocation10 + $0xa8] sm:$0xff] }
 0x369   : > { %21143 = vmatmul.mubr.msk.f32.gmra.mrb[28].mxu0 %vm685_vm1, %v3578_v3  ;;  %v4821_v3 = vld [vmem:[#allocation10 + $0x10] sm:$0xff] }
 0x36a   : > { %21145 = vmatprep.mubr.msk.f32.mxu0 %vm685_vm1, %v3579_v4  ;;  %v4822_v4 = vld [vmem:[#allocation10 + $0x18] sm:$0xff] }
 0x36d   : > { %21146 = vmatmul.mubr.msk.f32.gmra.mrb[30].mxu0 %vm685_vm1, %v3580_v5  ;;  %v22433_v5 = vpack.c.bf16 %v4822_v4, %v4821_v3 }
 0x36e   : > { %21148 = vmatprep.mubr.msk.f32.mxu0 %vm685_vm1, %v3581_v6  ;;  %v26359_v6 = vpop.permute.xlu1 %4500 }
 0x371   : > { %21149 = vmatmul.mubr.msk.f32.gmra.mrb[32].mxu0 %vm685_vm1, %v3582_v7  ;;  %v26361_v7 = vpop.permute.xlu0 %4490 }
 0x372   : > { %21151 = vmatprep.mubr.msk.f32.mxu0 %vm685_vm1, %v3583_v8  ;;  %v26363_v8 = vpop.permute.xlu1 %4505 }
 0x375   : > { %21152 = vmatmul.mubr.msk.f32.gmra.mrb[34].mxu0 %vm685_vm1, %v3584_v9  ;;  %v26365_v9 = vpop.permute.xlu0 %4495 }
 0x376   : > { %21156 = vmatprep.mubr.msk.f32.mxu0 %vm685_vm1, %v3979_v10  ;;  %v26367_v10 = vpop.permute.xlu1 %4515 }
 0x379   : > { %21157 = vmatmul.mubr.msk.f32.vlgmr.msra.gmra.mrb[0].mxu0 %vm685_vm1, %v3980_v11  ;;  %v26369_v11 = vpop.permute.xlu0 %4510 }
 0x37a   : > { %21159 = vmatprep.mubr.msk.f32.mxu0 %vm685_vm1, %v3981_v12  ;;  %22424 = vmatpush3.bf16.msra.mxu0 %v22421_v48  ;;  %v26371_v12 = vpop.permute.xlu1 %4525 }
 0x37b   : > { %22426 = vmatprep.subr.bf16.mxu0 %v22425_v53 }
 0x37d   : > { %21160 = vmatmul.mubr.msk.f32.gmra.mrb[2].mxu0 %vm685_vm1, %v3982_v13  ;;  %v26373_v13 = vpop.permute.xlu0 %4520 }
 0x37e   : > { %21162 = vmatprep.mubr.msk.f32.mxu0 %vm685_vm1, %v3983_v14  ;;  %22428 = vmatpush3.bf16.msra.mxu0 %v22425_v53  ;;  %v26375_v14 = vpop.permute.xlu1 %4535 }
 0x37f   : > { %22430 = vmatprep.subr.bf16.mxu0 %v22429_v2 }
 0x381   : > { %21163 = vmatmul.mubr.msk.f32.gmra.mrb[4].mxu0 %vm685_vm1, %v3984_v15  ;;  %v26377_v15 = vpop.permute.xlu0 %4530 }
 0x382   : > { %21165 = vmatprep.mubr.msk.f32.mxu0 %vm685_vm1, %v3985_v16  ;;  %v26379_v16 = vld [vmem:[#allocation8] ss:$0 sm:$0xff] }
 0x385   : > { %21166 = vmatmul.mubr.msk.f32.gmra.mrb[6].mxu0 %vm685_vm1, %v3986_v17  ;;  %v26381_v17 = vpop.permute.xlu1 %4545 }
 0x386   : > { %21168 = vmatprep.mubr.msk.f32.mxu0 %vm685_vm1, %v3987_v18 }
 0x389   : > { %21169 = vmatmul.mubr.msk.f32.gmra.mrb[8].mxu0 %vm685_vm1, %v3988_v19  ;;  %v26383_v19 = vpop.permute.xlu0 %4540 }
 0x38a   : > { %21171 = vmatprep.mubr.msk.f32.mxu0 %vm685_vm1, %v3989_v20 }
 0x38d   : > { %21172 = vmatmul.mubr.msk.f32.gmra.mrb[10].mxu0 %vm685_vm1, %v3990_v21 }
 0x38e   : > { %21174 = vmatprep.mubr.msk.f32.mxu0 %vm685_vm1, %v3991_v22 }
 0x391   : > { %21175 = vmatmul.mubr.msk.f32.gmra.mrb[12].mxu0 %vm685_vm1, %v3992_v23 }
 0x392   : > { %21177 = vmatprep.mubr.msk.f32.mxu0 %vm685_vm1, %v3993_v24 }
 0x395   : > { %21178 = vmatmul.mubr.msk.f32.gmra.mrb[14].mxu0 %vm685_vm1, %v3994_v25 }
 0x396   : > { %21180 = vmatprep.mubr.msk.f32.mxu0 %vm685_vm1, %v3995_v26 }
 0x399   : > { %21181 = vmatmul.mubr.msk.f32.gmra.mrb[16].mxu0 %vm685_vm1, %v3996_v27 }
 0x39a   : > { %21183 = vmatprep.mubr.msk.f32.mxu0 %vm685_vm1, %v3997_v28 }
 0x39d   : > { %21184 = vmatmul.mubr.msk.f32.gmra.mrb[18].mxu0 %vm685_vm1, %v3998_v29  ;;  %v26389_v29 = vpop.permute.xlu1 %4555 }
 0x39e   : > { %21186 = vmatprep.mubr.msk.f32.mxu0 %vm685_vm1, %v3999_v30 }
 0x3a1   : > { %21187 = vmatmul.mubr.msk.f32.gmra.mrb[20].mxu0 %vm685_vm1, %v4000_v31 }
 0x3a2   : > { %21189 = vmatprep.mubr.msk.f32.mxu0 %vm685_vm1, %v4001_v32  ;;  %v26393_v32 = vpop.permute.xlu0 %4550 }
 0x3a5   : > { %21190 = vmatmul.mubr.msk.f32.gmra.mrb[22].mxu0 %vm685_vm1, %v4002_v33 }
 0x3a6   : > { %21192 = vmatprep.mubr.msk.f32.mxu0 %vm685_vm1, %v4003_v34  ;;  %v26405_v47 = vpop.permute.xlu0 %4560 }
 0x3a7   : > { %28673 = vst [vmem:[#allocation36_spill] sm:$0xff] %v26405_v47 }
 0x3a9   : > { %21193 = vmatmul.mubr.msk.f32.gmra.mrb[24].mxu0 %vm685_vm1, %v4004_v35 }
 0x3aa   : > { %21195 = vmatprep.mubr.msk.f32.mxu0 %vm685_vm1, %v4005_v36 }
 0x3ad   : > { %21196 = vmatmul.mubr.msk.f32.gmra.mrb[26].mxu0 %vm685_vm1, %v4006_v37 }
 0x3ae   : > { %21198 = vmatprep.mubr.msk.f32.mxu0 %vm685_vm1, %v4007_v38 }
 0x3b1   : > { %21199 = vmatmul.mubr.msk.f32.gmra.mrb[28].mxu0 %vm685_vm1, %v4008_v39 }
 0x3b2   : > { %21201 = vmatprep.mubr.msk.f32.mxu0 %vm685_vm1, %v4009_v40 }
 0x3b5   : > { %21202 = vmatmul.mubr.msk.f32.gmra.mrb[30].mxu0 %vm685_vm1, %v4010_v41 }
 0x3b6   : > { %21204 = vmatprep.mubr.msk.f32.mxu0 %vm685_vm1, %v4011_v42  ;;  %v26402_v42 = vpop.permute.xlu1 %4565 }
 0x3b9   : > { %21205 = vmatmul.mubr.msk.f32.gmra.mrb[32].mxu0 %vm685_vm1, %v4012_v43 }
 0x3ba   : > { %21207 = vmatprep.mubr.msk.f32.mxu0 %vm685_vm1, %v4013_v44  ;;  %v26425_v4 = vpop.permute.xlu1 %4575 }
 0x3bb   : > { %28674 = vst [vmem:[#allocation37_spill] sm:$0xff] %v26425_v4 }
 0x3bd   : > { %21208 = vmatmul.mubr.msk.f32.gmra.mrb[34].mxu0 %vm685_vm1, %v4014_v45  ;;  %v6469_v45 = vld [vmem:[#allocation10 + $0x90] sm:$0xff] }
 0x3be   : > { %21218 = vmatprep.mubr.msk.f32.mxu0 %vm4704_vm2, %v4823_v58  ;;  %v22457_v58 = vpack.c.bf16 %v6470_v46, %v6469_v45 }
 0x3c1   : > { %21219 = vmatmul.mubr.msk.f32.vlgmr.msra.gmra.mrb[36].mxu0 %vm4704_vm2, %v4824_v60 }
 0x3c2   : > { %22432 = vmatpush3.bf16.msra.mxu0 %v22429_v2 }
 0x3c3   : > { %22434 = vmatprep.subr.bf16.mxu0 %v22433_v5 }
 0x3c6   : > { %22436 = vmatpush3.bf16.msra.mxu0 %v22433_v5 }
 0x44c   : > { %v21158_v18 = vpop.f32.mrb[0].mxu0 }
 0x44d   : > { %v4417_v20 = vadd.f32 %v21158_v18, %v26379_v16  ;;  %v4194_v21 = vpop.f32.mrb[1].mxu0 }
 0x44e   : > { %v4416_v22 = vadd.f32 %v26379_v16, %v4194_v21 }
 0x44f   : > { %v4453_v23 = vmax.f32 %v4417_v20, 0.0  ;;  %v26430_v20 = vpop.permute.xlu0 %4570 }
 0x450   : > { %v4452_v24 = vmax.f32 %v4416_v22, 0.0  ;;  %v21161_v25 = vpop.f32.mrb[2].mxu0  ;;  %28675 = vst [vmem:[#allocation38_spill] sm:$0xff] %v26430_v20 }
 0x451   : > { %v4669_v26 = vmul.f32 %v26365_v9, %v4453_v23  ;;  %v4419_v27 = vadd.f32 %v21161_v25, %v26379_v16  ;;  %v4204_v28 = vpop.f32.mrb[3].mxu0  ;;  %v26435_v25 = vpack.c.bf16 %v6898_v0, %v6897_v62 }
 0x452   : > { %v4668_v30 = vmul.f32 %v26361_v7, %v4452_v24  ;;  %v4418_v31 = vadd.f32 %v26379_v16, %v4204_v28 }
 0x453   : > { %4748 = vst.msk [vmem:[#allocation2 + $0x1b] sm:$0xff] %vm4704_vm2, %v4669_v26  ;;  %v4455_v33 = vmax.f32 %v4419_v27, 0.0 }
 0x454   : > { %4747 = vst.msk [vmem:[#allocation2 + $0x13] sm:$0xff] %vm4704_vm2, %v4668_v30  ;;  %v4454_v34 = vmax.f32 %v4418_v31, 0.0  ;;  %v21164_v35 = vpop.f32.mrb[4].mxu0 }
 0x455   : > { %v4671_v36 = vmul.f32 %v26363_v8, %v4455_v33  ;;  %v4421_v37 = vadd.f32 %v21164_v35, %v26379_v16  ;;  %v4214_v38 = vpop.f32.mrb[5].mxu0  ;;  %v5607_v33 = vld [vmem:[#allocation10 + $0x40] sm:$0xff] }
 0x456   : > { %v4670_v39 = vmul.f32 %v26359_v6, %v4454_v34  ;;  %v4420_v40 = vadd.f32 %v26379_v16, %v4214_v38  ;;  %v5608_v34 = vld [vmem:[#allocation10 + $0x48] sm:$0xff] }
 0x457   : > { %4750 = vst.msk [vmem:[#allocation2 + $0x2b] sm:$0xff] %vm4704_vm2, %v4671_v36  ;;  %v4457_v41 = vmax.f32 %v4421_v37, 0.0  ;;  %v26450_v37 = vpack.c.bf16 %v5608_v34, %v5607_v33 }
 0x458   : > { %4749 = vst.msk [vmem:[#allocation2 + $0x23] sm:$0xff] %vm4704_vm2, %v4670_v39  ;;  %v4456_v43 = vmax.f32 %v4420_v40, 0.0  ;;  %v21167_v44 = vpop.f32.mrb[6].mxu0 }
 0x459   : > { %v4673_v48 = vmul.f32 %v26367_v10, %v4457_v41  ;;  %v4423_v50 = vadd.f32 %v21167_v44, %v26379_v16  ;;  %v4224_v51 = vpop.f32.mrb[7].mxu0  ;;  %22438 = vmatprep.subr.bf16.mxu0 %v26450_v37 }
 0x45a   : > { %v4672_v52 = vmul.f32 %v26369_v11, %v4456_v43  ;;  %v4422_v53 = vadd.f32 %v26379_v16, %v4224_v51  ;;  %v26456_v43 = vpop.permute.xlu1 %4585 }
 0x45b   : > { %4752 = vst.msk [vmem:[#allocation2 + $0x3b] sm:$0xff] %vm4704_vm2, %v4673_v48  ;;  %v4459_v54 = vmax.f32 %v4423_v50, 0.0  ;;  %v4825_v55 = vld [vmem:[#allocation2 + $0x11] sm:$0xff]  ;;  %v4826_v57 = vld [vmem:[#allocation2 + $0x19] sm:$0xff]  ;;  %28676 = vst [vmem:[#allocation39_spill] sm:$0xff] %v26456_v43  ;;  %v26464_v48 = vpop.permute.xlu0 %4580 }
 0x45c   : > { %v26412_v56 = vld [vmem:[#allocation2 + $0x12] sm:$0xff]  ;;  %4751 = vst.msk [vmem:[#allocation2 + $0x33] sm:$0xff] %vm4704_vm2, %v4672_v52  ;;  %v4458_v59 = vmax.f32 %v4422_v53, 0.0  ;;  %v21170_v60 = vpop.f32.mrb[8].mxu0  ;;  %21221 = vmatprep.mubr.msk.f32.mxu0 %vm4704_vm2, %v4825_v55  ;;  %v26418_v61 = vld [vmem:[#allocation2 + $0x1a] sm:$0xff]  ;;  %28677 = vst [vmem:[#allocation40_spill] sm:$0xff] %v26464_v48 }
 0x45d   : > { %21404 = vmatprep.mubr.msk.f32.mxu1 %vm4704_vm2, %v26412_v56  ;;  %v4675_v1 = vmul.f32 %v26371_v12, %v4459_v54  ;;  %v4425_v2 = vadd.f32 %v21170_v60, %v26379_v16  ;;  %v4234_v3 = vpop.f32.mrb[9].mxu0  ;;  %21222 = vmatmul.mubr.msk.f32.gmra.mrb[38].mxu0 %vm4704_vm2, %v4826_v57 }
 0x45e   : > { %21405 = vmatmul.mubr.msk.f32.vlgmr.msra.gmra.mrb[0].mxu1 %vm4704_vm2, %v26418_v61  ;;  %v4674_v5 = vmul.f32 %v26373_v13, %v4458_v59  ;;  %v4424_v18 = vadd.f32 %v26379_v16, %v4234_v3 }
 0x45f   : > { %22456 = vmatpush3.bf16.msra.mxu1 %v26356_v63  ;;  %4754 = vst.msk [vmem:[#allocation2 + $0x4b] sm:$0xff] %vm4704_vm2, %v4675_v1  ;;  %v4461_v21 = vmax.f32 %v4425_v2, 0.0  ;;  %v4827_v22 = vld [vmem:[#allocation2 + $0x21] sm:$0xff]  ;;  %v4828_v24 = vld [vmem:[#allocation2 + $0x29] sm:$0xff] }
 0x460   : > { %v26433_v23 = vld [vmem:[#allocation2 + $0x22] sm:$0xff]  ;;  %22458 = vmatprep.subr.bf16.mxu1 %v22457_v58  ;;  %4753 = vst.msk [vmem:[#allocation2 + $0x43] sm:$0xff] %vm4704_vm2, %v4674_v5  ;;  %v4460_v26 = vmax.f32 %v4424_v18, 0.0  ;;  %v21173_v27 = vpop.f32.mrb[10].mxu0  ;;  %21224 = vmatprep.mubr.msk.f32.mxu0 %vm4704_vm2, %v4827_v22  ;;  %v26441_v63 = vld [vmem:[#allocation2 + $0x2a] sm:$0xff]  ;;  %v26488_v5 = vpop.permute.xlu1 %4595 }
 0x461   : > { %21407 = vmatprep.mubr.msk.f32.mxu1 %vm4704_vm2, %v26433_v23  ;;  %v4677_v28 = vmul.f32 %v26375_v14, %v4461_v21  ;;  %v4427_v30 = vadd.f32 %v21173_v27, %v26379_v16  ;;  %v4244_v31 = vpop.f32.mrb[11].mxu0  ;;  %21225 = vmatmul.mubr.msk.f32.gmra.mrb[40].mxu0 %vm4704_vm2, %v4828_v24  ;;  %28678 = vst [vmem:[#allocation41_spill] sm:$0xff] %v26488_v5  ;;  %v26492_v22 = vpop.permute.xlu0 %4590 }
 0x462   : > { %21408 = vmatmul.mubr.msk.f32.gmra.mrb[2].mxu1 %vm4704_vm2, %v26441_v63  ;;  %v4676_v35 = vmul.f32 %v26377_v15, %v4460_v26  ;;  %v4426_v36 = vadd.f32 %v26379_v16, %v4244_v31  ;;  %28679 = vst [vmem:[#allocation42_spill] sm:$0xff] %v26492_v22 }
 0x463   : > { %22460 = vmatpush3.bf16.msra.mxu1 %v22457_v58  ;;  %4756 = vst.msk [vmem:[#allocation2 + $0x5b] sm:$0xff] %vm4704_vm2, %v4677_v28  ;;  %v4463_v38 = vmax.f32 %v4427_v30, 0.0  ;;  %v4829_v39 = vld [vmem:[#allocation2 + $0x31] sm:$0xff]  ;;  %v4830_v41 = vld [vmem:[#allocation2 + $0x39] sm:$0xff] }
 0x464   : > { %v26453_v40 = vld [vmem:[#allocation2 + $0x32] sm:$0xff]  ;;  %22462 = vmatprep.subr.bf16.mxu1 %v26435_v25  ;;  %4755 = vst.msk [vmem:[#allocation2 + $0x53] sm:$0xff] %vm4704_vm2, %v4676_v35  ;;  %v4462_v44 = vmax.f32 %v4426_v36, 0.0  ;;  %v21176_v45 = vpop.f32.mrb[12].mxu0  ;;  %21227 = vmatprep.mubr.msk.f32.mxu0 %vm4704_vm2, %v4829_v39  ;;  %v26462_v46 = vld [vmem:[#allocation2 + $0x3a] sm:$0xff] }
 0x465   : > { %21410 = vmatprep.mubr.msk.f32.mxu1 %vm4704_vm2, %v26453_v40  ;;  %v4679_v50 = vmul.f32 %v26381_v17, %v4463_v38  ;;  %v4429_v51 = vadd.f32 %v21176_v45, %v26379_v16  ;;  %v4254_v52 = vpop.f32.mrb[13].mxu0  ;;  %21228 = vmatmul.mubr.msk.f32.gmra.mrb[42].mxu0 %vm4704_vm2, %v4830_v41 }
 0x466   : > { %21411 = vmatmul.mubr.msk.f32.gmra.mrb[4].mxu1 %vm4704_vm2, %v26462_v46  ;;  %v4678_v53 = vmul.f32 %v26383_v19, %v4462_v44  ;;  %v4428_v54 = vadd.f32 %v26379_v16, %v4254_v52 }
 0x467   : > { %4758 = vst.msk [vmem:[#allocation2 + $0x6b] sm:$0xff] %vm4704_vm2, %v4679_v50  ;;  %v4465_v55 = vmax.f32 %v4429_v51, 0.0  ;;  %v4831_v57 = vld [vmem:[#allocation2 + $0x41] sm:$0xff]  ;;  %v4832_v59 = vld [vmem:[#allocation2 + $0x49] sm:$0xff]  ;;  %v26513_v51 = vpop.permute.xlu1 %4605 }
 0x468   : > { %v26475_v58 = vld [vmem:[#allocation2 + $0x42] sm:$0xff]  ;;  %4757 = vst.msk [vmem:[#allocation2 + $0x63] sm:$0xff] %vm4704_vm2, %v4678_v53  ;;  %v4464_v60 = vmax.f32 %v4428_v54, 0.0  ;;  %v21179_v62 = vpop.f32.mrb[14].mxu0  ;;  %21230 = vmatprep.mubr.msk.f32.mxu0 %vm4704_vm2, %v4831_v57  ;;  %v26481_v0 = vld [vmem:[#allocation2 + $0x4a] sm:$0xff]  ;;  %28680 = vst [vmem:[#allocation43_spill] sm:$0xff] %v26513_v51 }
 0x469   : > { %21413 = vmatprep.mubr.msk.f32.mxu1 %vm4704_vm2, %v26475_v58  ;;  %v4681_v1 = vmul.f32 %v26389_v29, %v4465_v55  ;;  %v4431_v2 = vadd.f32 %v21179_v62, %v26379_v16  ;;  %v4264_v3 = vpop.f32.mrb[15].mxu0  ;;  %21231 = vmatmul.mubr.msk.f32.gmra.mrb[44].mxu0 %vm4704_vm2, %v4832_v59  ;;  %v26521_v55 = vpop.permute.xlu0 %4600 }
 0x46a   : > { %21414 = vmatmul.mubr.msk.f32.gmra.mrb[6].mxu1 %vm4704_vm2, %v26481_v0  ;;  %v4680_v18 = vmul.f32 %v26393_v32, %v4464_v60  ;;  %v4430_v21 = vadd.f32 %v26379_v16, %v4264_v3  ;;  %28681 = vst [vmem:[#allocation44_spill] sm:$0xff] %v26521_v55 }
 0x46b   : > { %4760 = vst.msk [vmem:[#allocation2 + $0x7b] sm:$0xff] %vm4704_vm2, %v4681_v1  ;;  %v4467_v24 = vmax.f32 %v4431_v2, 0.0  ;;  %v4833_v26 = vld [vmem:[#allocation2 + $0x51] sm:$0xff]  ;;  %v4834_v28 = vld [vmem:[#allocation2 + $0x59] sm:$0xff] }
 0x46c   : > { %v26495_v27 = vld [vmem:[#allocation2 + $0x52] sm:$0xff]  ;;  %4759 = vst.msk [vmem:[#allocation2 + $0x73] sm:$0xff] %vm4704_vm2, %v4680_v18  ;;  %v4466_v30 = vmax.f32 %v4430_v21, 0.0  ;;  %v21182_v31 = vpop.f32.mrb[16].mxu0  ;;  %21233 = vmatprep.mubr.msk.f32.mxu0 %vm4704_vm2, %v4833_v26  ;;  %v26501_v33 = vld [vmem:[#allocation2 + $0x5a] sm:$0xff] }
 0x46d   : > { %21416 = vmatprep.mubr.msk.f32.mxu1 %vm4704_vm2, %v26495_v27  ;;  %v4683_v34 = vmul.f32 %v26402_v42, %v4467_v24  ;;  %v4433_v35 = vadd.f32 %v21182_v31, %v26379_v16  ;;  %v4274_v36 = vpop.f32.mrb[17].mxu0  ;;  %21234 = vmatmul.mubr.msk.f32.gmra.mrb[46].mxu0 %vm4704_vm2, %v4834_v28 }
 0x46e   : > { %21417 = vmatmul.mubr.msk.f32.gmra.mrb[8].mxu1 %vm4704_vm2, %v26501_v33  ;;  %v4682_v38 = vmul.f32 %v26405_v47, %v4466_v30  ;;  %v4432_v39 = vadd.f32 %v26379_v16, %v4274_v36  ;;  %v4787_v47 = vld [vmem:[#allocation2 + $0x20] sm:$0xff] }
 0x46f   : > { %4762 = vst.msk [vmem:[#allocation2 + $0x8b] sm:$0xff] %vm4704_vm2, %v4683_v34  ;;  %v4469_v41 = vmax.f32 %v4433_v35, 0.0  ;;  %v4835_v44 = vld [vmem:[#allocation2 + $0x61] sm:$0xff]  ;;  %v4836_v50 = vld [vmem:[#allocation2 + $0x69] sm:$0xff]  ;;  %v26544_v35 = vpop.permute.xlu1 %4615 }
 0x470   : > { %v26511_v45 = vld [vmem:[#allocation2 + $0x62] sm:$0xff]  ;;  %4761 = vst.msk [vmem:[#allocation2 + $0x83] sm:$0xff] %vm4704_vm2, %v4682_v38  ;;  %v4468_v52 = vmax.f32 %v4432_v39, 0.0  ;;  %v21185_v53 = vpop.f32.mrb[18].mxu0  ;;  %21236 = vmatprep.mubr.msk.f32.mxu0 %vm4704_vm2, %v4835_v44  ;;  %v26519_v54 = vld [vmem:[#allocation2 + $0x6a] sm:$0xff]  ;;  %28682 = vst [vmem:[#allocation45_spill] sm:$0xff] %v26544_v35  ;;  %v26548_v39 = vpop.permute.xlu0 %4610 }
 0x471   : > { %21419 = vmatprep.mubr.msk.f32.mxu1 %vm4704_vm2, %v26511_v45  ;;  %v4685_v57 = vmul.f32 %v26425_v4, %v4469_v41  ;;  %v4435_v59 = vadd.f32 %v21185_v53, %v26379_v16  ;;  %v4284_v60 = vpop.f32.mrb[19].mxu0  ;;  %21237 = vmatmul.mubr.msk.f32.gmra.mrb[48].mxu0 %vm4704_vm2, %v4836_v50  ;;  %28683 = vst [vmem:[#allocation46_spill] sm:$0xff] %v26548_v39  ;;  %v6431_v4 = vld [vmem:[#allocation2 + $0x1b] sm:$0xff] }
 0x472   : > { %21420 = vmatmul.mubr.msk.f32.gmra.mrb[10].mxu1 %vm4704_vm2, %v26519_v54  ;;  %v4684_v62 = vmul.f32 %v26430_v20, %v4468_v52  ;;  %v4434_v1 = vadd.f32 %v26379_v16, %v4284_v60  ;;  %v6900_v20 = vld [vmem:[#allocation10 + $0xb8] sm:$0xff] }
 0x473   : > { %4764 = vst.msk [vmem:[#allocation2 + $0x9b] sm:$0xff] %vm4704_vm2, %v4685_v57  ;;  %v4471_v2 = vmax.f32 %v4435_v59, 0.0  ;;  %v4837_v3 = vld [vmem:[#allocation2 + $0x71] sm:$0xff]  ;;  %v4838_v21 = vld [vmem:[#allocation2 + $0x79] sm:$0xff] }
 0x474   : > { %v26531_v18 = vld [vmem:[#allocation2 + $0x72] sm:$0xff]  ;;  %4763 = vst.msk [vmem:[#allocation2 + $0x93] sm:$0xff] %vm4704_vm2, %v4684_v62  ;;  %v4470_v24 = vmax.f32 %v4434_v1, 0.0  ;;  %v21188_v26 = vpop.f32.mrb[20].mxu0  ;;  %21239 = vmatprep.mubr.msk.f32.mxu0 %vm4704_vm2, %v4837_v3  ;;  %v26537_v28 = vld [vmem:[#allocation2 + $0x7a] sm:$0xff] }
 0x475   : > { %21422 = vmatprep.mubr.msk.f32.mxu1 %vm4704_vm2, %v26531_v18  ;;  %v4687_v30 = vmul.f32 %v26456_v43, %v4471_v2  ;;  %v4437_v31 = vadd.f32 %v21188_v26, %v26379_v16  ;;  %v4294_v34 = vpop.f32.mrb[21].mxu0  ;;  %21240 = vmatmul.mubr.msk.f32.gmra.mrb[50].mxu0 %vm4704_vm2, %v4838_v21 }
 0x476   : > { %21423 = vmatmul.mubr.msk.f32.gmra.mrb[12].mxu1 %vm4704_vm2, %v26537_v28  ;;  %v4686_v36 = vmul.f32 %v26464_v48, %v4470_v24  ;;  %v4436_v38 = vadd.f32 %v26379_v16, %v4294_v34 }
 0x477   : > { %4766 = vst.msk [vmem:[#allocation2 + $0xab] sm:$0xff] %vm4704_vm2, %v4687_v30  ;;  %v4473_v41 = vmax.f32 %v4437_v31, 0.0  ;;  %v4839_v44 = vld [vmem:[#allocation2 + $0x81] sm:$0xff]  ;;  %v4840_v52 = vld [vmem:[#allocation2 + $0x89] sm:$0xff]  ;;  %v26569_v31 = vpop.permute.xlu1 %4625 }
 0x478   : > { %v26551_v50 = vld [vmem:[#allocation2 + $0x82] sm:$0xff]  ;;  %4765 = vst.msk [vmem:[#allocation2 + $0xa3] sm:$0xff] %vm4704_vm2, %v4686_v36  ;;  %v4472_v53 = vmax.f32 %v4436_v38, 0.0  ;;  %v21191_v57 = vpop.f32.mrb[22].mxu0  ;;  %21242 = vmatprep.mubr.msk.f32.mxu0 %vm4704_vm2, %v4839_v44  ;;  %v26557_v59 = vld [vmem:[#allocation2 + $0x8a] sm:$0xff]  ;;  %28684 = vst [vmem:[#allocation47_spill] sm:$0xff] %v26569_v31 }
 0x479   : > { %21425 = vmatprep.mubr.msk.f32.mxu1 %vm4704_vm2, %v26551_v50  ;;  %v4689_v60 = vmul.f32 %v26488_v5, %v4473_v41  ;;  %v4439_v62 = vadd.f32 %v21191_v57, %v26379_v16  ;;  %v4304_v1 = vpop.f32.mrb[23].mxu0  ;;  %21243 = vmatmul.mubr.msk.f32.gmra.mrb[52].mxu0 %vm4704_vm2, %v4840_v52  ;;  %v26577_v41 = vpop.permute.xlu0 %4620 }
 0x47a   : > { %21426 = vmatmul.mubr.msk.f32.gmra.mrb[14].mxu1 %vm4704_vm2, %v26557_v59  ;;  %v4688_v2 = vmul.f32 %v26492_v22, %v4472_v53  ;;  %v4438_v3 = vadd.f32 %v26379_v16, %v4304_v1  ;;  %28685 = vst [vmem:[#allocation48_spill] sm:$0xff] %v26577_v41 }
 0x47b   : > { %4768 = vst.msk [vmem:[#allocation2 + $0xbb] sm:$0xff] %vm4704_vm2, %v4689_v60  ;;  %v4475_v21 = vmax.f32 %v4439_v62, 0.0  ;;  %v4841_v24 = vld [vmem:[#allocation2 + $0x91] sm:$0xff]  ;;  %v4842_v30 = vld [vmem:[#allocation2 + $0x99] sm:$0xff] }
 0x47c   : > { %v26567_v26 = vld [vmem:[#allocation2 + $0x92] sm:$0xff]  ;;  %4767 = vst.msk [vmem:[#allocation2 + $0xb3] sm:$0xff] %vm4704_vm2, %v4688_v2  ;;  %v4474_v34 = vmax.f32 %v4438_v3, 0.0  ;;  %v21194_v36 = vpop.f32.mrb[24].mxu0  ;;  %21245 = vmatprep.mubr.msk.f32.mxu0 %vm4704_vm2, %v4841_v24  ;;  %v26575_v38 = vld [vmem:[#allocation2 + $0x9a] sm:$0xff] }
 0x47d   : > { %21428 = vmatprep.mubr.msk.f32.mxu1 %vm4704_vm2, %v26567_v26  ;;  %v4691_v44 = vmul.f32 %v26513_v51, %v4475_v21  ;;  %v4441_v52 = vadd.f32 %v21194_v36, %v26379_v16  ;;  %v4314_v53 = vpop.f32.mrb[25].mxu0  ;;  %21246 = vmatmul.mubr.msk.f32.gmra.mrb[54].mxu0 %vm4704_vm2, %v4842_v30 }
 0x47e   : > { %21429 = vmatmul.mubr.msk.f32.gmra.mrb[16].mxu1 %vm4704_vm2, %v26575_v38  ;;  %v4690_v57 = vmul.f32 %v26521_v55, %v4474_v34  ;;  %v4440_v60 = vadd.f32 %v26379_v16, %v4314_v53 }
 0x47f   : > { %4770 = vst.msk [vmem:[#allocation2 + $0xcb] sm:$0xff] %vm4704_vm2, %v4691_v44  ;;  %v4477_v62 = vmax.f32 %v4441_v52, 0.0  ;;  %v4843_v1 = vld [vmem:[#allocation2 + $0xa1] sm:$0xff]  ;;  %v4844_v3 = vld [vmem:[#allocation2 + $0xa9] sm:$0xff]  ;;  %v26600_v52 = vpop.permute.xlu1 %4635 }
 0x480   : > { %v26587_v2 = vld [vmem:[#allocation2 + $0xa2] sm:$0xff]  ;;  %4769 = vst.msk [vmem:[#allocation2 + $0xc3] sm:$0xff] %vm4704_vm2, %v4690_v57  ;;  %v4476_v21 = vmax.f32 %v4440_v60, 0.0  ;;  %v21197_v24 = vpop.f32.mrb[26].mxu0  ;;  %21248 = vmatprep.mubr.msk.f32.mxu0 %vm4704_vm2, %v4843_v1  ;;  %v26593_v30 = vld [vmem:[#allocation2 + $0xaa] sm:$0xff]  ;;  %28686 = vst [vmem:[#allocation49_spill] sm:$0xff] %v26600_v52  ;;  %v26604_v60 = vpop.permute.xlu0 %4630 }
 0x481   : > { %21431 = vmatprep.mubr.msk.f32.mxu1 %vm4704_vm2, %v26587_v2  ;;  %v4693_v34 = vmul.f32 %v26544_v35, %v4477_v62  ;;  %v4443_v36 = vadd.f32 %v21197_v24, %v26379_v16  ;;  %v4324_v44 = vpop.f32.mrb[27].mxu0  ;;  %21249 = vmatmul.mubr.msk.f32.gmra.mrb[56].mxu0 %vm4704_vm2, %v4844_v3  ;;  %28687 = vst [vmem:[#allocation50_spill] sm:$0xff] %v26604_v60 }
 0x482   : > { %21432 = vmatmul.mubr.msk.f32.gmra.mrb[18].mxu1 %vm4704_vm2, %v26593_v30  ;;  %v4692_v53 = vmul.f32 %v26548_v39, %v4476_v21  ;;  %v4442_v57 = vadd.f32 %v26379_v16, %v4324_v44 }
 0x483   : > { %4772 = vst.msk [vmem:[#allocation2 + $0xdb] sm:$0xff] %vm4704_vm2, %v4693_v34  ;;  %v4479_v1 = vmax.f32 %v4443_v36, 0.0  ;;  %v4845_v62 = vld [vmem:[#allocation2 + $0xb1] sm:$0xff]  ;;  %v4846_v24 = vld [vmem:[#allocation2 + $0xb9] sm:$0xff] }
 0x484   : > { %v26607_v49 = vld [vmem:[#allocation2 + $0xb2] sm:$0xff]  ;;  %4771 = vst.msk [vmem:[#allocation2 + $0xd3] sm:$0xff] %vm4704_vm2, %v4692_v53  ;;  %v4478_v3 = vmax.f32 %v4442_v57, 0.0  ;;  %v21200_v35 = vpop.f32.mrb[28].mxu0  ;;  %21251 = vmatprep.mubr.msk.f32.mxu0 %vm4704_vm2, %v4845_v62  ;;  %v26613_v21 = vld [vmem:[#allocation2 + $0xba] sm:$0xff] }
 0x485   : > { %21434 = vmatprep.mubr.msk.f32.mxu1 %vm4704_vm2, %v26607_v49  ;;  %v4695_v44 = vmul.f32 %v26569_v31, %v4479_v1  ;;  %v4445_v34 = vadd.f32 %v21200_v35, %v26379_v16  ;;  %v4334_v36 = vpop.f32.mrb[29].mxu0  ;;  %21252 = vmatmul.mubr.msk.f32.gmra.mrb[58].mxu0 %vm4704_vm2, %v4846_v24  ;;  %v26625_v1 = vpop.permute.xlu1 %4645 }
 0x486   : > { %21435 = vmatmul.mubr.msk.f32.gmra.mrb[20].mxu1 %vm4704_vm2, %v26613_v21  ;;  %v4694_v53 = vmul.f32 %v26577_v41, %v4478_v3  ;;  %v4444_v57 = vadd.f32 %v26379_v16, %v4334_v36  ;;  %28688 = vst [vmem:[#allocation51_spill] sm:$0xff] %v26625_v1  ;;  %v26633_v36 = vpop.permute.xlu0 %4640 }
 0x487   : > { %4774 = vst.msk [vmem:[#allocation2 + $0xeb] sm:$0xff] %vm4704_vm2, %v4695_v44  ;;  %v4481_v62 = vmax.f32 %v4445_v34, 0.0  ;;  %v4847_v39 = vld [vmem:[#allocation2 + $0xc1] sm:$0xff]  ;;  %v4848_v51 = vld [vmem:[#allocation2 + $0xc9] sm:$0xff]  ;;  %28689 = vst [vmem:[#allocation52_spill] sm:$0xff] %v26633_v36 }
 0x488   : > { %v26623_v55 = vld [vmem:[#allocation2 + $0xc2] sm:$0xff]  ;;  %4773 = vst.msk [vmem:[#allocation2 + $0xe3] sm:$0xff] %vm4704_vm2, %v4694_v53  ;;  %v4480_v35 = vmax.f32 %v4444_v57, 0.0  ;;  %v21203_v24 = vpop.f32.mrb[30].mxu0  ;;  %21254 = vmatprep.mubr.msk.f32.mxu0 %vm4704_vm2, %v4847_v39  ;;  %v26631_v3 = vld [vmem:[#allocation2 + $0xca] sm:$0xff] }
 0x489   : > { %21437 = vmatprep.mubr.msk.f32.mxu1 %vm4704_vm2, %v26623_v55  ;;  %v4697_v44 = vmul.f32 %v26600_v52, %v4481_v62  ;;  %v4447_v34 = vadd.f32 %v21203_v24, %v26379_v16  ;;  %v4344_v41 = vpop.f32.mrb[31].mxu0  ;;  %21255 = vmatmul.mubr.msk.f32.gmra.mrb[60].mxu0 %vm4704_vm2, %v4848_v51 }
 0x48a   : > { %21438 = vmatmul.mubr.msk.f32.gmra.mrb[22].mxu1 %vm4704_vm2, %v26631_v3  ;;  %v4696_v53 = vmul.f32 %v26604_v60, %v4480_v35  ;;  %v4446_v39 = vadd.f32 %v26379_v16, %v4344_v41 }
 0x48b   : > { %4776 = vst.msk [vmem:[#allocation2 + $0xfb] sm:$0xff] %vm4704_vm2, %v4697_v44  ;;  %v4483_v57 = vmax.f32 %v4447_v34, 0.0  ;;  %v4849_v31 = vld [vmem:[#allocation2 + $0xd1] sm:$0xff]  ;;  %v4850_v5 = vld [vmem:[#allocation2 + $0xd9] sm:$0xff]  ;;  %v26656_v34 = vpop.permute.xlu1 %4655 }
 0x48c   : > { %v26643_v22 = vld [vmem:[#allocation2 + $0xd2] sm:$0xff]  ;;  %4775 = vst.msk [vmem:[#allocation2 + $0xf3] sm:$0xff] %vm4704_vm2, %v4696_v53  ;;  %v4482_v62 = vmax.f32 %v4446_v39, 0.0  ;;  %v21206_v24 = vpop.f32.mrb[32].mxu0  ;;  %21257 = vmatprep.mubr.msk.f32.mxu0 %vm4704_vm2, %v4849_v31  ;;  %v26649_v51 = vld [vmem:[#allocation2 + $0xda] sm:$0xff]  ;;  %28690 = vst [vmem:[#allocation53_spill] sm:$0xff] %v26656_v34  ;;  %v26660_v39 = vpop.permute.xlu0 %4650 }
 0x48d   : > { %21440 = vmatprep.mubr.msk.f32.mxu1 %vm4704_vm2, %v26643_v22  ;;  %v4699_v41 = vmul.f32 %v26625_v1, %v4483_v57  ;;  %v4449_v35 = vadd.f32 %v21206_v24, %v26379_v16  ;;  %v4354_v44 = vpop.f32.mrb[33].mxu0  ;;  %21258 = vmatmul.mubr.msk.f32.gmra.mrb[62].mxu0 %vm4704_vm2, %v4850_v5  ;;  %28691 = vst [vmem:[#allocation54_spill] sm:$0xff] %v26660_v39 }
 0x48e   : > { %21441 = vmatmul.mubr.msk.f32.gmra.mrb[24].mxu1 %vm4704_vm2, %v26649_v51  ;;  %v4698_v53 = vmul.f32 %v26633_v36, %v4482_v62  ;;  %v4448_v31 = vadd.f32 %v26379_v16, %v4354_v44 }
 0x48f   : > { %4778 = vst.msk [vmem:[#allocation2 + $0x10b] sm:$0xff] %vm4704_vm2, %v4699_v41  ;;  %v4485_v60 = vmax.f32 %v4449_v35, 0.0  ;;  %v4851_v57 = vld [vmem:[#allocation2 + $0xe1] sm:$0xff]  ;;  %v4852_v24 = vld [vmem:[#allocation2 + $0xe9] sm:$0xff] }
 0x490   : > { %v26663_v1 = vld [vmem:[#allocation2 + $0xe2] sm:$0xff]  ;;  %4777 = vst.msk [vmem:[#allocation2 + $0x103] sm:$0xff] %vm4704_vm2, %v4698_v53  ;;  %v4484_v5 = vmax.f32 %v4448_v31, 0.0  ;;  %v21209_v52 = vpop.f32.mrb[34].mxu0  ;;  %21260 = vmatprep.mubr.msk.f32.mxu0 %vm4704_vm2, %v4851_v57  ;;  %v26669_v62 = vld [vmem:[#allocation2 + $0xea] sm:$0xff] }
 0x491   : > { %21443 = vmatprep.mubr.msk.f32.mxu1 %vm4704_vm2, %v26663_v1  ;;  %v4701_v44 = vmul.f32 %v26656_v34, %v4485_v60  ;;  %v4451_v41 = vadd.f32 %v21209_v52, %v26379_v16  ;;  %v4364_v35 = vpop.f32.mrb[35].mxu0  ;;  %21261 = vmatmul.mubr.msk.f32.gmra.mrb[64].mxu0 %vm4704_vm2, %v4852_v24  ;;  %v26681_v60 = vpop.permute.xlu1 %4665  ;;  %v6430_v34 = vld [vmem:[#allocation2 + $0x13] sm:$0xff] }
 0x492   : > { %21444 = vmatmul.mubr.msk.f32.gmra.mrb[26].mxu1 %vm4704_vm2, %v26669_v62  ;;  %v4700_v53 = vmul.f32 %v26660_v39, %v4484_v5  ;;  %v4450_v31 = vadd.f32 %v26379_v16, %v4364_v35  ;;  %28692 = vst [vmem:[#allocation55_spill] sm:$0xff] %v26681_v60  ;;  %v26689_v16 = vpop.permute.xlu0 %4660 }
 0x493   : > { %4780 = vst.msk [vmem:[#allocation2 + $0x11b] sm:$0xff] %vm4704_vm2, %v4701_v44  ;;  %v4487_v57 = vmax.f32 %v4451_v41, 0.0  ;;  %v4853_v36 = vld [vmem:[#allocation2 + $0xf1] sm:$0xff]  ;;  %v4854_v43 = vld [vmem:[#allocation2 + $0xf9] sm:$0xff]  ;;  %28693 = vst [vmem:[#allocation56_spill] sm:$0xff] %v26689_v16 }
 0x494   : > { %v26679_v48 = vld [vmem:[#allocation2 + $0xf2] sm:$0xff]  ;;  %4779 = vst.msk [vmem:[#allocation2 + $0x113] sm:$0xff] %vm4704_vm2, %v4700_v53  ;;  %v4486_v52 = vmax.f32 %v4450_v31, 0.0  ;;  %21263 = vmatprep.mubr.msk.f32.mxu0 %vm4704_vm2, %v4853_v36  ;;  %v26687_v24 = vld [vmem:[#allocation2 + $0xfa] sm:$0xff] }
 0x495   : > { %21446 = vmatprep.mubr.msk.f32.mxu1 %vm4704_vm2, %v26679_v48  ;;  %v4703_v5 = vmul.f32 %v26681_v60, %v4487_v57  ;;  %21264 = vmatmul.mubr.msk.f32.gmra.mrb[66].mxu0 %vm4704_vm2, %v4854_v43  ;;  %v4783_v43 = vld [vmem:[#allocation2] sm:$0xff] }
 0x496   : > { %21447 = vmatmul.mubr.msk.f32.gmra.mrb[28].mxu1 %vm4704_vm2, %v26687_v24  ;;  %v4702_v44 = vmul.f32 %v26689_v16, %v4486_v52 }
 0x497   : > { %4782 = vst.msk [vmem:[#allocation2 + $0x12b] sm:$0xff] %vm4704_vm2, %v4703_v5  ;;  %v4855_v41 = vld [vmem:[#allocation2 + $0x101] sm:$0xff]  ;;  %v4856_v35 = vld [vmem:[#allocation2 + $0x109] sm:$0xff] }
 0x498   : > { %v26697_v36 = vld [vmem:[#allocation2 + $0x102] sm:$0xff]  ;;  %4781 = vst.msk [vmem:[#allocation2 + $0x123] sm:$0xff] %vm4704_vm2, %v4702_v44  ;;  %21266 = vmatprep.mubr.msk.f32.mxu0 %vm4704_vm2, %v4855_v41  ;;  %v26703_v53 = vld [vmem:[#allocation2 + $0x10a] sm:$0xff]  ;;  %v5610_v41 = vld [vmem:[#allocation10 + $0x58] sm:$0xff] }
 0x499   : > { %21449 = vmatprep.mubr.msk.f32.mxu1 %vm4704_vm2, %v26697_v36  ;;  %21267 = vmatmul.mubr.msk.f32.gmra.mrb[68].mxu0 %vm4704_vm2, %v4856_v35  ;;  %v5609_v44 = vld [vmem:[#allocation10 + $0x50] sm:$0xff] }
 0x49a   : > { %21450 = vmatmul.mubr.msk.f32.gmra.mrb[30].mxu1 %vm4704_vm2, %v26703_v53  ;;  %v4784_v35 = vld [vmem:[#allocation2 + $0x8] sm:$0xff]  ;;  %v22441_v39 = vpack.c.bf16 %v5610_v41, %v5609_v44 }
 0x49b   : > { %v4857_v31 = vld [vmem:[#allocation2 + $0x111] sm:$0xff]  ;;  %v4858_v52 = vld [vmem:[#allocation2 + $0x119] sm:$0xff]  ;;  %v6432_v44 = vld [vmem:[#allocation2 + $0x23] sm:$0xff] }
 0x49c   : > { %v26708_v57 = vld [vmem:[#allocation2 + $0x112] sm:$0xff]  ;;  %21269 = vmatprep.mubr.msk.f32.mxu0 %vm4704_vm2, %v4857_v31  ;;  %v26713_v5 = vld [vmem:[#allocation2 + $0x11a] sm:$0xff]  ;;  %v7328_v41 = vld [vmem:[#allocation10 + $0xc8] sm:$0xff] }
 0x49d   : > { %21452 = vmatprep.mubr.msk.f32.mxu1 %vm4704_vm2, %v26708_v57  ;;  %21270 = vmatmul.mubr.msk.f32.gmra.mrb[70].mxu0 %vm4704_vm2, %v4858_v52  ;;  %v4785_v31 = vld [vmem:[#allocation2 + $0x10] sm:$0xff] }
 0x49e   : > { %21453 = vmatmul.mubr.msk.f32.gmra.mrb[32].mxu1 %vm4704_vm2, %v26713_v5  ;;  %21280 = vmatprep.mubr.msk.f32.mxu0 %vm4704_vm2, %v4783_v43  ;;  %v6899_v52 = vld [vmem:[#allocation10 + $0xb0] sm:$0xff]  ;;  %v4786_v43 = vld [vmem:[#allocation2 + $0x18] sm:$0xff] }
 0x49f   : > { %v6034_v16 = vld [vmem:[#allocation2 + $0x122] sm:$0xff]  ;;  %v6035_v60 = vld [vmem:[#allocation2 + $0x12a] sm:$0xff] }
 0x4a0   : > { %21455 = vmatprep.mubr.msk.f32.mxu1 %vm4704_vm2, %v6034_v16  ;;  %v22465_v16 = vpack.c.bf16 %v6900_v20, %v6899_v52  ;;  %v6434_v20 = vld [vmem:[#allocation2 + $0x33] sm:$0xff]  ;;  %v4792_v52 = vld [vmem:[#allocation2 + $0x48] sm:$0xff] }
 0x4a1   : > { %21281 = vmatmul.mubr.msk.f32.vlgmr.msra.gmra.mrb[36].mxu0 %vm4704_vm2, %v4784_v35 }
 0x4a2   : > { %21456 = vmatmul.mubr.msk.f32.gmra.mrb[34].mxu1 %vm4704_vm2, %v6035_v60  ;;  %21283 = vmatprep.mubr.msk.f32.mxu0 %vm4704_vm2, %v4785_v31  ;;  %v7327_v60 = vld [vmem:[#allocation10 + $0xc0] sm:$0xff] }
 0x4a3   : > { %21466 = vmatprep.mubr.msk.f32.mxu1 %vm4704_vm2, %v6430_v34  ;;  %22440 = vmatpush3.bf16.msra.mxu0 %v26450_v37  ;;  %v4788_v37 = vld [vmem:[#allocation2 + $0x28] sm:$0xff]  ;;  %v26730_v35 = vpack.c.bf16 %v7328_v41, %v7327_v60  ;;  %v6435_v31 = vld [vmem:[#allocation2 + $0x3b] sm:$0xff] }
 0x4a4   : > { %22442 = vmatprep.subr.bf16.mxu0 %v22441_v39  ;;  %v6433_v34 = vld [vmem:[#allocation2 + $0x2b] sm:$0xff]  ;;  %v4794_v60 = vld [vmem:[#allocation2 + $0x58] sm:$0xff] }
 0x4a5   : > { %21284 = vmatmul.mubr.msk.f32.gmra.mrb[38].mxu0 %vm4704_vm2, %v4786_v43  ;;  %v6437_v43 = vld [vmem:[#allocation2 + $0x4b] sm:$0xff]  ;;  %v6439_v41 = vld [vmem:[#allocation2 + $0x5b] sm:$0xff] }
 0x4a6   : > { %21467 = vmatmul.mubr.msk.f32.vlgmr.msra.gmra.mrb[0].mxu1 %vm4704_vm2, %v6431_v4  ;;  %21286 = vmatprep.mubr.msk.f32.mxu0 %vm4704_vm2, %v4787_v47  ;;  %v4789_v4 = vld [vmem:[#allocation2 + $0x30] sm:$0xff]  ;;  %v4790_v47 = vld [vmem:[#allocation2 + $0x38] sm:$0xff] }
 0x4a7   : > { %21469 = vmatprep.mubr.msk.f32.mxu1 %vm4704_vm2, %v6432_v44  ;;  %22464 = vmatpush3.bf16.msra.mxu1 %v26435_v25  ;;  %v4791_v25 = vld [vmem:[#allocation2 + $0x40] sm:$0xff]  ;;  %v6438_v44 = vld [vmem:[#allocation2 + $0x53] sm:$0xff] }
 0x4a8   : > { %22444 = vmatpush3.bf16.msra.mxu0 %v22441_v39  ;;  %22466 = vmatprep.subr.bf16.mxu1 %v22465_v16  ;;  %v6436_v39 = vld [vmem:[#allocation2 + $0x43] sm:$0xff] }
 0x4a9   : > { %21287 = vmatmul.mubr.msk.f32.gmra.mrb[40].mxu0 %vm4704_vm2, %v4788_v37  ;;  %v4795_v37 = vld [vmem:[#allocation2 + $0x60] sm:$0xff] }
 0x4aa   : > { %21470 = vmatmul.mubr.msk.f32.gmra.mrb[2].mxu1 %vm4704_vm2, %v6433_v34  ;;  %21289 = vmatprep.mubr.msk.f32.mxu0 %vm4704_vm2, %v4789_v4  ;;  %v6440_v34 = vld [vmem:[#allocation2 + $0x63] sm:$0xff] }
 0x4ab   : > { %21472 = vmatprep.mubr.msk.f32.mxu1 %vm4704_vm2, %v6434_v20  ;;  %22468 = vmatpush3.bf16.msra.mxu1 %v22465_v16  ;;  %v4793_v16 = vld [vmem:[#allocation2 + $0x50] sm:$0xff]  ;;  %v4796_v4 = vld [vmem:[#allocation2 + $0x68] sm:$0xff] }
 0x4ac   : > { %22470 = vmatprep.subr.bf16.mxu1 %v26730_v35  ;;  %v6441_v20 = vld [vmem:[#allocation2 + $0x6b] sm:$0xff] }
 0x4ad   : > { %21290 = vmatmul.mubr.msk.f32.gmra.mrb[42].mxu0 %vm4704_vm2, %v4790_v47  ;;  %v4797_v47 = vld [vmem:[#allocation2 + $0x70] sm:$0xff] }
 0x4ae   : > { %21473 = vmatmul.mubr.msk.f32.gmra.mrb[4].mxu1 %vm4704_vm2, %v6435_v31  ;;  %21292 = vmatprep.mubr.msk.f32.mxu0 %vm4704_vm2, %v4791_v25  ;;  %v6442_v31 = vld [vmem:[#allocation2 + $0x73] sm:$0xff] }
 0x4af   : > { %21475 = vmatprep.mubr.msk.f32.mxu1 %vm4704_vm2, %v6436_v39  ;;  %v4798_v25 = vld [vmem:[#allocation2 + $0x78] sm:$0xff] }
 0x4b0   : > { %v6443_v39 = vld [vmem:[#allocation2 + $0x7b] sm:$0xff] }
 0x4b1   : > { %21293 = vmatmul.mubr.msk.f32.gmra.mrb[44].mxu0 %vm4704_vm2, %v4792_v52  ;;  %v4799_v52 = vld [vmem:[#allocation2 + $0x80] sm:$0xff] }
 0x4b2   : > { %21476 = vmatmul.mubr.msk.f32.gmra.mrb[6].mxu1 %vm4704_vm2, %v6437_v43  ;;  %21295 = vmatprep.mubr.msk.f32.mxu0 %vm4704_vm2, %v4793_v16  ;;  %v6444_v43 = vld [vmem:[#allocation2 + $0x83] sm:$0xff] }
 0x4b3   : > { %21478 = vmatprep.mubr.msk.f32.mxu1 %vm4704_vm2, %v6438_v44  ;;  %v4800_v16 = vld [vmem:[#allocation2 + $0x88] sm:$0xff] }
 0x4b4   : > { %v6445_v44 = vld [vmem:[#allocation2 + $0x8b] sm:$0xff] }
 0x4b5   : > { %21296 = vmatmul.mubr.msk.f32.gmra.mrb[46].mxu0 %vm4704_vm2, %v4794_v60  ;;  %v4801_v60 = vld [vmem:[#allocation2 + $0x90] sm:$0xff] }
 0x4b6   : > { %21479 = vmatmul.mubr.msk.f32.gmra.mrb[8].mxu1 %vm4704_vm2, %v6439_v41  ;;  %21298 = vmatprep.mubr.msk.f32.mxu0 %vm4704_vm2, %v4795_v37  ;;  %v6446_v41 = vld [vmem:[#allocation2 + $0x93] sm:$0xff] }
 0x4b7   : > { %21481 = vmatprep.mubr.msk.f32.mxu1 %vm4704_vm2, %v6440_v34  ;;  %v4802_v37 = vld [vmem:[#allocation2 + $0x98] sm:$0xff] }
 0x4b8   : > { %v6447_v34 = vld [vmem:[#allocation2 + $0x9b] sm:$0xff] }
 0x4b9   : > { %21299 = vmatmul.mubr.msk.f32.gmra.mrb[48].mxu0 %vm4704_vm2, %v4796_v4  ;;  %v4803_v4 = vld [vmem:[#allocation2 + $0xa0] sm:$0xff] }
 0x4ba   : > { %21482 = vmatmul.mubr.msk.f32.gmra.mrb[10].mxu1 %vm4704_vm2, %v6441_v20  ;;  %21301 = vmatprep.mubr.msk.f32.mxu0 %vm4704_vm2, %v4797_v47  ;;  %v6448_v20 = vld [vmem:[#allocation2 + $0xa3] sm:$0xff] }
 0x4bb   : > { %21484 = vmatprep.mubr.msk.f32.mxu1 %vm4704_vm2, %v6442_v31  ;;  %v4804_v47 = vld [vmem:[#allocation2 + $0xa8] sm:$0xff] }
 0x4bc   : > { %v6449_v31 = vld [vmem:[#allocation2 + $0xab] sm:$0xff] }
 0x4bd   : > { %21302 = vmatmul.mubr.msk.f32.gmra.mrb[50].mxu0 %vm4704_vm2, %v4798_v25  ;;  %v4805_v25 = vld [vmem:[#allocation2 + $0xb0] sm:$0xff] }
 0x4be   : > { %21485 = vmatmul.mubr.msk.f32.gmra.mrb[12].mxu1 %vm4704_vm2, %v6443_v39  ;;  %21304 = vmatprep.mubr.msk.f32.mxu0 %vm4704_vm2, %v4799_v52  ;;  %v6450_v39 = vld [vmem:[#allocation2 + $0xb3] sm:$0xff] }
 0x4bf   : > { %21487 = vmatprep.mubr.msk.f32.mxu1 %vm4704_vm2, %v6444_v43  ;;  %v4806_v52 = vld [vmem:[#allocation2 + $0xb8] sm:$0xff] }
 0x4c0   : > { %v6451_v43 = vld [vmem:[#allocation2 + $0xbb] sm:$0xff] }
 0x4c1   : > { %21305 = vmatmul.mubr.msk.f32.gmra.mrb[52].mxu0 %vm4704_vm2, %v4800_v16  ;;  %v4807_v16 = vld [vmem:[#allocation2 + $0xc0] sm:$0xff] }
 0x4c2   : > { %21488 = vmatmul.mubr.msk.f32.gmra.mrb[14].mxu1 %vm4704_vm2, %v6445_v44  ;;  %21307 = vmatprep.mubr.msk.f32.mxu0 %vm4704_vm2, %v4801_v60  ;;  %v6452_v44 = vld [vmem:[#allocation2 + $0xc3] sm:$0xff] }
 0x4c3   : > { %21490 = vmatprep.mubr.msk.f32.mxu1 %vm4704_vm2, %v6446_v41  ;;  %v4808_v60 = vld [vmem:[#allocation2 + $0xc8] sm:$0xff] }
 0x4c4   : > { %v6453_v41 = vld [vmem:[#allocation2 + $0xcb] sm:$0xff] }
 0x4c5   : > { %21308 = vmatmul.mubr.msk.f32.gmra.mrb[54].mxu0 %vm4704_vm2, %v4802_v37  ;;  %v4809_v37 = vld [vmem:[#allocation2 + $0xd0] sm:$0xff] }
 0x4c6   : > { %21491 = vmatmul.mubr.msk.f32.gmra.mrb[16].mxu1 %vm4704_vm2, %v6447_v34  ;;  %21310 = vmatprep.mubr.msk.f32.mxu0 %vm4704_vm2, %v4803_v4  ;;  %v6454_v34 = vld [vmem:[#allocation2 + $0xd3] sm:$0xff] }
 0x4c7   : > { %21493 = vmatprep.mubr.msk.f32.mxu1 %vm4704_vm2, %v6448_v20  ;;  %v4810_v4 = vld [vmem:[#allocation2 + $0xd8] sm:$0xff] }
 0x4c8   : > { %v6455_v20 = vld [vmem:[#allocation2 + $0xdb] sm:$0xff] }
 0x4c9   : > { %21311 = vmatmul.mubr.msk.f32.gmra.mrb[56].mxu0 %vm4704_vm2, %v4804_v47  ;;  %v4811_v47 = vld [vmem:[#allocation2 + $0xe0] sm:$0xff] }
 0x4ca   : > { %21494 = vmatmul.mubr.msk.f32.gmra.mrb[18].mxu1 %vm4704_vm2, %v6449_v31  ;;  %21313 = vmatprep.mubr.msk.f32.mxu0 %vm4704_vm2, %v4805_v25  ;;  %v6456_v31 = vld [vmem:[#allocation2 + $0xe3] sm:$0xff] }
 0x4cb   : > { %21496 = vmatprep.mubr.msk.f32.mxu1 %vm4704_vm2, %v6450_v39  ;;  %v4812_v25 = vld [vmem:[#allocation2 + $0xe8] sm:$0xff] }
 0x4cc   : > { %v6457_v39 = vld [vmem:[#allocation2 + $0xeb] sm:$0xff] }
 0x4cd   : > { %21314 = vmatmul.mubr.msk.f32.gmra.mrb[58].mxu0 %vm4704_vm2, %v4806_v52  ;;  %v4813_v52 = vld [vmem:[#allocation2 + $0xf0] sm:$0xff] }
 0x4ce   : > { %21497 = vmatmul.mubr.msk.f32.gmra.mrb[20].mxu1 %vm4704_vm2, %v6451_v43  ;;  %21316 = vmatprep.mubr.msk.f32.mxu0 %vm4704_vm2, %v4807_v16  ;;  %v6458_v43 = vld [vmem:[#allocation2 + $0xf3] sm:$0xff] }
 0x4cf   : > { %21499 = vmatprep.mubr.msk.f32.mxu1 %vm4704_vm2, %v6452_v44  ;;  %v4814_v16 = vld [vmem:[#allocation2 + $0xf8] sm:$0xff] }
 0x4d0   : > { %v6459_v44 = vld [vmem:[#allocation2 + $0xfb] sm:$0xff] }
 0x4d1   : > { %21317 = vmatmul.mubr.msk.f32.gmra.mrb[60].mxu0 %vm4704_vm2, %v4808_v60  ;;  %v4815_v60 = vld [vmem:[#allocation2 + $0x100] sm:$0xff] }
 0x4d2   : > { %21500 = vmatmul.mubr.msk.f32.gmra.mrb[22].mxu1 %vm4704_vm2, %v6453_v41  ;;  %21319 = vmatprep.mubr.msk.f32.mxu0 %vm4704_vm2, %v4809_v37  ;;  %v6460_v41 = vld [vmem:[#allocation2 + $0x103] sm:$0xff] }
 0x4d3   : > { %21502 = vmatprep.mubr.msk.f32.mxu1 %vm4704_vm2, %v6454_v34  ;;  %v4816_v37 = vld [vmem:[#allocation2 + $0x108] sm:$0xff] }
 0x4d4   : > { %v6461_v34 = vld [vmem:[#allocation2 + $0x10b] sm:$0xff] }
 0x4d5   : > { %21320 = vmatmul.mubr.msk.f32.gmra.mrb[62].mxu0 %vm4704_vm2, %v4810_v4  ;;  %v4817_v4 = vld [vmem:[#allocation2 + $0x110] sm:$0xff] }
 0x4d6   : > { %21503 = vmatmul.mubr.msk.f32.gmra.mrb[24].mxu1 %vm4704_vm2, %v6455_v20  ;;  %21322 = vmatprep.mubr.msk.f32.mxu0 %vm4704_vm2, %v4811_v47  ;;  %v6462_v20 = vld [vmem:[#allocation2 + $0x113] sm:$0xff]  ;;  %v5570_v47 = vld [vmem:[#allocation2 + $0x2] sm:$0xff] }
 0x4d7   : > { %21505 = vmatprep.mubr.msk.f32.mxu1 %vm4704_vm2, %v6456_v31  ;;  %v4818_v31 = vld [vmem:[#allocation2 + $0x118] sm:$0xff] }
 0x4d9   : > { %21323 = vmatmul.mubr.msk.f32.gmra.mrb[64].mxu0 %vm4704_vm2, %v4812_v25  ;;  %v6463_v25 = vld [vmem:[#allocation2 + $0x11b] sm:$0xff] }
 0x4da   : > { %21506 = vmatmul.mubr.msk.f32.gmra.mrb[26].mxu1 %vm4704_vm2, %v6457_v39  ;;  %21325 = vmatprep.mubr.msk.f32.mxu0 %vm4704_vm2, %v4813_v52  ;;  %v6464_v39 = vld [vmem:[#allocation2 + $0x123] sm:$0xff] }
 0x4db   : > { %21508 = vmatprep.mubr.msk.f32.mxu1 %vm4704_vm2, %v6458_v43  ;;  %v5571_v52 = vld [vmem:[#allocation2 + $0xa] sm:$0xff] }
 0x4dc   : > { %v6465_v43 = vld [vmem:[#allocation2 + $0x12b] sm:$0xff] }
 0x4dd   : > { %21326 = vmatmul.mubr.msk.f32.gmra.mrb[66].mxu0 %vm4704_vm2, %v4814_v16  ;;  %v6860_v16 = vld [vmem:[#allocation2 + $0x14] sm:$0xff] }
 0x4de   : > { %21509 = vmatmul.mubr.msk.f32.gmra.mrb[28].mxu1 %vm4704_vm2, %v6459_v44  ;;  %21328 = vmatprep.mubr.msk.f32.mxu0 %vm4704_vm2, %v4815_v60  ;;  %v7329_v44 = vld [vmem:[#allocation10 + $0xd0] sm:$0xff]  ;;  %v7330_v60 = vld [vmem:[#allocation10 + $0xd8] sm:$0xff] }
 0x4df   : > { %21511 = vmatprep.mubr.msk.f32.mxu1 %vm4704_vm2, %v6460_v41  ;;  %v6861_v41 = vld [vmem:[#allocation2 + $0x1c] sm:$0xff] }
 0x4e1   : > { %21329 = vmatmul.mubr.msk.f32.gmra.mrb[68].mxu0 %vm4704_vm2, %v4816_v37  ;;  %v22473_v37 = vpack.c.bf16 %v7330_v60, %v7329_v44  ;;  %v8189_v60 = vld [vmem:[#allocation10 + $0x110] sm:$0xff] }
 0x4e2   : > { %21512 = vmatmul.mubr.msk.f32.gmra.mrb[30].mxu1 %vm4704_vm2, %v6461_v34  ;;  %21331 = vmatprep.mubr.msk.f32.mxu0 %vm4704_vm2, %v4817_v4  ;;  %v26805_v34 = vld [vmem:[#allocation2 + $0x24] sm:$0xff]  ;;  %v7757_v4 = vld [vmem:[#allocation10 + $0xe0] sm:$0xff] }
 0x4e3   : > { %21514 = vmatprep.mubr.msk.f32.mxu1 %vm4704_vm2, %v6462_v20  ;;  %v7758_v20 = vld [vmem:[#allocation10 + $0xe8] sm:$0xff] }
 0x4e5   : > { %21332 = vmatmul.mubr.msk.f32.gmra.mrb[70].mxu0 %vm4704_vm2, %v4818_v31  ;;  %v6887_v31 = vld [vmem:[#allocation2 + $0xec] sm:$0xff] }
 0x4e6   : > { %21515 = vmatmul.mubr.msk.f32.gmra.mrb[32].mxu1 %vm4704_vm2, %v6463_v25  ;;  %21342 = vmatprep.mubr.msk.f32.mxu0 %vm4704_vm2, %v5570_v47  ;;  %v26814_v47 = vpack.c.bf16 %v7758_v20, %v7757_v4  ;;  %v6895_v25 = vld [vmem:[#allocation2 + $0x12c] sm:$0xff]  ;;  %v7722_v20 = vld [vmem:[#allocation2 + $0x35] sm:$0xff] }
 0x4e7   : > { %21517 = vmatprep.mubr.msk.f32.mxu1 %vm4704_vm2, %v6464_v39  ;;  %v7759_v39 = vld [vmem:[#allocation10 + $0xf0] sm:$0xff] }
 0x4e8   : > { %v7721_v4 = vld [vmem:[#allocation2 + $0x2d] sm:$0xff] }
 0x4e9   : > { %21343 = vmatmul.mubr.msk.f32.vlgmr.msra.gmra.mrb[36].mxu0 %vm4704_vm2, %v5571_v52  ;;  %v8187_v52 = vld [vmem:[#allocation10 + $0x100] sm:$0xff] }
 0x4ea   : > { %21518 = vmatmul.mubr.msk.f32.gmra.mrb[34].mxu1 %vm4704_vm2, %v6465_v43  ;;  %21345 = vmatprep.mubr.msk.f32.mxu0 %vm4704_vm2, %v26412_v56  ;;  %v26812_v56 = vld [vmem:[#allocation2 + $0x2c] sm:$0xff]  ;;  %v8188_v43 = vld [vmem:[#allocation10 + $0x108] sm:$0xff] }
 0x4eb   : > { %21528 = vmatprep.mubr.msk.f32.mxu1 %vm4704_vm2, %v6860_v16  ;;  %v7324_v16 = vld [vmem:[#allocation2 + $0x134] sm:$0xff] }
 0x4ed   : > { %21346 = vmatmul.mubr.msk.f32.gmra.mrb[38].mxu0 %vm4704_vm2, %v26418_v61  ;;  %v26820_v61 = vld [vmem:[#allocation2 + $0x34] sm:$0xff] }
 0x4ee   : > { %21529 = vmatmul.mubr.msk.f32.vlgmr.msra.gmra.mrb[0].mxu1 %vm4704_vm2, %v6861_v41  ;;  %21348 = vmatprep.mubr.msk.f32.mxu0 %vm4704_vm2, %v26433_v23  ;;  %v26826_v23 = vld [vmem:[#allocation2 + $0x3c] sm:$0xff]  ;;  %v8190_v41 = vld [vmem:[#allocation10 + $0x118] sm:$0xff] }
 0x4ef   : > { %21531 = vmatprep.mubr.msk.f32.mxu1 %vm4704_vm2, %v26805_v34  ;;  %22472 = vmatpush3.bf16.msra.mxu1 %v26730_v35  ;;  %v26840_v35 = vld [vmem:[#allocation2 + $0x4c] sm:$0xff] }
 0x4f0   : > { %22474 = vmatprep.subr.bf16.mxu1 %v22473_v37 }
 0x4f1   : > { %21349 = vmatmul.mubr.msk.f32.gmra.mrb[40].mxu0 %vm4704_vm2, %v26441_v63  ;;  %v26833_v63 = vld [vmem:[#allocation2 + $0x44] sm:$0xff] }
 0x4f2   : > { %21532 = vmatmul.mubr.msk.f32.gmra.mrb[2].mxu1 %vm4704_vm2, %v26812_v56  ;;  %21351 = vmatprep.mubr.msk.f32.mxu0 %vm4704_vm2, %v26453_v40  ;;  %v28694_v40 = vmov 0.0  }
 0x4f3   : > { %21534 = vmatprep.mubr.msk.f32.mxu1 %vm4704_vm2, %v26820_v61  ;;  %22476 = vmatpush3.bf16.msra.mxu1 %v22473_v37  ;;  %4746 = vst.msk [vmem:[#allocation2 + $0x140] sm:$0x3f] %vm4745_vm3, %v28694_v40  ;;  %v7720_v37 = vld [vmem:[#allocation2 + $0x25] sm:$0xff] }
 0x4f4   : > { %22478 = vmatprep.subr.bf16.mxu1 %v26814_v47  ;;  %8699 = vst.msk [vmem:[#allocation3 + $0x18] sm:$0xff] %vm8695_vm4, %v28694_v40  ;;  %8700 = vst.msk [vmem:[#allocation3 + $0x20] sm:$0xff] %vm8695_vm4, %v28694_v40 }
 0x4f5   : > { %21352 = vmatmul.mubr.msk.f32.gmra.mrb[42].mxu0 %vm4704_vm2, %v26462_v46  ;;  %v26846_v46 = vld [vmem:[#allocation2 + $0x54] sm:$0xff]  ;;  %8696 = vst.msk [vmem:[#allocation3] sm:$0xff] %vm8695_vm4, %v28694_v40  ;;  %8697 = vst.msk [vmem:[#allocation3 + $0x8] sm:$0xff] %vm8695_vm4, %v28694_v40 }
 0x4f6   : > { %21535 = vmatmul.mubr.msk.f32.gmra.mrb[4].mxu1 %vm4704_vm2, %v26826_v23  ;;  %21354 = vmatprep.mubr.msk.f32.mxu0 %vm4704_vm2, %v26475_v58  ;;  %v26852_v58 = vld [vmem:[#allocation2 + $0x5c] sm:$0xff]  ;;  %8698 = vst.msk [vmem:[#allocation3 + $0x10] sm:$0xff] %vm8695_vm4, %v28694_v40  ;;  %8701 = vst.msk [vmem:[#allocation3 + $0x28] sm:$0xff] %vm8695_vm4, %v28694_v40 }
 0x4f7   : > { %21537 = vmatprep.mubr.msk.f32.mxu1 %vm4704_vm2, %v26833_v63  ;;  %8702 = vst.msk [vmem:[#allocation3 + $0x30] sm:$0xff] %vm8695_vm4, %v28694_v40  ;;  %8703 = vst.msk [vmem:[#allocation3 + $0x38] sm:$0xff] %vm8695_vm4, %v28694_v40 }
 0x4f8   : > { %8704 = vst.msk [vmem:[#allocation3 + $0x40] sm:$0xff] %vm8695_vm4, %v28694_v40  ;;  %8705 = vst.msk [vmem:[#allocation3 + $0x48] sm:$0xff] %vm8695_vm4, %v28694_v40 }
 0x4f9   : > { %21355 = vmatmul.mubr.msk.f32.gmra.mrb[44].mxu0 %vm4704_vm2, %v26481_v0  ;;  %v26858_v0 = vld [vmem:[#allocation2 + $0x64] sm:$0xff]  ;;  %8706 = vst.msk [vmem:[#allocation3 + $0x50] sm:$0xff] %vm8695_vm4, %v28694_v40  ;;  %8707 = vst.msk [vmem:[#allocation3 + $0x58] sm:$0xff] %vm8695_vm4, %v28694_v40 }
 0x4fa   : > { %21538 = vmatmul.mubr.msk.f32.gmra.mrb[6].mxu1 %vm4704_vm2, %v26840_v35  ;;  %21357 = vmatprep.mubr.msk.f32.mxu0 %vm4704_vm2, %v26495_v27  ;;  %v26864_v27 = vld [vmem:[#allocation2 + $0x6c] sm:$0xff]  ;;  %v7325_v44 = vld [vmem:[#allocation2 + $0x13c] sm:$0xff]  ;;  %8708 = vst.msk [vmem:[#allocation3 + $0x60] sm:$0xff] %vm8695_vm4, %v28694_v40  ;;  %8709 = vst.msk [vmem:[#allocation3 + $0x68] sm:$0xff] %vm8695_vm4, %v28694_v40 }
 0x4fb   : > { %21540 = vmatprep.mubr.msk.f32.mxu1 %vm4704_vm2, %v26846_v46  ;;  %8710 = vst.msk [vmem:[#allocation3 + $0x70] sm:$0xff] %vm8695_vm4, %v28694_v40  ;;  %8711 = vst.msk [vmem:[#allocation3 + $0x78] sm:$0xff] %vm8695_vm4, %v28694_v40 }
 0x4fc   : > { %8712 = vst.msk [vmem:[#allocation3 + $0x80] sm:$0xff] %vm8695_vm4, %v28694_v40  ;;  %8713 = vst.msk [vmem:[#allocation3 + $0x88] sm:$0xff] %vm8695_vm4, %v28694_v40 }
 0x4fd   : > { %21358 = vmatmul.mubr.msk.f32.gmra.mrb[46].mxu0 %vm4704_vm2, %v26501_v33  ;;  %v26870_v33 = vld [vmem:[#allocation2 + $0x74] sm:$0xff]  ;;  %8714 = vst.msk [vmem:[#allocation3 + $0x90] sm:$0xff] %vm8695_vm4, %v28694_v40  ;;  %8715 = vst.msk [vmem:[#allocation3 + $0x98] sm:$0xff] %vm8695_vm4, %v28694_v40 }
 0x4fe   : > { %21541 = vmatmul.mubr.msk.f32.gmra.mrb[8].mxu1 %vm4704_vm2, %v26852_v58  ;;  %21360 = vmatprep.mubr.msk.f32.mxu0 %vm4704_vm2, %v26511_v45  ;;  %v26876_v45 = vld [vmem:[#allocation2 + $0x7c] sm:$0xff]  ;;  %8716 = vst.msk [vmem:[#allocation3 + $0xa0] sm:$0xff] %vm8695_vm4, %v28694_v40  ;;  %8717 = vst.msk [vmem:[#allocation3 + $0xa8] sm:$0xff] %vm8695_vm4, %v28694_v40 }
 0x4ff   : > { %21543 = vmatprep.mubr.msk.f32.mxu1 %vm4704_vm2, %v26858_v0  ;;  %8718 = vst.msk [vmem:[#allocation3 + $0xb0] sm:$0xff] %vm8695_vm4, %v28694_v40  ;;  %8719 = vst.msk [vmem:[#allocation3 + $0xb8] sm:$0xff] %vm8695_vm4, %v28694_v40 }
 0x500   : > { %8720 = vst.msk [vmem:[#allocation3 + $0xc0] sm:$0xff] %vm8695_vm4, %v28694_v40  ;;  %8721 = vst.msk [vmem:[#allocation3 + $0xc8] sm:$0xff] %vm8695_vm4, %v28694_v40 }
 0x501   : > { %21361 = vmatmul.mubr.msk.f32.gmra.mrb[48].mxu0 %vm4704_vm2, %v26519_v54  ;;  %v26882_v54 = vld [vmem:[#allocation2 + $0x84] sm:$0xff]  ;;  %8722 = vst.msk [vmem:[#allocation3 + $0xd0] sm:$0xff] %vm8695_vm4, %v28694_v40  ;;  %8723 = vst.msk [vmem:[#allocation3 + $0xd8] sm:$0xff] %vm8695_vm4, %v28694_v40 }
 0x502   : > { %21544 = vmatmul.mubr.msk.f32.gmra.mrb[10].mxu1 %vm4704_vm2, %v26864_v27  ;;  %21363 = vmatprep.mubr.msk.f32.mxu0 %vm4704_vm2, %v26531_v18  ;;  %v26888_v18 = vld [vmem:[#allocation2 + $0x8c] sm:$0xff]  ;;  %8724 = vst.msk [vmem:[#allocation3 + $0xe0] sm:$0xff] %vm8695_vm4, %v28694_v40  ;;  %8725 = vst.msk [vmem:[#allocation3 + $0xe8] sm:$0xff] %vm8695_vm4, %v28694_v40 }
 0x503   : > { %21546 = vmatprep.mubr.msk.f32.mxu1 %vm4704_vm2, %v26870_v33  ;;  %8726 = vst.msk [vmem:[#allocation3 + $0xf0] sm:$0xff] %vm8695_vm4, %v28694_v40  ;;  %8727 = vst.msk [vmem:[#allocation3 + $0xf8] sm:$0xff] %vm8695_vm4, %v28694_v40 }
 0x504   : > { %8728 = vst.msk [vmem:[#allocation3 + $0x100] sm:$0xff] %vm8695_vm4, %v28694_v40  ;;  %8729 = vst.msk [vmem:[#allocation3 + $0x108] sm:$0xff] %vm8695_vm4, %v28694_v40 }
 0x505   : > { %21364 = vmatmul.mubr.msk.f32.gmra.mrb[50].mxu0 %vm4704_vm2, %v26537_v28  ;;  %v26894_v28 = vld [vmem:[#allocation2 + $0x94] sm:$0xff]  ;;  %8730 = vst.msk [vmem:[#allocation3 + $0x110] sm:$0xff] %vm8695_vm4, %v28694_v40  ;;  %8731 = vst.msk [vmem:[#allocation3 + $0x118] sm:$0xff] %vm8695_vm4, %v28694_v40 }
 0x506   : > { %21547 = vmatmul.mubr.msk.f32.gmra.mrb[12].mxu1 %vm4704_vm2, %v26876_v45  ;;  %21366 = vmatprep.mubr.msk.f32.mxu0 %vm4704_vm2, %v26551_v50  ;;  %v26900_v50 = vld [vmem:[#allocation2 + $0x9c] sm:$0xff]  ;;  %8732 = vst.msk [vmem:[#allocation3 + $0x120] sm:$0xff] %vm8695_vm4, %v28694_v40  ;;  %8733 = vst.msk [vmem:[#allocation3 + $0x128] sm:$0xff] %vm8695_vm4, %v28694_v40 }
 0x507   : > { %21549 = vmatprep.mubr.msk.f32.mxu1 %vm4704_vm2, %v26882_v54  ;;  %8734 = vst.msk [vmem:[#allocation3 + $0x130] sm:$0xff] %vm8695_vm4, %v28694_v40  ;;  %8735 = vst.msk [vmem:[#allocation3 + $0x138] sm:$0xff] %vm8695_vm4, %v28694_v40  ;;  %v8815_v40 = vld [vmem:[#allocation13 + $0x28] sm:$0xff] }
 0x509   : > { %21367 = vmatmul.mubr.msk.f32.gmra.mrb[52].mxu0 %vm4704_vm2, %v26557_v59  ;;  %v26906_v59 = vld [vmem:[#allocation2 + $0xa4] sm:$0xff] }
 0x50a   : > { %21550 = vmatmul.mubr.msk.f32.gmra.mrb[14].mxu1 %vm4704_vm2, %v26888_v18  ;;  %21369 = vmatprep.mubr.msk.f32.mxu0 %vm4704_vm2, %v26567_v26  ;;  %v26912_v26 = vld [vmem:[#allocation2 + $0xac] sm:$0xff] }
 0x50b   : > { %21552 = vmatprep.mubr.msk.f32.mxu1 %vm4704_vm2, %v26894_v28 }
 0x50d   : > { %21370 = vmatmul.mubr.msk.f32.gmra.mrb[54].mxu0 %vm4704_vm2, %v26575_v38  ;;  %v26918_v38 = vld [vmem:[#allocation2 + $0xb4] sm:$0xff] }
 0x50e   : > { %21553 = vmatmul.mubr.msk.f32.gmra.mrb[16].mxu1 %vm4704_vm2, %v26900_v50  ;;  %21372 = vmatprep.mubr.msk.f32.mxu0 %vm4704_vm2, %v26587_v2  ;;  %v26924_v2 = vld [vmem:[#allocation2 + $0xbc] sm:$0xff] }
 0x50f   : > { %21555 = vmatprep.mubr.msk.f32.mxu1 %vm4704_vm2, %v26906_v59 }
 0x511   : > { %21373 = vmatmul.mubr.msk.f32.gmra.mrb[56].mxu0 %vm4704_vm2, %v26593_v30  ;;  %v26930_v30 = vld [vmem:[#allocation2 + $0xc4] sm:$0xff] }
 0x512   : > { %21556 = vmatmul.mubr.msk.f32.gmra.mrb[18].mxu1 %vm4704_vm2, %v26912_v26  ;;  %21375 = vmatprep.mubr.msk.f32.mxu0 %vm4704_vm2, %v26607_v49  ;;  %v26936_v49 = vld [vmem:[#allocation2 + $0xcc] sm:$0xff] }
 0x513   : > { %21558 = vmatprep.mubr.msk.f32.mxu1 %vm4704_vm2, %v26918_v38 }
 0x515   : > { %21376 = vmatmul.mubr.msk.f32.gmra.mrb[58].mxu0 %vm4704_vm2, %v26613_v21  ;;  %v26942_v21 = vld [vmem:[#allocation2 + $0xd4] sm:$0xff] }
 0x516   : > { %21559 = vmatmul.mubr.msk.f32.gmra.mrb[20].mxu1 %vm4704_vm2, %v26924_v2  ;;  %21378 = vmatprep.mubr.msk.f32.mxu0 %vm4704_vm2, %v26623_v55  ;;  %v26948_v55 = vld [vmem:[#allocation2 + $0xdc] sm:$0xff] }
 0x517   : > { %21561 = vmatprep.mubr.msk.f32.mxu1 %vm4704_vm2, %v26930_v30 }
 0x519   : > { %21379 = vmatmul.mubr.msk.f32.gmra.mrb[60].mxu0 %vm4704_vm2, %v26631_v3  ;;  %v6886_v3 = vld [vmem:[#allocation2 + $0xe4] sm:$0xff] }
 0x51a   : > { %21562 = vmatmul.mubr.msk.f32.gmra.mrb[22].mxu1 %vm4704_vm2, %v26936_v49  ;;  %21381 = vmatprep.mubr.msk.f32.mxu0 %vm4704_vm2, %v26643_v22  ;;  %v6888_v22 = vld [vmem:[#allocation2 + $0xf4] sm:$0xff] }
 0x51b   : > { %21564 = vmatprep.mubr.msk.f32.mxu1 %vm4704_vm2, %v26942_v21 }
 0x51d   : > { %21382 = vmatmul.mubr.msk.f32.gmra.mrb[62].mxu0 %vm4704_vm2, %v26649_v51  ;;  %v6889_v51 = vld [vmem:[#allocation2 + $0xfc] sm:$0xff] }
 0x51e   : > { %21565 = vmatmul.mubr.msk.f32.gmra.mrb[24].mxu1 %vm4704_vm2, %v26948_v55  ;;  %21384 = vmatprep.mubr.msk.f32.mxu0 %vm4704_vm2, %v26663_v1  ;;  %v6890_v1 = vld [vmem:[#allocation2 + $0x104] sm:$0xff] }
 0x51f   : > { %21567 = vmatprep.mubr.msk.f32.mxu1 %vm4704_vm2, %v6886_v3 }
 0x521   : > { %21385 = vmatmul.mubr.msk.f32.gmra.mrb[64].mxu0 %vm4704_vm2, %v26669_v62  ;;  %v6891_v62 = vld [vmem:[#allocation2 + $0x10c] sm:$0xff] }
 0x522   : > { %21568 = vmatmul.mubr.msk.f32.gmra.mrb[26].mxu1 %vm4704_vm2, %v6887_v31  ;;  %21387 = vmatprep.mubr.msk.f32.mxu0 %vm4704_vm2, %v26679_v48  ;;  %v6892_v48 = vld [vmem:[#allocation2 + $0x114] sm:$0xff] }
 0x523   : > { %21570 = vmatprep.mubr.msk.f32.mxu1 %vm4704_vm2, %v6888_v22 }
 0x525   : > { %21388 = vmatmul.mubr.msk.f32.gmra.mrb[66].mxu0 %vm4704_vm2, %v26687_v24  ;;  %v6893_v24 = vld [vmem:[#allocation2 + $0x11c] sm:$0xff] }
 0x526   : > { %21571 = vmatmul.mubr.msk.f32.gmra.mrb[28].mxu1 %vm4704_vm2, %v6889_v51  ;;  %21390 = vmatprep.mubr.msk.f32.mxu0 %vm4704_vm2, %v26697_v36  ;;  %v6894_v36 = vld [vmem:[#allocation2 + $0x124] sm:$0xff] }
 0x527   : > { %21573 = vmatprep.mubr.msk.f32.mxu1 %vm4704_vm2, %v6890_v1 }
 0x529   : > { %21391 = vmatmul.mubr.msk.f32.gmra.mrb[68].mxu0 %vm4704_vm2, %v26703_v53  ;;  %v7760_v53 = vld [vmem:[#allocation10 + $0xf8] sm:$0xff] }
 0x52a   : > { %21574 = vmatmul.mubr.msk.f32.gmra.mrb[30].mxu1 %vm4704_vm2, %v6891_v62  ;;  %21393 = vmatprep.mubr.msk.f32.mxu0 %vm4704_vm2, %v26708_v57  ;;  %v22481_v57 = vpack.c.bf16 %v7760_v53, %v7759_v39  ;;  %v7753_v39 = vld [vmem:[#allocation2 + $0x12d] sm:$0xff] }
 0x52b   : > { %21576 = vmatprep.mubr.msk.f32.mxu1 %vm4704_vm2, %v6892_v48 }
 0x52d   : > { %21394 = vmatmul.mubr.msk.f32.gmra.mrb[70].mxu0 %vm4704_vm2, %v26713_v5  ;;  %v22485_v5 = vpack.c.bf16 %v8188_v43, %v8187_v52  ;;  %v7755_v52 = vld [vmem:[#allocation2 + $0x13d] sm:$0xff] }
 0x52e   : > { %21577 = vmatmul.mubr.msk.f32.gmra.mrb[32].mxu1 %vm4704_vm2, %v6893_v24 }
 0x52f   : > { %21579 = vmatprep.mubr.msk.f32.mxu1 %vm4704_vm2, %v6894_v36 }
 0x532   : > { %21580 = vmatmul.mubr.msk.f32.gmra.mrb[34].mxu1 %vm4704_vm2, %v6895_v25 }
 0x533   : > { %21590 = vmatprep.mubr.msk.f32.mxu1 %vm4704_vm2, %v26805_v34  ;;  %v22489_v34 = vpack.c.bf16 %v8190_v41, %v8189_v60  ;;  %v8151_v60 = vld [vmem:[#allocation2 + $0x2e] sm:$0xff] }
 0x536   : > { %21591 = vmatmul.mubr.msk.f32.vlgmr.msra.gmra.mrb[0].mxu1 %vm4704_vm2, %v26812_v56  ;;  %v7723_v56 = vld [vmem:[#allocation2 + $0x3d] sm:$0xff] }
 0x537   : > { %21593 = vmatprep.mubr.msk.f32.mxu1 %vm4704_vm2, %v26820_v61  ;;  %22480 = vmatpush3.bf16.msra.mxu1 %v26814_v47  ;;  %v7724_v47 = vld [vmem:[#allocation2 + $0x45] sm:$0xff]  ;;  %v7725_v61 = vld [vmem:[#allocation2 + $0x4d] sm:$0xff] }
 0x538   : > { %22482 = vmatprep.subr.bf16.mxu1 %v22481_v57 }
 0x53a   : > { %21594 = vmatmul.mubr.msk.f32.gmra.mrb[2].mxu1 %vm4704_vm2, %v26826_v23  ;;  %v7726_v23 = vld [vmem:[#allocation2 + $0x55] sm:$0xff] }
 0x53b   : > { %21596 = vmatprep.mubr.msk.f32.mxu1 %vm4704_vm2, %v26833_v63  ;;  %22484 = vmatpush3.bf16.msra.mxu1 %v22481_v57  ;;  %v7727_v63 = vld [vmem:[#allocation2 + $0x5d] sm:$0xff] }
 0x53c   : > { %22486 = vmatprep.subr.bf16.mxu1 %v22485_v5 }
 0x53e   : > { %21597 = vmatmul.mubr.msk.f32.gmra.mrb[4].mxu1 %vm4704_vm2, %v26840_v35  ;;  %v7728_v35 = vld [vmem:[#allocation2 + $0x65] sm:$0xff] }
 0x53f   : > { %21599 = vmatprep.mubr.msk.f32.mxu1 %vm4704_vm2, %v26846_v46  ;;  %v8855_v46 = vld [vmem:[#allocation13 + $0x40] sm:$0xff] }
 0x542   : > { %21600 = vmatmul.mubr.msk.f32.gmra.mrb[6].mxu1 %vm4704_vm2, %v26852_v58  ;;  %v8856_v58 = vld [vmem:[#allocation13 + $0x48] sm:$0xff] }
 0x543   : > { %21602 = vmatprep.mubr.msk.f32.mxu1 %vm4704_vm2, %v26858_v0  ;;  %v22493_v0 = vpack.c.bf16 %v8856_v58, %v8855_v46  ;;  %v8157_v46 = vld [vmem:[#allocation2 + $0x5e] sm:$0xff] }
 0x545   : > { %22494 = vmatprep.subr.bf16.mxu0 %v22493_v0 }
 0x546   : > { %21603 = vmatmul.mubr.msk.f32.gmra.mrb[8].mxu1 %vm4704_vm2, %v26864_v27  ;;  %v7729_v27 = vld [vmem:[#allocation2 + $0x6d] sm:$0xff]  ;;  %22496 = vmatpush3.bf16.msra.mxu0 %v22493_v0 }
 0x547   : > { %21605 = vmatprep.mubr.msk.f32.mxu1 %vm4704_vm2, %v26870_v33  ;;  %v7730_v33 = vld [vmem:[#allocation2 + $0x75] sm:$0xff]  ;;  %v8158_v0 = vld [vmem:[#allocation2 + $0x66] sm:$0xff] }
 0x54a   : > { %21606 = vmatmul.mubr.msk.f32.gmra.mrb[10].mxu1 %vm4704_vm2, %v26876_v45  ;;  %v7731_v45 = vld [vmem:[#allocation2 + $0x7d] sm:$0xff] }
 0x54b   : > { %21608 = vmatprep.mubr.msk.f32.mxu1 %vm4704_vm2, %v26882_v54  ;;  %v7732_v54 = vld [vmem:[#allocation2 + $0x85] sm:$0xff] }
 0x54e   : > { %21609 = vmatmul.mubr.msk.f32.gmra.mrb[12].mxu1 %vm4704_vm2, %v26888_v18  ;;  %v7733_v18 = vld [vmem:[#allocation2 + $0x8d] sm:$0xff] }
 0x54f   : > { %21611 = vmatprep.mubr.msk.f32.mxu1 %vm4704_vm2, %v26894_v28  ;;  %v7734_v28 = vld [vmem:[#allocation2 + $0x95] sm:$0xff] }
 0x552   : > { %21612 = vmatmul.mubr.msk.f32.gmra.mrb[14].mxu1 %vm4704_vm2, %v26900_v50  ;;  %v7735_v50 = vld [vmem:[#allocation2 + $0x9d] sm:$0xff] }
 0x553   : > { %21614 = vmatprep.mubr.msk.f32.mxu1 %vm4704_vm2, %v26906_v59  ;;  %v7736_v59 = vld [vmem:[#allocation2 + $0xa5] sm:$0xff] }
 0x556   : > { %21615 = vmatmul.mubr.msk.f32.gmra.mrb[16].mxu1 %vm4704_vm2, %v26912_v26  ;;  %v7737_v26 = vld [vmem:[#allocation2 + $0xad] sm:$0xff] }
 0x557   : > { %21617 = vmatprep.mubr.msk.f32.mxu1 %vm4704_vm2, %v26918_v38  ;;  %v7738_v38 = vld [vmem:[#allocation2 + $0xb5] sm:$0xff] }
 0x55a   : > { %21618 = vmatmul.mubr.msk.f32.gmra.mrb[18].mxu1 %vm4704_vm2, %v26924_v2  ;;  %v7739_v2 = vld [vmem:[#allocation2 + $0xbd] sm:$0xff] }
 0x55b   : > { %21620 = vmatprep.mubr.msk.f32.mxu1 %vm4704_vm2, %v26930_v30  ;;  %v7740_v30 = vld [vmem:[#allocation2 + $0xc5] sm:$0xff] }
 0x55e   : > { %21621 = vmatmul.mubr.msk.f32.gmra.mrb[20].mxu1 %vm4704_vm2, %v26936_v49  ;;  %v7741_v49 = vld [vmem:[#allocation2 + $0xcd] sm:$0xff] }
 0x55f   : > { %21623 = vmatprep.mubr.msk.f32.mxu1 %vm4704_vm2, %v26942_v21  ;;  %v7742_v21 = vld [vmem:[#allocation2 + $0xd5] sm:$0xff] }
 0x562   : > { %21624 = vmatmul.mubr.msk.f32.gmra.mrb[22].mxu1 %vm4704_vm2, %v26948_v55  ;;  %v7743_v55 = vld [vmem:[#allocation2 + $0xdd] sm:$0xff] }
 0x563   : > { %21626 = vmatprep.mubr.msk.f32.mxu1 %vm4704_vm2, %v6886_v3  ;;  %v7744_v3 = vld [vmem:[#allocation2 + $0xe5] sm:$0xff] }
 0x566   : > { %21627 = vmatmul.mubr.msk.f32.gmra.mrb[24].mxu1 %vm4704_vm2, %v6887_v31  ;;  %v7745_v31 = vld [vmem:[#allocation2 + $0xed] sm:$0xff] }
 0x567   : > { %21629 = vmatprep.mubr.msk.f32.mxu1 %vm4704_vm2, %v6888_v22  ;;  %v7746_v22 = vld [vmem:[#allocation2 + $0xf5] sm:$0xff] }
 0x56a   : > { %21630 = vmatmul.mubr.msk.f32.gmra.mrb[26].mxu1 %vm4704_vm2, %v6889_v51  ;;  %v7747_v51 = vld [vmem:[#allocation2 + $0xfd] sm:$0xff] }
 0x56b   : > { %21632 = vmatprep.mubr.msk.f32.mxu1 %vm4704_vm2, %v6890_v1  ;;  %v7748_v1 = vld [vmem:[#allocation2 + $0x105] sm:$0xff] }
 0x56e   : > { %21633 = vmatmul.mubr.msk.f32.gmra.mrb[28].mxu1 %vm4704_vm2, %v6891_v62  ;;  %v7749_v62 = vld [vmem:[#allocation2 + $0x10d] sm:$0xff] }
 0x56f   : > { %21635 = vmatprep.mubr.msk.f32.mxu1 %vm4704_vm2, %v6892_v48  ;;  %v7750_v48 = vld [vmem:[#allocation2 + $0x115] sm:$0xff] }
 0x572   : > { %21636 = vmatmul.mubr.msk.f32.gmra.mrb[30].mxu1 %vm4704_vm2, %v6893_v24  ;;  %v7751_v24 = vld [vmem:[#allocation2 + $0x11d] sm:$0xff] }
 0x573   : > { %21638 = vmatprep.mubr.msk.f32.mxu1 %vm4704_vm2, %v6894_v36  ;;  %v7752_v36 = vld [vmem:[#allocation2 + $0x125] sm:$0xff] }
 0x576   : > { %21639 = vmatmul.mubr.msk.f32.gmra.mrb[32].mxu1 %vm4704_vm2, %v6895_v25  ;;  %v7754_v25 = vld [vmem:[#allocation2 + $0x135] sm:$0xff] }
 0x577   : > { %21641 = vmatprep.mubr.msk.f32.mxu1 %vm4704_vm2, %v7324_v16  ;;  %v8150_v16 = vld [vmem:[#allocation2 + $0x26] sm:$0xff] }
 0x57a   : > { %21642 = vmatmul.mubr.msk.f32.gmra.mrb[34].mxu1 %vm4704_vm2, %v7325_v44 }
 0x57b   : > { %21652 = vmatprep.mubr.msk.f32.mxu1 %vm4704_vm2, %v7720_v37  ;;  %v8152_v37 = vld [vmem:[#allocation2 + $0x36] sm:$0xff] }
 0x57e   : > { %21653 = vmatmul.mubr.msk.f32.vlgmr.msra.gmra.mrb[0].mxu1 %vm4704_vm2, %v7721_v4  ;;  %v8153_v4 = vld [vmem:[#allocation2 + $0x3e] sm:$0xff] }
 0x57f   : > { %21655 = vmatprep.mubr.msk.f32.mxu1 %vm4704_vm2, %v7722_v20  ;;  %22488 = vmatpush3.bf16.msra.mxu1 %v22485_v5 }
 0x580   : > { %22490 = vmatprep.subr.bf16.mxu1 %v22489_v34 }
 0x582   : > { %21656 = vmatmul.mubr.msk.f32.gmra.mrb[2].mxu1 %vm4704_vm2, %v7723_v56  ;;  %v8154_v56 = vld [vmem:[#allocation2 + $0x46] sm:$0xff] }
 0x583   : > { %21658 = vmatprep.mubr.msk.f32.mxu1 %vm4704_vm2, %v7724_v47  ;;  %22492 = vmatpush3.bf16.msra.mxu1 %v22489_v34 }
 0x586   : > { %21659 = vmatmul.mubr.msk.f32.gmra.mrb[4].mxu1 %vm4704_vm2, %v7725_v61  ;;  %v8155_v61 = vld [vmem:[#allocation2 + $0x4e] sm:$0xff] }
 0x587   : > { %21661 = vmatprep.mubr.msk.f32.mxu1 %vm4704_vm2, %v7726_v23 }
 0x58a   : > { %21662 = vmatmul.mubr.msk.f32.gmra.mrb[6].mxu1 %vm4704_vm2, %v7727_v63  ;;  %v8156_v63 = vld [vmem:[#allocation2 + $0x56] sm:$0xff] }
 0x58b   : > { %21664 = vmatprep.mubr.msk.f32.mxu1 %vm4704_vm2, %v7728_v35 }
 0x58e   : > { %21665 = vmatmul.mubr.msk.f32.gmra.mrb[8].mxu1 %vm4704_vm2, %v7729_v27 }
 0x58f   : > { %21667 = vmatprep.mubr.msk.f32.mxu1 %vm4704_vm2, %v7730_v33  ;;  %v8159_v33 = vld [vmem:[#allocation2 + $0x6e] sm:$0xff] }
 0x592   : > { %21668 = vmatmul.mubr.msk.f32.gmra.mrb[10].mxu1 %vm4704_vm2, %v7731_v45 }
 0x593   : > { %21670 = vmatprep.mubr.msk.f32.mxu1 %vm4704_vm2, %v7732_v54  ;;  %v8160_v54 = vld [vmem:[#allocation2 + $0x76] sm:$0xff] }
 0x596   : > { %21671 = vmatmul.mubr.msk.f32.gmra.mrb[12].mxu1 %vm4704_vm2, %v7733_v18 }
 0x597   : > { %21673 = vmatprep.mubr.msk.f32.mxu1 %vm4704_vm2, %v7734_v28  ;;  %v8161_v28 = vld [vmem:[#allocation2 + $0x7e] sm:$0xff] }
 0x59a   : > { %21674 = vmatmul.mubr.msk.f32.gmra.mrb[14].mxu1 %vm4704_vm2, %v7735_v50 }
 0x59b   : > { %21676 = vmatprep.mubr.msk.f32.mxu1 %vm4704_vm2, %v7736_v59  ;;  %v8162_v59 = vld [vmem:[#allocation2 + $0x86] sm:$0xff] }
 0x59e   : > { %21677 = vmatmul.mubr.msk.f32.gmra.mrb[16].mxu1 %vm4704_vm2, %v7737_v26 }
 0x59f   : > { %21679 = vmatprep.mubr.msk.f32.mxu1 %vm4704_vm2, %v7738_v38  ;;  %v8163_v38 = vld [vmem:[#allocation2 + $0x8e] sm:$0xff] }
 0x5a2   : > { %21680 = vmatmul.mubr.msk.f32.gmra.mrb[18].mxu1 %vm4704_vm2, %v7739_v2 }
 0x5a3   : > { %21682 = vmatprep.mubr.msk.f32.mxu1 %vm4704_vm2, %v7740_v30  ;;  %v8164_v30 = vld [vmem:[#allocation2 + $0x96] sm:$0xff] }
 0x5a6   : > { %21683 = vmatmul.mubr.msk.f32.gmra.mrb[20].mxu1 %vm4704_vm2, %v7741_v49 }
 0x5a7   : > { %21685 = vmatprep.mubr.msk.f32.mxu1 %vm4704_vm2, %v7742_v21  ;;  %v8165_v21 = vld [vmem:[#allocation2 + $0x9e] sm:$0xff] }
 0x5aa   : > { %21686 = vmatmul.mubr.msk.f32.gmra.mrb[22].mxu1 %vm4704_vm2, %v7743_v55 }
 0x5ab   : > { %21688 = vmatprep.mubr.msk.f32.mxu1 %vm4704_vm2, %v7744_v3  ;;  %v8166_v3 = vld [vmem:[#allocation2 + $0xa6] sm:$0xff] }
 0x5ae   : > { %21689 = vmatmul.mubr.msk.f32.gmra.mrb[24].mxu1 %vm4704_vm2, %v7745_v31 }
 0x5af   : > { %21691 = vmatprep.mubr.msk.f32.mxu1 %vm4704_vm2, %v7746_v22  ;;  %v8167_v22 = vld [vmem:[#allocation2 + $0xae] sm:$0xff] }
 0x5b2   : > { %21692 = vmatmul.mubr.msk.f32.gmra.mrb[26].mxu1 %vm4704_vm2, %v7747_v51 }
 0x5b3   : > { %21694 = vmatprep.mubr.msk.f32.mxu1 %vm4704_vm2, %v7748_v1  ;;  %v8168_v1 = vld [vmem:[#allocation2 + $0xb6] sm:$0xff] }
 0x5b6   : > { %21695 = vmatmul.mubr.msk.f32.gmra.mrb[28].mxu1 %vm4704_vm2, %v7749_v62 }
 0x5b7   : > { %21697 = vmatprep.mubr.msk.f32.mxu1 %vm4704_vm2, %v7750_v48  ;;  %v8169_v48 = vld [vmem:[#allocation2 + $0xbe] sm:$0xff] }
 0x5ba   : > { %21698 = vmatmul.mubr.msk.f32.gmra.mrb[30].mxu1 %vm4704_vm2, %v7751_v24 }
 0x5bb   : > { %21700 = vmatprep.mubr.msk.f32.mxu1 %vm4704_vm2, %v7752_v36  ;;  %v8170_v36 = vld [vmem:[#allocation2 + $0xc6] sm:$0xff] }
 0x5bc   : > { %v27074_v53 = vpop.f32.mrb[36].mxu0 }
 0x5bd   : > { %v27077_v57 = vpop.f32.mrb[37].mxu0 }
 0x5be   : > { %21701 = vmatmul.mubr.msk.f32.gmra.mrb[32].mxu1 %vm4704_vm2, %v7753_v39  ;;  %v8171_v39 = vld [vmem:[#allocation2 + $0xce] sm:$0xff] }
 0x5bf   : > { %21703 = vmatprep.mubr.msk.f32.mxu1 %vm4704_vm2, %v7754_v25 }
 0x5c0   : > { %v27080_v43 = vpop.f32.mrb[38].mxu0 }
 0x5c1   : > { %v27082_v5 = vpop.f32.mrb[39].mxu0 }
 0x5c2   : > { %21704 = vmatmul.mubr.msk.f32.gmra.mrb[34].mxu1 %vm4704_vm2, %v7755_v52 }
 0x5c3   : > { %21714 = vmatprep.mubr.msk.f32.mxu1 %vm4704_vm2, %v8150_v16  ;;  %v8172_v16 = vld [vmem:[#allocation2 + $0xd6] sm:$0xff] }
 0x5c4   : > { %v27086_v44 = vpop.f32.mrb[40].mxu0 }
 0x5c5   : > { %v27088_v41 = vpop.f32.mrb[41].mxu0 }
 0x5c6   : > { %21715 = vmatmul.mubr.msk.f32.vlgmr.msra.gmra.mrb[0].mxu1 %vm4704_vm2, %v8151_v60 }
 0x5c7   : > { %21717 = vmatprep.mubr.msk.f32.mxu1 %vm4704_vm2, %v8152_v37  ;;  %v8173_v37 = vld [vmem:[#allocation2 + $0xde] sm:$0xff] }
 0x5c8   : > { %v27092_v34 = vpop.f32.mrb[42].mxu0 }
 0x5c9   : > { %v27094_v20 = vpop.f32.mrb[43].mxu0 }
 0x5ca   : > { %21718 = vmatmul.mubr.msk.f32.gmra.mrb[2].mxu1 %vm4704_vm2, %v8153_v4 }
 0x5cb   : > { %21720 = vmatprep.mubr.msk.f32.mxu1 %vm4704_vm2, %v8154_v56  ;;  %v8174_v56 = vld [vmem:[#allocation2 + $0xe6] sm:$0xff] }
 0x5cc   : > { %v27098_v47 = vpop.f32.mrb[44].mxu0 }
 0x5cd   : > { %v27100_v23 = vpop.f32.mrb[45].mxu0 }
 0x5ce   : > { %21721 = vmatmul.mubr.msk.f32.gmra.mrb[4].mxu1 %vm4704_vm2, %v8155_v61 }
 0x5cf   : > { %21723 = vmatprep.mubr.msk.f32.mxu1 %vm4704_vm2, %v8156_v63  ;;  %v8175_v63 = vld [vmem:[#allocation2 + $0xee] sm:$0xff] }
 0x5d0   : > { %v27104_v35 = vpop.f32.mrb[46].mxu0 }
 0x5d1   : > { %v27106_v58 = vpop.f32.mrb[47].mxu0 }
 0x5d2   : > { %21724 = vmatmul.mubr.msk.f32.gmra.mrb[6].mxu1 %vm4704_vm2, %v8157_v46 }
 0x5d3   : > { %21726 = vmatprep.mubr.msk.f32.mxu1 %vm4704_vm2, %v8158_v0  ;;  %v8176_v0 = vld [vmem:[#allocation2 + $0xf6] sm:$0xff] }
 0x5d4   : > { %v27110_v27 = vpop.f32.mrb[48].mxu0 }
 0x5d5   : > { %v27112_v45 = vpop.f32.mrb[49].mxu0 }
 0x5d6   : > { %21727 = vmatmul.mubr.msk.f32.gmra.mrb[8].mxu1 %vm4704_vm2, %v8159_v33 }
 0x5d7   : > { %21729 = vmatprep.mubr.msk.f32.mxu1 %vm4704_vm2, %v8160_v54  ;;  %v8177_v54 = vld [vmem:[#allocation2 + $0xfe] sm:$0xff] }
 0x5d8   : > { %v27116_v18 = vpop.f32.mrb[50].mxu0 }
 0x5d9   : > { %v27118_v50 = vpop.f32.mrb[51].mxu0 }
 0x5da   : > { %21730 = vmatmul.mubr.msk.f32.gmra.mrb[10].mxu1 %vm4704_vm2, %v8161_v28 }
 0x5db   : > { %21732 = vmatprep.mubr.msk.f32.mxu1 %vm4704_vm2, %v8162_v59  ;;  %v8178_v59 = vld [vmem:[#allocation2 + $0x106] sm:$0xff] }
 0x5dc   : > { %v27122_v26 = vpop.f32.mrb[52].mxu0 }
 0x5dd   : > { %v27124_v2 = vpop.f32.mrb[53].mxu0 }
 0x5de   : > { %21733 = vmatmul.mubr.msk.f32.gmra.mrb[12].mxu1 %vm4704_vm2, %v8163_v38 }
 0x5df   : > { %21735 = vmatprep.mubr.msk.f32.mxu1 %vm4704_vm2, %v8164_v30  ;;  %v8179_v30 = vld [vmem:[#allocation2 + $0x10e] sm:$0xff] }
 0x5e0   : > { %v27128_v49 = vpop.f32.mrb[54].mxu0 }
 0x5e1   : > { %v27130_v55 = vpop.f32.mrb[55].mxu0 }
 0x5e2   : > { %21736 = vmatmul.mubr.msk.f32.gmra.mrb[14].mxu1 %vm4704_vm2, %v8165_v21 }
 0x5e3   : > { %21738 = vmatprep.mubr.msk.f32.mxu1 %vm4704_vm2, %v8166_v3  ;;  %v8180_v3 = vld [vmem:[#allocation2 + $0x116] sm:$0xff] }
 0x5e4   : > { %v27134_v31 = vpop.f32.mrb[56].mxu0 }
 0x5e5   : > { %v27136_v51 = vpop.f32.mrb[57].mxu0 }
 0x5e6   : > { %21739 = vmatmul.mubr.msk.f32.gmra.mrb[16].mxu1 %vm4704_vm2, %v8167_v22 }
 0x5e7   : > { %21741 = vmatprep.mubr.msk.f32.mxu1 %vm4704_vm2, %v8168_v1  ;;  %v8181_v1 = vld [vmem:[#allocation2 + $0x11e] sm:$0xff] }
 0x5e8   : > { %v27140_v62 = vpop.f32.mrb[58].mxu0 }
 0x5e9   : > { %v27142_v24 = vpop.f32.mrb[59].mxu0 }
 0x5ea   : > { %21742 = vmatmul.mubr.msk.f32.gmra.mrb[18].mxu1 %vm4704_vm2, %v8169_v48 }
 0x5eb   : > { %21744 = vmatprep.mubr.msk.f32.mxu1 %vm4704_vm2, %v8170_v36  ;;  %v8182_v36 = vld [vmem:[#allocation2 + $0x126] sm:$0xff] }
 0x5ec   : > { %v27146_v25 = vpop.f32.mrb[60].mxu0 }
 0x5ed   : > { %v27148_v52 = vpop.f32.mrb[61].mxu0 }
 0x5ee   : > { %21745 = vmatmul.mubr.msk.f32.gmra.mrb[20].mxu1 %vm4704_vm2, %v8171_v39  ;;  %v8184_v39 = vld [vmem:[#allocation2 + $0x136] sm:$0xff] }
 0x5ef   : > { %21747 = vmatprep.mubr.msk.f32.mxu1 %vm4704_vm2, %v8172_v16  ;;  %v8183_v16 = vld [vmem:[#allocation2 + $0x12e] sm:$0xff] }
 0x5f0   : > { %v27152_v60 = vpop.f32.mrb[62].mxu0 }
 0x5f1   : > { %v27154_v4 = vpop.f32.mrb[63].mxu0 }
 0x5f2   : > { %21748 = vmatmul.mubr.msk.f32.gmra.mrb[22].mxu1 %vm4704_vm2, %v8173_v37  ;;  %v8185_v37 = vld [vmem:[#allocation2 + $0x13e] sm:$0xff] }
 0x5f3   : > { %21750 = vmatprep.mubr.msk.f32.mxu1 %vm4704_vm2, %v8174_v56  ;;  %v8857_v56 = vld [vmem:[#allocation13 + $0x50] sm:$0xff] }
 0x5f4   : > { %v27158_v61 = vpop.f32.mrb[64].mxu0 }
 0x5f5   : > { %v27160_v46 = vpop.f32.mrb[65].mxu0 }
 0x5f6   : > { %21751 = vmatmul.mubr.msk.f32.gmra.mrb[24].mxu1 %vm4704_vm2, %v8175_v63  ;;  %v8858_v63 = vld [vmem:[#allocation13 + $0x58] sm:$0xff] }
 0x5f7   : > { %21753 = vmatprep.mubr.msk.f32.mxu1 %vm4704_vm2, %v8176_v0  ;;  %v22497_v0 = vpack.c.bf16 %v8858_v63, %v8857_v56  ;;  %v8811_v56 = vld [vmem:[#allocation13 + $0x8] sm:$0xff] }
 0x5f8   : > { %v27164_v33 = vpop.f32.mrb[66].mxu0 }
 0x5f9   : > { %v27166_v28 = vpop.f32.mrb[67].mxu0  ;;  %22498 = vmatprep.subr.bf16.mxu0 %v22497_v0 }
 0x5fa   : > { %21754 = vmatmul.mubr.msk.f32.gmra.mrb[26].mxu1 %vm4704_vm2, %v8177_v54  ;;  %22500 = vmatpush3.bf16.msra.mxu0 %v22497_v0  ;;  %v8859_v54 = vld [vmem:[#allocation13 + $0x60] sm:$0xff]  ;;  %v8812_v0 = vld [vmem:[#allocation13 + $0x10] sm:$0xff] }
 0x5fb   : > { %21756 = vmatprep.mubr.msk.f32.mxu1 %vm4704_vm2, %v8178_v59  ;;  %v8860_v59 = vld [vmem:[#allocation13 + $0x68] sm:$0xff] }
 0x5fc   : > { %v27170_v38 = vpop.f32.mrb[68].mxu0 }
 0x5fd   : > { %v27172_v21 = vpop.f32.mrb[69].mxu0 }
 0x5fe   : > { %21757 = vmatmul.mubr.msk.f32.gmra.mrb[28].mxu1 %vm4704_vm2, %v8179_v30  ;;  %v22501_v30 = vpack.c.bf16 %v8860_v59, %v8859_v54  ;;  %v8813_v54 = vld [vmem:[#allocation13 + $0x18] sm:$0xff] }
 0x5ff   : > { %21759 = vmatprep.mubr.msk.f32.mxu1 %vm4704_vm2, %v8180_v3  ;;  %v8861_v3 = vld [vmem:[#allocation13 + $0x70] sm:$0xff]  ;;  %v22513_v59 = vpack.c.bf16 %v8813_v54, %v8812_v0 }
 0x600   : > { %v27176_v22 = vpop.f32.mrb[70].mxu0  ;;  %22502 = vmatprep.subr.bf16.mxu0 %v22501_v30 }
 0x601   : > { %28695 = vst [vmem:[#allocation57_spill] sm:$0xff] %v27176_v22  ;;  %v27178_v48 = vpop.f32.mrb[71].mxu0  ;;  %22504 = vmatpush3.bf16.msra.mxu0 %v22501_v30  ;;  %v8814_v30 = vld [vmem:[#allocation13 + $0x20] sm:$0xff] }
 0x602   : > { %28696 = vst [vmem:[#allocation58_spill] sm:$0xff] %v27178_v48  ;;  %21760 = vmatmul.mubr.msk.f32.gmra.mrb[30].mxu1 %vm4704_vm2, %v8181_v1  ;;  %v8862_v1 = vld [vmem:[#allocation13 + $0x78] sm:$0xff]  ;;  %v22517_v48 = vpack.c.bf16 %v8815_v40, %v8814_v30 }
 0x603   : > { %21762 = vmatprep.mubr.msk.f32.mxu1 %vm4704_vm2, %v8182_v36  ;;  %v22505_v36 = vpack.c.bf16 %v8862_v1, %v8861_v3  ;;  %v8816_v3 = vld [vmem:[#allocation13 + $0x30] sm:$0xff]  ;;  %v8817_v1 = vld [vmem:[#allocation13 + $0x38] sm:$0xff] }
 0x605   : > { %22506 = vmatprep.subr.bf16.mxu0 %v22505_v36 }
 0x606   : > { %21763 = vmatmul.mubr.msk.f32.gmra.mrb[32].mxu1 %vm4704_vm2, %v8183_v16  ;;  %22508 = vmatpush3.bf16.msra.mxu0 %v22505_v36  ;;  %v8819_v16 = vld [vmem:[#allocation3 + $0x9] sm:$0xff]  ;;  %v22521_v36 = vpack.c.bf16 %v8817_v1, %v8816_v3 }
 0x607   : > { %21765 = vmatprep.mubr.msk.f32.mxu1 %vm4704_vm2, %v8184_v39  ;;  %v8818_v39 = vld [vmem:[#allocation3 + $0x1] sm:$0xff] }
 0x608   : > { %21784 = vmatprep.mubr.msk.f32.mxu0 %vm8695_vm4, %v8818_v39  ;;  %v9606_v39 = vld [vmem:[#allocation13 + $0x80] sm:$0xff] }
 0x609   : > { %21785 = vmatmul.mubr.msk.f32.vlgmr.msra.gmra.mrb[72].mxu0 %vm8695_vm4, %v8819_v16  ;;  %v9607_v16 = vld [vmem:[#allocation13 + $0x88] sm:$0xff] }
 0x60a   : > { %21766 = vmatmul.mubr.msk.f32.gmra.mrb[34].mxu1 %vm4704_vm2, %v8185_v37  ;;  %v8810_v37 = vld [vmem:[#allocation13] sm:$0xff] }
 0x60b   : > { %v22509_v63 = vpack.c.bf16 %v8811_v56, %v8810_v37  ;;  %v27267_v56 = vld [vmem:[#allocation11] ss:$0 sm:$0xff] }
 0x60d   : > { %22510 = vmatprep.subr.bf16.mxu0 %v22509_v63 }
 0x60e   : > { %22512 = vmatpush3.bf16.msra.mxu0 %v22509_v63  ;;  %v27269_v63 = vpack.c.bf16 %v9607_v16, %v9606_v39 }
 0x60f   : > { %22514 = vmatprep.subr.bf16.mxu0 %v22513_v59 }
 0x612   : > { %22516 = vmatpush3.bf16.msra.mxu0 %v22513_v59 }
 0x613   : > { %22518 = vmatprep.subr.bf16.mxu0 %v22517_v48 }
 0x616   : > { %22520 = vmatpush3.bf16.msra.mxu0 %v22517_v48 }
 0x617   : > { %22522 = vmatprep.subr.bf16.mxu0 %v22521_v36 }
 0x61a   : > { %22524 = vmatpush3.bf16.msra.mxu0 %v22521_v36 }
 0x61b   : > { %22526 = vmatprep.subr.bf16.mxu0 %v27269_v63 }
 0x699   : > { %v21716_v37 = vpop.f32.mrb[0].mxu1 }
 0x69a   : > { %v22707_v0 = vadd.f32 %v21716_v37, %v27074_v53  ;;  %v8365_v54 = vpop.f32.mrb[1].mxu1 }
 0x69b   : > { %v22708_v40 = vadd.f32 %v8365_v54, %v27077_v57 }
 0x69c   : > { %v8588_v59 = vadd.f32 %v22707_v0, %v27267_v56 }
 0x69d   : > { %v8587_v48 = vadd.f32 %v22708_v40, %v27267_v56  ;;  %v21719_v30 = vpop.f32.mrb[2].mxu1 }
 0x69e   : > { %v8624_v3 = vmax.f32 %v8588_v59, 0.0  ;;  %v22709_v1 = vadd.f32 %v21719_v30, %v27080_v43  ;;  %v8375_v36 = vpop.f32.mrb[3].mxu1 }
 0x69f   : > { %v8623_v22 = vmax.f32 %v8587_v48, 0.0  ;;  %v22710_v39 = vadd.f32 %v8375_v36, %v27082_v5 }
 0x6a0   : > { %v8660_v16 = vmul.f32 %v8624_v3, %v26365_v9  ;;  %v8590_v53 = vadd.f32 %v22709_v1, %v27267_v56 }
 0x6a1   : > { %v8659_v57 = vmul.f32 %v8623_v22, %v26361_v7  ;;  %v8589_v37 = vadd.f32 %v22710_v39, %v27267_v56  ;;  %v21722_v54 = vpop.f32.mrb[4].mxu1 }
 0x6a2   : > { %8739 = vst.msk [vmem:[#allocation3 + $0x1b] sm:$0xff] %vm8695_vm4, %v8660_v16  ;;  %v8626_v0 = vmax.f32 %v8590_v53, 0.0  ;;  %v22711_v40 = vadd.f32 %v21722_v54, %v27086_v44  ;;  %v8385_v59 = vpop.f32.mrb[5].mxu1 }
 0x6a3   : > { %8738 = vst.msk [vmem:[#allocation3 + $0x13] sm:$0xff] %vm8695_vm4, %v8659_v57  ;;  %v8625_v43 = vmax.f32 %v8589_v37, 0.0  ;;  %v22712_v5 = vadd.f32 %v8385_v59, %v27088_v41 }
 0x6a4   : > { %v8662_v48 = vmul.f32 %v8626_v0, %v26363_v8  ;;  %v8592_v30 = vadd.f32 %v22711_v40, %v27267_v56 }
 0x6a5   : > { %v8661_v22 = vmul.f32 %v8625_v43, %v26359_v6  ;;  %v8591_v3 = vadd.f32 %v22712_v5, %v27267_v56  ;;  %v21725_v1 = vpop.f32.mrb[6].mxu1 }
 0x6a6   : > { %8741 = vst.msk [vmem:[#allocation3 + $0x2b] sm:$0xff] %vm8695_vm4, %v8662_v48  ;;  %v8628_v36 = vmax.f32 %v8592_v30, 0.0  ;;  %v22713_v44 = vadd.f32 %v21725_v1, %v27092_v34  ;;  %v8395_v39 = vpop.f32.mrb[7].mxu1 }
 0x6a7   : > { %8740 = vst.msk [vmem:[#allocation3 + $0x23] sm:$0xff] %vm8695_vm4, %v8661_v22  ;;  %v8627_v16 = vmax.f32 %v8591_v3, 0.0  ;;  %v22714_v41 = vadd.f32 %v8395_v39, %v27094_v20 }
 0x6a8   : > { %v8664_v53 = vmul.f32 %v8628_v36, %v26367_v10  ;;  %v8594_v57 = vadd.f32 %v22713_v44, %v27267_v56 }
 0x6a9   : > { %v8663_v37 = vmul.f32 %v8627_v16, %v26369_v11  ;;  %v8593_v54 = vadd.f32 %v22714_v41, %v27267_v56  ;;  %v21728_v0 = vpop.f32.mrb[8].mxu1 }
 0x6aa   : > { %8743 = vst.msk [vmem:[#allocation3 + $0x3b] sm:$0xff] %vm8695_vm4, %v8664_v53  ;;  %v8630_v40 = vmax.f32 %v8594_v57, 0.0  ;;  %v22715_v34 = vadd.f32 %v21728_v0, %v27098_v47  ;;  %v8405_v59 = vpop.f32.mrb[9].mxu1  ;;  %v8820_v43 = vld [vmem:[#allocation3 + $0x11] sm:$0xff]  ;;  %v8821_v5 = vld [vmem:[#allocation3 + $0x19] sm:$0xff] }
 0x6ab   : > { %8742 = vst.msk [vmem:[#allocation3 + $0x33] sm:$0xff] %vm8695_vm4, %v8663_v37  ;;  %v8629_v20 = vmax.f32 %v8593_v54, 0.0  ;;  %v22716_v48 = vadd.f32 %v8405_v59, %v27100_v23  ;;  %21787 = vmatprep.mubr.msk.f32.mxu0 %vm8695_vm4, %v8820_v43 }
 0x6ac   : > { %v8666_v30 = vmul.f32 %v8630_v40, %v26371_v12  ;;  %v8596_v22 = vadd.f32 %v22715_v34, %v27267_v56  ;;  %21788 = vmatmul.mubr.msk.f32.gmra.mrb[74].mxu0 %vm8695_vm4, %v8821_v5 }
 0x6ad   : > { %v8665_v3 = vmul.f32 %v8629_v20, %v26373_v13  ;;  %v8595_v47 = vadd.f32 %v22716_v48, %v27267_v56  ;;  %v21731_v1 = vpop.f32.mrb[10].mxu1 }
 0x6ae   : > { %8745 = vst.msk [vmem:[#allocation3 + $0x4b] sm:$0xff] %vm8695_vm4, %v8666_v30  ;;  %v8632_v36 = vmax.f32 %v8596_v22, 0.0  ;;  %v22717_v44 = vadd.f32 %v21731_v1, %v27104_v35  ;;  %v8415_v39 = vpop.f32.mrb[11].mxu1  ;;  %v8822_v23 = vld [vmem:[#allocation3 + $0x21] sm:$0xff]  ;;  %v8823_v16 = vld [vmem:[#allocation3 + $0x29] sm:$0xff] }
 0x6af   : > { %8744 = vst.msk [vmem:[#allocation3 + $0x43] sm:$0xff] %vm8695_vm4, %v8665_v3  ;;  %v8631_v41 = vmax.f32 %v8595_v47, 0.0  ;;  %v22718_v53 = vadd.f32 %v8415_v39, %v27106_v58  ;;  %21790 = vmatprep.mubr.msk.f32.mxu0 %vm8695_vm4, %v8822_v23 }
 0x6b0   : > { %v8668_v57 = vmul.f32 %v8632_v36, %v26375_v14  ;;  %v8598_v37 = vadd.f32 %v22717_v44, %v27267_v56  ;;  %21791 = vmatmul.mubr.msk.f32.gmra.mrb[76].mxu0 %vm8695_vm4, %v8823_v16 }
 0x6b1   : > { %v8667_v54 = vmul.f32 %v8631_v41, %v26377_v15  ;;  %v8597_v35 = vadd.f32 %v22718_v53, %v27267_v56  ;;  %v21734_v0 = vpop.f32.mrb[12].mxu1 }
 0x6b2   : > { %8747 = vst.msk [vmem:[#allocation3 + $0x5b] sm:$0xff] %vm8695_vm4, %v8668_v57  ;;  %v8634_v40 = vmax.f32 %v8598_v37, 0.0  ;;  %v22719_v34 = vadd.f32 %v21734_v0, %v27110_v27  ;;  %v8425_v59 = vpop.f32.mrb[13].mxu1  ;;  %v8824_v58 = vld [vmem:[#allocation3 + $0x31] sm:$0xff]  ;;  %v8825_v43 = vld [vmem:[#allocation3 + $0x39] sm:$0xff] }
 0x6b3   : > { %8746 = vst.msk [vmem:[#allocation3 + $0x53] sm:$0xff] %vm8695_vm4, %v8667_v54  ;;  %v8633_v5 = vmax.f32 %v8597_v35, 0.0  ;;  %v22720_v20 = vadd.f32 %v8425_v59, %v27112_v45  ;;  %21793 = vmatprep.mubr.msk.f32.mxu0 %vm8695_vm4, %v8824_v58 }
 0x6b4   : > { %v8670_v48 = vmul.f32 %v8634_v40, %v26381_v17  ;;  %v8600_v30 = vadd.f32 %v22719_v34, %v27267_v56  ;;  %21794 = vmatmul.mubr.msk.f32.gmra.mrb[78].mxu0 %vm8695_vm4, %v8825_v43  ;;  %v28697_v43 = vld [vmem:[#allocation36_spill] sm:$0xff] }
 0x6b5   : > { %v8669_v22 = vmul.f32 %v8633_v5, %v26383_v19  ;;  %v8599_v27 = vadd.f32 %v22720_v20, %v27267_v56  ;;  %v21737_v3 = vpop.f32.mrb[14].mxu1 }
 0x6b6   : > { %8749 = vst.msk [vmem:[#allocation3 + $0x6b] sm:$0xff] %vm8695_vm4, %v8670_v48  ;;  %v8636_v47 = vmax.f32 %v8600_v30, 0.0  ;;  %v22721_v1 = vadd.f32 %v21737_v3, %v27116_v18  ;;  %v8435_v36 = vpop.f32.mrb[15].mxu1  ;;  %v8826_v45 = vld [vmem:[#allocation3 + $0x41] sm:$0xff]  ;;  %v8827_v44 = vld [vmem:[#allocation3 + $0x49] sm:$0xff] }
 0x6b7   : > { %8748 = vst.msk [vmem:[#allocation3 + $0x63] sm:$0xff] %vm8695_vm4, %v8669_v22  ;;  %v8635_v39 = vmax.f32 %v8599_v27, 0.0  ;;  %v22722_v23 = vadd.f32 %v8435_v36, %v27118_v50  ;;  %21796 = vmatprep.mubr.msk.f32.mxu0 %vm8695_vm4, %v8826_v45 }
 0x6b8   : > { %v8672_v16 = vmul.f32 %v8636_v47, %v26389_v29  ;;  %v8602_v41 = vadd.f32 %v22721_v1, %v27267_v56  ;;  %21797 = vmatmul.mubr.msk.f32.gmra.mrb[80].mxu0 %vm8695_vm4, %v8827_v44  ;;  %v28698_v1 = vld [vmem:[#allocation37_spill] sm:$0xff]  ;;  %v28699_v44 = vld [vmem:[#allocation38_spill] sm:$0xff] }
 0x6b9   : > { %v8671_v53 = vmul.f32 %v8635_v39, %v26393_v32  ;;  %v8601_v18 = vadd.f32 %v22722_v23, %v27267_v56  ;;  %v21740_v57 = vpop.f32.mrb[16].mxu1 }
 0x6ba   : > { %8751 = vst.msk [vmem:[#allocation3 + $0x7b] sm:$0xff] %vm8695_vm4, %v8672_v16  ;;  %v8638_v37 = vmax.f32 %v8602_v41, 0.0  ;;  %v22723_v54 = vadd.f32 %v21740_v57, %v27122_v26  ;;  %v8445_v35 = vpop.f32.mrb[17].mxu1  ;;  %v8828_v50 = vld [vmem:[#allocation3 + $0x51] sm:$0xff]  ;;  %v8829_v0 = vld [vmem:[#allocation3 + $0x59] sm:$0xff] }
 0x6bb   : > { %8750 = vst.msk [vmem:[#allocation3 + $0x73] sm:$0xff] %vm8695_vm4, %v8671_v53  ;;  %v8637_v40 = vmax.f32 %v8601_v18, 0.0  ;;  %v22724_v34 = vadd.f32 %v8445_v35, %v27124_v2  ;;  %21799 = vmatprep.mubr.msk.f32.mxu0 %vm8695_vm4, %v8828_v50 }
 0x6bc   : > { %v8674_v59 = vmul.f32 %v8638_v37, %v26402_v42  ;;  %v8604_v58 = vadd.f32 %v22723_v54, %v27267_v56  ;;  %21800 = vmatmul.mubr.msk.f32.gmra.mrb[82].mxu0 %vm8695_vm4, %v8829_v0  ;;  %v28700_v54 = vld [vmem:[#allocation39_spill] sm:$0xff]  ;;  %v28701_v0 = vld [vmem:[#allocation40_spill] sm:$0xff] }
 0x6bd   : > { %v8673_v5 = vmul.f32 %v8637_v40, %v28697_v43  ;;  %v8603_v26 = vadd.f32 %v22724_v34, %v27267_v56  ;;  %v21743_v20 = vpop.f32.mrb[18].mxu1 }
 0x6be   : > { %8753 = vst.msk [vmem:[#allocation3 + $0x8b] sm:$0xff] %vm8695_vm4, %v8674_v59  ;;  %v8640_v48 = vmax.f32 %v8604_v58, 0.0  ;;  %v22725_v30 = vadd.f32 %v21743_v20, %v27128_v49  ;;  %v8455_v22 = vpop.f32.mrb[19].mxu1  ;;  %v8830_v2 = vld [vmem:[#allocation3 + $0x61] sm:$0xff]  ;;  %v8831_v27 = vld [vmem:[#allocation3 + $0x69] sm:$0xff] }
 0x6bf   : > { %8752 = vst.msk [vmem:[#allocation3 + $0x83] sm:$0xff] %vm8695_vm4, %v8673_v5  ;;  %v8639_v3 = vmax.f32 %v8603_v26, 0.0  ;;  %v22726_v47 = vadd.f32 %v8455_v22, %v27130_v55  ;;  %21802 = vmatprep.mubr.msk.f32.mxu0 %vm8695_vm4, %v8830_v2 }
 0x6c0   : > { %v8676_v36 = vmul.f32 %v8640_v48, %v28698_v1  ;;  %v8606_v45 = vadd.f32 %v22725_v30, %v27267_v56  ;;  %21803 = vmatmul.mubr.msk.f32.gmra.mrb[84].mxu0 %vm8695_vm4, %v8831_v27  ;;  %v28702_v30 = vld [vmem:[#allocation41_spill] sm:$0xff]  ;;  %v28703_v27 = vld [vmem:[#allocation42_spill] sm:$0xff] }
 0x6c1   : > { %v8675_v39 = vmul.f32 %v8639_v3, %v28699_v44  ;;  %v8605_v49 = vadd.f32 %v22726_v47, %v27267_v56  ;;  %v21746_v23 = vpop.f32.mrb[20].mxu1 }
 0x6c2   : > { %8755 = vst.msk [vmem:[#allocation3 + $0x9b] sm:$0xff] %vm8695_vm4, %v8676_v36  ;;  %v8642_v16 = vmax.f32 %v8606_v45, 0.0  ;;  %v22727_v41 = vadd.f32 %v21746_v23, %v27134_v31  ;;  %v8465_v53 = vpop.f32.mrb[21].mxu1  ;;  %v8832_v55 = vld [vmem:[#allocation3 + $0x71] sm:$0xff]  ;;  %v8833_v18 = vld [vmem:[#allocation3 + $0x79] sm:$0xff] }
 0x6c3   : > { %8754 = vst.msk [vmem:[#allocation3 + $0x93] sm:$0xff] %vm8695_vm4, %v8675_v39  ;;  %v8641_v57 = vmax.f32 %v8605_v49, 0.0  ;;  %v22728_v37 = vadd.f32 %v8465_v53, %v27136_v51  ;;  %21805 = vmatprep.mubr.msk.f32.mxu0 %vm8695_vm4, %v8832_v55 }
 0x6c4   : > { %v8678_v35 = vmul.f32 %v8642_v16, %v28700_v54  ;;  %v8608_v50 = vadd.f32 %v22727_v41, %v27267_v56  ;;  %21806 = vmatmul.mubr.msk.f32.gmra.mrb[86].mxu0 %vm8695_vm4, %v8833_v18  ;;  %v28704_v41 = vld [vmem:[#allocation43_spill] sm:$0xff]  ;;  %v28705_v18 = vld [vmem:[#allocation44_spill] sm:$0xff] }
 0x6c5   : > { %v8677_v40 = vmul.f32 %v8641_v57, %v28701_v0  ;;  %v8607_v31 = vadd.f32 %v22728_v37, %v27267_v56  ;;  %v21749_v34 = vpop.f32.mrb[22].mxu1 }
 0x6c6   : > { %8757 = vst.msk [vmem:[#allocation3 + $0xab] sm:$0xff] %vm8695_vm4, %v8678_v35  ;;  %v8644_v59 = vmax.f32 %v8608_v50, 0.0  ;;  %v22729_v58 = vadd.f32 %v21749_v34, %v27140_v62  ;;  %v8475_v5 = vpop.f32.mrb[23].mxu1  ;;  %v8834_v51 = vld [vmem:[#allocation3 + $0x81] sm:$0xff]  ;;  %v8835_v26 = vld [vmem:[#allocation3 + $0x89] sm:$0xff] }
 0x6c7   : > { %8756 = vst.msk [vmem:[#allocation3 + $0xa3] sm:$0xff] %vm8695_vm4, %v8677_v40  ;;  %v8643_v20 = vmax.f32 %v8607_v31, 0.0  ;;  %v22730_v48 = vadd.f32 %v8475_v5, %v27142_v24  ;;  %21808 = vmatprep.mubr.msk.f32.mxu0 %vm8695_vm4, %v8834_v51 }
 0x6c8   : > { %v8680_v22 = vmul.f32 %v8644_v59, %v28702_v30  ;;  %v8610_v2 = vadd.f32 %v22729_v58, %v27267_v56  ;;  %21809 = vmatmul.mubr.msk.f32.gmra.mrb[88].mxu0 %vm8695_vm4, %v8835_v26  ;;  %v28706_v58 = vld [vmem:[#allocation45_spill] sm:$0xff]  ;;  %v28707_v26 = vld [vmem:[#allocation46_spill] sm:$0xff] }
 0x6c9   : > { %v8679_v3 = vmul.f32 %v8643_v20, %v28703_v27  ;;  %v8609_v62 = vadd.f32 %v22730_v48, %v27267_v56  ;;  %v21752_v47 = vpop.f32.mrb[24].mxu1  ;;  %v10481_v27 = vld [vmem:[#allocation13 + $0x138] sm:$0xff] }
 0x6ca   : > { %8759 = vst.msk [vmem:[#allocation3 + $0xbb] sm:$0xff] %vm8695_vm4, %v8680_v22  ;;  %v8646_v36 = vmax.f32 %v8610_v2, 0.0  ;;  %v22731_v45 = vadd.f32 %v21752_v47, %v27146_v25  ;;  %v8485_v39 = vpop.f32.mrb[25].mxu1  ;;  %v8836_v24 = vld [vmem:[#allocation3 + $0x91] sm:$0xff]  ;;  %v8837_v49 = vld [vmem:[#allocation3 + $0x99] sm:$0xff] }
 0x6cb   : > { %8758 = vst.msk [vmem:[#allocation3 + $0xb3] sm:$0xff] %vm8695_vm4, %v8679_v3  ;;  %v8645_v23 = vmax.f32 %v8609_v62, 0.0  ;;  %v22732_v16 = vadd.f32 %v8485_v39, %v27148_v52  ;;  %21811 = vmatprep.mubr.msk.f32.mxu0 %vm8695_vm4, %v8836_v24 }
 0x6cc   : > { %v8682_v53 = vmul.f32 %v8646_v36, %v28704_v41  ;;  %v8612_v55 = vadd.f32 %v22731_v45, %v27267_v56  ;;  %21812 = vmatmul.mubr.msk.f32.gmra.mrb[90].mxu0 %vm8695_vm4, %v8837_v49  ;;  %v28708_v45 = vld [vmem:[#allocation47_spill] sm:$0xff]  ;;  %v28709_v49 = vld [vmem:[#allocation48_spill] sm:$0xff]  ;;  %v10480_v41 = vld [vmem:[#allocation13 + $0x130] sm:$0xff] }
 0x6cd   : > { %v8681_v57 = vmul.f32 %v8645_v23, %v28705_v18  ;;  %v8611_v25 = vadd.f32 %v22732_v16, %v27267_v56  ;;  %v21755_v37 = vpop.f32.mrb[26].mxu1 }
 0x6ce   : > { %8761 = vst.msk [vmem:[#allocation3 + $0xcb] sm:$0xff] %vm8695_vm4, %v8682_v53  ;;  %v8648_v35 = vmax.f32 %v8612_v55, 0.0  ;;  %v22733_v50 = vadd.f32 %v21755_v37, %v27152_v60  ;;  %v8495_v40 = vpop.f32.mrb[27].mxu1  ;;  %v8838_v52 = vld [vmem:[#allocation3 + $0xa1] sm:$0xff]  ;;  %v8839_v31 = vld [vmem:[#allocation3 + $0xa9] sm:$0xff] }
 0x6cf   : > { %8760 = vst.msk [vmem:[#allocation3 + $0xc3] sm:$0xff] %vm8695_vm4, %v8681_v57  ;;  %v8647_v34 = vmax.f32 %v8611_v25, 0.0  ;;  %v22734_v59 = vadd.f32 %v8495_v40, %v27154_v4  ;;  %21814 = vmatprep.mubr.msk.f32.mxu0 %vm8695_vm4, %v8838_v52 }
 0x6d0   : > { %v8684_v5 = vmul.f32 %v8648_v35, %v28706_v58  ;;  %v8614_v51 = vadd.f32 %v22733_v50, %v27267_v56  ;;  %21815 = vmatmul.mubr.msk.f32.gmra.mrb[92].mxu0 %vm8695_vm4, %v8839_v31  ;;  %v28710_v50 = vld [vmem:[#allocation49_spill] sm:$0xff]  ;;  %v28711_v31 = vld [vmem:[#allocation50_spill] sm:$0xff] }
 0x6d1   : > { %v8683_v20 = vmul.f32 %v8647_v34, %v28707_v26  ;;  %v8613_v60 = vadd.f32 %v22734_v59, %v27267_v56  ;;  %v21758_v48 = vpop.f32.mrb[28].mxu1  ;;  %v10478_v26 = vld [vmem:[#allocation13 + $0x120] sm:$0xff]  ;;  %v10479_v58 = vld [vmem:[#allocation13 + $0x128] sm:$0xff] }
 0x6d2   : > { %8763 = vst.msk [vmem:[#allocation3 + $0xdb] sm:$0xff] %vm8695_vm4, %v8684_v5  ;;  %v8650_v22 = vmax.f32 %v8614_v51, 0.0  ;;  %v22735_v2 = vadd.f32 %v21758_v48, %v27158_v61  ;;  %v8505_v3 = vpop.f32.mrb[29].mxu1  ;;  %v8840_v4 = vld [vmem:[#allocation3 + $0xb1] sm:$0xff]  ;;  %v8841_v62 = vld [vmem:[#allocation3 + $0xb9] sm:$0xff]  ;;  %v22565_v18 = vpack.c.bf16 %v10479_v58, %v10478_v26 }
 0x6d3   : > { %8762 = vst.msk [vmem:[#allocation3 + $0xd3] sm:$0xff] %vm8695_vm4, %v8683_v20  ;;  %v8649_v47 = vmax.f32 %v8613_v60, 0.0  ;;  %v22736_v36 = vadd.f32 %v8505_v3, %v27160_v46  ;;  %21817 = vmatprep.mubr.msk.f32.mxu0 %vm8695_vm4, %v8840_v4  ;;  %v10911_v26 = vld [vmem:[#allocation13 + $0x158] sm:$0xff] }
 0x6d4   : > { %v8686_v39 = vmul.f32 %v8650_v22, %v28708_v45  ;;  %v8616_v24 = vadd.f32 %v22735_v2, %v27267_v56  ;;  %21818 = vmatmul.mubr.msk.f32.gmra.mrb[94].mxu0 %vm8695_vm4, %v8841_v62  ;;  %v28712_v2 = vld [vmem:[#allocation51_spill] sm:$0xff]  ;;  %v28713_v62 = vld [vmem:[#allocation52_spill] sm:$0xff] }
 0x6d5   : > { %v8685_v23 = vmul.f32 %v8649_v47, %v28709_v49  ;;  %v8615_v61 = vadd.f32 %v22736_v36, %v27267_v56  ;;  %v21761_v16 = vpop.f32.mrb[30].mxu1  ;;  %v10477_v49 = vld [vmem:[#allocation13 + $0x118] sm:$0xff] }
 0x6d6   : > { %8765 = vst.msk [vmem:[#allocation3 + $0xeb] sm:$0xff] %vm8695_vm4, %v8686_v39  ;;  %v8652_v53 = vmax.f32 %v8616_v24, 0.0  ;;  %v22737_v55 = vadd.f32 %v21761_v16, %v27164_v33  ;;  %v8515_v57 = vpop.f32.mrb[31].mxu1  ;;  %v8842_v46 = vld [vmem:[#allocation3 + $0xc1] sm:$0xff]  ;;  %v8843_v25 = vld [vmem:[#allocation3 + $0xc9] sm:$0xff] }
 0x6d7   : > { %8764 = vst.msk [vmem:[#allocation3 + $0xe3] sm:$0xff] %vm8695_vm4, %v8685_v23  ;;  %v8651_v37 = vmax.f32 %v8615_v61, 0.0  ;;  %v22738_v35 = vadd.f32 %v8515_v57, %v27166_v28  ;;  %21820 = vmatprep.mubr.msk.f32.mxu0 %vm8695_vm4, %v8842_v46  ;;  %v28714_v24 = vld [vmem:[#allocation57_spill] sm:$0xff] }
 0x6d8   : > { %v8688_v40 = vmul.f32 %v8652_v53, %v28710_v50  ;;  %v8618_v52 = vadd.f32 %v22737_v55, %v27267_v56  ;;  %21821 = vmatmul.mubr.msk.f32.gmra.mrb[96].mxu0 %vm8695_vm4, %v8843_v25  ;;  %v28715_v55 = vld [vmem:[#allocation58_spill] sm:$0xff]  ;;  %v28716_v46 = vld [vmem:[#allocation53_spill] sm:$0xff] }
 0x6d9   : > { %v8687_v34 = vmul.f32 %v8651_v37, %v28711_v31  ;;  %v8617_v33 = vadd.f32 %v22738_v35, %v27267_v56  ;;  %v21764_v59 = vpop.f32.mrb[32].mxu1  ;;  %v28717_v35 = vld [vmem:[#allocation54_spill] sm:$0xff] }
 0x6da   : > { %8767 = vst.msk [vmem:[#allocation3 + $0xfb] sm:$0xff] %vm8695_vm4, %v8688_v40  ;;  %v8654_v5 = vmax.f32 %v8618_v52, 0.0  ;;  %v22739_v51 = vadd.f32 %v21764_v59, %v27170_v38  ;;  %v8525_v20 = vpop.f32.mrb[33].mxu1  ;;  %v8844_v28 = vld [vmem:[#allocation3 + $0xd1] sm:$0xff]  ;;  %v8845_v60 = vld [vmem:[#allocation3 + $0xd9] sm:$0xff]  ;;  %v10476_v50 = vld [vmem:[#allocation13 + $0x110] sm:$0xff] }
 0x6db   : > { %8766 = vst.msk [vmem:[#allocation3 + $0xf3] sm:$0xff] %vm8695_vm4, %v8687_v34  ;;  %v8653_v48 = vmax.f32 %v8617_v33, 0.0  ;;  %v22740_v22 = vadd.f32 %v8525_v20, %v27172_v21  ;;  %21823 = vmatprep.mubr.msk.f32.mxu0 %vm8695_vm4, %v8844_v28  ;;  %v28719_v28 = vld [vmem:[#allocation56_spill] sm:$0xff]  ;;  %v22561_v45 = vpack.c.bf16 %v10477_v49, %v10476_v50  ;;  %v22569_v49 = vpack.c.bf16 %v10481_v27, %v10480_v41 }
 0x6dc   : > { %v8690_v3 = vmul.f32 %v8654_v5, %v28712_v2  ;;  %v8620_v4 = vadd.f32 %v22739_v51, %v27267_v56  ;;  %21824 = vmatmul.mubr.msk.f32.gmra.mrb[98].mxu0 %vm8695_vm4, %v8845_v60  ;;  %v28718_v51 = vld [vmem:[#allocation55_spill] sm:$0xff]  ;;  %v10908_v50 = vld [vmem:[#allocation13 + $0x140] sm:$0xff] }
 0x6dd   : > { %v8689_v47 = vmul.f32 %v8653_v48, %v28713_v62  ;;  %v8619_v38 = vadd.f32 %v22740_v22, %v27267_v56  ;;  %v21767_v36 = vpop.f32.mrb[34].mxu1 }
 0x6de   : > { %8769 = vst.msk [vmem:[#allocation3 + $0x10b] sm:$0xff] %vm8695_vm4, %v8690_v3  ;;  %v8656_v39 = vmax.f32 %v8620_v4, 0.0  ;;  %v22741_v23 = vadd.f32 %v21767_v36, %v28714_v24  ;;  %v8535_v61 = vpop.f32.mrb[35].mxu1  ;;  %v8846_v21 = vld [vmem:[#allocation3 + $0xe1] sm:$0xff]  ;;  %v8847_v16 = vld [vmem:[#allocation3 + $0xe9] sm:$0xff]  ;;  %v9610_v24 = vld [vmem:[#allocation13 + $0xa0] sm:$0xff] }
 0x6df   : > { %8768 = vst.msk [vmem:[#allocation3 + $0x103] sm:$0xff] %vm8695_vm4, %v8689_v47  ;;  %v8655_v53 = vmax.f32 %v8619_v38, 0.0  ;;  %v22742_v57 = vadd.f32 %v8535_v61, %v28715_v55  ;;  %21826 = vmatprep.mubr.msk.f32.mxu0 %vm8695_vm4, %v8846_v21  ;;  %v8774_v4 = vld [vmem:[#allocation3] sm:$0xff]  ;;  %v9609_v38 = vld [vmem:[#allocation13 + $0x98] sm:$0xff] }
 0x6e0   : > { %v8692_v25 = vmul.f32 %v8656_v39, %v28716_v46  ;;  %v8622_v37 = vadd.f32 %v22741_v23, %v27267_v56  ;;  %21827 = vmatmul.mubr.msk.f32.gmra.mrb[100].mxu0 %vm8695_vm4, %v8847_v16  ;;  %v9608_v47 = vld [vmem:[#allocation13 + $0x90] sm:$0xff]  ;;  %v9611_v23 = vld [vmem:[#allocation13 + $0xa8] sm:$0xff]  ;;  %v8776_v61 = vld [vmem:[#allocation3 + $0x10] sm:$0xff] }
 0x6e1   : > { %v8691_v40 = vmul.f32 %v8655_v53, %v28717_v35  ;;  %v8621_v52 = vadd.f32 %v22742_v57, %v27267_v56  ;;  %v8775_v36 = vld [vmem:[#allocation3 + $0x8] sm:$0xff]  ;;  %v22529_v39 = vpack.c.bf16 %v9609_v38, %v9608_v47  ;;  %v22533_v21 = vpack.c.bf16 %v9611_v23, %v9610_v24  ;;  %v8777_v16 = vld [vmem:[#allocation3 + $0x18] sm:$0xff]  ;;  %v8778_v57 = vld [vmem:[#allocation3 + $0x20] sm:$0xff] }
 0x6e2   : > { %8771 = vst.msk [vmem:[#allocation3 + $0x11b] sm:$0xff] %vm8695_vm4, %v8692_v25  ;;  %v8658_v34 = vmax.f32 %v8622_v37, 0.0  ;;  %v8848_v33 = vld [vmem:[#allocation3 + $0xf1] sm:$0xff]  ;;  %v8849_v59 = vld [vmem:[#allocation3 + $0xf9] sm:$0xff]  ;;  %v9612_v53 = vld [vmem:[#allocation13 + $0xb0] sm:$0xff] }
 0x6e3   : > { %8770 = vst.msk [vmem:[#allocation3 + $0x113] sm:$0xff] %vm8695_vm4, %v8691_v40  ;;  %v8657_v5 = vmax.f32 %v8621_v52, 0.0  ;;  %21829 = vmatprep.mubr.msk.f32.mxu0 %vm8695_vm4, %v8848_v33  ;;  %v9613_v55 = vld [vmem:[#allocation13 + $0xb8] sm:$0xff]  ;;  %v10040_v40 = vld [vmem:[#allocation13 + $0xc0] sm:$0xff]  ;;  %v10041_v52 = vld [vmem:[#allocation13 + $0xc8] sm:$0xff] }
 0x6e4   : > { %v8694_v20 = vmul.f32 %v8658_v34, %v28718_v51  ;;  %21830 = vmatmul.mubr.msk.f32.gmra.mrb[102].mxu0 %vm8695_vm4, %v8849_v59  ;;  %v22537_v25 = vpack.c.bf16 %v9613_v55, %v9612_v53  ;;  %v8779_v37 = vld [vmem:[#allocation3 + $0x28] sm:$0xff]  ;;  %v8780_v34 = vld [vmem:[#allocation3 + $0x30] sm:$0xff]  ;;  %v8781_v33 = vld [vmem:[#allocation3 + $0x38] sm:$0xff] }
 0x6e5   : > { %v8693_v60 = vmul.f32 %v8657_v5, %v28719_v28  ;;  %v8782_v59 = vld [vmem:[#allocation3 + $0x40] sm:$0xff]  ;;  %v8783_v5 = vld [vmem:[#allocation3 + $0x48] sm:$0xff]  ;;  %v8792_v38 = vld [vmem:[#allocation3 + $0x90] sm:$0xff] }
 0x6e6   : > { %8773 = vst.msk [vmem:[#allocation3 + $0x12b] sm:$0xff] %vm8695_vm4, %v8694_v20  ;;  %v8850_v48 = vld [vmem:[#allocation3 + $0x101] sm:$0xff]  ;;  %v8851_v56 = vld [vmem:[#allocation3 + $0x109] sm:$0xff]  ;;  %v8801_v55 = vld [vmem:[#allocation3 + $0xd8] sm:$0xff] }
 0x6e7   : > { %8772 = vst.msk [vmem:[#allocation3 + $0x123] sm:$0xff] %vm8695_vm4, %v8693_v60  ;;  %21832 = vmatprep.mubr.msk.f32.mxu0 %vm8695_vm4, %v8850_v48  ;;  %v8784_v20 = vld [vmem:[#allocation3 + $0x50] sm:$0xff]  ;;  %v8785_v60 = vld [vmem:[#allocation3 + $0x58] sm:$0xff]  ;;  %v8786_v48 = vld [vmem:[#allocation3 + $0x60] sm:$0xff] }
 0x6e8   : > { %21833 = vmatmul.mubr.msk.f32.gmra.mrb[104].mxu0 %vm8695_vm4, %v8851_v56  ;;  %v8787_v56 = vld [vmem:[#allocation3 + $0x68] sm:$0xff]  ;;  %v8796_v23 = vld [vmem:[#allocation3 + $0xb0] sm:$0xff]  ;;  %v9600_v35 = vld [vmem:[#allocation3 + $0xfa] sm:$0xff] }
 0x6e9   : > { %v8791_v47 = vld [vmem:[#allocation3 + $0x88] sm:$0xff]  ;;  %v8800_v53 = vld [vmem:[#allocation3 + $0xd0] sm:$0xff] }
 0x6ea   : > { %v8852_v22 = vld [vmem:[#allocation3 + $0x111] sm:$0xff]  ;;  %v8853_v3 = vld [vmem:[#allocation3 + $0x119] sm:$0xff]  ;;  %v8795_v24 = vld [vmem:[#allocation3 + $0xa8] sm:$0xff] }
 0x6eb   : > { %21835 = vmatprep.mubr.msk.f32.mxu0 %vm8695_vm4, %v8852_v22  ;;  %v8788_v22 = vld [vmem:[#allocation3 + $0x70] sm:$0xff]  ;;  %v9601_v46 = vld [vmem:[#allocation3 + $0x102] sm:$0xff]  ;;  %v9604_v31 = vld [vmem:[#allocation3 + $0x11a] sm:$0xff] }
 0x6ec   : > { %21836 = vmatmul.mubr.msk.f32.gmra.mrb[106].mxu0 %vm8695_vm4, %v8853_v3  ;;  %v8789_v3 = vld [vmem:[#allocation3 + $0x78] sm:$0xff]  ;;  %v9598_v28 = vld [vmem:[#allocation3 + $0xea] sm:$0xff] }
 0x6ed   : > { %21854 = vmatprep.mubr.msk.f32.mxu0 %vm8695_vm4, %v8774_v4  ;;  %v8790_v4 = vld [vmem:[#allocation3 + $0x80] sm:$0xff]  ;;  %v9599_v51 = vld [vmem:[#allocation3 + $0xf2] sm:$0xff]  ;;  %v9602_v62 = vld [vmem:[#allocation3 + $0x10a] sm:$0xff] }
 0x6ee   : > { %v9603_v2 = vld [vmem:[#allocation3 + $0x112] sm:$0xff]  ;;  %v10037_v27 = vld [vmem:[#allocation3 + $0x122] sm:$0xff]  ;;  %v10038_v41 = vld [vmem:[#allocation3 + $0x12a] sm:$0xff] }
 0x6f0   : > { %21855 = vmatmul.mubr.msk.f32.vlgmr.msra.gmra.mrb[72].mxu0 %vm8695_vm4, %v8775_v36  ;;  %v8793_v36 = vld [vmem:[#allocation3 + $0x98] sm:$0xff] }
 0x6f1   : > { %21857 = vmatprep.mubr.msk.f32.mxu0 %vm8695_vm4, %v8776_v61  ;;  %22528 = vmatpush3.bf16.msra.mxu0 %v27269_v63  ;;  %v27458_v63 = vpack.c.bf16 %v10041_v52, %v10040_v40  ;;  %v8797_v61 = vld [vmem:[#allocation3 + $0xb8] sm:$0xff]  ;;  %v8806_v52 = vld [vmem:[#allocation3 + $0x100] sm:$0xff] }
 0x6f2   : > { %22530 = vmatprep.subr.bf16.mxu0 %v22529_v39  ;;  %v8805_v40 = vld [vmem:[#allocation3 + $0xf8] sm:$0xff] }
 0x6f4   : > { %21858 = vmatmul.mubr.msk.f32.gmra.mrb[74].mxu0 %vm8695_vm4, %v8777_v16  ;;  %v8799_v16 = vld [vmem:[#allocation3 + $0xc8] sm:$0xff] }
 0x6f5   : > { %21860 = vmatprep.mubr.msk.f32.mxu0 %vm8695_vm4, %v8778_v57  ;;  %22532 = vmatpush3.bf16.msra.mxu0 %v22529_v39  ;;  %v8794_v39 = vld [vmem:[#allocation3 + $0xa0] sm:$0xff] }
 0x6f6   : > { %22534 = vmatprep.subr.bf16.mxu0 %v22533_v21  ;;  %v8802_v57 = vld [vmem:[#allocation3 + $0xe0] sm:$0xff] }
 0x6f8   : > { %21861 = vmatmul.mubr.msk.f32.gmra.mrb[76].mxu0 %vm8695_vm4, %v8779_v37  ;;  %v8804_v37 = vld [vmem:[#allocation3 + $0xf0] sm:$0xff] }
 0x6f9   : > { %21863 = vmatprep.mubr.msk.f32.mxu0 %vm8695_vm4, %v8780_v34  ;;  %22536 = vmatpush3.bf16.msra.mxu0 %v22533_v21  ;;  %v8798_v21 = vld [vmem:[#allocation3 + $0xc0] sm:$0xff]  ;;  %v8807_v34 = vld [vmem:[#allocation3 + $0x108] sm:$0xff] }
 0x6fa   : > { %22538 = vmatprep.subr.bf16.mxu0 %v22537_v25 }
 0x6fc   : > { %21864 = vmatmul.mubr.msk.f32.gmra.mrb[78].mxu0 %vm8695_vm4, %v8781_v33  ;;  %v8808_v33 = vld [vmem:[#allocation3 + $0x110] sm:$0xff] }
 0x6fd   : > { %21866 = vmatprep.mubr.msk.f32.mxu0 %vm8695_vm4, %v8782_v59  ;;  %22540 = vmatpush3.bf16.msra.mxu0 %v22537_v25  ;;  %v8803_v25 = vld [vmem:[#allocation3 + $0xe8] sm:$0xff] }
 0x6fe   : > { %22542 = vmatprep.subr.bf16.mxu0 %v27458_v63  ;;  %v9569_v59 = vld [vmem:[#allocation3 + $0x2] sm:$0xff] }
 0x700   : > { %21867 = vmatmul.mubr.msk.f32.gmra.mrb[80].mxu0 %vm8695_vm4, %v8783_v5  ;;  %v8809_v5 = vld [vmem:[#allocation3 + $0x118] sm:$0xff] }
 0x701   : > { %21869 = vmatprep.mubr.msk.f32.mxu0 %vm8695_vm4, %v8784_v20  ;;  %v10042_v20 = vld [vmem:[#allocation13 + $0xd0] sm:$0xff] }
 0x704   : > { %21870 = vmatmul.mubr.msk.f32.gmra.mrb[82].mxu0 %vm8695_vm4, %v8785_v60  ;;  %v10043_v60 = vld [vmem:[#allocation13 + $0xd8] sm:$0xff] }
 0x705   : > { %21872 = vmatprep.mubr.msk.f32.mxu0 %vm8695_vm4, %v8786_v48  ;;  %v9570_v48 = vld [vmem:[#allocation3 + $0xa] sm:$0xff] }
 0x708   : > { %21873 = vmatmul.mubr.msk.f32.gmra.mrb[84].mxu0 %vm8695_vm4, %v8787_v56  ;;  %v22545_v56 = vpack.c.bf16 %v10043_v60, %v10042_v20  ;;  %v27556_v20 = vld [vmem:[#allocation3 + $0x8a] sm:$0xff]  ;;  %v27560_v60 = vld [vmem:[#allocation3 + $0x92] sm:$0xff] }
 0x709   : > { %21875 = vmatprep.mubr.msk.f32.mxu0 %vm8695_vm4, %v8788_v22  ;;  %v10044_v22 = vld [vmem:[#allocation13 + $0xe0] sm:$0xff] }
 0x70c   : > { %21876 = vmatmul.mubr.msk.f32.gmra.mrb[86].mxu0 %vm8695_vm4, %v8789_v3  ;;  %v10045_v3 = vld [vmem:[#allocation13 + $0xe8] sm:$0xff] }
 0x70d   : > { %21878 = vmatprep.mubr.msk.f32.mxu0 %vm8695_vm4, %v8790_v4  ;;  %v27492_v4 = vld [vmem:[#allocation3 + $0x12] sm:$0xff] }
 0x710   : > { %21879 = vmatmul.mubr.msk.f32.gmra.mrb[88].mxu0 %vm8695_vm4, %v8791_v47  ;;  %v22549_v47 = vpack.c.bf16 %v10045_v3, %v10044_v22  ;;  %v27572_v22 = vld [vmem:[#allocation3 + $0xaa] sm:$0xff]  ;;  %v27576_v3 = vld [vmem:[#allocation3 + $0xb2] sm:$0xff] }
 0x711   : > { %21881 = vmatprep.mubr.msk.f32.mxu0 %vm8695_vm4, %v8792_v38  ;;  %v27497_v38 = vld [vmem:[#allocation3 + $0x1a] sm:$0xff] }
 0x714   : > { %21882 = vmatmul.mubr.msk.f32.gmra.mrb[90].mxu0 %vm8695_vm4, %v8793_v36  ;;  %v10046_v36 = vld [vmem:[#allocation13 + $0xf0] sm:$0xff] }
 0x715   : > { %21884 = vmatprep.mubr.msk.f32.mxu0 %vm8695_vm4, %v8794_v39  ;;  %v10047_v39 = vld [vmem:[#allocation13 + $0xf8] sm:$0xff] }
 0x718   : > { %21885 = vmatmul.mubr.msk.f32.gmra.mrb[92].mxu0 %vm8695_vm4, %v8795_v24  ;;  %v27501_v24 = vld [vmem:[#allocation3 + $0x22] sm:$0xff] }
 0x719   : > { %21887 = vmatprep.mubr.msk.f32.mxu0 %vm8695_vm4, %v8796_v23  ;;  %v22553_v23 = vpack.c.bf16 %v10047_v39, %v10046_v36  ;;  %v27584_v36 = vld [vmem:[#allocation3 + $0xc2] sm:$0xff]  ;;  %v27588_v39 = vld [vmem:[#allocation3 + $0xca] sm:$0xff] }
 0x71c   : > { %21888 = vmatmul.mubr.msk.f32.gmra.mrb[94].mxu0 %vm8695_vm4, %v8797_v61  ;;  %v27505_v61 = vld [vmem:[#allocation3 + $0x2a] sm:$0xff] }
 0x71d   : > { %21890 = vmatprep.mubr.msk.f32.mxu0 %vm8695_vm4, %v8798_v21  ;;  %v10475_v21 = vld [vmem:[#allocation13 + $0x108] sm:$0xff] }
 0x720   : > { %21891 = vmatmul.mubr.msk.f32.gmra.mrb[96].mxu0 %vm8695_vm4, %v8799_v16  ;;  %v27509_v16 = vld [vmem:[#allocation3 + $0x32] sm:$0xff] }
 0x721   : > { %21893 = vmatprep.mubr.msk.f32.mxu0 %vm8695_vm4, %v8800_v53 }
 0x724   : > { %21894 = vmatmul.mubr.msk.f32.gmra.mrb[98].mxu0 %vm8695_vm4, %v8801_v55  ;;  %v27515_v55 = vld [vmem:[#allocation3 + $0x3a] sm:$0xff] }
 0x725   : > { %21896 = vmatprep.mubr.msk.f32.mxu0 %vm8695_vm4, %v8802_v57  ;;  %v27519_v57 = vld [vmem:[#allocation3 + $0x42] sm:$0xff] }
 0x728   : > { %21897 = vmatmul.mubr.msk.f32.gmra.mrb[100].mxu0 %vm8695_vm4, %v8803_v25  ;;  %v27524_v25 = vld [vmem:[#allocation3 + $0x4a] sm:$0xff] }
 0x729   : > { %21899 = vmatprep.mubr.msk.f32.mxu0 %vm8695_vm4, %v8804_v37  ;;  %v27528_v37 = vld [vmem:[#allocation3 + $0x52] sm:$0xff] }
 0x72c   : > { %21900 = vmatmul.mubr.msk.f32.gmra.mrb[102].mxu0 %vm8695_vm4, %v8805_v40  ;;  %v27532_v40 = vld [vmem:[#allocation3 + $0x5a] sm:$0xff] }
 0x72d   : > { %21902 = vmatprep.mubr.msk.f32.mxu0 %vm8695_vm4, %v8806_v52  ;;  %v27536_v52 = vld [vmem:[#allocation3 + $0x62] sm:$0xff] }
 0x730   : > { %21903 = vmatmul.mubr.msk.f32.gmra.mrb[104].mxu0 %vm8695_vm4, %v8807_v34  ;;  %v27540_v34 = vld [vmem:[#allocation3 + $0x6a] sm:$0xff] }
 0x731   : > { %21905 = vmatprep.mubr.msk.f32.mxu0 %vm8695_vm4, %v8808_v33  ;;  %v27544_v33 = vld [vmem:[#allocation3 + $0x72] sm:$0xff] }
 0x734   : > { %21906 = vmatmul.mubr.msk.f32.gmra.mrb[106].mxu0 %vm8695_vm4, %v8809_v5  ;;  %v27552_v5 = vld [vmem:[#allocation3 + $0x82] sm:$0xff] }
 0x735   : > { %21924 = vmatprep.mubr.msk.f32.mxu0 %vm8695_vm4, %v9569_v59  ;;  %v27548_v59 = vld [vmem:[#allocation3 + $0x7a] sm:$0xff] }
 0x738   : > { %21925 = vmatmul.mubr.msk.f32.vlgmr.msra.gmra.mrb[72].mxu0 %vm8695_vm4, %v9570_v48  ;;  %v27564_v48 = vld [vmem:[#allocation3 + $0x9a] sm:$0xff] }
 0x739   : > { %21927 = vmatprep.mubr.msk.f32.mxu0 %vm8695_vm4, %v27492_v4  ;;  %22544 = vmatpush3.bf16.msra.mxu0 %v27458_v63  ;;  %v10474_v63 = vld [vmem:[#allocation13 + $0x100] sm:$0xff] }
 0x73a   : > { %22546 = vmatprep.subr.bf16.mxu0 %v22545_v56  ;;  %v27513_v53 = vpack.c.bf16 %v10475_v21, %v10474_v63  ;;  %v27596_v63 = vld [vmem:[#allocation3 + $0xda] sm:$0xff]  ;;  %v9597_v21 = vld [vmem:[#allocation3 + $0xe2] sm:$0xff] }
 0x73c   : > { %21928 = vmatmul.mubr.msk.f32.gmra.mrb[74].mxu0 %vm8695_vm4, %v27497_v38 }
 0x73d   : > { %21930 = vmatprep.mubr.msk.f32.mxu0 %vm8695_vm4, %v27501_v24  ;;  %22548 = vmatpush3.bf16.msra.mxu0 %v22545_v56  ;;  %v27568_v56 = vld [vmem:[#allocation3 + $0xa2] sm:$0xff] }
 0x73e   : > { %22550 = vmatprep.subr.bf16.mxu0 %v22549_v47 }
 0x740   : > { %21931 = vmatmul.mubr.msk.f32.gmra.mrb[76].mxu0 %vm8695_vm4, %v27505_v61 }
 0x741   : > { %21933 = vmatprep.mubr.msk.f32.mxu0 %vm8695_vm4, %v27509_v16  ;;  %22552 = vmatpush3.bf16.msra.mxu0 %v22549_v47  ;;  %v27580_v47 = vld [vmem:[#allocation3 + $0xba] sm:$0xff] }
 0x742   : > { %22554 = vmatprep.subr.bf16.mxu0 %v22553_v23 }
 0x744   : > { %21934 = vmatmul.mubr.msk.f32.gmra.mrb[78].mxu0 %vm8695_vm4, %v27515_v55 }
 0x745   : > { %21936 = vmatprep.mubr.msk.f32.mxu0 %vm8695_vm4, %v27519_v57  ;;  %22556 = vmatpush3.bf16.msra.mxu0 %v22553_v23  ;;  %v27592_v23 = vld [vmem:[#allocation3 + $0xd2] sm:$0xff] }
 0x746   : > { %22558 = vmatprep.subr.bf16.mxu0 %v27513_v53 }
 0x748   : > { %21937 = vmatmul.mubr.msk.f32.gmra.mrb[80].mxu0 %vm8695_vm4, %v27524_v25 }
 0x749   : > { %21939 = vmatprep.mubr.msk.f32.mxu0 %vm8695_vm4, %v27528_v37 }
 0x74c   : > { %21940 = vmatmul.mubr.msk.f32.gmra.mrb[82].mxu0 %vm8695_vm4, %v27532_v40 }
 0x74d   : > { %21942 = vmatprep.mubr.msk.f32.mxu0 %vm8695_vm4, %v27536_v52 }
 0x750   : > { %21943 = vmatmul.mubr.msk.f32.gmra.mrb[84].mxu0 %vm8695_vm4, %v27540_v34 }
 0x751   : > { %21945 = vmatprep.mubr.msk.f32.mxu0 %vm8695_vm4, %v27544_v33 }
 0x754   : > { %21946 = vmatmul.mubr.msk.f32.gmra.mrb[86].mxu0 %vm8695_vm4, %v27548_v59 }
 0x755   : > { %21948 = vmatprep.mubr.msk.f32.mxu0 %vm8695_vm4, %v27552_v5 }
 0x758   : > { %21949 = vmatmul.mubr.msk.f32.gmra.mrb[88].mxu0 %vm8695_vm4, %v27556_v20 }
 0x759   : > { %21951 = vmatprep.mubr.msk.f32.mxu0 %vm8695_vm4, %v27560_v60 }
 0x75c   : > { %21952 = vmatmul.mubr.msk.f32.gmra.mrb[90].mxu0 %vm8695_vm4, %v27564_v48 }
 0x75d   : > { %21954 = vmatprep.mubr.msk.f32.mxu0 %vm8695_vm4, %v27568_v56 }
 0x760   : > { %21955 = vmatmul.mubr.msk.f32.gmra.mrb[92].mxu0 %vm8695_vm4, %v27572_v22 }
 0x761   : > { %21957 = vmatprep.mubr.msk.f32.mxu0 %vm8695_vm4, %v27576_v3 }
 0x764   : > { %21958 = vmatmul.mubr.msk.f32.gmra.mrb[94].mxu0 %vm8695_vm4, %v27580_v47 }
 0x765   : > { %21960 = vmatprep.mubr.msk.f32.mxu0 %vm8695_vm4, %v27584_v36 }
 0x768   : > { %21961 = vmatmul.mubr.msk.f32.gmra.mrb[96].mxu0 %vm8695_vm4, %v27588_v39 }
 0x769   : > { %21963 = vmatprep.mubr.msk.f32.mxu0 %vm8695_vm4, %v27592_v23 }
 0x76c   : > { %21964 = vmatmul.mubr.msk.f32.gmra.mrb[98].mxu0 %vm8695_vm4, %v27596_v63 }
 0x76d   : > { %21966 = vmatprep.mubr.msk.f32.mxu0 %vm8695_vm4, %v9597_v21 }
 0x770   : > { %21967 = vmatmul.mubr.msk.f32.gmra.mrb[100].mxu0 %vm8695_vm4, %v9598_v28 }
 0x771   : > { %21969 = vmatprep.mubr.msk.f32.mxu0 %vm8695_vm4, %v9599_v51 }
 0x774   : > { %21970 = vmatmul.mubr.msk.f32.gmra.mrb[102].mxu0 %vm8695_vm4, %v9600_v35 }
 0x775   : > { %21972 = vmatprep.mubr.msk.f32.mxu0 %vm8695_vm4, %v9601_v46 }
 0x778   : > { %21973 = vmatmul.mubr.msk.f32.gmra.mrb[104].mxu0 %vm8695_vm4, %v9602_v62 }
 0x779   : > { %21975 = vmatprep.mubr.msk.f32.mxu0 %vm8695_vm4, %v9603_v2 }
 0x77c   : > { %21976 = vmatmul.mubr.msk.f32.gmra.mrb[106].mxu0 %vm8695_vm4, %v9604_v31 }
 0x77d   : > { %21994 = vmatprep.mubr.msk.f32.mxu0 %vm8695_vm4, %v27492_v4  ;;  %v10909_v4 = vld [vmem:[#allocation13 + $0x148] sm:$0xff] }
 0x77e   : > { %v22573_v58 = vpack.c.bf16 %v10909_v4, %v10908_v50  ;;  %v10463_v50 = vld [vmem:[#allocation3 + $0xe3] sm:$0xff]  ;;  %v10464_v4 = vld [vmem:[#allocation3 + $0xeb] sm:$0xff] }
 0x780   : > { %21995 = vmatmul.mubr.msk.f32.vlgmr.msra.gmra.mrb[72].mxu0 %vm8695_vm4, %v27497_v38  ;;  %v10914_v38 = vld [vmem:[#allocation13 + $0x170] sm:$0xff] }
 0x781   : > { %21997 = vmatprep.mubr.msk.f32.mxu0 %vm8695_vm4, %v27501_v24  ;;  %22560 = vmatpush3.bf16.msra.mxu0 %v27513_v53  ;;  %v10915_v24 = vld [vmem:[#allocation13 + $0x178] sm:$0xff]  ;;  %v10442_v53 = vld [vmem:[#allocation3 + $0x3b] sm:$0xff] }
 0x782   : > { %22562 = vmatprep.subr.bf16.mxu0 %v22561_v45 }
 0x784   : > { %21998 = vmatmul.mubr.msk.f32.gmra.mrb[74].mxu0 %vm8695_vm4, %v27505_v61  ;;  %v10441_v61 = vld [vmem:[#allocation3 + $0x33] sm:$0xff] }
 0x785   : > { %22000 = vmatprep.mubr.msk.f32.mxu0 %vm8695_vm4, %v27509_v16  ;;  %22564 = vmatpush3.bf16.msra.mxu0 %v22561_v45  ;;  %v10437_v45 = vld [vmem:[#allocation3 + $0x13] sm:$0xff]  ;;  %v22585_v16 = vpack.c.bf16 %v10915_v24, %v10914_v38  ;;  %v11347_v24 = vld [vmem:[#allocation13 + $0x1a8] sm:$0xff] }
 0x786   : > { %22566 = vmatprep.subr.bf16.mxu0 %v22565_v18  ;;  %v11346_v38 = vld [vmem:[#allocation13 + $0x1a0] sm:$0xff] }
 0x788   : > { %22001 = vmatmul.mubr.msk.f32.gmra.mrb[76].mxu0 %vm8695_vm4, %v27515_v55  ;;  %v11342_v55 = vld [vmem:[#allocation13 + $0x180] sm:$0xff] }
 0x789   : > { %22003 = vmatprep.mubr.msk.f32.mxu0 %vm8695_vm4, %v27519_v57  ;;  %22568 = vmatpush3.bf16.msra.mxu0 %v22565_v18  ;;  %v10910_v18 = vld [vmem:[#allocation13 + $0x150] sm:$0xff]  ;;  %v11343_v57 = vld [vmem:[#allocation13 + $0x188] sm:$0xff] }
 0x78a   : > { %22570 = vmatprep.subr.bf16.mxu0 %v22569_v49 }
 0x78c   : > { %22004 = vmatmul.mubr.msk.f32.gmra.mrb[78].mxu0 %vm8695_vm4, %v27524_v25  ;;  %v10443_v25 = vld [vmem:[#allocation3 + $0x43] sm:$0xff] }
 0x78d   : > { %22006 = vmatprep.mubr.msk.f32.mxu0 %vm8695_vm4, %v27528_v37  ;;  %22572 = vmatpush3.bf16.msra.mxu0 %v22569_v49  ;;  %v27678_v37 = vpack.c.bf16 %v11343_v57, %v11342_v55  ;;  %v10462_v49 = vld [vmem:[#allocation3 + $0xdb] sm:$0xff]  ;;  %v11348_v55 = vld [vmem:[#allocation13 + $0x1b0] sm:$0xff]  ;;  %v11349_v57 = vld [vmem:[#allocation13 + $0x1b8] sm:$0xff] }
 0x78e   : > { %22574 = vmatprep.subr.bf16.mxu0 %v22573_v58 }
 0x790   : > { %22007 = vmatmul.mubr.msk.f32.gmra.mrb[80].mxu0 %vm8695_vm4, %v27532_v40  ;;  %v10444_v40 = vld [vmem:[#allocation3 + $0x4b] sm:$0xff] }
 0x791   : > { %22009 = vmatprep.mubr.msk.f32.mxu0 %vm8695_vm4, %v27536_v52  ;;  %v10445_v52 = vld [vmem:[#allocation3 + $0x53] sm:$0xff] }
 0x794   : > { %22010 = vmatmul.mubr.msk.f32.gmra.mrb[82].mxu0 %vm8695_vm4, %v27540_v34  ;;  %v10446_v34 = vld [vmem:[#allocation3 + $0x5b] sm:$0xff] }
 0x795   : > { %22012 = vmatprep.mubr.msk.f32.mxu0 %vm8695_vm4, %v27544_v33  ;;  %v10447_v33 = vld [vmem:[#allocation3 + $0x63] sm:$0xff] }
 0x798   : > { %22013 = vmatmul.mubr.msk.f32.gmra.mrb[84].mxu0 %vm8695_vm4, %v27548_v59  ;;  %v10448_v59 = vld [vmem:[#allocation3 + $0x6b] sm:$0xff] }
 0x799   : > { %22015 = vmatprep.mubr.msk.f32.mxu0 %vm8695_vm4, %v27552_v5  ;;  %v10449_v5 = vld [vmem:[#allocation3 + $0x73] sm:$0xff] }
 0x79c   : > { %22016 = vmatmul.mubr.msk.f32.gmra.mrb[86].mxu0 %vm8695_vm4, %v27556_v20  ;;  %v10450_v20 = vld [vmem:[#allocation3 + $0x7b] sm:$0xff] }
 0x79d   : > { %22018 = vmatprep.mubr.msk.f32.mxu0 %vm8695_vm4, %v27560_v60  ;;  %v10451_v60 = vld [vmem:[#allocation3 + $0x83] sm:$0xff] }
 0x7a0   : > { %22019 = vmatmul.mubr.msk.f32.gmra.mrb[88].mxu0 %vm8695_vm4, %v27564_v48  ;;  %v10452_v48 = vld [vmem:[#allocation3 + $0x8b] sm:$0xff] }
 0x7a1   : > { %22021 = vmatprep.mubr.msk.f32.mxu0 %vm8695_vm4, %v27568_v56  ;;  %v10453_v56 = vld [vmem:[#allocation3 + $0x93] sm:$0xff] }
 0x7a4   : > { %22022 = vmatmul.mubr.msk.f32.gmra.mrb[90].mxu0 %vm8695_vm4, %v27572_v22  ;;  %v10454_v22 = vld [vmem:[#allocation3 + $0x9b] sm:$0xff] }
 0x7a5   : > { %22024 = vmatprep.mubr.msk.f32.mxu0 %vm8695_vm4, %v27576_v3  ;;  %v10455_v3 = vld [vmem:[#allocation3 + $0xa3] sm:$0xff] }
 0x7a8   : > { %22025 = vmatmul.mubr.msk.f32.gmra.mrb[92].mxu0 %vm8695_vm4, %v27580_v47  ;;  %v10456_v47 = vld [vmem:[#allocation3 + $0xab] sm:$0xff] }
 0x7a9   : > { %22027 = vmatprep.mubr.msk.f32.mxu0 %vm8695_vm4, %v27584_v36  ;;  %v10457_v36 = vld [vmem:[#allocation3 + $0xb3] sm:$0xff] }
 0x7ac   : > { %22028 = vmatmul.mubr.msk.f32.gmra.mrb[94].mxu0 %vm8695_vm4, %v27588_v39  ;;  %v10458_v39 = vld [vmem:[#allocation3 + $0xbb] sm:$0xff] }
 0x7ad   : > { %22030 = vmatprep.mubr.msk.f32.mxu0 %vm8695_vm4, %v27592_v23  ;;  %v10459_v23 = vld [vmem:[#allocation3 + $0xc3] sm:$0xff] }
 0x7b0   : > { %22031 = vmatmul.mubr.msk.f32.gmra.mrb[96].mxu0 %vm8695_vm4, %v27596_v63  ;;  %v10460_v63 = vld [vmem:[#allocation3 + $0xcb] sm:$0xff] }
 0x7b1   : > { %22033 = vmatprep.mubr.msk.f32.mxu0 %vm8695_vm4, %v9597_v21  ;;  %v10461_v21 = vld [vmem:[#allocation3 + $0xd3] sm:$0xff] }
 0x7b4   : > { %22034 = vmatmul.mubr.msk.f32.gmra.mrb[98].mxu0 %vm8695_vm4, %v9598_v28  ;;  %v10913_v28 = vld [vmem:[#allocation13 + $0x168] sm:$0xff] }
 0x7b5   : > { %22036 = vmatprep.mubr.msk.f32.mxu0 %vm8695_vm4, %v9599_v51  ;;  %v10438_v51 = vld [vmem:[#allocation3 + $0x1b] sm:$0xff] }
 0x7b8   : > { %22037 = vmatmul.mubr.msk.f32.gmra.mrb[100].mxu0 %vm8695_vm4, %v9600_v35  ;;  %v22577_v35 = vpack.c.bf16 %v10911_v26, %v10910_v18  ;;  %v10468_v18 = vld [vmem:[#allocation3 + $0x10b] sm:$0xff]  ;;  %v10469_v26 = vld [vmem:[#allocation3 + $0x113] sm:$0xff] }
 0x7b9   : > { %22039 = vmatprep.mubr.msk.f32.mxu0 %vm8695_vm4, %v9601_v46  ;;  %v10912_v46 = vld [vmem:[#allocation13 + $0x160] sm:$0xff] }
 0x7bc   : > { %22040 = vmatmul.mubr.msk.f32.gmra.mrb[102].mxu0 %vm8695_vm4, %v9602_v62  ;;  %v10440_v62 = vld [vmem:[#allocation3 + $0x2b] sm:$0xff] }
 0x7bd   : > { %22042 = vmatprep.mubr.msk.f32.mxu0 %vm8695_vm4, %v9603_v2  ;;  %v10439_v2 = vld [vmem:[#allocation3 + $0x23] sm:$0xff] }
 0x7c0   : > { %22043 = vmatmul.mubr.msk.f32.gmra.mrb[104].mxu0 %vm8695_vm4, %v9604_v31  ;;  %v22581_v31 = vpack.c.bf16 %v10913_v28, %v10912_v46  ;;  %v11344_v46 = vld [vmem:[#allocation13 + $0x190] sm:$0xff]  ;;  %v11345_v28 = vld [vmem:[#allocation13 + $0x198] sm:$0xff] }
 0x7c1   : > { %22045 = vmatprep.mubr.msk.f32.mxu0 %vm8695_vm4, %v10037_v27  ;;  %v10466_v27 = vld [vmem:[#allocation3 + $0xfb] sm:$0xff] }
 0x7c4   : > { %22046 = vmatmul.mubr.msk.f32.gmra.mrb[106].mxu0 %vm8695_vm4, %v10038_v41  ;;  %v10467_v41 = vld [vmem:[#allocation3 + $0x103] sm:$0xff] }
 0x7c5   : > { %22064 = vmatprep.mubr.msk.f32.mxu0 %vm8695_vm4, %v10437_v45  ;;  %v10470_v45 = vld [vmem:[#allocation3 + $0x11b] sm:$0xff] }
 0x7c8   : > { %22065 = vmatmul.mubr.msk.f32.vlgmr.msra.gmra.mrb[72].mxu0 %vm8695_vm4, %v10438_v51  ;;  %v10472_v51 = vld [vmem:[#allocation3 + $0x12b] sm:$0xff] }
 0x7c9   : > { %22067 = vmatprep.mubr.msk.f32.mxu0 %vm8695_vm4, %v10439_v2  ;;  %22576 = vmatpush3.bf16.msra.mxu0 %v22573_v58  ;;  %v10465_v58 = vld [vmem:[#allocation3 + $0xf3] sm:$0xff] }
 0x7ca   : > { %22578 = vmatprep.subr.bf16.mxu0 %v22577_v35  ;;  %v10871_v2 = vld [vmem:[#allocation3 + $0x14] sm:$0xff] }
 0x7cc   : > { %22068 = vmatmul.mubr.msk.f32.gmra.mrb[74].mxu0 %vm8695_vm4, %v10440_v62  ;;  %v10872_v62 = vld [vmem:[#allocation3 + $0x1c] sm:$0xff] }
 0x7cd   : > { %22070 = vmatprep.mubr.msk.f32.mxu0 %vm8695_vm4, %v10441_v61  ;;  %22580 = vmatpush3.bf16.msra.mxu0 %v22577_v35  ;;  %v10471_v35 = vld [vmem:[#allocation3 + $0x123] sm:$0xff] }
 0x7ce   : > { %22582 = vmatprep.subr.bf16.mxu0 %v22581_v31  ;;  %v27712_v61 = vld [vmem:[#allocation3 + $0x24] sm:$0xff] }
 0x7d0   : > { %22071 = vmatmul.mubr.msk.f32.gmra.mrb[76].mxu0 %vm8695_vm4, %v10442_v53  ;;  %v27717_v53 = vld [vmem:[#allocation3 + $0x2c] sm:$0xff] }
 0x7d1   : > { %22073 = vmatprep.mubr.msk.f32.mxu0 %vm8695_vm4, %v10443_v25  ;;  %22584 = vmatpush3.bf16.msra.mxu0 %v22581_v31  ;;  %v22593_v31 = vpack.c.bf16 %v11345_v28, %v11344_v46  ;;  %v27721_v25 = vld [vmem:[#allocation3 + $0x34] sm:$0xff]  ;;  %v10901_v46 = vld [vmem:[#allocation3 + $0x104] sm:$0xff]  ;;  %v10902_v28 = vld [vmem:[#allocation3 + $0x10c] sm:$0xff] }
 0x7d2   : > { %22586 = vmatprep.subr.bf16.mxu0 %v22585_v16 }
 0x7d4   : > { %22074 = vmatmul.mubr.msk.f32.gmra.mrb[78].mxu0 %vm8695_vm4, %v10444_v40  ;;  %v22601_v40 = vpack.c.bf16 %v11349_v57, %v11348_v55  ;;  %v11780_v57 = vld [vmem:[#allocation13 + $0x1e0] sm:$0xff] }
 0x7d5   : > { %22076 = vmatprep.mubr.msk.f32.mxu0 %vm8695_vm4, %v10445_v52  ;;  %22588 = vmatpush3.bf16.msra.mxu0 %v22585_v16  ;;  %v22597_v16 = vpack.c.bf16 %v11347_v24, %v11346_v38  ;;  %v27725_v52 = vld [vmem:[#allocation3 + $0x3c] sm:$0xff]  ;;  %v10906_v38 = vld [vmem:[#allocation3 + $0x12c] sm:$0xff]  ;;  %v11778_v24 = vld [vmem:[#allocation13 + $0x1d0] sm:$0xff] }
 0x7d6   : > { %22590 = vmatprep.subr.bf16.mxu0 %v27678_v37 }
 0x7d8   : > { %22077 = vmatmul.mubr.msk.f32.gmra.mrb[80].mxu0 %vm8695_vm4, %v10446_v34  ;;  %v11777_v34 = vld [vmem:[#allocation13 + $0x1c8] sm:$0xff] }
 0x7d9   : > { %22079 = vmatprep.mubr.msk.f32.mxu0 %vm8695_vm4, %v10447_v33  ;;  %v27729_v33 = vld [vmem:[#allocation3 + $0x44] sm:$0xff] }
 0x7dc   : > { %22080 = vmatmul.mubr.msk.f32.gmra.mrb[82].mxu0 %vm8695_vm4, %v10448_v59 }
 0x7dd   : > { %22082 = vmatprep.mubr.msk.f32.mxu0 %vm8695_vm4, %v10449_v5  ;;  %v28720_v5 = vmov 0.0  }
 0x7de   : > { %8737 = vst.msk [vmem:[#allocation3 + $0x140] sm:$0x3f] %vm8736_vm5, %v28720_v5  ;;  %v11783_v5 = vld [vmem:[#allocation13 + $0x1f8] sm:$0xff] }
 0x7e0   : > { %22083 = vmatmul.mubr.msk.f32.gmra.mrb[84].mxu0 %vm8695_vm4, %v10450_v20  ;;  %v27736_v20 = vld [vmem:[#allocation3 + $0x4c] sm:$0xff] }
 0x7e1   : > { %22085 = vmatprep.mubr.msk.f32.mxu0 %vm8695_vm4, %v10451_v60  ;;  %v27740_v60 = vld [vmem:[#allocation3 + $0x54] sm:$0xff] }
 0x7e4   : > { %22086 = vmatmul.mubr.msk.f32.gmra.mrb[86].mxu0 %vm8695_vm4, %v10452_v48  ;;  %v27745_v48 = vld [vmem:[#allocation3 + $0x5c] sm:$0xff] }
 0x7e5   : > { %22088 = vmatprep.mubr.msk.f32.mxu0 %vm8695_vm4, %v10453_v56  ;;  %v27749_v56 = vld [vmem:[#allocation3 + $0x64] sm:$0xff] }
 0x7e8   : > { %22089 = vmatmul.mubr.msk.f32.gmra.mrb[88].mxu0 %vm8695_vm4, %v10454_v22  ;;  %v27753_v22 = vld [vmem:[#allocation3 + $0x6c] sm:$0xff] }
 0x7e9   : > { %22091 = vmatprep.mubr.msk.f32.mxu0 %vm8695_vm4, %v10455_v3  ;;  %v27757_v3 = vld [vmem:[#allocation3 + $0x74] sm:$0xff] }
 0x7ec   : > { %22092 = vmatmul.mubr.msk.f32.gmra.mrb[90].mxu0 %vm8695_vm4, %v10456_v47  ;;  %v27761_v47 = vld [vmem:[#allocation3 + $0x7c] sm:$0xff] }
 0x7ed   : > { %22094 = vmatprep.mubr.msk.f32.mxu0 %vm8695_vm4, %v10457_v36  ;;  %v27765_v36 = vld [vmem:[#allocation3 + $0x84] sm:$0xff] }
 0x7f0   : > { %22095 = vmatmul.mubr.msk.f32.gmra.mrb[92].mxu0 %vm8695_vm4, %v10458_v39  ;;  %v27769_v39 = vld [vmem:[#allocation3 + $0x8c] sm:$0xff] }
 0x7f1   : > { %22097 = vmatprep.mubr.msk.f32.mxu0 %vm8695_vm4, %v10459_v23  ;;  %v27773_v23 = vld [vmem:[#allocation3 + $0x94] sm:$0xff] }
 0x7f4   : > { %22098 = vmatmul.mubr.msk.f32.gmra.mrb[94].mxu0 %vm8695_vm4, %v10460_v63  ;;  %v27777_v63 = vld [vmem:[#allocation3 + $0x9c] sm:$0xff] }
 0x7f5   : > { %22100 = vmatprep.mubr.msk.f32.mxu0 %vm8695_vm4, %v10461_v21  ;;  %v27781_v21 = vld [vmem:[#allocation3 + $0xa4] sm:$0xff] }
 0x7f8   : > { %22101 = vmatmul.mubr.msk.f32.gmra.mrb[96].mxu0 %vm8695_vm4, %v10462_v49  ;;  %v27785_v49 = vld [vmem:[#allocation3 + $0xac] sm:$0xff] }
 0x7f9   : > { %22103 = vmatprep.mubr.msk.f32.mxu0 %vm8695_vm4, %v10463_v50  ;;  %v27789_v50 = vld [vmem:[#allocation3 + $0xb4] sm:$0xff] }
 0x7fc   : > { %22104 = vmatmul.mubr.msk.f32.gmra.mrb[98].mxu0 %vm8695_vm4, %v10464_v4  ;;  %v27793_v4 = vld [vmem:[#allocation3 + $0xbc] sm:$0xff] }
 0x7fd   : > { %22106 = vmatprep.mubr.msk.f32.mxu0 %vm8695_vm4, %v10465_v58  ;;  %v27797_v58 = vld [vmem:[#allocation3 + $0xc4] sm:$0xff] }
 0x800   : > { %22107 = vmatmul.mubr.msk.f32.gmra.mrb[100].mxu0 %vm8695_vm4, %v10466_v27  ;;  %v27801_v27 = vld [vmem:[#allocation3 + $0xcc] sm:$0xff] }
 0x801   : > { %22109 = vmatprep.mubr.msk.f32.mxu0 %vm8695_vm4, %v10467_v41  ;;  %v27805_v41 = vld [vmem:[#allocation3 + $0xd4] sm:$0xff] }
 0x804   : > { %22110 = vmatmul.mubr.msk.f32.gmra.mrb[102].mxu0 %vm8695_vm4, %v10468_v18  ;;  %v27809_v18 = vld [vmem:[#allocation3 + $0xdc] sm:$0xff] }
 0x805   : > { %22112 = vmatprep.mubr.msk.f32.mxu0 %vm8695_vm4, %v10469_v26  ;;  %v27813_v26 = vld [vmem:[#allocation3 + $0xe4] sm:$0xff] }
 0x808   : > { %22113 = vmatmul.mubr.msk.f32.gmra.mrb[104].mxu0 %vm8695_vm4, %v10470_v45  ;;  %v27817_v45 = vld [vmem:[#allocation3 + $0xec] sm:$0xff] }
 0x809   : > { %22115 = vmatprep.mubr.msk.f32.mxu0 %vm8695_vm4, %v10471_v35  ;;  %v10899_v35 = vld [vmem:[#allocation3 + $0xf4] sm:$0xff] }
 0x80c   : > { %22116 = vmatmul.mubr.msk.f32.gmra.mrb[106].mxu0 %vm8695_vm4, %v10472_v51  ;;  %v10900_v51 = vld [vmem:[#allocation3 + $0xfc] sm:$0xff] }
 0x80d   : > { %22134 = vmatprep.mubr.msk.f32.mxu0 %vm8695_vm4, %v10871_v2  ;;  %v10903_v2 = vld [vmem:[#allocation3 + $0x114] sm:$0xff] }
 0x810   : > { %22135 = vmatmul.mubr.msk.f32.vlgmr.msra.gmra.mrb[72].mxu0 %vm8695_vm4, %v10872_v62  ;;  %v10905_v62 = vld [vmem:[#allocation3 + $0x124] sm:$0xff] }
 0x811   : > { %22137 = vmatprep.mubr.msk.f32.mxu0 %vm8695_vm4, %v27712_v61  ;;  %22592 = vmatpush3.bf16.msra.mxu0 %v27678_v37  ;;  %v11776_v37 = vld [vmem:[#allocation13 + $0x1c0] sm:$0xff] }
 0x812   : > { %22594 = vmatprep.subr.bf16.mxu0 %v22593_v31  ;;  %v27733_v59 = vpack.c.bf16 %v11777_v34, %v11776_v37  ;;  %v11782_v34 = vld [vmem:[#allocation13 + $0x1f0] sm:$0xff] }
 0x814   : > { %22138 = vmatmul.mubr.msk.f32.gmra.mrb[74].mxu0 %vm8695_vm4, %v27717_v53 }
 0x815   : > { %22140 = vmatprep.mubr.msk.f32.mxu0 %vm8695_vm4, %v27721_v25  ;;  %22596 = vmatpush3.bf16.msra.mxu0 %v22593_v31  ;;  %v10904_v31 = vld [vmem:[#allocation3 + $0x11c] sm:$0xff] }
 0x816   : > { %22598 = vmatprep.subr.bf16.mxu0 %v22597_v16 }
 0x818   : > { %22141 = vmatmul.mubr.msk.f32.gmra.mrb[76].mxu0 %vm8695_vm4, %v27725_v52 }
 0x819   : > { %22143 = vmatprep.mubr.msk.f32.mxu0 %vm8695_vm4, %v27729_v33  ;;  %22600 = vmatpush3.bf16.msra.mxu0 %v22597_v16  ;;  %v11779_v16 = vld [vmem:[#allocation13 + $0x1d8] sm:$0xff] }
 0x81a   : > { %22602 = vmatprep.subr.bf16.mxu0 %v22601_v40  ;;  %v22609_v55 = vpack.c.bf16 %v11779_v16, %v11778_v24  ;;  %v12210_v24 = vld [vmem:[#allocation13 + $0x200] sm:$0xff] }
 0x81b   : > { %v11761_v16 = vld [vmem:[#allocation3 + $0xd5] sm:$0xff] }
 0x81c   : > { %22144 = vmatmul.mubr.msk.f32.gmra.mrb[78].mxu0 %vm8695_vm4, %v27736_v20 }
 0x81d   : > { %22146 = vmatprep.mubr.msk.f32.mxu0 %vm8695_vm4, %v27740_v60  ;;  %22604 = vmatpush3.bf16.msra.mxu0 %v22601_v40  ;;  %v11781_v40 = vld [vmem:[#allocation13 + $0x1e8] sm:$0xff] }
 0x81e   : > { %22606 = vmatprep.subr.bf16.mxu0 %v27733_v59  ;;  %v22613_v37 = vpack.c.bf16 %v11781_v40, %v11780_v57  ;;  %v11763_v57 = vld [vmem:[#allocation3 + $0xe5] sm:$0xff]  ;;  %v11764_v40 = vld [vmem:[#allocation3 + $0xed] sm:$0xff] }
 0x820   : > { %22147 = vmatmul.mubr.msk.f32.gmra.mrb[80].mxu0 %vm8695_vm4, %v27745_v48 }
 0x821   : > { %22149 = vmatprep.mubr.msk.f32.mxu0 %vm8695_vm4, %v27749_v56 }
 0x824   : > { %22150 = vmatmul.mubr.msk.f32.gmra.mrb[82].mxu0 %vm8695_vm4, %v27753_v22 }
 0x825   : > { %22152 = vmatprep.mubr.msk.f32.mxu0 %vm8695_vm4, %v27757_v3 }
 0x828   : > { %22153 = vmatmul.mubr.msk.f32.gmra.mrb[84].mxu0 %vm8695_vm4, %v27761_v47 }
 0x829   : > { %22155 = vmatprep.mubr.msk.f32.mxu0 %vm8695_vm4, %v27765_v36 }
 0x82c   : > { %22156 = vmatmul.mubr.msk.f32.gmra.mrb[86].mxu0 %vm8695_vm4, %v27769_v39 }
 0x82d   : > { %22158 = vmatprep.mubr.msk.f32.mxu0 %vm8695_vm4, %v27773_v23 }
 0x830   : > { %22159 = vmatmul.mubr.msk.f32.gmra.mrb[88].mxu0 %vm8695_vm4, %v27777_v63 }
 0x831   : > { %22161 = vmatprep.mubr.msk.f32.mxu0 %vm8695_vm4, %v27781_v21 }
 0x834   : > { %22162 = vmatmul.mubr.msk.f32.gmra.mrb[90].mxu0 %vm8695_vm4, %v27785_v49 }
 0x835   : > { %22164 = vmatprep.mubr.msk.f32.mxu0 %vm8695_vm4, %v27789_v50 }
 0x838   : > { %22165 = vmatmul.mubr.msk.f32.gmra.mrb[92].mxu0 %vm8695_vm4, %v27793_v4 }
 0x839   : > { %22167 = vmatprep.mubr.msk.f32.mxu0 %vm8695_vm4, %v27797_v58 }
 0x83c   : > { %22168 = vmatmul.mubr.msk.f32.gmra.mrb[94].mxu0 %vm8695_vm4, %v27801_v27 }
 0x83d   : > { %22170 = vmatprep.mubr.msk.f32.mxu0 %vm8695_vm4, %v27805_v41 }
 0x840   : > { %22171 = vmatmul.mubr.msk.f32.gmra.mrb[96].mxu0 %vm8695_vm4, %v27809_v18 }
 0x841   : > { %22173 = vmatprep.mubr.msk.f32.mxu0 %vm8695_vm4, %v27813_v26 }
 0x844   : > { %22174 = vmatmul.mubr.msk.f32.gmra.mrb[98].mxu0 %vm8695_vm4, %v27817_v45 }
 0x845   : > { %22176 = vmatprep.mubr.msk.f32.mxu0 %vm8695_vm4, %v10899_v35 }
 0x848   : > { %22177 = vmatmul.mubr.msk.f32.gmra.mrb[100].mxu0 %vm8695_vm4, %v10900_v51 }
 0x849   : > { %22179 = vmatprep.mubr.msk.f32.mxu0 %vm8695_vm4, %v10901_v46 }
 0x84c   : > { %22180 = vmatmul.mubr.msk.f32.gmra.mrb[102].mxu0 %vm8695_vm4, %v10902_v28 }
 0x84d   : > { %22182 = vmatprep.mubr.msk.f32.mxu0 %vm8695_vm4, %v10903_v2 }
 0x850   : > { %22183 = vmatmul.mubr.msk.f32.gmra.mrb[104].mxu0 %vm8695_vm4, %v10904_v31 }
 0x851   : > { %22185 = vmatprep.mubr.msk.f32.mxu0 %vm8695_vm4, %v10905_v62 }
 0x854   : > { %22186 = vmatmul.mubr.msk.f32.gmra.mrb[106].mxu0 %vm8695_vm4, %v10906_v38 }
 0x855   : > { %22204 = vmatprep.mubr.msk.f32.mxu0 %vm8695_vm4, %v27712_v61  ;;  %v22617_v61 = vpack.c.bf16 %v11783_v5, %v11782_v34  ;;  %v12213_v5 = vld [vmem:[#allocation13 + $0x218] sm:$0xff]  ;;  %v11766_v34 = vld [vmem:[#allocation3 + $0xfd] sm:$0xff] }
 0x858   : > { %22205 = vmatmul.mubr.msk.f32.vlgmr.msra.gmra.mrb[72].mxu0 %vm8695_vm4, %v27717_v53  ;;  %v12211_v53 = vld [vmem:[#allocation13 + $0x208] sm:$0xff] }
 0x859   : > { %22207 = vmatprep.mubr.msk.f32.mxu0 %vm8695_vm4, %v27721_v25  ;;  %22608 = vmatpush3.bf16.msra.mxu0 %v27733_v59  ;;  %v22621_v25 = vpack.c.bf16 %v12211_v53, %v12210_v24  ;;  %v12212_v59 = vld [vmem:[#allocation13 + $0x210] sm:$0xff]  ;;  %v11768_v24 = vld [vmem:[#allocation3 + $0x10d] sm:$0xff]  ;;  %v11769_v53 = vld [vmem:[#allocation3 + $0x115] sm:$0xff] }
 0x85a   : > { %22610 = vmatprep.subr.bf16.mxu0 %v22609_v55 }
 0x85c   : > { %22208 = vmatmul.mubr.msk.f32.gmra.mrb[74].mxu0 %vm8695_vm4, %v27725_v52  ;;  %v11339_v52 = vld [vmem:[#allocation3 + $0x134] sm:$0xff] }
 0x85d   : > { %22210 = vmatprep.mubr.msk.f32.mxu0 %vm8695_vm4, %v27729_v33  ;;  %22612 = vmatpush3.bf16.msra.mxu0 %v22609_v55  ;;  %v11340_v33 = vld [vmem:[#allocation3 + $0x13c] sm:$0xff] }
 0x85e   : > { %22614 = vmatprep.subr.bf16.mxu0 %v22613_v37  ;;  %v11762_v55 = vld [vmem:[#allocation3 + $0xdd] sm:$0xff] }
 0x860   : > { %22211 = vmatmul.mubr.msk.f32.gmra.mrb[76].mxu0 %vm8695_vm4, %v27736_v20  ;;  %v11739_v20 = vld [vmem:[#allocation3 + $0x25] sm:$0xff] }
 0x861   : > { %22213 = vmatprep.mubr.msk.f32.mxu0 %vm8695_vm4, %v27740_v60  ;;  %22616 = vmatpush3.bf16.msra.mxu0 %v22613_v37  ;;  %v22625_v60 = vpack.c.bf16 %v12213_v5, %v12212_v59  ;;  %v11765_v37 = vld [vmem:[#allocation3 + $0xf5] sm:$0xff]  ;;  %v11772_v59 = vld [vmem:[#allocation3 + $0x12d] sm:$0xff]  ;;  %v11774_v5 = vld [vmem:[#allocation3 + $0x13d] sm:$0xff] }
 0x862   : > { %22618 = vmatprep.subr.bf16.mxu0 %v22617_v61 }
 0x864   : > { %22214 = vmatmul.mubr.msk.f32.gmra.mrb[78].mxu0 %vm8695_vm4, %v27745_v48  ;;  %v11740_v48 = vld [vmem:[#allocation3 + $0x2d] sm:$0xff] }
 0x865   : > { %22216 = vmatprep.mubr.msk.f32.mxu0 %vm8695_vm4, %v27749_v56  ;;  %22620 = vmatpush3.bf16.msra.mxu0 %v22617_v61  ;;  %v12214_v56 = vld [vmem:[#allocation13 + $0x220] sm:$0xff]  ;;  %v11767_v61 = vld [vmem:[#allocation3 + $0x105] sm:$0xff] }
 0x866   : > { %22622 = vmatprep.subr.bf16.mxu0 %v22621_v25 }
 0x868   : > { %22217 = vmatmul.mubr.msk.f32.gmra.mrb[80].mxu0 %vm8695_vm4, %v27753_v22  ;;  %v12215_v22 = vld [vmem:[#allocation13 + $0x228] sm:$0xff] }
 0x869   : > { %22219 = vmatprep.mubr.msk.f32.mxu0 %vm8695_vm4, %v27757_v3  ;;  %v11741_v3 = vld [vmem:[#allocation3 + $0x35] sm:$0xff] }
 0x86c   : > { %22220 = vmatmul.mubr.msk.f32.gmra.mrb[82].mxu0 %vm8695_vm4, %v27761_v47  ;;  %v22629_v47 = vpack.c.bf16 %v12215_v22, %v12214_v56  ;;  %v12176_v56 = vld [vmem:[#allocation3 + $0x3e] sm:$0xff]  ;;  %v12177_v22 = vld [vmem:[#allocation3 + $0x46] sm:$0xff] }
 0x86d   : > { %22222 = vmatprep.mubr.msk.f32.mxu0 %vm8695_vm4, %v27765_v36  ;;  %v11742_v36 = vld [vmem:[#allocation3 + $0x3d] sm:$0xff] }
 0x870   : > { %22223 = vmatmul.mubr.msk.f32.gmra.mrb[84].mxu0 %vm8695_vm4, %v27769_v39  ;;  %v12216_v39 = vld [vmem:[#allocation13 + $0x230] sm:$0xff] }
 0x871   : > { %22225 = vmatprep.mubr.msk.f32.mxu0 %vm8695_vm4, %v27773_v23  ;;  %v12217_v23 = vld [vmem:[#allocation13 + $0x238] sm:$0xff] }
 0x874   : > { %22226 = vmatmul.mubr.msk.f32.gmra.mrb[86].mxu0 %vm8695_vm4, %v27777_v63  ;;  %v11743_v63 = vld [vmem:[#allocation3 + $0x45] sm:$0xff] }
 0x875   : > { %22228 = vmatprep.mubr.msk.f32.mxu0 %vm8695_vm4, %v27781_v21  ;;  %v22633_v21 = vpack.c.bf16 %v12217_v23, %v12216_v39  ;;  %v12181_v39 = vld [vmem:[#allocation3 + $0x66] sm:$0xff]  ;;  %v12182_v23 = vld [vmem:[#allocation3 + $0x6e] sm:$0xff] }
 0x878   : > { %22229 = vmatmul.mubr.msk.f32.gmra.mrb[88].mxu0 %vm8695_vm4, %v27785_v49  ;;  %v11744_v49 = vld [vmem:[#allocation3 + $0x4d] sm:$0xff] }
 0x879   : > { %22231 = vmatprep.mubr.msk.f32.mxu0 %vm8695_vm4, %v27789_v50  ;;  %v11745_v50 = vld [vmem:[#allocation3 + $0x55] sm:$0xff] }
 0x87c   : > { %22232 = vmatmul.mubr.msk.f32.gmra.mrb[90].mxu0 %vm8695_vm4, %v27793_v4  ;;  %v11746_v4 = vld [vmem:[#allocation3 + $0x5d] sm:$0xff] }
 0x87d   : > { %22234 = vmatprep.mubr.msk.f32.mxu0 %vm8695_vm4, %v27797_v58  ;;  %v11747_v58 = vld [vmem:[#allocation3 + $0x65] sm:$0xff] }
 0x880   : > { %22235 = vmatmul.mubr.msk.f32.gmra.mrb[92].mxu0 %vm8695_vm4, %v27801_v27  ;;  %v11748_v27 = vld [vmem:[#allocation3 + $0x6d] sm:$0xff] }
 0x881   : > { %22237 = vmatprep.mubr.msk.f32.mxu0 %vm8695_vm4, %v27805_v41  ;;  %v11749_v41 = vld [vmem:[#allocation3 + $0x75] sm:$0xff] }
 0x884   : > { %22238 = vmatmul.mubr.msk.f32.gmra.mrb[94].mxu0 %vm8695_vm4, %v27809_v18  ;;  %v11750_v18 = vld [vmem:[#allocation3 + $0x7d] sm:$0xff] }
 0x885   : > { %22240 = vmatprep.mubr.msk.f32.mxu0 %vm8695_vm4, %v27813_v26  ;;  %v11751_v26 = vld [vmem:[#allocation3 + $0x85] sm:$0xff] }
 0x888   : > { %22241 = vmatmul.mubr.msk.f32.gmra.mrb[96].mxu0 %vm8695_vm4, %v27817_v45  ;;  %v11752_v45 = vld [vmem:[#allocation3 + $0x8d] sm:$0xff] }
 0x889   : > { %22243 = vmatprep.mubr.msk.f32.mxu0 %vm8695_vm4, %v10899_v35  ;;  %v11753_v35 = vld [vmem:[#allocation3 + $0x95] sm:$0xff] }
 0x88c   : > { %22244 = vmatmul.mubr.msk.f32.gmra.mrb[98].mxu0 %vm8695_vm4, %v10900_v51  ;;  %v11754_v51 = vld [vmem:[#allocation3 + $0x9d] sm:$0xff] }
 0x88d   : > { %22246 = vmatprep.mubr.msk.f32.mxu0 %vm8695_vm4, %v10901_v46  ;;  %v11755_v46 = vld [vmem:[#allocation3 + $0xa5] sm:$0xff] }
 0x890   : > { %22247 = vmatmul.mubr.msk.f32.gmra.mrb[100].mxu0 %vm8695_vm4, %v10902_v28  ;;  %v11756_v28 = vld [vmem:[#allocation3 + $0xad] sm:$0xff] }
 0x891   : > { %22249 = vmatprep.mubr.msk.f32.mxu0 %vm8695_vm4, %v10903_v2  ;;  %v11757_v2 = vld [vmem:[#allocation3 + $0xb5] sm:$0xff] }
 0x894   : > { %22250 = vmatmul.mubr.msk.f32.gmra.mrb[102].mxu0 %vm8695_vm4, %v10904_v31  ;;  %v11758_v31 = vld [vmem:[#allocation3 + $0xbd] sm:$0xff] }
 0x895   : > { %22252 = vmatprep.mubr.msk.f32.mxu0 %vm8695_vm4, %v10905_v62  ;;  %v11759_v62 = vld [vmem:[#allocation3 + $0xc5] sm:$0xff] }
 0x898   : > { %22253 = vmatmul.mubr.msk.f32.gmra.mrb[104].mxu0 %vm8695_vm4, %v10906_v38  ;;  %v11760_v38 = vld [vmem:[#allocation3 + $0xcd] sm:$0xff] }
 0x899   : > { %22255 = vmatprep.mubr.msk.f32.mxu0 %vm8695_vm4, %v11339_v52  ;;  %v11771_v52 = vld [vmem:[#allocation3 + $0x125] sm:$0xff] }
 0x89c   : > { %22256 = vmatmul.mubr.msk.f32.gmra.mrb[106].mxu0 %vm8695_vm4, %v11340_v33  ;;  %v11773_v33 = vld [vmem:[#allocation3 + $0x135] sm:$0xff] }
 0x89d   : > { %22274 = vmatprep.mubr.msk.f32.mxu0 %vm8695_vm4, %v11739_v20  ;;  %v12173_v20 = vld [vmem:[#allocation3 + $0x26] sm:$0xff] }
 0x8a0   : > { %22275 = vmatmul.mubr.msk.f32.vlgmr.msra.gmra.mrb[72].mxu0 %vm8695_vm4, %v11740_v48  ;;  %v12175_v48 = vld [vmem:[#allocation3 + $0x36] sm:$0xff] }
 0x8a1   : > { %22277 = vmatprep.mubr.msk.f32.mxu0 %vm8695_vm4, %v11741_v3  ;;  %22624 = vmatpush3.bf16.msra.mxu0 %v22621_v25  ;;  %v11770_v25 = vld [vmem:[#allocation3 + $0x11d] sm:$0xff]  ;;  %v12178_v3 = vld [vmem:[#allocation3 + $0x4e] sm:$0xff] }
 0x8a2   : > { %22626 = vmatprep.subr.bf16.mxu0 %v22625_v60 }
 0x8a4   : > { %22278 = vmatmul.mubr.msk.f32.gmra.mrb[74].mxu0 %vm8695_vm4, %v11742_v36  ;;  %v12180_v36 = vld [vmem:[#allocation3 + $0x5e] sm:$0xff] }
 0x8a5   : > { %22280 = vmatprep.mubr.msk.f32.mxu0 %vm8695_vm4, %v11743_v63  ;;  %22628 = vmatpush3.bf16.msra.mxu0 %v22625_v60  ;;  %v12174_v60 = vld [vmem:[#allocation3 + $0x2e] sm:$0xff]  ;;  %v12183_v63 = vld [vmem:[#allocation3 + $0x76] sm:$0xff] }
 0x8a6   : > { %22630 = vmatprep.subr.bf16.mxu0 %v22629_v47 }
 0x8a8   : > { %22281 = vmatmul.mubr.msk.f32.gmra.mrb[76].mxu0 %vm8695_vm4, %v11744_v49  ;;  %v12185_v49 = vld [vmem:[#allocation3 + $0x86] sm:$0xff] }
 0x8a9   : > { %22283 = vmatprep.mubr.msk.f32.mxu0 %vm8695_vm4, %v11745_v50  ;;  %22632 = vmatpush3.bf16.msra.mxu0 %v22629_v47  ;;  %v12179_v47 = vld [vmem:[#allocation3 + $0x56] sm:$0xff]  ;;  %v12186_v50 = vld [vmem:[#allocation3 + $0x8e] sm:$0xff] }
 0x8aa   : > { %22634 = vmatprep.subr.bf16.mxu0 %v22633_v21 }
 0x8ac   : > { %22284 = vmatmul.mubr.msk.f32.gmra.mrb[78].mxu0 %vm8695_vm4, %v11746_v4  ;;  %v12187_v4 = vld [vmem:[#allocation3 + $0x96] sm:$0xff] }
 0x8ad   : > { %22286 = vmatprep.mubr.msk.f32.mxu0 %vm8695_vm4, %v11747_v58  ;;  %22636 = vmatpush3.bf16.msra.mxu0 %v22633_v21  ;;  %v12184_v21 = vld [vmem:[#allocation3 + $0x7e] sm:$0xff] }
 0x8ae   : > { %v12188_v58 = vld [vmem:[#allocation3 + $0x9e] sm:$0xff] }
 0x8b0   : > { %22287 = vmatmul.mubr.msk.f32.gmra.mrb[80].mxu0 %vm8695_vm4, %v11748_v27  ;;  %v12189_v27 = vld [vmem:[#allocation3 + $0xa6] sm:$0xff] }
 0x8b1   : > { %22289 = vmatprep.mubr.msk.f32.mxu0 %vm8695_vm4, %v11749_v41  ;;  %v12190_v41 = vld [vmem:[#allocation3 + $0xae] sm:$0xff] }
 0x8b4   : > { %22290 = vmatmul.mubr.msk.f32.gmra.mrb[82].mxu0 %vm8695_vm4, %v11750_v18  ;;  %v12191_v18 = vld [vmem:[#allocation3 + $0xb6] sm:$0xff] }
 0x8b5   : > { %22292 = vmatprep.mubr.msk.f32.mxu0 %vm8695_vm4, %v11751_v26  ;;  %v12192_v26 = vld [vmem:[#allocation3 + $0xbe] sm:$0xff] }
 0x8b8   : > { %22293 = vmatmul.mubr.msk.f32.gmra.mrb[84].mxu0 %vm8695_vm4, %v11752_v45  ;;  %v12193_v45 = vld [vmem:[#allocation3 + $0xc6] sm:$0xff] }
 0x8b9   : > { %22295 = vmatprep.mubr.msk.f32.mxu0 %vm8695_vm4, %v11753_v35  ;;  %v12194_v35 = vld [vmem:[#allocation3 + $0xce] sm:$0xff] }
 0x8bc   : > { %22296 = vmatmul.mubr.msk.f32.gmra.mrb[86].mxu0 %vm8695_vm4, %v11754_v51  ;;  %v12195_v51 = vld [vmem:[#allocation3 + $0xd6] sm:$0xff] }
 0x8bd   : > { %22298 = vmatprep.mubr.msk.f32.mxu0 %vm8695_vm4, %v11755_v46  ;;  %v12196_v46 = vld [vmem:[#allocation3 + $0xde] sm:$0xff] }
 0x8c0   : > { %22299 = vmatmul.mubr.msk.f32.gmra.mrb[88].mxu0 %vm8695_vm4, %v11756_v28  ;;  %v12197_v28 = vld [vmem:[#allocation3 + $0xe6] sm:$0xff] }
 0x8c1   : > { %22301 = vmatprep.mubr.msk.f32.mxu0 %vm8695_vm4, %v11757_v2  ;;  %v12198_v2 = vld [vmem:[#allocation3 + $0xee] sm:$0xff] }
 0x8c4   : > { %22302 = vmatmul.mubr.msk.f32.gmra.mrb[90].mxu0 %vm8695_vm4, %v11758_v31  ;;  %v12199_v31 = vld [vmem:[#allocation3 + $0xf6] sm:$0xff] }
 0x8c5   : > { %22304 = vmatprep.mubr.msk.f32.mxu0 %vm8695_vm4, %v11759_v62  ;;  %v12200_v62 = vld [vmem:[#allocation3 + $0xfe] sm:$0xff] }
 0x8c8   : > { %22305 = vmatmul.mubr.msk.f32.gmra.mrb[92].mxu0 %vm8695_vm4, %v11760_v38  ;;  %v12201_v38 = vld [vmem:[#allocation3 + $0x106] sm:$0xff] }
 0x8c9   : > { %22307 = vmatprep.mubr.msk.f32.mxu0 %vm8695_vm4, %v11761_v16  ;;  %v12202_v16 = vld [vmem:[#allocation3 + $0x10e] sm:$0xff] }
 0x8cc   : > { %22308 = vmatmul.mubr.msk.f32.gmra.mrb[94].mxu0 %vm8695_vm4, %v11762_v55  ;;  %v12203_v55 = vld [vmem:[#allocation3 + $0x116] sm:$0xff] }
 0x8cd   : > { %22310 = vmatprep.mubr.msk.f32.mxu0 %vm8695_vm4, %v11763_v57  ;;  %v12204_v57 = vld [vmem:[#allocation3 + $0x11e] sm:$0xff] }
 0x8d0   : > { %22311 = vmatmul.mubr.msk.f32.gmra.mrb[96].mxu0 %vm8695_vm4, %v11764_v40  ;;  %v12205_v40 = vld [vmem:[#allocation3 + $0x126] sm:$0xff] }
 0x8d1   : > { %22313 = vmatprep.mubr.msk.f32.mxu0 %vm8695_vm4, %v11765_v37  ;;  %v12207_v37 = vld [vmem:[#allocation3 + $0x136] sm:$0xff] }
 0x8d4   : > { %22314 = vmatmul.mubr.msk.f32.gmra.mrb[98].mxu0 %vm8695_vm4, %v11766_v34  ;;  %v12206_v34 = vld [vmem:[#allocation3 + $0x12e] sm:$0xff] }
 0x8d5   : > { %22316 = vmatprep.mubr.msk.f32.mxu0 %vm8695_vm4, %v11767_v61  ;;  %v12208_v61 = vld [vmem:[#allocation3 + $0x13e] sm:$0xff] }
 0x8d8   : > { %22317 = vmatmul.mubr.msk.f32.gmra.mrb[100].mxu0 %vm8695_vm4, %v11768_v24  ;;  %v12723_v24 = vld [vmem:[#allocation16 + $0x8] sm:$0xff] }
 0x8d9   : > { %22319 = vmatprep.mubr.msk.f32.mxu0 %vm8695_vm4, %v11769_v53  ;;  %12816 = vmatprep.mubr.f32.mxu1 %v12723_v24  ;;  %v23802_v53 = vld [vmem:[#allocation17] ss:$8 sps:$4 sm:$0xff]  }
 0x8dc   : > { %22320 = vmatmul.mubr.msk.f32.gmra.mrb[102].mxu0 %vm8695_vm4, %v11770_v25  ;;  %v23804_v25 = vld [vmem:[#allocation17 + $0x4] ss:$8 sps:$4 sm:$0xff]  }
 0x8dd   : > { %22322 = vmatprep.mubr.msk.f32.mxu0 %vm8695_vm4, %v11771_v52  ;;  %v23810_v52 = vld [vmem:[#allocation17 + $0x14] ss:$8 sps:$4 sm:$0xff]   ;;  %16922 = vmatprep.subr.bf16.mxu0 %v23804_v25 }
 0x8e0   : > { %22323 = vmatmul.mubr.msk.f32.gmra.mrb[104].mxu0 %vm8695_vm4, %v11772_v59  ;;  %v23816_v59 = vld [vmem:[#allocation17 + $0x24] ss:$8 sps:$4 sm:$0xff]  }
 0x8e1   : > { %22325 = vmatprep.mubr.msk.f32.mxu0 %vm8695_vm4, %v11773_v33  ;;  %v23808_v33 = vld [vmem:[#allocation17 + $0x10] ss:$8 sps:$4 sm:$0xff]  }
 0x8e4   : > { %22326 = vmatmul.mubr.msk.f32.gmra.mrb[106].mxu0 %vm8695_vm4, %v11774_v5  ;;  %v23814_v5 = vld [vmem:[#allocation17 + $0x20] ss:$8 sps:$4 sm:$0xff]  }
 0x8e5   : > { %22344 = vmatprep.mubr.msk.f32.mxu0 %vm8695_vm4, %v12173_v20  ;;  %v23822_v20 = vld [vmem:[#allocation17 + $0x34] ss:$8 sps:$4 sm:$0xff]  }
 0x8e8   : > { %22345 = vmatmul.mubr.msk.f32.vlgmr.msra.gmra.mrb[72].mxu0 %vm8695_vm4, %v12174_v60  ;;  %v23820_v60 = vld [vmem:[#allocation17 + $0x30] ss:$8 sps:$4 sm:$0xff]  }
 0x8e9   : > { %22347 = vmatprep.mubr.msk.f32.mxu0 %vm8695_vm4, %v12175_v48  ;;  %16923 = vmatpush1.bf16.msra.mxu0 %v23802_v53  ;;  %v23828_v48 = vld [vmem:[#allocation17 + $0x44] ss:$8 sps:$4 sm:$0xff]  }
 0x8ea   : > { %16924 = vmatprep.subr.bf16.mxu0 %v23810_v52 }
 0x8ec   : > { %22348 = vmatmul.mubr.msk.f32.gmra.mrb[74].mxu0 %vm8695_vm4, %v12176_v56  ;;  %v27964_v56 = vld [vmem:[#allocation14] ss:$0 sm:$0xff] }
 0x8ed   : > { %22350 = vmatprep.mubr.msk.f32.mxu0 %vm8695_vm4, %v12177_v22  ;;  %16925 = vmatpush1.bf16.msra.mxu0 %v23808_v33  ;;  %v23826_v22 = vld [vmem:[#allocation17 + $0x40] ss:$8 sps:$4 sm:$0xff]  }
 0x8ee   : > { %16926 = vmatprep.subr.bf16.mxu0 %v23816_v59 }
 0x8f0   : > { %22351 = vmatmul.mubr.msk.f32.gmra.mrb[76].mxu0 %vm8695_vm4, %v12178_v3 }
 0x8f1   : > { %22353 = vmatprep.mubr.msk.f32.mxu0 %vm8695_vm4, %v12179_v47  ;;  %16927 = vmatpush1.bf16.msra.mxu0 %v23814_v5 }
 0x8f2   : > { %16928 = vmatprep.subr.bf16.mxu0 %v23822_v20 }
 0x8f4   : > { %22354 = vmatmul.mubr.msk.f32.gmra.mrb[78].mxu0 %vm8695_vm4, %v12180_v36 }
 0x8f5   : > { %22356 = vmatprep.mubr.msk.f32.mxu0 %vm8695_vm4, %v12181_v39  ;;  %16929 = vmatpush1.bf16.msra.mxu0 %v23820_v60 }
 0x8f6   : > { %16930 = vmatprep.subr.bf16.mxu0 %v23828_v48 }
 0x8f8   : > { %22357 = vmatmul.mubr.msk.f32.gmra.mrb[80].mxu0 %vm8695_vm4, %v12182_v23 }
 0x8f9   : > { %22359 = vmatprep.mubr.msk.f32.mxu0 %vm8695_vm4, %v12183_v63  ;;  %16931 = vmatpush1.bf16.msra.mxu0 %v23826_v22 }
 0x8fc   : > { %22360 = vmatmul.mubr.msk.f32.gmra.mrb[82].mxu0 %vm8695_vm4, %v12184_v21 }
 0x8fd   : > { %22362 = vmatprep.mubr.msk.f32.mxu0 %vm8695_vm4, %v12185_v49 }
 0x900   : > { %22363 = vmatmul.mubr.msk.f32.gmra.mrb[84].mxu0 %vm8695_vm4, %v12186_v50 }
 0x901   : > { %22365 = vmatprep.mubr.msk.f32.mxu0 %vm8695_vm4, %v12187_v4 }
 0x904   : > { %22366 = vmatmul.mubr.msk.f32.gmra.mrb[86].mxu0 %vm8695_vm4, %v12188_v58 }
 0x905   : > { %22368 = vmatprep.mubr.msk.f32.mxu0 %vm8695_vm4, %v12189_v27 }
 0x908   : > { %22369 = vmatmul.mubr.msk.f32.gmra.mrb[88].mxu0 %vm8695_vm4, %v12190_v41 }
 0x909   : > { %22371 = vmatprep.mubr.msk.f32.mxu0 %vm8695_vm4, %v12191_v18 }
 0x90c   : > { %22372 = vmatmul.mubr.msk.f32.gmra.mrb[90].mxu0 %vm8695_vm4, %v12192_v26 }
 0x90d   : > { %22374 = vmatprep.mubr.msk.f32.mxu0 %vm8695_vm4, %v12193_v45 }
 0x910   : > { %22375 = vmatmul.mubr.msk.f32.gmra.mrb[92].mxu0 %vm8695_vm4, %v12194_v35 }
 0x911   : > { %22377 = vmatprep.mubr.msk.f32.mxu0 %vm8695_vm4, %v12195_v51 }
 0x914   : > { %22378 = vmatmul.mubr.msk.f32.gmra.mrb[94].mxu0 %vm8695_vm4, %v12196_v46 }
 0x915   : > { %22380 = vmatprep.mubr.msk.f32.mxu0 %vm8695_vm4, %v12197_v28 }
 0x918   : > { %22381 = vmatmul.mubr.msk.f32.gmra.mrb[96].mxu0 %vm8695_vm4, %v12198_v2 }
 0x919   : > { %22383 = vmatprep.mubr.msk.f32.mxu0 %vm8695_vm4, %v12199_v31 }
 0x91c   : > { %22384 = vmatmul.mubr.msk.f32.gmra.mrb[98].mxu0 %vm8695_vm4, %v12200_v62 }
 0x91d   : > { %22386 = vmatprep.mubr.msk.f32.mxu0 %vm8695_vm4, %v12201_v38 }
 0x920   : > { %22387 = vmatmul.mubr.msk.f32.gmra.mrb[100].mxu0 %vm8695_vm4, %v12202_v16 }
 0x921   : > { %22389 = vmatprep.mubr.msk.f32.mxu0 %vm8695_vm4, %v12203_v55 }
 0x924   : > { %22390 = vmatmul.mubr.msk.f32.gmra.mrb[102].mxu0 %vm8695_vm4, %v12204_v57 }
 0x925   : > { %22392 = vmatprep.mubr.msk.f32.mxu0 %vm8695_vm4, %v12205_v40 }
 0x928   : > { %22393 = vmatmul.mubr.msk.f32.gmra.mrb[104].mxu0 %vm8695_vm4, %v12206_v34 }
 0x929   : > { %22395 = vmatprep.mubr.msk.f32.mxu0 %vm8695_vm4, %v12207_v37 }
 0x92c   : > { %22396 = vmatmul.mubr.msk.f32.gmra.mrb[106].mxu0 %vm8695_vm4, %v12208_v61 }
 0x9bb   : > { %v22346_v3 = vpop.f32.mrb[72].mxu0 }
 0x9bc   : > { %v12615_v47 = vadd.f32 %v22346_v3, %v27964_v56  ;;  %v12392_v36 = vpop.f32.mrb[73].mxu0 }
 0x9bd   : > { %v12614_v39 = vadd.f32 %v27964_v56, %v12392_v36 }
 0x9be   : > { %v12651_v23 = vmax.f32 %v12615_v47, 0.0 }
 0x9bf   : > { %v12650_v63 = vmax.f32 %v12614_v39, 0.0  ;;  %v22349_v21 = vpop.f32.mrb[74].mxu0 }
 0x9c0   : > { %v27969_v49 = vmul.f32 %v12651_v23, %v26365_v9  ;;  %v12617_v50 = vadd.f32 %v22349_v21, %v27964_v56  ;;  %v12402_v4 = vpop.f32.mrb[75].mxu0 }
 0x9c1   : > { %v27973_v58 = vmul.f32 %v12650_v63, %v26361_v7  ;;  %v12616_v27 = vadd.f32 %v27964_v56, %v12402_v4 }
 0x9c2   : > { %v12653_v41 = vmax.f32 %v12617_v50, 0.0 }
 0x9c3   : > { %v22639_v18 = vpack.c.bf16 %v27969_v49, %v27973_v58  ;;  %v12652_v26 = vmax.f32 %v12616_v27, 0.0  ;;  %v22352_v45 = vpop.f32.mrb[76].mxu0 }
 0x9c4   : > { %v27979_v35 = vmul.f32 %v12653_v41, %v26363_v8  ;;  %v12619_v9 = vadd.f32 %v22352_v45, %v27964_v56  ;;  %v12412_v51 = vpop.f32.mrb[77].mxu0 }
 0x9c5   : > { %v27983_v46 = vmul.f32 %v12652_v26, %v26359_v6  ;;  %v12618_v7 = vadd.f32 %v27964_v56, %v12412_v51 }
 0x9c6   : > { %v12655_v28 = vmax.f32 %v12619_v9, 0.0 }
 0x9c7   : > { %v22643_v2 = vpack.c.bf16 %v27979_v35, %v27983_v46  ;;  %v12654_v31 = vmax.f32 %v12618_v7, 0.0  ;;  %v22355_v62 = vpop.f32.mrb[78].mxu0 }
 0x9c8   : > { %v27989_v38 = vmul.f32 %v12655_v28, %v26367_v10  ;;  %v12621_v8 = vadd.f32 %v22355_v62, %v27964_v56  ;;  %v12422_v16 = vpop.f32.mrb[79].mxu0 }
 0x9c9   : > { %v27993_v55 = vmul.f32 %v12654_v31, %v26369_v11  ;;  %v12620_v6 = vadd.f32 %v27964_v56, %v12422_v16 }
 0x9ca   : > { %v12657_v57 = vmax.f32 %v12621_v8, 0.0 }
 0x9cb   : > { %v22647_v40 = vpack.c.bf16 %v27989_v38, %v27993_v55  ;;  %v12656_v37 = vmax.f32 %v12620_v6, 0.0  ;;  %v22358_v34 = vpop.f32.mrb[80].mxu0 }
 0x9cc   : > { %v27999_v61 = vmul.f32 %v12657_v57, %v26371_v12  ;;  %v12623_v10 = vadd.f32 %v22358_v34, %v27964_v56  ;;  %v12432_v24 = vpop.f32.mrb[81].mxu0 }
 0x9cd   : > { %v28003_v53 = vmul.f32 %v12656_v37, %v26373_v13  ;;  %v12622_v11 = vadd.f32 %v27964_v56, %v12432_v24 }
 0x9ce   : > { %v12659_v25 = vmax.f32 %v12623_v10, 0.0 }
 0x9cf   : > { %v22651_v52 = vpack.c.bf16 %v27999_v61, %v28003_v53  ;;  %v12658_v33 = vmax.f32 %v12622_v11, 0.0  ;;  %v22361_v59 = vpop.f32.mrb[82].mxu0 }
 0x9d0   : > { %v28009_v5 = vmul.f32 %v12659_v25, %v26375_v14  ;;  %v12625_v12 = vadd.f32 %v22361_v59, %v27964_v56  ;;  %v12442_v20 = vpop.f32.mrb[83].mxu0 }
 0x9d1   : > { %v28013_v60 = vmul.f32 %v12658_v33, %v26377_v15  ;;  %v12624_v13 = vadd.f32 %v27964_v56, %v12442_v20 }
 0x9d2   : > { %v12661_v48 = vmax.f32 %v12625_v12, 0.0 }
 0x9d3   : > { %v22655_v22 = vpack.c.bf16 %v28009_v5, %v28013_v60  ;;  %v12660_v3 = vmax.f32 %v12624_v13, 0.0  ;;  %v22364_v47 = vpop.f32.mrb[84].mxu0 }
 0x9d4   : > { %v28019_v36 = vmul.f32 %v12661_v48, %v26381_v17  ;;  %v12627_v14 = vadd.f32 %v22364_v47, %v27964_v56  ;;  %v12452_v39 = vpop.f32.mrb[85].mxu0 }
 0x9d5   : > { %v28023_v23 = vmul.f32 %v12660_v3, %v26383_v19  ;;  %v12626_v15 = vadd.f32 %v27964_v56, %v12452_v39 }
 0x9d6   : > { %v12663_v63 = vmax.f32 %v12627_v14, 0.0 }
 0x9d7   : > { %v22659_v21 = vpack.c.bf16 %v28019_v36, %v28023_v23  ;;  %v12662_v50 = vmax.f32 %v12626_v15, 0.0  ;;  %v22367_v4 = vpop.f32.mrb[86].mxu0  ;;  %v28721_v15 = vld [vmem:[#allocation42_spill] sm:$0xff] }
 0x9d8   : > { %v28029_v27 = vmul.f32 %v12663_v63, %v26389_v29  ;;  %v12629_v17 = vadd.f32 %v22367_v4, %v27964_v56  ;;  %v12462_v41 = vpop.f32.mrb[87].mxu0  ;;  %v28722_v4 = vld [vmem:[#allocation43_spill] sm:$0xff] }
 0x9d9   : > { %v28033_v26 = vmul.f32 %v12662_v50, %v26393_v32  ;;  %v12628_v19 = vadd.f32 %v27964_v56, %v12462_v41 }
 0x9da   : > { %v12665_v45 = vmax.f32 %v12629_v17, 0.0 }
 0x9db   : > { %v22663_v9 = vpack.c.bf16 %v28029_v27, %v28033_v26  ;;  %v12664_v51 = vmax.f32 %v12628_v19, 0.0  ;;  %v22370_v7 = vpop.f32.mrb[88].mxu0  ;;  %v28723_v19 = vld [vmem:[#allocation44_spill] sm:$0xff] }
 0x9dc   : > { %v28039_v28 = vmul.f32 %v12665_v45, %v26402_v42  ;;  %v12631_v29 = vadd.f32 %v22370_v7, %v27964_v56  ;;  %v12472_v31 = vpop.f32.mrb[89].mxu0  ;;  %v12722_v27 = vld [vmem:[#allocation16] sm:$0xff] }
 0x9dd   : > { %v28043_v62 = vmul.f32 %v12664_v51, %v28697_v43  ;;  %v12630_v32 = vadd.f32 %v27964_v56, %v12472_v31 }
 0x9de   : > { %v12667_v8 = vmax.f32 %v12631_v29, 0.0  ;;  %v28724_v29 = vld [vmem:[#allocation45_spill] sm:$0xff] }
 0x9df   : > { %v22667_v16 = vpack.c.bf16 %v28039_v28, %v28043_v62  ;;  %v12666_v6 = vmax.f32 %v12630_v32, 0.0  ;;  %v22373_v57 = vpop.f32.mrb[90].mxu0  ;;  %v12728_v28 = vld [vmem:[#allocation16 + $0x30] sm:$0xff] }
 0x9e0   : > { %v12703_v37 = vmul.f32 %v12667_v8, %v28698_v1  ;;  %v12633_v34 = vadd.f32 %v22373_v57, %v27964_v56  ;;  %v12482_v42 = vpop.f32.mrb[91].mxu0  ;;  %v12732_v62 = vld [vmem:[#allocation16 + $0x50] sm:$0xff] }
 0x9e1   : > { %v12702_v10 = vmul.f32 %v12666_v6, %v28699_v44  ;;  %v12632_v24 = vadd.f32 %v27964_v56, %v12482_v42  ;;  %v28725_v6 = vld [vmem:[#allocation46_spill] sm:$0xff]  ;;  %v28726_v42 = vld [vmem:[#allocation47_spill] sm:$0xff] }
 0x9e2   : > { %v12669_v11 = vmax.f32 %v12633_v34, 0.0 }
 0x9e3   : > { %v12668_v43 = vmax.f32 %v12632_v24, 0.0  ;;  %v22376_v25 = vpop.f32.mrb[92].mxu0  ;;  %v22637_v33 = vpack.c.bf16 %v12703_v37, %v12702_v10 }
 0x9e4   : > { %v12705_v59 = vmul.f32 %v12669_v11, %v28700_v54  ;;  %v12635_v12 = vadd.f32 %v22376_v25, %v27964_v56  ;;  %v12492_v20 = vpop.f32.mrb[93].mxu0 }
 0x9e5   : > { %v12704_v13 = vmul.f32 %v12668_v43, %v28701_v0  ;;  %v12634_v1 = vadd.f32 %v27964_v56, %v12492_v20  ;;  %22638 = vmatprep.subr.bf16.mxu1 %v22637_v33  ;;  %v28727_v43 = vld [vmem:[#allocation48_spill] sm:$0xff] }
 0x9e6   : > { %v12671_v48 = vmax.f32 %v12635_v12, 0.0  ;;  %22640 = vmatpush3.bf16.msra.mxu1 %v22639_v18  ;;  %v28728_v12 = vld [vmem:[#allocation49_spill] sm:$0xff] }
 0x9e7   : > { %v12670_v44 = vmax.f32 %v12634_v1, 0.0  ;;  %v22379_v3 = vpop.f32.mrb[94].mxu0  ;;  %v22641_v47 = vpack.c.bf16 %v12705_v59, %v12704_v13 }
 0x9e8   : > { %v12707_v14 = vmul.f32 %v12671_v48, %v28702_v30  ;;  %v12637_v54 = vadd.f32 %v22379_v3, %v27964_v56  ;;  %v12502_v39 = vpop.f32.mrb[95].mxu0  ;;  %v28729_v48 = vld [vmem:[#allocation50_spill] sm:$0xff] }
 0x9e9   : > { %v12706_v63 = vmul.f32 %v12670_v44, %v28721_v15  ;;  %v12636_v0 = vadd.f32 %v27964_v56, %v12502_v39  ;;  %22642 = vmatprep.subr.bf16.mxu1 %v22641_v47 }
 0x9ea   : > { %v12673_v50 = vmax.f32 %v12637_v54, 0.0  ;;  %22644 = vmatpush3.bf16.msra.mxu1 %v22643_v2 }
 0x9eb   : > { %v12672_v49 = vmax.f32 %v12636_v0, 0.0  ;;  %v22382_v58 = vpop.f32.mrb[96].mxu0  ;;  %v22645_v18 = vpack.c.bf16 %v12707_v14, %v12706_v63  ;;  %v28730_v14 = vld [vmem:[#allocation51_spill] sm:$0xff]  ;;  %v28731_v63 = vld [vmem:[#allocation52_spill] sm:$0xff] }
 0x9ec   : > { %v12709_v17 = vmul.f32 %v12673_v50, %v28722_v4  ;;  %v12639_v30 = vadd.f32 %v22382_v58, %v27964_v56  ;;  %v12512_v41 = vpop.f32.mrb[97].mxu0  ;;  %v28732_v58 = vld [vmem:[#allocation53_spill] sm:$0xff] }
 0x9ed   : > { %v12708_v45 = vmul.f32 %v12672_v49, %v28723_v19  ;;  %v12638_v51 = vadd.f32 %v27964_v56, %v12512_v41  ;;  %22646 = vmatprep.subr.bf16.mxu1 %v22645_v18 }
 0x9ee   : > { %v12675_v7 = vmax.f32 %v12639_v30, 0.0  ;;  %22648 = vmatpush3.bf16.msra.mxu1 %v22647_v40  ;;  %v28733_v30 = vld [vmem:[#allocation54_spill] sm:$0xff] }
 0x9ef   : > { %v12674_v35 = vmax.f32 %v12638_v51, 0.0  ;;  %v22385_v46 = vpop.f32.mrb[98].mxu0  ;;  %v22649_v2 = vpack.c.bf16 %v12709_v17, %v12708_v45  ;;  %v25045_v51 = vmov 0.0|0.0  }
 0x9f0   : > { %v12711_v31 = vmul.f32 %v12675_v7, %v28724_v29  ;;  %v12641_v32 = vadd.f32 %v22385_v46, %v27964_v56  ;;  %v12522_v8 = vpop.f32.mrb[99].mxu0  ;;  %v12726_v7 = vld [vmem:[#allocation16 + $0x20] sm:$0xff] }
 0x9f1   : > { %v12710_v57 = vmul.f32 %v12674_v35, %v28725_v6  ;;  %v12640_v37 = vadd.f32 %v27964_v56, %v12522_v8  ;;  %22650 = vmatprep.subr.bf16.mxu1 %v22649_v2  ;;  %v28734_v35 = vld [vmem:[#allocation55_spill] sm:$0xff]  ;;  %v28735_v2 = vld [vmem:[#allocation56_spill] sm:$0xff]  ;;  %v12735_v6 = vld [vmem:[#allocation16 + $0x68] sm:$0xf] }
 0x9f2   : > { %v12677_v34 = vmax.f32 %v12641_v32, 0.0  ;;  %22652 = vmatpush3.bf16.msra.mxu1 %v22651_v52  ;;  %v12729_v32 = vld [vmem:[#allocation16 + $0x38] sm:$0xff] }
 0x9f3   : > { %v12676_v38 = vmax.f32 %v12640_v37, 0.0  ;;  %v22388_v55 = vpop.f32.mrb[100].mxu0  ;;  %v22653_v40 = vpack.c.bf16 %v12711_v31, %v12710_v57  ;;  %v23795_v8 = vld [vmem:[#allocation17 + $0x104] ss:$8 sps:$4 sm:$0xff]   ;;  %v12734_v57 = vld [vmem:[#allocation16 + $0x60] sm:$0xf] }
 0x9f4   : > { %v12713_v10 = vmul.f32 %v12677_v34, %v28726_v42  ;;  %v12643_v24 = vadd.f32 %v22388_v55, %v27964_v56  ;;  %v12532_v11 = vpop.f32.mrb[101].mxu0  ;;  %v28736_v37 = vmov 0.0   ;;  %v12724_v34 = vld [vmem:[#allocation16 + $0x10] sm:$0xff] }
 0x9f5   : > { %v12712_v25 = vmul.f32 %v12676_v38, %v28727_v43  ;;  %v12642_v33 = vadd.f32 %v27964_v56, %v12532_v11  ;;  %22654 = vmatprep.subr.bf16.mxu1 %v22653_v40  ;;  %v23793_v38 = vld [vmem:[#allocation17 + $0x100] ss:$8 sps:$4 sm:$0xff]   ;;  %v23798_v55 = vld [vmem:[#allocation17 + $0x114] ss:$8 sps:$4 sm:$0xff]   ;;  %v23796_v42 = vld [vmem:[#allocation17 + $0x110] ss:$8 sps:$4 sm:$0xff]  }
 0x9f6   : > { %v12679_v59 = vmax.f32 %v12643_v24, 0.0  ;;  %22656 = vmatpush3.bf16.msra.mxu1 %v22655_v22  ;;  %v12727_v40 = vld [vmem:[#allocation16 + $0x28] sm:$0xff]  ;;  %v12730_v24 = vld [vmem:[#allocation16 + $0x40] sm:$0xff] }
 0x9f7   : > { %v12678_v61 = vmax.f32 %v12642_v33, 0.0  ;;  %v22391_v53 = vpop.f32.mrb[102].mxu0  ;;  %v22657_v52 = vpack.c.bf16 %v12713_v10, %v12712_v25  ;;  %v23801_v10 = vld [vmem:[#allocation17 + $0x124] ss:$8 sps:$4 sm:$0xff]   ;;  %v23799_v11 = vld [vmem:[#allocation17 + $0x120] ss:$8 sps:$4 sm:$0xff]  }
 0x9f8   : > { %v12715_v20 = vmul.f32 %v12679_v59, %v28728_v12  ;;  %v12645_v13 = vadd.f32 %v22391_v53, %v27964_v56  ;;  %v12542_v1 = vpop.f32.mrb[103].mxu0  ;;  %v23807_v43 = vld [vmem:[#allocation17 + $0x134] ss:$8 sps:$4 sm:$0xff]   ;;  %v12733_v25 = vld [vmem:[#allocation16 + $0x58] sm:$0xff]  ;;  %v23805_v33 = vld [vmem:[#allocation17 + $0x130] ss:$8 sps:$4 sm:$0xff]  }
 0x9f9   : > { %v12714_v44 = vmul.f32 %v12678_v61, %v28729_v48  ;;  %v12644_v3 = vadd.f32 %v27964_v56, %v12542_v1  ;;  %22658 = vmatprep.subr.bf16.mxu1 %v22657_v52  ;;  %v23813_v59 = vld [vmem:[#allocation17 + $0x144] ss:$8 sps:$4 sm:$0xff]   ;;  %v12736_v61 = vld [vmem:[#allocation16 + $0x70] sm:$0xf]  ;;  %v23811_v53 = vld [vmem:[#allocation17 + $0x140] ss:$8 sps:$4 sm:$0xff]  }
 0x9fa   : > { %v12681_v47 = vmax.f32 %v12645_v13, 0.0  ;;  %22660 = vmatpush3.bf16.msra.mxu1 %v22659_v21  ;;  %v23819_v52 = vld [vmem:[#allocation17 + $0x154] ss:$8 sps:$4 sm:$0xff]   ;;  %v23817_v12 = vld [vmem:[#allocation17 + $0x150] ss:$8 sps:$4 sm:$0xff]  }
 0x9fb   : > { %v12680_v5 = vmax.f32 %v12644_v3, 0.0  ;;  %v22394_v60 = vpop.f32.mrb[104].mxu0  ;;  %v22661_v22 = vpack.c.bf16 %v12715_v20, %v12714_v44  ;;  %v23825_v20 = vld [vmem:[#allocation17 + $0x164] ss:$8 sps:$4 sm:$0xff]   ;;  %v23823_v13 = vld [vmem:[#allocation17 + $0x160] ss:$8 sps:$4 sm:$0xff]  }
 0x9fc   : > { %v12717_v54 = vmul.f32 %v12681_v47, %v28730_v14  ;;  %v12647_v39 = vadd.f32 %v22394_v60, %v27964_v56  ;;  %v12552_v15 = vpop.f32.mrb[105].mxu0  ;;  %v23831_v1 = vld [vmem:[#allocation17 + $0x174] ss:$8 sps:$4 sm:$0xff]   ;;  %v23829_v48 = vld [vmem:[#allocation17 + $0x170] ss:$8 sps:$4 sm:$0xff]  }
 0x9fd   : > { %v12716_v0 = vmul.f32 %v12680_v5, %v28731_v63  ;;  %v12646_v50 = vadd.f32 %v27964_v56, %v12552_v15  ;;  %22662 = vmatprep.subr.bf16.mxu1 %v22661_v22  ;;  %v23832_v44 = vld [vmem:[#allocation17 + $0x50] ss:$8 sps:$4 sm:$0xff]   ;;  %v23834_v3 = vld [vmem:[#allocation17 + $0x54] ss:$8 sps:$4 sm:$0xff]   ;;  %v23835_v47 = vld [vmem:[#allocation17 + $0x180] ss:$8 sps:$4 sm:$0xff]  }
 0x9fe   : > { %v12683_v49 = vmax.f32 %v12647_v39, 0.0  ;;  %22664 = vmatpush3.bf16.msra.mxu1 %v22663_v9  ;;  %16932 = vmatprep.subr.bf16.mxu0 %v23834_v3  ;;  %v23837_v5 = vld [vmem:[#allocation17 + $0x184] ss:$8 sps:$4 sm:$0xff]   ;;  %v23838_v60 = vld [vmem:[#allocation17 + $0x60] ss:$8 sps:$4 sm:$0xff]  }
 0x9ff   : > { %v12682_v36 = vmax.f32 %v12646_v50, 0.0  ;;  %v22397_v23 = vpop.f32.mrb[106].mxu0  ;;  %v22665_v21 = vpack.c.bf16 %v12717_v54, %v12716_v0  ;;  %16933 = vmatpush1.bf16.msra.mxu0 %v23832_v44  ;;  %v23840_v22 = vld [vmem:[#allocation17 + $0x64] ss:$8 sps:$4 sm:$0xff]   ;;  %v23841_v14 = vld [vmem:[#allocation17 + $0x190] ss:$8 sps:$4 sm:$0xff]  }
 0xa00   : > { %v12719_v18 = vmul.f32 %v12683_v49, %v28732_v58  ;;  %v12649_v4 = vadd.f32 %v22397_v23, %v27964_v56  ;;  %v12562_v17 = vpop.f32.mrb[107].mxu0  ;;  %16934 = vmatprep.subr.bf16.mxu0 %v23840_v22  ;;  %v23843_v54 = vld [vmem:[#allocation17 + $0x194] ss:$8 sps:$4 sm:$0xff]   ;;  %v23844_v39 = vld [vmem:[#allocation17 + $0x70] ss:$8 sps:$4 sm:$0xff]  }
 0xa01   : > { %v12718_v41 = vmul.f32 %v12682_v36, %v28733_v30  ;;  %v12648_v19 = vadd.f32 %v27964_v56, %v12562_v17  ;;  %22666 = vmatprep.subr.bf16.mxu1 %v22665_v21  ;;  %v12725_v56 = vld [vmem:[#allocation16 + $0x18] sm:$0xff]  ;;  %v23846_v15 = vld [vmem:[#allocation17 + $0x74] ss:$8 sps:$4 sm:$0xff]   ;;  %v23853_v21 = vld [vmem:[#allocation17 + $0x1b0] ss:$8 sps:$4 sm:$0xff]  }
 0xa02   : > { %v12685_v45 = vmax.f32 %v12649_v4, 0.0  ;;  %22668 = vmatpush3.bf16.msra.mxu1 %v22667_v16  ;;  %v12731_v16 = vld [vmem:[#allocation16 + $0x48] sm:$0xff]  ;;  %v23847_v63 = vld [vmem:[#allocation17 + $0x1a0] ss:$8 sps:$4 sm:$0xff]   ;;  %v23849_v0 = vld [vmem:[#allocation17 + $0x1a4] ss:$8 sps:$4 sm:$0xff]  }
 0xa03   : > { %v22670_v26 = vpack.c.bf16 %v12719_v18, %v12718_v41  ;;  %v12684_v9 = vmax.f32 %v12648_v19, 0.0  ;;  %22669 = vmatprep.subr.bf16.mxu1 %v25045_v51  ;;  %16935 = vmatpush1.bf16.msra.mxu0 %v23838_v60  ;;  %v23850_v50 = vld [vmem:[#allocation17 + $0x80] ss:$8 sps:$4 sm:$0xff]   ;;  %v23852_v49 = vld [vmem:[#allocation17 + $0x84] ss:$8 sps:$4 sm:$0xff]  }
 0xa04   : > { %v12721_v46 = vmul.f32 %v12685_v45, %v28734_v35  ;;  %16936 = vmatprep.subr.bf16.mxu0 %v23846_v15  ;;  %v23855_v36 = vld [vmem:[#allocation17 + $0x1b4] ss:$8 sps:$4 sm:$0xff]   ;;  %v23856_v58 = vld [vmem:[#allocation17 + $0x90] ss:$8 sps:$4 sm:$0xff]   ;;  %v23861_v18 = vld [vmem:[#allocation17 + $0x1c4] ss:$8 sps:$4 sm:$0xff]  }
 0xa05   : > { %v12720_v29 = vmul.f32 %v12684_v9, %v28735_v2  ;;  %12817 = vmatmul.mubr.f32.vlgmr.msra.gmra.mrb[36].mxu1 %v12722_v27  ;;  %v23858_v23 = vld [vmem:[#allocation17 + $0x94] ss:$8 sps:$4 sm:$0xff]   ;;  %v23864_v4 = vld [vmem:[#allocation17 + $0xa4] ss:$8 sps:$4 sm:$0xff]   ;;  %v23859_v17 = vld [vmem:[#allocation17 + $0x1c0] ss:$8 sps:$4 sm:$0xff]  }
 0xa06   : > { %22671 = vmatpush3.bf16.msra.mxu1 %v22670_v26  ;;  %12821 = vmatprep.mubr.f32.mxu1 %v12726_v7  ;;  %v23862_v30 = vld [vmem:[#allocation17 + $0xa0] ss:$8 sps:$4 sm:$0xff]   ;;  %v23867_v41 = vld [vmem:[#allocation17 + $0x1d4] ss:$8 sps:$4 sm:$0xff]   ;;  %v23865_v45 = vld [vmem:[#allocation17 + $0x1d0] ss:$8 sps:$4 sm:$0xff]  }
 0xa07   : > { %v22673_v31 = vpack.c.bf16 %v12721_v46, %v12720_v29  ;;  %22672 = vmatprep.subr.bf16.mxu1 %v25045_v51  ;;  %16937 = vmatpush1.bf16.msra.mxu0 %v23844_v39  ;;  %v23870_v19 = vld [vmem:[#allocation17 + $0xb4] ss:$8 sps:$4 sm:$0xff]   ;;  %v23868_v27 = vld [vmem:[#allocation17 + $0xb0] ss:$8 sps:$4 sm:$0xff]   ;;  %v23873_v26 = vld [vmem:[#allocation17 + $0x1e4] ss:$8 sps:$4 sm:$0xff]  }
 0xa08   : > { %16938 = vmatprep.subr.bf16.mxu0 %v23852_v49  ;;  %v23876_v9 = vld [vmem:[#allocation17 + $0xc4] ss:$8 sps:$4 sm:$0xff]   ;;  %v23871_v51 = vld [vmem:[#allocation17 + $0x1e0] ss:$8 sps:$4 sm:$0xff]   ;;  %v23879_v35 = vld [vmem:[#allocation17 + $0x1f4] ss:$8 sps:$4 sm:$0xff]  }
 0xa09   : > { %12822 = vmatmul.mubr.f32.gmra.mrb[38].mxu1 %v12725_v56  ;;  %v23874_v7 = vld [vmem:[#allocation17 + $0xc0] ss:$8 sps:$4 sm:$0xff]   ;;  %v23882_v46 = vld [vmem:[#allocation17 + $0xd4] ss:$8 sps:$4 sm:$0xff]   ;;  %v23877_v2 = vld [vmem:[#allocation17 + $0x1f0] ss:$8 sps:$4 sm:$0xff]  }
 0xa0a   : > { %22674 = vmatpush3.bf16.msra.mxu1 %v22673_v31  ;;  %12826 = vmatprep.mubr.f32.mxu1 %v12729_v32  ;;  %v23880_v29 = vld [vmem:[#allocation17 + $0xd0] ss:$8 sps:$4 sm:$0xff]   ;;  %v23885_v56 = vld [vmem:[#allocation17 + $0x204] ss:$8 sps:$4 sm:$0xff]   ;;  %v23886_v32 = vld [vmem:[#allocation17 + $0xe0] ss:$8 sps:$4 sm:$0xff]  }
 0xa0b   : > { %16963 = vmatprep.subr.bf16.mxu1 %v23795_v8  ;;  %16939 = vmatpush1.bf16.msra.mxu0 %v23850_v50  ;;  %v23888_v31 = vld [vmem:[#allocation17 + $0xe4] ss:$8 sps:$4 sm:$0xff]   ;;  %v23894_v8 = vld [vmem:[#allocation17 + $0xf4] ss:$8 sps:$4 sm:$0xff]  }
 0xa0c   : > { %16940 = vmatprep.subr.bf16.mxu0 %v23858_v23 }
 0xa0d   : > { %12827 = vmatmul.mubr.f32.gmra.mrb[40].mxu1 %v12728_v28  ;;  %v23892_v28 = vld [vmem:[#allocation17 + $0xf0] ss:$8 sps:$4 sm:$0xff]  }
 0xa0e   : > { %12831 = vmatprep.mubr.f32.mxu1 %v12732_v62 }
 0xa0f   : > { %16941 = vmatpush1.bf16.msra.mxu0 %v23856_v58 }
 0xa10   : > { %16942 = vmatprep.subr.bf16.mxu0 %v23864_v4 }
 0xa11   : > { %12832 = vmatmul.mubr.f32.gmra.mrb[42].mxu1 %v12731_v16 }
 0xa12   : > { %12836 = vmatprep.mubr.f32.mxu1 %v12735_v6 }
 0xa13   : > { %16943 = vmatpush1.bf16.msra.mxu0 %v23862_v30 }
 0xa14   : > { %16944 = vmatprep.subr.bf16.mxu0 %v23870_v19 }
 0xa15   : > { %12837 = vmatmul.mubr.f32.gmra.mrb[44].mxu1 %v12734_v57 }
 0xa16   : > { %22406 = vmatprep.mubr.msk.f32.mxu1 %vm25046_vm6, %v28736_v37 }
 0xa17   : > { %16945 = vmatpush1.bf16.msra.mxu0 %v23868_v27 }
 0xa18   : > { %16946 = vmatprep.subr.bf16.mxu0 %v23876_v9 }
 0xa19   : > { %22407 = vmatmul.mubr.msk.f32.vlgmr.msra.gmra.mrb[46].mxu1 %vm4704_vm2, %v12724_v34 }
 0xa1a   : > { %22409 = vmatprep.mubr.msk.f32.mxu1 %vm25046_vm6, %v28736_v37  ;;  %16964 = vmatpush1.bf16.msra.mxu1 %v23793_v38 }
 0xa1b   : > { %16965 = vmatprep.subr.bf16.mxu1 %v23798_v55  ;;  %16947 = vmatpush1.bf16.msra.mxu0 %v23874_v7 }
 0xa1c   : > { %16948 = vmatprep.subr.bf16.mxu0 %v23882_v46 }
 0xa1d   : > { %22410 = vmatmul.mubr.msk.f32.gmra.mrb[48].mxu1 %vm4704_vm2, %v12727_v40 }
 0xa1e   : > { %22412 = vmatprep.mubr.msk.f32.mxu1 %vm25046_vm6, %v28736_v37  ;;  %16966 = vmatpush1.bf16.msra.mxu1 %v23796_v42  ;;  %v12932_v42 = vlaneseq }
 0xa1f   : > { %16967 = vmatprep.subr.bf16.mxu1 %v23801_v10  ;;  %16949 = vmatpush1.bf16.msra.mxu0 %v23880_v29  ;;  %v25047_v10 = vmov 1966171168  }
 0xa20   : > { %16950 = vmatprep.subr.bf16.mxu0 %v23888_v31  ;;  %vm28132_vm7 = vcmp.lt.s32.totalorder %v12932_v42, 128 }
 0xa21   : > { %22413 = vmatmul.mubr.msk.f32.gmra.mrb[50].mxu1 %vm4704_vm2, %v12730_v24  ;;  %v12939_v24 = vunpack.c.l.s4 %v25047_v10 }
 0xa22   : > { %22415 = vmatprep.mubr.msk.f32.mxu1 %vm25046_vm6, %v28736_v37  ;;  %16968 = vmatpush1.bf16.msra.mxu1 %v23799_v11 }
 0xa23   : > { %16969 = vmatprep.subr.bf16.mxu1 %v23807_v43  ;;  %16951 = vmatpush1.bf16.msra.mxu0 %v23886_v32 }
 0xa24   : > { %16952 = vmatprep.subr.bf16.mxu0 %v23894_v8 }
 0xa25   : > { %22416 = vmatmul.mubr.msk.f32.gmra.mrb[52].mxu1 %vm4704_vm2, %v12733_v25 }
 0xa26   : > { %22418 = vmatprep.mubr.msk.f32.mxu1 %vm25046_vm6, %v28736_v37  ;;  %16970 = vmatpush1.bf16.msra.mxu1 %v23805_v33  ;;  %v12940_v33 = vunpack.c.0.s8 %v12939_v24 }
 0xa27   : > { %16971 = vmatprep.subr.bf16.mxu1 %v23813_v59  ;;  %16953 = vmatpush1.bf16.msra.mxu0 %v23892_v28  ;;  %v28125_v59 = vshrl.u32 %v12932_v42, 7 }
 0xa29   : > { %22419 = vmatmul.mubr.msk.f32.gmra.mrb[54].mxu1 %vm4704_vm2, %v12736_v61 }
 0xa2a   : > { %16972 = vmatpush1.bf16.msra.mxu1 %v23811_v53 }
 0xa2b   : > { %16973 = vmatprep.subr.bf16.mxu1 %v23819_v52 }
 0xa2e   : > { %16974 = vmatpush1.bf16.msra.mxu1 %v23817_v12  ;;  %v28130_v12 = vsub.s32 %v12940_v33, %v28125_v59 }
 0xa2f   : > { %16975 = vmatprep.subr.bf16.mxu1 %v23825_v20 }
 0xa32   : > { %16976 = vmatpush1.bf16.msra.mxu1 %v23823_v13 }
 0xa33   : > { %16977 = vmatprep.subr.bf16.mxu1 %v23831_v1 }
 0xa36   : > { %16978 = vmatpush1.bf16.msra.mxu1 %v23829_v48 }
 0xa37   : > { %16979 = vmatprep.subr.bf16.mxu1 %v23837_v5 }
 0xa3a   : > { %16980 = vmatpush1.bf16.msra.mxu1 %v23835_v47 }
 0xa3b   : > { %16981 = vmatprep.subr.bf16.mxu1 %v23843_v54 }
 0xa3e   : > { %16982 = vmatpush1.bf16.msra.mxu1 %v23841_v14 }
 0xa3f   : > { %16983 = vmatprep.subr.bf16.mxu1 %v23849_v0 }
 0xa42   : > { %16984 = vmatpush1.bf16.msra.mxu1 %v23847_v63 }
 0xa43   : > { %16985 = vmatprep.subr.bf16.mxu1 %v23855_v36 }
 0xa46   : > { %16986 = vmatpush1.bf16.msra.mxu1 %v23853_v21 }
 0xa47   : > { %16987 = vmatprep.subr.bf16.mxu1 %v23861_v18 }
 0xa4a   : > { %16988 = vmatpush1.bf16.msra.mxu1 %v23859_v17 }
 0xa4b   : > { %16989 = vmatprep.subr.bf16.mxu1 %v23867_v41 }
 0xa4e   : > { %16990 = vmatpush1.bf16.msra.mxu1 %v23865_v45 }
 0xa4f   : > { %16991 = vmatprep.subr.bf16.mxu1 %v23873_v26 }
 0xa52   : > { %16992 = vmatpush1.bf16.msra.mxu1 %v23871_v51 }
 0xa53   : > { %16993 = vmatprep.subr.bf16.mxu1 %v23879_v35 }
 0xa56   : > { %16994 = vmatpush1.bf16.msra.mxu1 %v23877_v2 }
 0xa57   : > { %17004 = vmatprep.subr.bf16.mxu1 %v23885_v56 }
 0xad8   : > { %v20647_v62 = vpop.f32.mrb[36].mxu1 }
 0xad9   : > { %v20648_v16 = vpop.f32.mrb[37].mxu1 }
 0xada   : > { %v20649_v6 = vadd.f32 %v20648_v16, %v20647_v62  ;;  %v28178_v62 = vsub.s32 3, %v28125_v59 }
 0xadc   : > { %v20650_v57 = vpop.f32.mrb[38].mxu1 }
 0xadd   : > { %v20651_v37 = vpop.f32.mrb[39].mxu1 }
 0xade   : > { %v20652_v34 = vadd.f32 %v20651_v37, %v20650_v57 }
 0xae0   : > { %v20653_v38 = vpop.f32.mrb[40].mxu1 }
 0xae1   : > { %v20654_v55 = vpop.f32.mrb[41].mxu1 }
 0xae2   : > { %v20655_v40 = vadd.f32 %v20654_v55, %v20653_v38 }
 0xae4   : > { %v20656_v11 = vpop.f32.mrb[42].mxu1 }
 0xae5   : > { %v20657_v43 = vpop.f32.mrb[43].mxu1 }
 0xae6   : > { %v20658_v25 = vadd.f32 %v20657_v43, %v20656_v11 }
 0xae8   : > { %v20659_v61 = vpop.f32.mrb[44].mxu1 }
 0xae9   : > { %v20660_v53 = vpop.f32.mrb[45].mxu1 }
 0xaea   : > { %v28127_v52 = vadd.f32 %v20660_v53, %v20659_v61 }
 0xaec   : > { %v12908_v20 = vpop.f32.mrb[46].mxu1 }
 0xaed   : > { %v12909_v1 = vadd.f32 %v20649_v6, %v12908_v20  ;;  %v22408_v48 = vpop.f32.mrb[47].mxu1  ;;  %v28207_v20 = vsub.s32 1, %v28125_v59 }
 0xaee   : > { %v28219_v48 = vsub.s32 0, %v28125_v59 }
 0xaef   : > { %12936 = vst.msk [vmem:[#allocation4] sm:$0x1] %vm28132_vm7, %v12909_v1  ;;  %v12944_v44 = vrot.slane %v12909_v1, %v28130_v12  ;;  %v12968_v3 = vcombine.high %v12909_v1, %v12909_v1 }
 0xaf0   : > { %v12913_v47 = vpop.f32.mrb[48].mxu1 }
 0xaf1   : > { %v12945_v5 = vcombine.high %v12944_v44, %v12944_v44  ;;  %v12952_v60 = vrot.slane %v12944_v44, %v28130_v12  ;;  %v12975_v22 = vrot.slane %v12968_v3, %v28130_v12  ;;  %v12914_v14 = vadd.f32 %v20652_v34, %v12913_v47  ;;  %v22411_v54 = vpop.f32.mrb[49].mxu1 }
 0xaf2   : > { %v28222_v44 = vsub.s32 5, %v28125_v59 }
 0xaf3   : > { %v12959_v39 = vrot.slane %v12945_v5, %v28130_v12  ;;  %v12962_v15 = vcombine.high %v12952_v60, %v12952_v60  ;;  %v12982_v63 = vrot.slane %v12975_v22, %v28130_v12  ;;  %v12985_v0 = vcombine.high %v12975_v22, %v12975_v22  ;;  %13001 = vst.msk [vmem:[#allocation4 + $0x8] sm:$0x1] %vm28132_vm7, %v12914_v14 }
 0xaf4   : > { %v13009_v50 = vrot.slane %v12914_v14, %v28130_v12  ;;  %v13033_v49 = vcombine.high %v12914_v14, %v12914_v14  ;;  %v12918_v36 = vpop.f32.mrb[50].mxu1 }
 0xaf5   : > { %12961 = vst.msk [vmem:[#allocation4 + $0x1] sm:$0x1] %vm28132_vm7, %v12959_v39  ;;  %12964 = vst.msk [vmem:[#allocation4 + $0x2] sm:$0x1] %vm28132_vm7, %v12962_v15  ;;  %v12965_v23 = vcombine.high %v12959_v39, %v12959_v39  ;;  %v12992_v21 = vrot.slane %v12985_v0, %v28130_v12  ;;  %v12995_v58 = vcombine.high %v12982_v63, %v12982_v63  ;;  %v22414_v4 = vpop.f32.mrb[51].mxu1 }
 0xaf6   : > { %12984 = vst.msk [vmem:[#allocation4 + $0x4] sm:$0x1] %vm28132_vm7, %v12982_v63  ;;  %v12919_v18 = vadd.f32 %v20655_v40, %v12918_v36  ;;  %v13010_v17 = vcombine.high %v13009_v50, %v13009_v50  ;;  %v13017_v30 = vrot.slane %v13009_v50, %v28130_v12  ;;  %v13040_v41 = vrot.slane %v13033_v49, %v28130_v12 }
 0xaf7   : > { %12967 = vst.msk [vmem:[#allocation4 + $0x3] sm:$0x1] %vm28132_vm7, %v12965_v23  ;;  %12994 = vst.msk [vmem:[#allocation4 + $0x5] sm:$0x1] %vm28132_vm7, %v12992_v21  ;;  %v12998_v19 = vcombine.high %v12992_v21, %v12992_v21  ;;  %v28192_v40 = vsub.s32 2, %v28125_v59 }
 0xaf8   : > { %12997 = vst.msk [vmem:[#allocation4 + $0x6] sm:$0x1] %vm28132_vm7, %v12995_v58  ;;  %13066 = vst.msk [vmem:[#allocation4 + $0x10] sm:$0x1] %vm28132_vm7, %v12919_v18  ;;  %v13074_v45 = vrot.slane %v12919_v18, %v28130_v12  ;;  %v13098_v27 = vcombine.high %v12919_v18, %v12919_v18  ;;  %v13024_v26 = vrot.slane %v13010_v17, %v28130_v12  ;;  %v12923_v35 = vpop.f32.mrb[52].mxu1 }
 0xaf9   : > { %v13027_v9 = vcombine.high %v13017_v30, %v13017_v30  ;;  %v13047_v51 = vrot.slane %v13040_v41, %v28130_v12  ;;  %v13050_v7 = vcombine.high %v13040_v41, %v13040_v41  ;;  %13000 = vst.msk [vmem:[#allocation4 + $0x7] sm:$0x1] %vm28132_vm7, %v12998_v19  ;;  %v12924_v56 = vadd.f32 %v20658_v25, %v12923_v35  ;;  %v22417_v31 = vpop.f32.mrb[53].mxu1  ;;  %v23883_v23 = vld [vmem:[#allocation17 + $0x200] ss:$8 sps:$4 sm:$0xff]  }
 0xafa   : > { %v13075_v46 = vcombine.high %v13074_v45, %v13074_v45  ;;  %v13082_v2 = vrot.slane %v13074_v45, %v28130_v12  ;;  %v13105_v29 = vrot.slane %v13098_v27, %v28130_v12  ;;  %13026 = vst.msk [vmem:[#allocation4 + $0x9] sm:$0x1] %vm28132_vm7, %v13024_v26  ;;  %v13030_v32 = vcombine.high %v13024_v26, %v13024_v26  ;;  %v23891_v17 = vld [vmem:[#allocation17 + $0x214] ss:$8 sps:$4 sm:$0xff]   ;;  %v23889_v26 = vld [vmem:[#allocation17 + $0x210] ss:$8 sps:$4 sm:$0xff]  }
 0xafb   : > { %13029 = vst.msk [vmem:[#allocation4 + $0xa] sm:$0x1] %vm28132_vm7, %v13027_v9  ;;  %13049 = vst.msk [vmem:[#allocation4 + $0xc] sm:$0x1] %vm28132_vm7, %v13047_v51  ;;  %v13057_v8 = vrot.slane %v13050_v7, %v28130_v12  ;;  %v13060_v28 = vcombine.high %v13047_v51, %v13047_v51  ;;  %v13139_v38 = vrot.slane %v12924_v56, %v28130_v12  ;;  %v28266_v51 = vsub.s32 4, %v28125_v59 }
 0xafc   : > { %v13089_v16 = vrot.slane %v13075_v46, %v28130_v12  ;;  %v13092_v6 = vcombine.high %v13082_v2, %v13082_v2  ;;  %v13112_v57 = vrot.slane %v13105_v29, %v28130_v12  ;;  %v13115_v37 = vcombine.high %v13105_v29, %v13105_v29  ;;  %13131 = vst.msk [vmem:[#allocation4 + $0x18] sm:$0x1] %vm28132_vm7, %v12924_v56  ;;  %v12928_v42 = vpop.f32.mrb[54].mxu1  ;;  %v23897_v35 = vld [vmem:[#allocation17 + $0x224] ss:$8 sps:$4 sm:$0xff]  }
 0xafd   : > { %13032 = vst.msk [vmem:[#allocation4 + $0xb] sm:$0x1] %vm28132_vm7, %v13030_v32  ;;  %13059 = vst.msk [vmem:[#allocation4 + $0xd] sm:$0x1] %vm28132_vm7, %v13057_v8  ;;  %v13063_v34 = vcombine.high %v13057_v8, %v13057_v8  ;;  %v13163_v55 = vcombine.high %v12924_v56, %v12924_v56  ;;  %v12929_v43 = vadd.f32 %v28127_v52, %v12928_v42  ;;  %v22420_v25 = vpop.f32.mrb[55].mxu1  ;;  %v28269_v7 = vsub.s32 7, %v28125_v59 }
 0xafe   : > { %13062 = vst.msk [vmem:[#allocation4 + $0xe] sm:$0x1] %vm28132_vm7, %v13060_v28  ;;  %13091 = vst.msk [vmem:[#allocation4 + $0x11] sm:$0x1] %vm28132_vm7, %v13089_v16  ;;  %v13095_v10 = vcombine.high %v13089_v16, %v13089_v16  ;;  %v13122_v24 = vrot.slane %v13115_v37, %v28130_v12  ;;  %v13125_v11 = vcombine.high %v13112_v57, %v13112_v57  ;;  %v28272_v46 = vsub.s32 6, %v28125_v59 }
 0xaff   : > { %13094 = vst.msk [vmem:[#allocation4 + $0x12] sm:$0x1] %vm28132_vm7, %v13092_v6  ;;  %13114 = vst.msk [vmem:[#allocation4 + $0x14] sm:$0x1] %vm28132_vm7, %v13112_v57  ;;  %v13140_v33 = vcombine.high %v13139_v38, %v13139_v38  ;;  %v13147_v61 = vrot.slane %v13139_v38, %v28130_v12  ;;  %v13170_v53 = vrot.slane %v13163_v55, %v28130_v12  ;;  %v23895_v8 = vld [vmem:[#allocation17 + $0x220] ss:$8 sps:$4 sm:$0xff]  }
 0xb00   : > { %13065 = vst.msk [vmem:[#allocation4 + $0xf] sm:$0x1] %vm28132_vm7, %v13063_v34  ;;  %13097 = vst.msk [vmem:[#allocation4 + $0x13] sm:$0x1] %vm28132_vm7, %v13095_v10  ;;  %v13128_v52 = vcombine.high %v13122_v24, %v13122_v24  ;;  %v13204_v1 = vrot.slane %v12929_v43, %v28130_v12  ;;  %v28226_v22 = vld [vmem:[#allocation4] sm:$0xff] }
 0xb01   : > { %13124 = vst.msk [vmem:[#allocation4 + $0x15] sm:$0x1] %vm28132_vm7, %v13122_v24  ;;  %13127 = vst.msk [vmem:[#allocation4 + $0x16] sm:$0x1] %vm28132_vm7, %v13125_v11  ;;  %v13154_v3 = vrot.slane %v13140_v33, %v28130_v12  ;;  %v13157_v47 = vcombine.high %v13147_v61, %v13147_v61  ;;  %v13177_v5 = vrot.slane %v13170_v53, %v28130_v12  ;;  %v23900_v28 = vld [vmem:[#allocation17 + $0x234] ss:$8 sps:$4 sm:$0xff]  }
 0xb02   : > { %13196 = vst.msk [vmem:[#allocation4 + $0x20] sm:$0x1] %vm28132_vm7, %v12929_v43  ;;  %v13180_v60 = vcombine.high %v13170_v53, %v13170_v53  ;;  %13130 = vst.msk [vmem:[#allocation4 + $0x17] sm:$0x1] %vm28132_vm7, %v13128_v52  ;;  %v13253_v14 = vrot.slane %v28226_v22, %v28178_v62  ;;  %v13249_v54 = vrot.slane %v28226_v22, %v28192_v40  ;;  %v23898_v42 = vld [vmem:[#allocation17 + $0x230] ss:$8 sps:$4 sm:$0xff]  }
 0xb03   : > { %v13205_v39 = vcombine.high %v13204_v1, %v13204_v1  ;;  %v13212_v15 = vrot.slane %v13204_v1, %v28130_v12  ;;  %13156 = vst.msk [vmem:[#allocation4 + $0x19] sm:$0x1] %vm28132_vm7, %v13154_v3  ;;  %13159 = vst.msk [vmem:[#allocation4 + $0x1a] sm:$0x1] %vm28132_vm7, %v13157_v47  ;;  %v13160_v63 = vcombine.high %v13154_v3, %v13154_v3  ;;  %v23903_v10 = vld [vmem:[#allocation17 + $0x244] ss:$8 sps:$4 sm:$0xff]  }
 0xb04   : > { %13179 = vst.msk [vmem:[#allocation4 + $0x1c] sm:$0x1] %vm28132_vm7, %v13177_v5  ;;  %v13187_v0 = vrot.slane %v13180_v60, %v28130_v12  ;;  %v13190_v50 = vcombine.high %v13177_v5, %v13177_v5  ;;  %v13245_v49 = vrot.slane %v28226_v22, %v28207_v20  ;;  %v13421_v36 = vpack.c.bf16 %v13253_v14, %v13253_v14  ;;  %v23901_v52 = vld [vmem:[#allocation17 + $0x240] ss:$8 sps:$4 sm:$0xff]   ;;  %v23906_v1 = vld [vmem:[#allocation17 + $0x254] ss:$8 sps:$4 sm:$0xff]  }
 0xb05   : > { %v13420_v21 = vpack.c.bf16 %v13249_v54, %v13249_v54  ;;  %v13219_v58 = vrot.slane %v13205_v39, %v28130_v12  ;;  %v13222_v18 = vcombine.high %v13212_v15, %v13212_v15  ;;  %13162 = vst.msk [vmem:[#allocation4 + $0x1b] sm:$0x1] %vm28132_vm7, %v13160_v63  ;;  %v13241_v41 = vrot.slane %v28226_v22, %v28219_v48  ;;  %v23904_v47 = vld [vmem:[#allocation17 + $0x250] ss:$8 sps:$4 sm:$0xff]   ;;  %v23909_v5 = vld [vmem:[#allocation17 + $0x264] ss:$8 sps:$4 sm:$0xff]  }
 0xb06   : > { %13189 = vst.msk [vmem:[#allocation4 + $0x1d] sm:$0x1] %vm28132_vm7, %v13187_v0  ;;  %13192 = vst.msk [vmem:[#allocation4 + $0x1e] sm:$0x1] %vm28132_vm7, %v13190_v50  ;;  %v13193_v4 = vcombine.high %v13187_v0, %v13187_v0  ;;  %v13419_v30 = vpack.c.bf16 %v13245_v49, %v13245_v49  ;;  %v13261_v19 = vrot.slane %v28226_v22, %v28222_v44  ;;  %16995 = vmatprep.mubr.bf16.mxu1 %v13421_v36  ;;  %v23907_v60 = vld [vmem:[#allocation17 + $0x260] ss:$8 sps:$4 sm:$0xff]  }
 0xb07   : > { %13221 = vst.msk [vmem:[#allocation4 + $0x21] sm:$0x1] %vm28132_vm7, %v13219_v58  ;;  %13224 = vst.msk [vmem:[#allocation4 + $0x22] sm:$0x1] %vm28132_vm7, %v13222_v18  ;;  %v13225_v12 = vcombine.high %v13219_v58, %v13219_v58  ;;  %v28259_v45 = vld [vmem:[#allocation4 + $0x8] sm:$0xff]  ;;  %16996 = vmatmul.mubr.bf16.vlgmr.msra.gmra.mrb[56].mxu1 %v13420_v21  ;;  %v13418_v27 = vpack.c.bf16 %v13241_v41, %v13241_v41  ;;  %v13257_v41 = vrot.slane %v28226_v22, %v28266_v51 }
 0xb08   : > { %13195 = vst.msk [vmem:[#allocation4 + $0x1f] sm:$0x1] %vm28132_vm7, %v13193_v4  ;;  %16954 = vmatprep.mubr.bf16.mxu0 %v13419_v30  ;;  %17005 = vmatpush1.bf16.msra.mxu1 %v23883_v23  ;;  %v13423_v9 = vpack.c.bf16 %v13261_v19, %v13261_v19  ;;  %v28276_v2 = vrot.slane %v28259_v45, %v28178_v62  ;;  %v23912_v14 = vld [vmem:[#allocation17 + $0x274] ss:$8 sps:$4 sm:$0xff]   ;;  %v23910_v54 = vld [vmem:[#allocation17 + $0x270] ss:$8 sps:$4 sm:$0xff]  }
 0xb09   : > { %13227 = vst.msk [vmem:[#allocation4 + $0x23] sm:$0x1] %vm28132_vm7, %v13225_v12  ;;  %17006 = vmatprep.subr.bf16.mxu1 %v23891_v17  ;;  %16955 = vmatmul.mubr.bf16.vlgmr.msra.gmra.mrb[108].mxu0 %v13418_v27  ;;  %v28280_v13 = vrot.slane %v28259_v45, %v28192_v40  ;;  %v28284_v29 = vrot.slane %v28259_v45, %v28222_v44  ;;  %v28294_v31 = vld [vmem:[#allocation4 + $0x10] sm:$0xff]  ;;  %v23924_v50 = vld [vmem:[#allocation17 + $0x2b4] ss:$8 sps:$4 sm:$0xff]  }
 0xb0a   : > { %17036 = vmatprep.mubr.bf16.mxu1 %v13423_v9  ;;  %v28288_v56 = vrot.slane %v28259_v45, %v28266_v51  ;;  %v28292_v59 = vrot.slane %v28259_v45, %v28269_v7  ;;  %v28298_v32 = vrot.slane %v28259_v45, %v28272_v46  ;;  %v28302_v16 = vrot.slane %v28294_v31, %v28178_v62  ;;  %v23915_v39 = vld [vmem:[#allocation17 + $0x284] ss:$8 sps:$4 sm:$0xff]   ;;  %v23913_v15 = vld [vmem:[#allocation17 + $0x280] ss:$8 sps:$4 sm:$0xff]   ;;  %v23916_v63 = vld [vmem:[#allocation17 + $0x290] ss:$8 sps:$4 sm:$0xff]  }
 0xb0b   : > { %v28306_v6 = vrot.slane %v28294_v31, %v28192_v40  ;;  %v28310_v57 = vrot.slane %v28294_v31, %v28222_v44  ;;  %v28314_v37 = vrot.slane %v28294_v31, %v28266_v51  ;;  %v28318_v34 = vrot.slane %v28294_v31, %v28269_v7  ;;  %v23919_v0 = vld [vmem:[#allocation17 + $0x2a0] ss:$8 sps:$4 sm:$0xff]   ;;  %v23922_v49 = vld [vmem:[#allocation17 + $0x2b0] ss:$8 sps:$4 sm:$0xff]   ;;  %v23927_v36 = vld [vmem:[#allocation17 + $0x2c4] ss:$8 sps:$4 sm:$0xff]  }
 0xb0c   : > { %17007 = vmatpush1.bf16.msra.mxu1 %v23889_v26  ;;  %v28322_v55 = vrot.slane %v28294_v31, %v28272_v46  ;;  %v23925_v23 = vld [vmem:[#allocation17 + $0x2c0] ss:$8 sps:$4 sm:$0xff]   ;;  %v23930_v21 = vld [vmem:[#allocation17 + $0x2d4] ss:$8 sps:$4 sm:$0xff]   ;;  %v23928_v58 = vld [vmem:[#allocation17 + $0x2d0] ss:$8 sps:$4 sm:$0xff]   ;;  %v13269_v12 = vrot.slane %v28226_v22, %v28269_v7  ;;  %v13422_v26 = vpack.c.bf16 %v13257_v41, %v13257_v41  ;;  %v13277_v41 = vrot.slane %v28259_v45, %v28207_v20 }
 0xb0d   : > { %17008 = vmatprep.subr.bf16.mxu1 %v23897_v35  ;;  %v23933_v18 = vld [vmem:[#allocation17 + $0x2e4] ss:$8 sps:$4 sm:$0xff]   ;;  %v23931_v4 = vld [vmem:[#allocation17 + $0x2e0] ss:$8 sps:$4 sm:$0xff]   ;;  %v23936_v17 = vld [vmem:[#allocation17 + $0x2f4] ss:$8 sps:$4 sm:$0xff]  }
 0xb0e   : > { %v23934_v30 = vld [vmem:[#allocation17 + $0x2f0] ss:$8 sps:$4 sm:$0xff]   ;;  %v23939_v19 = vld [vmem:[#allocation17 + $0x304] ss:$8 sps:$4 sm:$0xff]   ;;  %v23937_v27 = vld [vmem:[#allocation17 + $0x300] ss:$8 sps:$4 sm:$0xff]   ;;  %v13425_v35 = vpack.c.bf16 %v13269_v12, %v13269_v12 }
 0xb0f   : > { %v13231_v38 = vld [vmem:[#allocation4 + $0x18] sm:$0xff] }
 0xb10   : > { %17009 = vmatpush1.bf16.msra.mxu1 %v23895_v8  ;;  %v28325_v24 = vrot.slane %v13231_v38, %v28178_v62  ;;  %v28328_v11 = vrot.slane %v13231_v38, %v28192_v40  ;;  %v28331_v43 = vrot.slane %v13231_v38, %v28222_v44  ;;  %v28334_v25 = vrot.slane %v13231_v38, %v28266_v51  ;;  %v13232_v61 = vld [vmem:[#allocation4 + $0x20] sm:$0xf] }
 0xb11   : > { %17010 = vmatprep.subr.bf16.mxu1 %v23900_v28  ;;  %v28337_v33 = vrot.slane %v13231_v38, %v28269_v7  ;;  %v28340_v53 = vrot.slane %v13231_v38, %v28272_v46  ;;  %v28343_v3 = vrot.slane %v13232_v61, %v28178_v62  ;;  %v28346_v44 = vrot.slane %v13232_v61, %v28192_v40  ;;  %v23918_v62 = vld [vmem:[#allocation17 + $0x294] ss:$8 sps:$4 sm:$0xff]   ;;  %v23921_v40 = vld [vmem:[#allocation17 + $0x2a4] ss:$8 sps:$4 sm:$0xff]   ;;  %v23940_v8 = vld [vmem:[#allocation17 + $0x310] ss:$8 sps:$4 sm:$0xff]  }
 0xb12   : > { %v23942_v9 = vld [vmem:[#allocation17 + $0x314] ss:$8 sps:$4 sm:$0xff]   ;;  %v23945_v28 = vld [vmem:[#allocation17 + $0x324] ss:$8 sps:$4 sm:$0xff]   ;;  %v23943_v38 = vld [vmem:[#allocation17 + $0x320] ss:$8 sps:$4 sm:$0xff]  }
 0xb13   : > { %v23948_v51 = vld [vmem:[#allocation17 + $0x334] ss:$8 sps:$4 sm:$0xff]   ;;  %v23951_v7 = vld [vmem:[#allocation17 + $0x344] ss:$8 sps:$4 sm:$0xff]  }
 0xb14   : > { %17011 = vmatpush1.bf16.msra.mxu1 %v23898_v42  ;;  %v23946_v42 = vld [vmem:[#allocation17 + $0x330] ss:$8 sps:$4 sm:$0xff]   ;;  %v23954_v61 = vld [vmem:[#allocation17 + $0x354] ss:$8 sps:$4 sm:$0xff]  }
 0xb15   : > { %17012 = vmatprep.subr.bf16.mxu1 %v23903_v10  ;;  %v23949_v10 = vld [vmem:[#allocation17 + $0x340] ss:$8 sps:$4 sm:$0xff]  }
 0xb18   : > { %17013 = vmatpush1.bf16.msra.mxu1 %v23901_v52  ;;  %v23952_v52 = vld [vmem:[#allocation17 + $0x350] ss:$8 sps:$4 sm:$0xff]  }
 0xb19   : > { %17014 = vmatprep.subr.bf16.mxu1 %v23906_v1  ;;  %v23957_v1 = vld [vmem:[#allocation17 + $0x364] ss:$8 sps:$4 sm:$0xff]  }
 0xb1c   : > { %17015 = vmatpush1.bf16.msra.mxu1 %v23904_v47  ;;  %v23955_v47 = vld [vmem:[#allocation17 + $0x360] ss:$8 sps:$4 sm:$0xff]  }
 0xb1d   : > { %17016 = vmatprep.subr.bf16.mxu1 %v23909_v5  ;;  %v23960_v5 = vld [vmem:[#allocation17 + $0x374] ss:$8 sps:$4 sm:$0xff]  }
 0xb20   : > { %17017 = vmatpush1.bf16.msra.mxu1 %v23907_v60  ;;  %v23958_v60 = vld [vmem:[#allocation17 + $0x370] ss:$8 sps:$4 sm:$0xff]  }
 0xb21   : > { %17018 = vmatprep.subr.bf16.mxu1 %v23912_v14  ;;  %v23963_v14 = vld [vmem:[#allocation17 + $0x384] ss:$8 sps:$4 sm:$0xff]  }
 0xb24   : > { %17019 = vmatpush1.bf16.msra.mxu1 %v23910_v54  ;;  %v23961_v54 = vld [vmem:[#allocation17 + $0x380] ss:$8 sps:$4 sm:$0xff]  }
 0xb25   : > { %17020 = vmatprep.subr.bf16.mxu1 %v23915_v39  ;;  %v23966_v39 = vld [vmem:[#allocation17 + $0x394] ss:$8 sps:$4 sm:$0xff]  }
 0xb28   : > { %17021 = vmatpush1.bf16.msra.mxu1 %v23913_v15  ;;  %v23964_v15 = vld [vmem:[#allocation17 + $0x390] ss:$8 sps:$4 sm:$0xff]  }
 0xb29   : > { %17022 = vmatprep.subr.bf16.mxu1 %v23918_v62  ;;  %v23969_v62 = vld [vmem:[#allocation17 + $0x3a4] ss:$8 sps:$4 sm:$0xff]  }
 0xb2c   : > { %17023 = vmatpush1.bf16.msra.mxu1 %v23916_v63  ;;  %v23967_v63 = vld [vmem:[#allocation17 + $0x3a0] ss:$8 sps:$4 sm:$0xff]  }
 0xb2d   : > { %17024 = vmatprep.subr.bf16.mxu1 %v23921_v40  ;;  %v23972_v40 = vld [vmem:[#allocation17 + $0x3b4] ss:$8 sps:$4 sm:$0xff]  }
 0xb30   : > { %17025 = vmatpush1.bf16.msra.mxu1 %v23919_v0  ;;  %v23970_v0 = vld [vmem:[#allocation17 + $0x3b0] ss:$8 sps:$4 sm:$0xff]  }
 0xb31   : > { %17026 = vmatprep.subr.bf16.mxu1 %v23924_v50  ;;  %v23975_v50 = vld [vmem:[#allocation17 + $0x3c4] ss:$8 sps:$4 sm:$0xff]  }
 0xb34   : > { %17027 = vmatpush1.bf16.msra.mxu1 %v23922_v49  ;;  %v23973_v49 = vld [vmem:[#allocation17 + $0x3c0] ss:$8 sps:$4 sm:$0xff]  }
 0xb35   : > { %17028 = vmatprep.subr.bf16.mxu1 %v23927_v36  ;;  %v23978_v36 = vld [vmem:[#allocation17 + $0x3d4] ss:$8 sps:$4 sm:$0xff]  }
 0xb38   : > { %17029 = vmatpush1.bf16.msra.mxu1 %v23925_v23  ;;  %v23976_v23 = vld [vmem:[#allocation17 + $0x3d0] ss:$8 sps:$4 sm:$0xff]  }
 0xb39   : > { %17030 = vmatprep.subr.bf16.mxu1 %v23930_v21  ;;  %v23981_v21 = vld [vmem:[#allocation17 + $0x3e4] ss:$8 sps:$4 sm:$0xff]  }
 0xb3c   : > { %17031 = vmatpush1.bf16.msra.mxu1 %v23928_v58  ;;  %v23979_v58 = vld [vmem:[#allocation17 + $0x3e0] ss:$8 sps:$4 sm:$0xff]  }
 0xb3d   : > { %17032 = vmatprep.subr.bf16.mxu1 %v23933_v18  ;;  %v23984_v18 = vld [vmem:[#allocation17 + $0x3f4] ss:$8 sps:$4 sm:$0xff]  }
 0xb40   : > { %17033 = vmatpush1.bf16.msra.mxu1 %v23931_v4  ;;  %v23982_v4 = vld [vmem:[#allocation17 + $0x3f0] ss:$8 sps:$4 sm:$0xff]  }
 0xb41   : > { %17034 = vmatprep.subr.bf16.mxu1 %v23936_v17  ;;  %v13265_v17 = vrot.slane %v28226_v22, %v28272_v46  ;;  %v23996_v22 = vld [vmem:[#allocation17 + $0x434] ss:$8 sps:$4 sm:$0xff]   ;;  %v23994_v46 = vld [vmem:[#allocation17 + $0x430] ss:$8 sps:$4 sm:$0xff]  }
 0xb43   : > { %v13424_v12 = vpack.c.bf16 %v13265_v17, %v13265_v17  ;;  %v24038_v17 = vld [vmem:[#allocation17 + $0x514] ss:$8 sps:$4 sm:$0xff]  }
 0xb44   : > { %17035 = vmatpush1.bf16.msra.mxu1 %v23934_v30  ;;  %v23987_v30 = vld [vmem:[#allocation17 + $0x404] ss:$8 sps:$4 sm:$0xff]  }
 0xb45   : > { %17045 = vmatprep.subr.bf16.mxu1 %v23939_v19  ;;  %v23985_v19 = vld [vmem:[#allocation17 + $0x400] ss:$8 sps:$4 sm:$0xff]  }
 0xb47   : > { %17037 = vmatmul.mubr.bf16.vlgmr.msra.gmra.mrb[56].mxu1 %v13422_v26  ;;  %v13427_v26 = vpack.c.bf16 %v13277_v41, %v13277_v41  ;;  %v24036_v41 = vld [vmem:[#allocation17 + $0x510] ss:$8 sps:$4 sm:$0xff]  }
 0xb48   : > { %17046 = vmatpush1.bf16.msra.mxu1 %v23937_v27  ;;  %17077 = vmatprep.mubr.bf16.mxu1 %v13425_v35  ;;  %v23990_v27 = vld [vmem:[#allocation17 + $0x414] ss:$8 sps:$4 sm:$0xff]   ;;  %v23993_v35 = vld [vmem:[#allocation17 + $0x424] ss:$8 sps:$4 sm:$0xff]  }
 0xb49   : > { %17047 = vmatprep.subr.bf16.mxu1 %v23942_v9  ;;  %v23988_v9 = vld [vmem:[#allocation17 + $0x410] ss:$8 sps:$4 sm:$0xff]  }
 0xb4c   : > { %17048 = vmatpush1.bf16.msra.mxu1 %v23940_v8  ;;  %v23991_v8 = vld [vmem:[#allocation17 + $0x420] ss:$8 sps:$4 sm:$0xff]  }
 0xb4d   : > { %17049 = vmatprep.subr.bf16.mxu1 %v23945_v28  ;;  %v23999_v28 = vld [vmem:[#allocation17 + $0x444] ss:$8 sps:$4 sm:$0xff]  }
 0xb50   : > { %17050 = vmatpush1.bf16.msra.mxu1 %v23943_v38  ;;  %v23997_v38 = vld [vmem:[#allocation17 + $0x440] ss:$8 sps:$4 sm:$0xff]  }
 0xb51   : > { %17051 = vmatprep.subr.bf16.mxu1 %v23948_v51  ;;  %v24002_v51 = vld [vmem:[#allocation17 + $0x454] ss:$8 sps:$4 sm:$0xff]  }
 0xb54   : > { %17052 = vmatpush1.bf16.msra.mxu1 %v23946_v42  ;;  %v24000_v42 = vld [vmem:[#allocation17 + $0x450] ss:$8 sps:$4 sm:$0xff]  }
 0xb55   : > { %17053 = vmatprep.subr.bf16.mxu1 %v23951_v7  ;;  %v24005_v7 = vld [vmem:[#allocation17 + $0x464] ss:$8 sps:$4 sm:$0xff]  }
 0xb58   : > { %17054 = vmatpush1.bf16.msra.mxu1 %v23949_v10  ;;  %v24003_v10 = vld [vmem:[#allocation17 + $0x460] ss:$8 sps:$4 sm:$0xff]  }
 0xb59   : > { %17055 = vmatprep.subr.bf16.mxu1 %v23954_v61  ;;  %v24008_v61 = vld [vmem:[#allocation17 + $0x474] ss:$8 sps:$4 sm:$0xff]  }
 0xb5c   : > { %17056 = vmatpush1.bf16.msra.mxu1 %v23952_v52  ;;  %v24006_v52 = vld [vmem:[#allocation17 + $0x470] ss:$8 sps:$4 sm:$0xff]  }
 0xb5d   : > { %17057 = vmatprep.subr.bf16.mxu1 %v23957_v1  ;;  %v24011_v1 = vld [vmem:[#allocation17 + $0x484] ss:$8 sps:$4 sm:$0xff]  }
 0xb60   : > { %17058 = vmatpush1.bf16.msra.mxu1 %v23955_v47  ;;  %v24009_v47 = vld [vmem:[#allocation17 + $0x480] ss:$8 sps:$4 sm:$0xff]  }
 0xb61   : > { %17059 = vmatprep.subr.bf16.mxu1 %v23960_v5  ;;  %v24014_v5 = vld [vmem:[#allocation17 + $0x494] ss:$8 sps:$4 sm:$0xff]  }
 0xb64   : > { %17060 = vmatpush1.bf16.msra.mxu1 %v23958_v60  ;;  %v24012_v60 = vld [vmem:[#allocation17 + $0x490] ss:$8 sps:$4 sm:$0xff]  }
 0xb65   : > { %17061 = vmatprep.subr.bf16.mxu1 %v23963_v14  ;;  %v24017_v14 = vld [vmem:[#allocation17 + $0x4a4] ss:$8 sps:$4 sm:$0xff]  }
 0xb68   : > { %17062 = vmatpush1.bf16.msra.mxu1 %v23961_v54  ;;  %v24015_v54 = vld [vmem:[#allocation17 + $0x4a0] ss:$8 sps:$4 sm:$0xff]  }
 0xb69   : > { %17063 = vmatprep.subr.bf16.mxu1 %v23966_v39  ;;  %v24020_v39 = vld [vmem:[#allocation17 + $0x4b4] ss:$8 sps:$4 sm:$0xff]  }
 0xb6c   : > { %17064 = vmatpush1.bf16.msra.mxu1 %v23964_v15  ;;  %v24018_v15 = vld [vmem:[#allocation17 + $0x4b0] ss:$8 sps:$4 sm:$0xff]  }
 0xb6d   : > { %17065 = vmatprep.subr.bf16.mxu1 %v23969_v62  ;;  %v24023_v62 = vld [vmem:[#allocation17 + $0x4c4] ss:$8 sps:$4 sm:$0xff]  }
 0xb70   : > { %17066 = vmatpush1.bf16.msra.mxu1 %v23967_v63  ;;  %v24021_v63 = vld [vmem:[#allocation17 + $0x4c0] ss:$8 sps:$4 sm:$0xff]  }
 0xb71   : > { %17067 = vmatprep.subr.bf16.mxu1 %v23972_v40  ;;  %v24026_v40 = vld [vmem:[#allocation17 + $0x4d4] ss:$8 sps:$4 sm:$0xff]  }
 0xb74   : > { %17068 = vmatpush1.bf16.msra.mxu1 %v23970_v0  ;;  %v24024_v0 = vld [vmem:[#allocation17 + $0x4d0] ss:$8 sps:$4 sm:$0xff]  }
 0xb75   : > { %17069 = vmatprep.subr.bf16.mxu1 %v23975_v50  ;;  %v24029_v50 = vld [vmem:[#allocation17 + $0x4e4] ss:$8 sps:$4 sm:$0xff]  }
 0xb78   : > { %17070 = vmatpush1.bf16.msra.mxu1 %v23973_v49  ;;  %v24027_v49 = vld [vmem:[#allocation17 + $0x4e0] ss:$8 sps:$4 sm:$0xff]  }
 0xb79   : > { %17071 = vmatprep.subr.bf16.mxu1 %v23978_v36  ;;  %v24032_v36 = vld [vmem:[#allocation17 + $0x4f4] ss:$8 sps:$4 sm:$0xff]  }
 0xb7c   : > { %17072 = vmatpush1.bf16.msra.mxu1 %v23976_v23  ;;  %v24030_v23 = vld [vmem:[#allocation17 + $0x4f0] ss:$8 sps:$4 sm:$0xff]  }
 0xb7d   : > { %17073 = vmatprep.subr.bf16.mxu1 %v23981_v21  ;;  %v13273_v21 = vrot.slane %v28259_v45, %v28219_v48  ;;  %v24042_v45 = vld [vmem:[#allocation17 + $0x530] ss:$8 sps:$4 sm:$0xff]  }
 0xb80   : > { %17074 = vmatpush1.bf16.msra.mxu1 %v23979_v58  ;;  %v24035_v58 = vld [vmem:[#allocation17 + $0x504] ss:$8 sps:$4 sm:$0xff]  }
 0xb81   : > { %17075 = vmatprep.subr.bf16.mxu1 %v23984_v18  ;;  %v24033_v18 = vld [vmem:[#allocation17 + $0x500] ss:$8 sps:$4 sm:$0xff]  }
 0xb84   : > { %17076 = vmatpush1.bf16.msra.mxu1 %v23982_v4  ;;  %v13426_v4 = vpack.c.bf16 %v13273_v21, %v13273_v21  ;;  %v24086_v21 = vld [vmem:[#allocation17 + $0x614] ss:$8 sps:$4 sm:$0xff]  }
 0xb85   : > { %17086 = vmatprep.subr.bf16.mxu1 %v23987_v30  ;;  %v13429_v30 = vpack.c.bf16 %v28276_v2, %v28276_v2  ;;  %v24048_v2 = vld [vmem:[#allocation17 + $0x550] ss:$8 sps:$4 sm:$0xff]  }
 0xb87   : > { %17078 = vmatmul.mubr.bf16.vlgmr.msra.gmra.mrb[56].mxu1 %v13424_v12  ;;  %v24039_v12 = vld [vmem:[#allocation17 + $0x520] ss:$8 sps:$4 sm:$0xff]  }
 0xb88   : > { %17087 = vmatpush1.bf16.msra.mxu1 %v23985_v19  ;;  %17118 = vmatprep.mubr.bf16.mxu1 %v13427_v26  ;;  %v24041_v19 = vld [vmem:[#allocation17 + $0x524] ss:$8 sps:$4 sm:$0xff]  }
 0xb89   : > { %17088 = vmatprep.subr.bf16.mxu1 %v23990_v27  ;;  %v24044_v27 = vld [vmem:[#allocation17 + $0x534] ss:$8 sps:$4 sm:$0xff]   ;;  %v24047_v26 = vld [vmem:[#allocation17 + $0x544] ss:$8 sps:$4 sm:$0xff]  }
 0xb8c   : > { %17089 = vmatpush1.bf16.msra.mxu1 %v23988_v9  ;;  %v24045_v9 = vld [vmem:[#allocation17 + $0x540] ss:$8 sps:$4 sm:$0xff]  }
 0xb8d   : > { %17090 = vmatprep.subr.bf16.mxu1 %v23993_v35  ;;  %v24050_v35 = vld [vmem:[#allocation17 + $0x554] ss:$8 sps:$4 sm:$0xff]  }
 0xb90   : > { %17091 = vmatpush1.bf16.msra.mxu1 %v23991_v8  ;;  %v24053_v8 = vld [vmem:[#allocation17 + $0x564] ss:$8 sps:$4 sm:$0xff]  }
 0xb91   : > { %17092 = vmatprep.subr.bf16.mxu1 %v23996_v22  ;;  %v24051_v22 = vld [vmem:[#allocation17 + $0x560] ss:$8 sps:$4 sm:$0xff]  }
 0xb94   : > { %17093 = vmatpush1.bf16.msra.mxu1 %v23994_v46 }
 0xb95   : > { %17094 = vmatprep.subr.bf16.mxu1 %v23999_v28  ;;  %v24056_v28 = vld [vmem:[#allocation17 + $0x574] ss:$8 sps:$4 sm:$0xff]  }
 0xb98   : > { %17095 = vmatpush1.bf16.msra.mxu1 %v23997_v38 }
 0xb99   : > { %17096 = vmatprep.subr.bf16.mxu1 %v24002_v51 }
 0xb9c   : > { %17097 = vmatpush1.bf16.msra.mxu1 %v24000_v42 }
 0xb9d   : > { %17098 = vmatprep.subr.bf16.mxu1 %v24005_v7  ;;  %v24054_v7 = vld [vmem:[#allocation17 + $0x570] ss:$8 sps:$4 sm:$0xff]  }
 0xba0   : > { %17099 = vmatpush1.bf16.msra.mxu1 %v24003_v10  ;;  %v24059_v10 = vld [vmem:[#allocation17 + $0x584] ss:$8 sps:$4 sm:$0xff]  }
 0xba1   : > { %17100 = vmatprep.subr.bf16.mxu1 %v24008_v61  ;;  %v24057_v61 = vld [vmem:[#allocation17 + $0x580] ss:$8 sps:$4 sm:$0xff]  }
 0xba4   : > { %17101 = vmatpush1.bf16.msra.mxu1 %v24006_v52  ;;  %v24062_v52 = vld [vmem:[#allocation17 + $0x594] ss:$8 sps:$4 sm:$0xff]  }
 0xba5   : > { %17102 = vmatprep.subr.bf16.mxu1 %v24011_v1  ;;  %v24060_v1 = vld [vmem:[#allocation17 + $0x590] ss:$8 sps:$4 sm:$0xff]  }
 0xba8   : > { %17103 = vmatpush1.bf16.msra.mxu1 %v24009_v47  ;;  %v24065_v47 = vld [vmem:[#allocation17 + $0x5a4] ss:$8 sps:$4 sm:$0xff]  }
 0xba9   : > { %17104 = vmatprep.subr.bf16.mxu1 %v24014_v5  ;;  %v24063_v5 = vld [vmem:[#allocation17 + $0x5a0] ss:$8 sps:$4 sm:$0xff]  }
 0xbac   : > { %17105 = vmatpush1.bf16.msra.mxu1 %v24012_v60  ;;  %v24068_v60 = vld [vmem:[#allocation17 + $0x5b4] ss:$8 sps:$4 sm:$0xff]  }
 0xbad   : > { %17106 = vmatprep.subr.bf16.mxu1 %v24017_v14  ;;  %v24066_v14 = vld [vmem:[#allocation17 + $0x5b0] ss:$8 sps:$4 sm:$0xff]  }
 0xbb0   : > { %17107 = vmatpush1.bf16.msra.mxu1 %v24015_v54  ;;  %v24071_v54 = vld [vmem:[#allocation17 + $0x5c4] ss:$8 sps:$4 sm:$0xff]  }
 0xbb1   : > { %17108 = vmatprep.subr.bf16.mxu1 %v24020_v39  ;;  %v24069_v39 = vld [vmem:[#allocation17 + $0x5c0] ss:$8 sps:$4 sm:$0xff]  }
 0xbb4   : > { %17109 = vmatpush1.bf16.msra.mxu1 %v24018_v15  ;;  %v24074_v15 = vld [vmem:[#allocation17 + $0x5d4] ss:$8 sps:$4 sm:$0xff]  }
 0xbb5   : > { %17110 = vmatprep.subr.bf16.mxu1 %v24023_v62  ;;  %v24072_v62 = vld [vmem:[#allocation17 + $0x5d0] ss:$8 sps:$4 sm:$0xff]  }
 0xbb8   : > { %17111 = vmatpush1.bf16.msra.mxu1 %v24021_v63  ;;  %v24077_v63 = vld [vmem:[#allocation17 + $0x5e4] ss:$8 sps:$4 sm:$0xff]  }
 0xbb9   : > { %17112 = vmatprep.subr.bf16.mxu1 %v24026_v40  ;;  %v24075_v40 = vld [vmem:[#allocation17 + $0x5e0] ss:$8 sps:$4 sm:$0xff]  }
 0xbbc   : > { %17113 = vmatpush1.bf16.msra.mxu1 %v24024_v0  ;;  %v24080_v0 = vld [vmem:[#allocation17 + $0x5f4] ss:$8 sps:$4 sm:$0xff]  }
 0xbbd   : > { %17114 = vmatprep.subr.bf16.mxu1 %v24029_v50  ;;  %v24078_v50 = vld [vmem:[#allocation17 + $0x5f0] ss:$8 sps:$4 sm:$0xff]  }
 0xbc0   : > { %17115 = vmatpush1.bf16.msra.mxu1 %v24027_v49  ;;  %v24083_v49 = vld [vmem:[#allocation17 + $0x604] ss:$8 sps:$4 sm:$0xff]  }
 0xbc1   : > { %17116 = vmatprep.subr.bf16.mxu1 %v24032_v36  ;;  %v24081_v36 = vld [vmem:[#allocation17 + $0x600] ss:$8 sps:$4 sm:$0xff]  }
 0xbc4   : > { %17117 = vmatpush1.bf16.msra.mxu1 %v24030_v23  ;;  %v13428_v23 = vpack.c.bf16 %v28280_v13, %v28280_v13  ;;  %v24093_v13 = vld [vmem:[#allocation17 + $0x640] ss:$8 sps:$4 sm:$0xff]  }
 0xbc5   : > { %17127 = vmatprep.subr.bf16.mxu1 %v24035_v58  ;;  %v13431_v58 = vpack.c.bf16 %v28284_v29, %v28284_v29  ;;  %v24096_v29 = vld [vmem:[#allocation17 + $0x650] ss:$8 sps:$4 sm:$0xff]  }
 0xbc7   : > { %17119 = vmatmul.mubr.bf16.vlgmr.msra.gmra.mrb[56].mxu1 %v13426_v4  ;;  %v24089_v4 = vld [vmem:[#allocation17 + $0x624] ss:$8 sps:$4 sm:$0xff]  }
 0xbc8   : > { %17128 = vmatpush1.bf16.msra.mxu1 %v24033_v18  ;;  %17159 = vmatprep.mubr.bf16.mxu1 %v13429_v30  ;;  %v24084_v18 = vld [vmem:[#allocation17 + $0x610] ss:$8 sps:$4 sm:$0xff]   ;;  %v24092_v30 = vld [vmem:[#allocation17 + $0x634] ss:$8 sps:$4 sm:$0xff]  }
 0xbc9   : > { %17129 = vmatprep.subr.bf16.mxu1 %v24038_v17  ;;  %v24087_v17 = vld [vmem:[#allocation17 + $0x620] ss:$8 sps:$4 sm:$0xff]  }
 0xbcc   : > { %17130 = vmatpush1.bf16.msra.mxu1 %v24036_v41  ;;  %v24090_v41 = vld [vmem:[#allocation17 + $0x630] ss:$8 sps:$4 sm:$0xff]  }
 0xbcd   : > { %17131 = vmatprep.subr.bf16.mxu1 %v24041_v19  ;;  %v24095_v19 = vld [vmem:[#allocation17 + $0x644] ss:$8 sps:$4 sm:$0xff]  }
 0xbd0   : > { %17132 = vmatpush1.bf16.msra.mxu1 %v24039_v12  ;;  %v24098_v12 = vld [vmem:[#allocation17 + $0x654] ss:$8 sps:$4 sm:$0xff]  }
 0xbd1   : > { %17133 = vmatprep.subr.bf16.mxu1 %v24044_v27  ;;  %v24101_v27 = vld [vmem:[#allocation17 + $0x664] ss:$8 sps:$4 sm:$0xff]  }
 0xbd4   : > { %17134 = vmatpush1.bf16.msra.mxu1 %v24042_v45  ;;  %v24099_v45 = vld [vmem:[#allocation17 + $0x660] ss:$8 sps:$4 sm:$0xff]  }
 0xbd5   : > { %17135 = vmatprep.subr.bf16.mxu1 %v24047_v26  ;;  %v24104_v26 = vld [vmem:[#allocation17 + $0x674] ss:$8 sps:$4 sm:$0xff]  }
 0xbd8   : > { %17136 = vmatpush1.bf16.msra.mxu1 %v24045_v9  ;;  %v24102_v9 = vld [vmem:[#allocation17 + $0x670] ss:$8 sps:$4 sm:$0xff]  }
 0xbd9   : > { %17137 = vmatprep.subr.bf16.mxu1 %v24050_v35  ;;  %v24107_v35 = vld [vmem:[#allocation17 + $0x684] ss:$8 sps:$4 sm:$0xff]  }
 0xbdc   : > { %17138 = vmatpush1.bf16.msra.mxu1 %v24048_v2  ;;  %v28360_v46 = vpop.f32.mrb[108].mxu0  ;;  %v24105_v2 = vld [vmem:[#allocation17 + $0x680] ss:$8 sps:$4 sm:$0xff]  }
 0xbdd   : > { %17139 = vmatprep.subr.bf16.mxu1 %v24053_v8  ;;  %v28362_v38 = vpop.f32.mrb[109].mxu0  ;;  %v24110_v8 = vld [vmem:[#allocation17 + $0x694] ss:$8 sps:$4 sm:$0xff]  }
 0xbde   : > { %v16960_v51 = vpop.f32.mrb[110].mxu0 }
 0xbdf   : > { %v16961_v42 = vpop.f32.mrb[111].mxu0  ;;  %v24111_v51 = vld [vmem:[#allocation17 + $0x6a0] ss:$8 sps:$4 sm:$0xff]  }
 0xbe0   : > { %17140 = vmatpush1.bf16.msra.mxu1 %v24051_v22  ;;  %v24108_v22 = vld [vmem:[#allocation17 + $0x690] ss:$8 sps:$4 sm:$0xff]   ;;  %v24116_v42 = vld [vmem:[#allocation17 + $0x6b4] ss:$8 sps:$4 sm:$0xff]  }
 0xbe1   : > { %17141 = vmatprep.subr.bf16.mxu1 %v24056_v28  ;;  %v24113_v28 = vld [vmem:[#allocation17 + $0x6a4] ss:$8 sps:$4 sm:$0xff]  }
 0xbe4   : > { %17142 = vmatpush1.bf16.msra.mxu1 %v24054_v7  ;;  %v24114_v7 = vld [vmem:[#allocation17 + $0x6b0] ss:$8 sps:$4 sm:$0xff]  }
 0xbe5   : > { %17143 = vmatprep.subr.bf16.mxu1 %v24059_v10  ;;  %v24119_v10 = vld [vmem:[#allocation17 + $0x6c4] ss:$8 sps:$4 sm:$0xff]  }
 0xbe8   : > { %17144 = vmatpush1.bf16.msra.mxu1 %v24057_v61  ;;  %v24117_v61 = vld [vmem:[#allocation17 + $0x6c0] ss:$8 sps:$4 sm:$0xff]  }
 0xbe9   : > { %17145 = vmatprep.subr.bf16.mxu1 %v24062_v52  ;;  %v24122_v52 = vld [vmem:[#allocation17 + $0x6d4] ss:$8 sps:$4 sm:$0xff]  }
 0xbec   : > { %17146 = vmatpush1.bf16.msra.mxu1 %v24060_v1  ;;  %v24120_v1 = vld [vmem:[#allocation17 + $0x6d0] ss:$8 sps:$4 sm:$0xff]  }
 0xbed   : > { %17147 = vmatprep.subr.bf16.mxu1 %v24065_v47  ;;  %v24125_v47 = vld [vmem:[#allocation17 + $0x6e4] ss:$8 sps:$4 sm:$0xff]  }
 0xbf0   : > { %17148 = vmatpush1.bf16.msra.mxu1 %v24063_v5  ;;  %v24123_v5 = vld [vmem:[#allocation17 + $0x6e0] ss:$8 sps:$4 sm:$0xff]  }
 0xbf1   : > { %17149 = vmatprep.subr.bf16.mxu1 %v24068_v60  ;;  %v24128_v60 = vld [vmem:[#allocation17 + $0x6f4] ss:$8 sps:$4 sm:$0xff]  }
 0xbf4   : > { %17150 = vmatpush1.bf16.msra.mxu1 %v24066_v14  ;;  %v24126_v14 = vld [vmem:[#allocation17 + $0x6f0] ss:$8 sps:$4 sm:$0xff]  }
 0xbf5   : > { %17151 = vmatprep.subr.bf16.mxu1 %v24071_v54  ;;  %v24131_v54 = vld [vmem:[#allocation17 + $0x704] ss:$8 sps:$4 sm:$0xff]  }
 0xbf8   : > { %17152 = vmatpush1.bf16.msra.mxu1 %v24069_v39  ;;  %v24129_v39 = vld [vmem:[#allocation17 + $0x700] ss:$8 sps:$4 sm:$0xff]  }
 0xbf9   : > { %17153 = vmatprep.subr.bf16.mxu1 %v24074_v15  ;;  %v13430_v15 = vpack.c.bf16 %v28288_v56, %v28288_v56  ;;  %v24141_v56 = vld [vmem:[#allocation17 + $0x740] ss:$8 sps:$4 sm:$0xff]  }
 0xbfc   : > { %17154 = vmatpush1.bf16.msra.mxu1 %v24072_v62  ;;  %v24134_v62 = vld [vmem:[#allocation17 + $0x714] ss:$8 sps:$4 sm:$0xff]  }
 0xbfd   : > { %17155 = vmatprep.subr.bf16.mxu1 %v24077_v63  ;;  %v13433_v63 = vpack.c.bf16 %v28292_v59, %v28292_v59  ;;  %v24144_v59 = vld [vmem:[#allocation17 + $0x750] ss:$8 sps:$4 sm:$0xff]  }
 0xc00   : > { %17156 = vmatpush1.bf16.msra.mxu1 %v24075_v40  ;;  %v24132_v40 = vld [vmem:[#allocation17 + $0x710] ss:$8 sps:$4 sm:$0xff]  }
 0xc01   : > { %17157 = vmatprep.subr.bf16.mxu1 %v24080_v0  ;;  %v24137_v0 = vld [vmem:[#allocation17 + $0x724] ss:$8 sps:$4 sm:$0xff]  }
 0xc04   : > { %17158 = vmatpush1.bf16.msra.mxu1 %v24078_v50  ;;  %v24135_v50 = vld [vmem:[#allocation17 + $0x720] ss:$8 sps:$4 sm:$0xff]  }
 0xc05   : > { %17168 = vmatprep.subr.bf16.mxu1 %v24083_v49  ;;  %v24140_v49 = vld [vmem:[#allocation17 + $0x734] ss:$8 sps:$4 sm:$0xff]  }
 0xc07   : > { %17160 = vmatmul.mubr.bf16.vlgmr.msra.gmra.mrb[56].mxu1 %v13428_v23  ;;  %v24143_v23 = vld [vmem:[#allocation17 + $0x744] ss:$8 sps:$4 sm:$0xff]  }
 0xc08   : > { %17169 = vmatpush1.bf16.msra.mxu1 %v24081_v36  ;;  %17200 = vmatprep.mubr.bf16.mxu1 %v13431_v58  ;;  %v24138_v36 = vld [vmem:[#allocation17 + $0x730] ss:$8 sps:$4 sm:$0xff]   ;;  %v24149_v58 = vld [vmem:[#allocation17 + $0x764] ss:$8 sps:$4 sm:$0xff]  }
 0xc09   : > { %17170 = vmatprep.subr.bf16.mxu1 %v24086_v21  ;;  %v24146_v21 = vld [vmem:[#allocation17 + $0x754] ss:$8 sps:$4 sm:$0xff]  }
 0xc0c   : > { %17171 = vmatpush1.bf16.msra.mxu1 %v24084_v18  ;;  %v24147_v18 = vld [vmem:[#allocation17 + $0x760] ss:$8 sps:$4 sm:$0xff]  }
 0xc0d   : > { %17172 = vmatprep.subr.bf16.mxu1 %v24089_v4  ;;  %v24152_v4 = vld [vmem:[#allocation17 + $0x774] ss:$8 sps:$4 sm:$0xff]  }
 0xc10   : > { %17173 = vmatpush1.bf16.msra.mxu1 %v24087_v17  ;;  %v24150_v17 = vld [vmem:[#allocation17 + $0x770] ss:$8 sps:$4 sm:$0xff]  }
 0xc11   : > { %17174 = vmatprep.subr.bf16.mxu1 %v24092_v30  ;;  %v24155_v30 = vld [vmem:[#allocation17 + $0x784] ss:$8 sps:$4 sm:$0xff]  }
 0xc14   : > { %17175 = vmatpush1.bf16.msra.mxu1 %v24090_v41  ;;  %v24153_v41 = vld [vmem:[#allocation17 + $0x780] ss:$8 sps:$4 sm:$0xff]  }
 0xc15   : > { %17176 = vmatprep.subr.bf16.mxu1 %v24095_v19  ;;  %v24158_v19 = vld [vmem:[#allocation17 + $0x794] ss:$8 sps:$4 sm:$0xff]  }
 0xc18   : > { %17177 = vmatpush1.bf16.msra.mxu1 %v24093_v13  ;;  %v24156_v13 = vld [vmem:[#allocation17 + $0x790] ss:$8 sps:$4 sm:$0xff]  }
 0xc19   : > { %17178 = vmatprep.subr.bf16.mxu1 %v24098_v12  ;;  %v24161_v12 = vld [vmem:[#allocation17 + $0x7a4] ss:$8 sps:$4 sm:$0xff]  }
 0xc1c   : > { %17179 = vmatpush1.bf16.msra.mxu1 %v24096_v29  ;;  %v24159_v29 = vld [vmem:[#allocation17 + $0x7a0] ss:$8 sps:$4 sm:$0xff]  }
 0xc1d   : > { %17180 = vmatprep.subr.bf16.mxu1 %v24101_v27  ;;  %v24164_v27 = vld [vmem:[#allocation17 + $0x7b4] ss:$8 sps:$4 sm:$0xff]  }
 0xc20   : > { %17181 = vmatpush1.bf16.msra.mxu1 %v24099_v45  ;;  %v24162_v45 = vld [vmem:[#allocation17 + $0x7b0] ss:$8 sps:$4 sm:$0xff]  }
 0xc21   : > { %17182 = vmatprep.subr.bf16.mxu1 %v24104_v26  ;;  %v24167_v26 = vld [vmem:[#allocation17 + $0x7c4] ss:$8 sps:$4 sm:$0xff]  }
 0xc24   : > { %17183 = vmatpush1.bf16.msra.mxu1 %v24102_v9  ;;  %v24165_v9 = vld [vmem:[#allocation17 + $0x7c0] ss:$8 sps:$4 sm:$0xff]  }
 0xc25   : > { %17184 = vmatprep.subr.bf16.mxu1 %v24107_v35  ;;  %v24170_v35 = vld [vmem:[#allocation17 + $0x7d4] ss:$8 sps:$4 sm:$0xff]  }
 0xc28   : > { %17185 = vmatpush1.bf16.msra.mxu1 %v24105_v2  ;;  %v24168_v2 = vld [vmem:[#allocation17 + $0x7d0] ss:$8 sps:$4 sm:$0xff]  }
 0xc29   : > { %17186 = vmatprep.subr.bf16.mxu1 %v24110_v8  ;;  %v24173_v8 = vld [vmem:[#allocation17 + $0x7e4] ss:$8 sps:$4 sm:$0xff]  }
 0xc2c   : > { %17187 = vmatpush1.bf16.msra.mxu1 %v24108_v22  ;;  %v24171_v22 = vld [vmem:[#allocation17 + $0x7e0] ss:$8 sps:$4 sm:$0xff]  }
 0xc2d   : > { %17188 = vmatprep.subr.bf16.mxu1 %v24113_v28  ;;  %v24176_v28 = vld [vmem:[#allocation17 + $0x7f4] ss:$8 sps:$4 sm:$0xff]  }
 0xc30   : > { %17189 = vmatpush1.bf16.msra.mxu1 %v24111_v51  ;;  %v24174_v51 = vld [vmem:[#allocation17 + $0x7f0] ss:$8 sps:$4 sm:$0xff]  }
 0xc31   : > { %17190 = vmatprep.subr.bf16.mxu1 %v24116_v42  ;;  %v24179_v42 = vld [vmem:[#allocation17 + $0x804] ss:$8 sps:$4 sm:$0xff]  }
 0xc34   : > { %17191 = vmatpush1.bf16.msra.mxu1 %v24114_v7  ;;  %v13309_v7 = vrot.slane %v28294_v31, %v28207_v20 }
 0xc35   : > { %17192 = vmatprep.subr.bf16.mxu1 %v24119_v10  ;;  %v24177_v10 = vld [vmem:[#allocation17 + $0x800] ss:$8 sps:$4 sm:$0xff]  }
 0xc38   : > { %17193 = vmatpush1.bf16.msra.mxu1 %v24117_v61  ;;  %v13432_v61 = vpack.c.bf16 %v28298_v32, %v28298_v32  ;;  %v24194_v32 = vld [vmem:[#allocation17 + $0x854] ss:$8 sps:$4 sm:$0xff]  }
 0xc39   : > { %17194 = vmatprep.subr.bf16.mxu1 %v24122_v52  ;;  %v24182_v52 = vld [vmem:[#allocation17 + $0x814] ss:$8 sps:$4 sm:$0xff]  }
 0xc3c   : > { %17195 = vmatpush1.bf16.msra.mxu1 %v24120_v1  ;;  %v13435_v1 = vpack.c.bf16 %v13309_v7, %v13309_v7  ;;  %v24237_v7 = vld [vmem:[#allocation17 + $0x940] ss:$8 sps:$4 sm:$0xff]  }
 0xc3d   : > { %17196 = vmatprep.subr.bf16.mxu1 %v24125_v47  ;;  %v24180_v47 = vld [vmem:[#allocation17 + $0x810] ss:$8 sps:$4 sm:$0xff]  }
 0xc40   : > { %17197 = vmatpush1.bf16.msra.mxu1 %v24123_v5  ;;  %v24185_v5 = vld [vmem:[#allocation17 + $0x824] ss:$8 sps:$4 sm:$0xff]  }
 0xc41   : > { %17198 = vmatprep.subr.bf16.mxu1 %v24128_v60  ;;  %v24183_v60 = vld [vmem:[#allocation17 + $0x820] ss:$8 sps:$4 sm:$0xff]  }
 0xc44   : > { %17199 = vmatpush1.bf16.msra.mxu1 %v24126_v14  ;;  %v24188_v14 = vld [vmem:[#allocation17 + $0x834] ss:$8 sps:$4 sm:$0xff]  }
 0xc45   : > { %17209 = vmatprep.subr.bf16.mxu1 %v24131_v54  ;;  %v24186_v54 = vld [vmem:[#allocation17 + $0x830] ss:$8 sps:$4 sm:$0xff]  }
 0xc47   : > { %17201 = vmatmul.mubr.bf16.vlgmr.msra.gmra.mrb[56].mxu1 %v13430_v15  ;;  %v24189_v15 = vld [vmem:[#allocation17 + $0x840] ss:$8 sps:$4 sm:$0xff]  }
 0xc48   : > { %17210 = vmatpush1.bf16.msra.mxu1 %v24129_v39  ;;  %17241 = vmatprep.mubr.bf16.mxu1 %v13433_v63  ;;  %v24191_v39 = vld [vmem:[#allocation17 + $0x844] ss:$8 sps:$4 sm:$0xff]  }
 0xc49   : > { %17211 = vmatprep.subr.bf16.mxu1 %v24134_v62  ;;  %v24192_v62 = vld [vmem:[#allocation17 + $0x850] ss:$8 sps:$4 sm:$0xff]   ;;  %v24197_v63 = vld [vmem:[#allocation17 + $0x864] ss:$8 sps:$4 sm:$0xff]  }
 0xc4c   : > { %17212 = vmatpush1.bf16.msra.mxu1 %v24132_v40  ;;  %v24195_v40 = vld [vmem:[#allocation17 + $0x860] ss:$8 sps:$4 sm:$0xff]  }
 0xc4d   : > { %17213 = vmatprep.subr.bf16.mxu1 %v24137_v0  ;;  %v24200_v0 = vld [vmem:[#allocation17 + $0x874] ss:$8 sps:$4 sm:$0xff]  }
 0xc50   : > { %17214 = vmatpush1.bf16.msra.mxu1 %v24135_v50  ;;  %v24198_v50 = vld [vmem:[#allocation17 + $0x870] ss:$8 sps:$4 sm:$0xff]  }
 0xc51   : > { %17215 = vmatprep.subr.bf16.mxu1 %v24140_v49  ;;  %v24203_v49 = vld [vmem:[#allocation17 + $0x884] ss:$8 sps:$4 sm:$0xff]  }
 0xc54   : > { %17216 = vmatpush1.bf16.msra.mxu1 %v24138_v36  ;;  %v24201_v36 = vld [vmem:[#allocation17 + $0x880] ss:$8 sps:$4 sm:$0xff]  }
 0xc55   : > { %17217 = vmatprep.subr.bf16.mxu1 %v24143_v23  ;;  %v24206_v23 = vld [vmem:[#allocation17 + $0x894] ss:$8 sps:$4 sm:$0xff]  }
 0xc58   : > { %17218 = vmatpush1.bf16.msra.mxu1 %v24141_v56  ;;  %v24204_v56 = vld [vmem:[#allocation17 + $0x890] ss:$8 sps:$4 sm:$0xff]  }
 0xc59   : > { %17219 = vmatprep.subr.bf16.mxu1 %v24146_v21  ;;  %v24209_v21 = vld [vmem:[#allocation17 + $0x8a4] ss:$8 sps:$4 sm:$0xff]  }
 0xc5c   : > { %17220 = vmatpush1.bf16.msra.mxu1 %v24144_v59  ;;  %v24207_v59 = vld [vmem:[#allocation17 + $0x8a0] ss:$8 sps:$4 sm:$0xff]  }
 0xc5d   : > { %17221 = vmatprep.subr.bf16.mxu1 %v24149_v58  ;;  %v24212_v58 = vld [vmem:[#allocation17 + $0x8b4] ss:$8 sps:$4 sm:$0xff]  }
 0xc60   : > { %17222 = vmatpush1.bf16.msra.mxu1 %v24147_v18  ;;  %v24210_v18 = vld [vmem:[#allocation17 + $0x8b0] ss:$8 sps:$4 sm:$0xff]  }
 0xc61   : > { %17223 = vmatprep.subr.bf16.mxu1 %v24152_v4  ;;  %v24215_v4 = vld [vmem:[#allocation17 + $0x8c4] ss:$8 sps:$4 sm:$0xff]  }
 0xc64   : > { %17224 = vmatpush1.bf16.msra.mxu1 %v24150_v17  ;;  %v24213_v17 = vld [vmem:[#allocation17 + $0x8c0] ss:$8 sps:$4 sm:$0xff]  }
 0xc65   : > { %17225 = vmatprep.subr.bf16.mxu1 %v24155_v30  ;;  %v24218_v30 = vld [vmem:[#allocation17 + $0x8d4] ss:$8 sps:$4 sm:$0xff]  }
 0xc68   : > { %17226 = vmatpush1.bf16.msra.mxu1 %v24153_v41  ;;  %v24216_v41 = vld [vmem:[#allocation17 + $0x8d0] ss:$8 sps:$4 sm:$0xff]  }
 0xc69   : > { %17227 = vmatprep.subr.bf16.mxu1 %v24158_v19  ;;  %v24221_v19 = vld [vmem:[#allocation17 + $0x8e4] ss:$8 sps:$4 sm:$0xff]  }
 0xc6c   : > { %17228 = vmatpush1.bf16.msra.mxu1 %v24156_v13  ;;  %v24219_v13 = vld [vmem:[#allocation17 + $0x8e0] ss:$8 sps:$4 sm:$0xff]  }
 0xc6d   : > { %17229 = vmatprep.subr.bf16.mxu1 %v24161_v12  ;;  %v24224_v12 = vld [vmem:[#allocation17 + $0x8f4] ss:$8 sps:$4 sm:$0xff]  }
 0xc70   : > { %17230 = vmatpush1.bf16.msra.mxu1 %v24159_v29  ;;  %v24222_v29 = vld [vmem:[#allocation17 + $0x8f0] ss:$8 sps:$4 sm:$0xff]  }
 0xc71   : > { %17231 = vmatprep.subr.bf16.mxu1 %v24164_v27  ;;  %v13305_v27 = vrot.slane %v28294_v31, %v28219_v48  ;;  %v24234_v31 = vld [vmem:[#allocation17 + $0x930] ss:$8 sps:$4 sm:$0xff]  }
 0xc74   : > { %17232 = vmatpush1.bf16.msra.mxu1 %v24162_v45  ;;  %v24227_v45 = vld [vmem:[#allocation17 + $0x904] ss:$8 sps:$4 sm:$0xff]  }
 0xc75   : > { %17233 = vmatprep.subr.bf16.mxu1 %v24167_v26  ;;  %v24225_v26 = vld [vmem:[#allocation17 + $0x900] ss:$8 sps:$4 sm:$0xff]  }
 0xc78   : > { %17234 = vmatpush1.bf16.msra.mxu1 %v24165_v9  ;;  %v13434_v9 = vpack.c.bf16 %v13305_v27, %v13305_v27  ;;  %v24293_v27 = vld [vmem:[#allocation17 + $0xa64] ss:$8 sps:$4 sm:$0xff]  }
 0xc79   : > { %17235 = vmatprep.subr.bf16.mxu1 %v24170_v35  ;;  %v24230_v35 = vld [vmem:[#allocation17 + $0x914] ss:$8 sps:$4 sm:$0xff]  }
 0xc7c   : > { %17236 = vmatpush1.bf16.msra.mxu1 %v24168_v2  ;;  %v13437_v2 = vpack.c.bf16 %v28302_v16, %v28302_v16  ;;  %v24240_v16 = vld [vmem:[#allocation17 + $0x950] ss:$8 sps:$4 sm:$0xff]  }
 0xc7d   : > { %17237 = vmatprep.subr.bf16.mxu1 %v24173_v8  ;;  %v24228_v8 = vld [vmem:[#allocation17 + $0x910] ss:$8 sps:$4 sm:$0xff]  }
 0xc80   : > { %17238 = vmatpush1.bf16.msra.mxu1 %v24171_v22  ;;  %v24233_v22 = vld [vmem:[#allocation17 + $0x924] ss:$8 sps:$4 sm:$0xff]  }
 0xc81   : > { %17239 = vmatprep.subr.bf16.mxu1 %v24176_v28  ;;  %v24231_v28 = vld [vmem:[#allocation17 + $0x920] ss:$8 sps:$4 sm:$0xff]  }
 0xc84   : > { %17240 = vmatpush1.bf16.msra.mxu1 %v24174_v51  ;;  %v24236_v51 = vld [vmem:[#allocation17 + $0x934] ss:$8 sps:$4 sm:$0xff]  }
 0xc85   : > { %17250 = vmatprep.subr.bf16.mxu1 %v24179_v42  ;;  %v24239_v42 = vld [vmem:[#allocation17 + $0x944] ss:$8 sps:$4 sm:$0xff]  }
 0xc87   : > { %17242 = vmatmul.mubr.bf16.vlgmr.msra.gmra.mrb[56].mxu1 %v13432_v61  ;;  %v24245_v61 = vld [vmem:[#allocation17 + $0x964] ss:$8 sps:$4 sm:$0xff]  }
 0xc88   : > { %17251 = vmatpush1.bf16.msra.mxu1 %v24177_v10  ;;  %17282 = vmatprep.mubr.bf16.mxu1 %v13435_v1  ;;  %v24242_v10 = vld [vmem:[#allocation17 + $0x954] ss:$8 sps:$4 sm:$0xff]  }
 0xc89   : > { %17252 = vmatprep.subr.bf16.mxu1 %v24182_v52  ;;  %v24243_v52 = vld [vmem:[#allocation17 + $0x960] ss:$8 sps:$4 sm:$0xff]   ;;  %v24248_v1 = vld [vmem:[#allocation17 + $0x974] ss:$8 sps:$4 sm:$0xff]  }
 0xc8c   : > { %17253 = vmatpush1.bf16.msra.mxu1 %v24180_v47  ;;  %v24246_v47 = vld [vmem:[#allocation17 + $0x970] ss:$8 sps:$4 sm:$0xff]  }
 0xc8d   : > { %17254 = vmatprep.subr.bf16.mxu1 %v24185_v5  ;;  %v24251_v5 = vld [vmem:[#allocation17 + $0x984] ss:$8 sps:$4 sm:$0xff]  }
 0xc90   : > { %17255 = vmatpush1.bf16.msra.mxu1 %v24183_v60  ;;  %v24249_v60 = vld [vmem:[#allocation17 + $0x980] ss:$8 sps:$4 sm:$0xff]  }
 0xc91   : > { %17256 = vmatprep.subr.bf16.mxu1 %v24188_v14  ;;  %v24254_v14 = vld [vmem:[#allocation17 + $0x994] ss:$8 sps:$4 sm:$0xff]  }
 0xc94   : > { %17257 = vmatpush1.bf16.msra.mxu1 %v24186_v54  ;;  %v24252_v54 = vld [vmem:[#allocation17 + $0x990] ss:$8 sps:$4 sm:$0xff]  }
 0xc95   : > { %17258 = vmatprep.subr.bf16.mxu1 %v24191_v39  ;;  %v24257_v39 = vld [vmem:[#allocation17 + $0x9a4] ss:$8 sps:$4 sm:$0xff]  }
 0xc98   : > { %17259 = vmatpush1.bf16.msra.mxu1 %v24189_v15  ;;  %v24255_v15 = vld [vmem:[#allocation17 + $0x9a0] ss:$8 sps:$4 sm:$0xff]  }
 0xc99   : > { %17260 = vmatprep.subr.bf16.mxu1 %v24194_v32  ;;  %v24260_v32 = vld [vmem:[#allocation17 + $0x9b4] ss:$8 sps:$4 sm:$0xff]  }
 0xc9c   : > { %17261 = vmatpush1.bf16.msra.mxu1 %v24192_v62  ;;  %v24258_v62 = vld [vmem:[#allocation17 + $0x9b0] ss:$8 sps:$4 sm:$0xff]  }
 0xc9d   : > { %17262 = vmatprep.subr.bf16.mxu1 %v24197_v63  ;;  %v24263_v63 = vld [vmem:[#allocation17 + $0x9c4] ss:$8 sps:$4 sm:$0xff]  }
 0xca0   : > { %17263 = vmatpush1.bf16.msra.mxu1 %v24195_v40  ;;  %v24261_v40 = vld [vmem:[#allocation17 + $0x9c0] ss:$8 sps:$4 sm:$0xff]  }
 0xca1   : > { %17264 = vmatprep.subr.bf16.mxu1 %v24200_v0  ;;  %v24266_v0 = vld [vmem:[#allocation17 + $0x9d4] ss:$8 sps:$4 sm:$0xff]  }
 0xca4   : > { %17265 = vmatpush1.bf16.msra.mxu1 %v24198_v50  ;;  %v24264_v50 = vld [vmem:[#allocation17 + $0x9d0] ss:$8 sps:$4 sm:$0xff]  }
 0xca5   : > { %17266 = vmatprep.subr.bf16.mxu1 %v24203_v49  ;;  %v24269_v49 = vld [vmem:[#allocation17 + $0x9e4] ss:$8 sps:$4 sm:$0xff]  }
 0xca8   : > { %17267 = vmatpush1.bf16.msra.mxu1 %v24201_v36  ;;  %v24267_v36 = vld [vmem:[#allocation17 + $0x9e0] ss:$8 sps:$4 sm:$0xff]  }
 0xca9   : > { %17268 = vmatprep.subr.bf16.mxu1 %v24206_v23  ;;  %v24272_v23 = vld [vmem:[#allocation17 + $0x9f4] ss:$8 sps:$4 sm:$0xff]  }
 0xcac   : > { %17269 = vmatpush1.bf16.msra.mxu1 %v24204_v56  ;;  %v24270_v56 = vld [vmem:[#allocation17 + $0x9f0] ss:$8 sps:$4 sm:$0xff]  }
 0xcad   : > { %17270 = vmatprep.subr.bf16.mxu1 %v24209_v21  ;;  %v24275_v21 = vld [vmem:[#allocation17 + $0xa04] ss:$8 sps:$4 sm:$0xff]  }
 0xcb0   : > { %17271 = vmatpush1.bf16.msra.mxu1 %v24207_v59  ;;  %v24273_v59 = vld [vmem:[#allocation17 + $0xa00] ss:$8 sps:$4 sm:$0xff]  }
 0xcb1   : > { %17272 = vmatprep.subr.bf16.mxu1 %v24212_v58  ;;  %v13436_v58 = vpack.c.bf16 %v28306_v6, %v28306_v6  ;;  %v24285_v6 = vld [vmem:[#allocation17 + $0xa40] ss:$8 sps:$4 sm:$0xff]  }
 0xcb4   : > { %17273 = vmatpush1.bf16.msra.mxu1 %v24210_v18  ;;  %v24278_v18 = vld [vmem:[#allocation17 + $0xa14] ss:$8 sps:$4 sm:$0xff]  }
 0xcb5   : > { %17274 = vmatprep.subr.bf16.mxu1 %v24215_v4  ;;  %v13439_v4 = vpack.c.bf16 %v28310_v57, %v28310_v57  ;;  %v24288_v57 = vld [vmem:[#allocation17 + $0xa50] ss:$8 sps:$4 sm:$0xff]  }
 0xcb8   : > { %17275 = vmatpush1.bf16.msra.mxu1 %v24213_v17  ;;  %v24276_v17 = vld [vmem:[#allocation17 + $0xa10] ss:$8 sps:$4 sm:$0xff]  }
 0xcb9   : > { %17276 = vmatprep.subr.bf16.mxu1 %v24218_v30  ;;  %v24281_v30 = vld [vmem:[#allocation17 + $0xa24] ss:$8 sps:$4 sm:$0xff]  }
 0xcbc   : > { %17277 = vmatpush1.bf16.msra.mxu1 %v24216_v41  ;;  %v24279_v41 = vld [vmem:[#allocation17 + $0xa20] ss:$8 sps:$4 sm:$0xff]  }
 0xcbd   : > { %17278 = vmatprep.subr.bf16.mxu1 %v24221_v19  ;;  %v24284_v19 = vld [vmem:[#allocation17 + $0xa34] ss:$8 sps:$4 sm:$0xff]  }
 0xcc0   : > { %17279 = vmatpush1.bf16.msra.mxu1 %v24219_v13  ;;  %v24282_v13 = vld [vmem:[#allocation17 + $0xa30] ss:$8 sps:$4 sm:$0xff]  }
 0xcc1   : > { %17280 = vmatprep.subr.bf16.mxu1 %v24224_v12  ;;  %v24287_v12 = vld [vmem:[#allocation17 + $0xa44] ss:$8 sps:$4 sm:$0xff]  }
 0xcc4   : > { %17281 = vmatpush1.bf16.msra.mxu1 %v24222_v29  ;;  %v24290_v29 = vld [vmem:[#allocation17 + $0xa54] ss:$8 sps:$4 sm:$0xff]  }
 0xcc5   : > { %17291 = vmatprep.subr.bf16.mxu1 %v24227_v45  ;;  %v24291_v45 = vld [vmem:[#allocation17 + $0xa60] ss:$8 sps:$4 sm:$0xff]  }
 0xcc7   : > { %17283 = vmatmul.mubr.bf16.vlgmr.msra.gmra.mrb[56].mxu1 %v13434_v9  ;;  %v24294_v9 = vld [vmem:[#allocation17 + $0xa70] ss:$8 sps:$4 sm:$0xff]  }
 0xcc8   : > { %17292 = vmatpush1.bf16.msra.mxu1 %v24225_v26  ;;  %17323 = vmatprep.mubr.bf16.mxu1 %v13437_v2  ;;  %v24296_v26 = vld [vmem:[#allocation17 + $0xa74] ss:$8 sps:$4 sm:$0xff]   ;;  %v24297_v2 = vld [vmem:[#allocation17 + $0xa80] ss:$8 sps:$4 sm:$0xff]  }
 0xcc9   : > { %17293 = vmatprep.subr.bf16.mxu1 %v24230_v35  ;;  %v24299_v35 = vld [vmem:[#allocation17 + $0xa84] ss:$8 sps:$4 sm:$0xff]  }
 0xccc   : > { %17294 = vmatpush1.bf16.msra.mxu1 %v24228_v8  ;;  %v24302_v8 = vld [vmem:[#allocation17 + $0xa94] ss:$8 sps:$4 sm:$0xff]  }
 0xccd   : > { %17295 = vmatprep.subr.bf16.mxu1 %v24233_v22  ;;  %v24300_v22 = vld [vmem:[#allocation17 + $0xa90] ss:$8 sps:$4 sm:$0xff]  }
 0xcd0   : > { %17296 = vmatpush1.bf16.msra.mxu1 %v24231_v28  ;;  %v24305_v28 = vld [vmem:[#allocation17 + $0xaa4] ss:$8 sps:$4 sm:$0xff]  }
 0xcd1   : > { %17297 = vmatprep.subr.bf16.mxu1 %v24236_v51  ;;  %v24303_v51 = vld [vmem:[#allocation17 + $0xaa0] ss:$8 sps:$4 sm:$0xff]  }
 0xcd4   : > { %17298 = vmatpush1.bf16.msra.mxu1 %v24234_v31  ;;  %v24308_v31 = vld [vmem:[#allocation17 + $0xab4] ss:$8 sps:$4 sm:$0xff]  }
 0xcd5   : > { %17299 = vmatprep.subr.bf16.mxu1 %v24239_v42  ;;  %v24306_v42 = vld [vmem:[#allocation17 + $0xab0] ss:$8 sps:$4 sm:$0xff]  }
 0xcd8   : > { %17300 = vmatpush1.bf16.msra.mxu1 %v24237_v7  ;;  %v24311_v7 = vld [vmem:[#allocation17 + $0xac4] ss:$8 sps:$4 sm:$0xff]  }
 0xcd9   : > { %17301 = vmatprep.subr.bf16.mxu1 %v24242_v10  ;;  %v24309_v10 = vld [vmem:[#allocation17 + $0xac0] ss:$8 sps:$4 sm:$0xff]  }
 0xcdc   : > { %17302 = vmatpush1.bf16.msra.mxu1 %v24240_v16  ;;  %v24314_v16 = vld [vmem:[#allocation17 + $0xad4] ss:$8 sps:$4 sm:$0xff]  }
 0xcdd   : > { %17303 = vmatprep.subr.bf16.mxu1 %v24245_v61  ;;  %v24312_v61 = vld [vmem:[#allocation17 + $0xad0] ss:$8 sps:$4 sm:$0xff]  }
 0xce0   : > { %17304 = vmatpush1.bf16.msra.mxu1 %v24243_v52  ;;  %v24317_v52 = vld [vmem:[#allocation17 + $0xae4] ss:$8 sps:$4 sm:$0xff]  }
 0xce1   : > { %17305 = vmatprep.subr.bf16.mxu1 %v24248_v1  ;;  %v24315_v1 = vld [vmem:[#allocation17 + $0xae0] ss:$8 sps:$4 sm:$0xff]  }
 0xce4   : > { %17306 = vmatpush1.bf16.msra.mxu1 %v24246_v47  ;;  %v24320_v47 = vld [vmem:[#allocation17 + $0xaf4] ss:$8 sps:$4 sm:$0xff]  }
 0xce5   : > { %17307 = vmatprep.subr.bf16.mxu1 %v24251_v5  ;;  %v24318_v5 = vld [vmem:[#allocation17 + $0xaf0] ss:$8 sps:$4 sm:$0xff]  }
 0xce8   : > { %17308 = vmatpush1.bf16.msra.mxu1 %v24249_v60  ;;  %v24323_v60 = vld [vmem:[#allocation17 + $0xb04] ss:$8 sps:$4 sm:$0xff]  }
 0xce9   : > { %17309 = vmatprep.subr.bf16.mxu1 %v24254_v14  ;;  %v24321_v14 = vld [vmem:[#allocation17 + $0xb00] ss:$8 sps:$4 sm:$0xff]  }
 0xcec   : > { %17310 = vmatpush1.bf16.msra.mxu1 %v24252_v54  ;;  %v13438_v54 = vpack.c.bf16 %v28314_v37, %v28314_v37  ;;  %v24333_v37 = vld [vmem:[#allocation17 + $0xb40] ss:$8 sps:$4 sm:$0xff]  }
 0xced   : > { %17311 = vmatprep.subr.bf16.mxu1 %v24257_v39  ;;  %v24326_v39 = vld [vmem:[#allocation17 + $0xb14] ss:$8 sps:$4 sm:$0xff]  }
 0xcf0   : > { %17312 = vmatpush1.bf16.msra.mxu1 %v24255_v15  ;;  %v13441_v15 = vpack.c.bf16 %v28318_v34, %v28318_v34  ;;  %v24336_v34 = vld [vmem:[#allocation17 + $0xb50] ss:$8 sps:$4 sm:$0xff]  }
 0xcf1   : > { %17313 = vmatprep.subr.bf16.mxu1 %v24260_v32  ;;  %v24324_v32 = vld [vmem:[#allocation17 + $0xb10] ss:$8 sps:$4 sm:$0xff]  }
 0xcf4   : > { %17314 = vmatpush1.bf16.msra.mxu1 %v24258_v62  ;;  %v24329_v62 = vld [vmem:[#allocation17 + $0xb24] ss:$8 sps:$4 sm:$0xff]  }
 0xcf5   : > { %17315 = vmatprep.subr.bf16.mxu1 %v24263_v63  ;;  %v24327_v63 = vld [vmem:[#allocation17 + $0xb20] ss:$8 sps:$4 sm:$0xff]  }
 0xcf8   : > { %17316 = vmatpush1.bf16.msra.mxu1 %v24261_v40  ;;  %v24332_v40 = vld [vmem:[#allocation17 + $0xb34] ss:$8 sps:$4 sm:$0xff]  }
 0xcf9   : > { %17317 = vmatprep.subr.bf16.mxu1 %v24266_v0  ;;  %v24330_v0 = vld [vmem:[#allocation17 + $0xb30] ss:$8 sps:$4 sm:$0xff]  }
 0xcfc   : > { %17318 = vmatpush1.bf16.msra.mxu1 %v24264_v50  ;;  %v24335_v50 = vld [vmem:[#allocation17 + $0xb44] ss:$8 sps:$4 sm:$0xff]  }
 0xcfd   : > { %17319 = vmatprep.subr.bf16.mxu1 %v24269_v49  ;;  %v24338_v49 = vld [vmem:[#allocation17 + $0xb54] ss:$8 sps:$4 sm:$0xff]  }
 0xd00   : > { %17320 = vmatpush1.bf16.msra.mxu1 %v24267_v36  ;;  %v24341_v36 = vld [vmem:[#allocation17 + $0xb64] ss:$8 sps:$4 sm:$0xff]  }
 0xd01   : > { %17321 = vmatprep.subr.bf16.mxu1 %v24272_v23  ;;  %v24339_v23 = vld [vmem:[#allocation17 + $0xb60] ss:$8 sps:$4 sm:$0xff]  }
 0xd04   : > { %17322 = vmatpush1.bf16.msra.mxu1 %v24270_v56  ;;  %v24344_v56 = vld [vmem:[#allocation17 + $0xb74] ss:$8 sps:$4 sm:$0xff]  }
 0xd05   : > { %17332 = vmatprep.subr.bf16.mxu1 %v24275_v21  ;;  %v24342_v21 = vld [vmem:[#allocation17 + $0xb70] ss:$8 sps:$4 sm:$0xff]  }
 0xd07   : > { %17324 = vmatmul.mubr.bf16.vlgmr.msra.gmra.mrb[56].mxu1 %v13436_v58  ;;  %v24345_v58 = vld [vmem:[#allocation17 + $0xb80] ss:$8 sps:$4 sm:$0xff]  }
 0xd08   : > { %17333 = vmatpush1.bf16.msra.mxu1 %v24273_v59  ;;  %17364 = vmatprep.mubr.bf16.mxu1 %v13439_v4  ;;  %v24347_v59 = vld [vmem:[#allocation17 + $0xb84] ss:$8 sps:$4 sm:$0xff]   ;;  %v24348_v4 = vld [vmem:[#allocation17 + $0xb90] ss:$8 sps:$4 sm:$0xff]  }
 0xd09   : > { %17334 = vmatprep.subr.bf16.mxu1 %v24278_v18  ;;  %v24350_v18 = vld [vmem:[#allocation17 + $0xb94] ss:$8 sps:$4 sm:$0xff]  }
 0xd0c   : > { %17335 = vmatpush1.bf16.msra.mxu1 %v24276_v17  ;;  %v24353_v17 = vld [vmem:[#allocation17 + $0xba4] ss:$8 sps:$4 sm:$0xff]  }
 0xd0d   : > { %17336 = vmatprep.subr.bf16.mxu1 %v24281_v30  ;;  %v24351_v30 = vld [vmem:[#allocation17 + $0xba0] ss:$8 sps:$4 sm:$0xff]  }
 0xd10   : > { %17337 = vmatpush1.bf16.msra.mxu1 %v24279_v41  ;;  %v24356_v41 = vld [vmem:[#allocation17 + $0xbb4] ss:$8 sps:$4 sm:$0xff]  }
 0xd11   : > { %17338 = vmatprep.subr.bf16.mxu1 %v24284_v19  ;;  %v24354_v19 = vld [vmem:[#allocation17 + $0xbb0] ss:$8 sps:$4 sm:$0xff]  }
 0xd14   : > { %17339 = vmatpush1.bf16.msra.mxu1 %v24282_v13  ;;  %v24359_v13 = vld [vmem:[#allocation17 + $0xbc4] ss:$8 sps:$4 sm:$0xff]  }
 0xd15   : > { %17340 = vmatprep.subr.bf16.mxu1 %v24287_v12  ;;  %v24357_v12 = vld [vmem:[#allocation17 + $0xbc0] ss:$8 sps:$4 sm:$0xff]  }
 0xd18   : > { %17341 = vmatpush1.bf16.msra.mxu1 %v24285_v6  ;;  %v24362_v6 = vld [vmem:[#allocation17 + $0xbd4] ss:$8 sps:$4 sm:$0xff]  }
 0xd19   : > { %17342 = vmatprep.subr.bf16.mxu1 %v24290_v29  ;;  %v24360_v29 = vld [vmem:[#allocation17 + $0xbd0] ss:$8 sps:$4 sm:$0xff]  }
 0xd1c   : > { %17343 = vmatpush1.bf16.msra.mxu1 %v24288_v57  ;;  %v24365_v57 = vld [vmem:[#allocation17 + $0xbe4] ss:$8 sps:$4 sm:$0xff]  }
 0xd1d   : > { %17344 = vmatprep.subr.bf16.mxu1 %v24293_v27  ;;  %v24363_v27 = vld [vmem:[#allocation17 + $0xbe0] ss:$8 sps:$4 sm:$0xff]  }
 0xd20   : > { %17345 = vmatpush1.bf16.msra.mxu1 %v24291_v45  ;;  %v24368_v45 = vld [vmem:[#allocation17 + $0xbf4] ss:$8 sps:$4 sm:$0xff]  }
 0xd21   : > { %17346 = vmatprep.subr.bf16.mxu1 %v24296_v26  ;;  %v24366_v26 = vld [vmem:[#allocation17 + $0xbf0] ss:$8 sps:$4 sm:$0xff]  }
 0xd24   : > { %17347 = vmatpush1.bf16.msra.mxu1 %v24294_v9  ;;  %v24371_v9 = vld [vmem:[#allocation17 + $0xc04] ss:$8 sps:$4 sm:$0xff]  }
 0xd25   : > { %17348 = vmatprep.subr.bf16.mxu1 %v24299_v35  ;;  %v28388_v35 = vld [vmem:[#allocation4 + $0x18] sm:$0xff] }
 0xd28   : > { %17349 = vmatpush1.bf16.msra.mxu1 %v24297_v2  ;;  %v13341_v2 = vrot.slane %v28388_v35, %v28207_v20 }
 0xd29   : > { %17350 = vmatprep.subr.bf16.mxu1 %v24302_v8  ;;  %v24369_v8 = vld [vmem:[#allocation17 + $0xc00] ss:$8 sps:$4 sm:$0xff]  }
 0xd2c   : > { %17351 = vmatpush1.bf16.msra.mxu1 %v24300_v22  ;;  %v13440_v22 = vpack.c.bf16 %v28322_v55, %v28322_v55  ;;  %v24386_v55 = vld [vmem:[#allocation17 + $0xc54] ss:$8 sps:$4 sm:$0xff]  }
 0xd2d   : > { %17352 = vmatprep.subr.bf16.mxu1 %v24305_v28  ;;  %v24374_v28 = vld [vmem:[#allocation17 + $0xc14] ss:$8 sps:$4 sm:$0xff]  }
 0xd30   : > { %17353 = vmatpush1.bf16.msra.mxu1 %v24303_v51  ;;  %v13443_v51 = vpack.c.bf16 %v13341_v2, %v13341_v2  ;;  %v24443_v2 = vld [vmem:[#allocation17 + $0xd84] ss:$8 sps:$4 sm:$0xff]  }
 0xd31   : > { %17354 = vmatprep.subr.bf16.mxu1 %v24308_v31  ;;  %v24372_v31 = vld [vmem:[#allocation17 + $0xc10] ss:$8 sps:$4 sm:$0xff]  }
 0xd34   : > { %17355 = vmatpush1.bf16.msra.mxu1 %v24306_v42  ;;  %v24377_v42 = vld [vmem:[#allocation17 + $0xc24] ss:$8 sps:$4 sm:$0xff]  }
 0xd35   : > { %17356 = vmatprep.subr.bf16.mxu1 %v24311_v7  ;;  %v24375_v7 = vld [vmem:[#allocation17 + $0xc20] ss:$8 sps:$4 sm:$0xff]  }
 0xd38   : > { %17357 = vmatpush1.bf16.msra.mxu1 %v24309_v10  ;;  %v24380_v10 = vld [vmem:[#allocation17 + $0xc34] ss:$8 sps:$4 sm:$0xff]  }
 0xd39   : > { %17358 = vmatprep.subr.bf16.mxu1 %v24314_v16  ;;  %v24378_v16 = vld [vmem:[#allocation17 + $0xc30] ss:$8 sps:$4 sm:$0xff]  }
 0xd3c   : > { %17359 = vmatpush1.bf16.msra.mxu1 %v24312_v61  ;;  %v24383_v61 = vld [vmem:[#allocation17 + $0xc44] ss:$8 sps:$4 sm:$0xff]  }
 0xd3d   : > { %17360 = vmatprep.subr.bf16.mxu1 %v24317_v52  ;;  %v24381_v52 = vld [vmem:[#allocation17 + $0xc40] ss:$8 sps:$4 sm:$0xff]  }
 0xd40   : > { %17361 = vmatpush1.bf16.msra.mxu1 %v24315_v1  ;;  %v24384_v1 = vld [vmem:[#allocation17 + $0xc50] ss:$8 sps:$4 sm:$0xff]  }
 0xd41   : > { %17362 = vmatprep.subr.bf16.mxu1 %v24320_v47  ;;  %v24389_v47 = vld [vmem:[#allocation17 + $0xc64] ss:$8 sps:$4 sm:$0xff]  }
 0xd44   : > { %17363 = vmatpush1.bf16.msra.mxu1 %v24318_v5  ;;  %v24387_v5 = vld [vmem:[#allocation17 + $0xc60] ss:$8 sps:$4 sm:$0xff]  }
 0xd45   : > { %17373 = vmatprep.subr.bf16.mxu1 %v24323_v60  ;;  %v24392_v60 = vld [vmem:[#allocation17 + $0xc74] ss:$8 sps:$4 sm:$0xff]  }
 0xd47   : > { %17365 = vmatmul.mubr.bf16.vlgmr.msra.gmra.mrb[56].mxu1 %v13438_v54  ;;  %v24395_v54 = vld [vmem:[#allocation17 + $0xc84] ss:$8 sps:$4 sm:$0xff]  }
 0xd48   : > { %17374 = vmatpush1.bf16.msra.mxu1 %v24321_v14  ;;  %17405 = vmatprep.mubr.bf16.mxu1 %v13441_v15  ;;  %v24390_v14 = vld [vmem:[#allocation17 + $0xc70] ss:$8 sps:$4 sm:$0xff]   ;;  %v24398_v15 = vld [vmem:[#allocation17 + $0xc94] ss:$8 sps:$4 sm:$0xff]  }
 0xd49   : > { %17375 = vmatprep.subr.bf16.mxu1 %v24326_v39  ;;  %v24393_v39 = vld [vmem:[#allocation17 + $0xc80] ss:$8 sps:$4 sm:$0xff]  }
 0xd4c   : > { %17376 = vmatpush1.bf16.msra.mxu1 %v24324_v32  ;;  %v24396_v32 = vld [vmem:[#allocation17 + $0xc90] ss:$8 sps:$4 sm:$0xff]  }
 0xd4d   : > { %17377 = vmatprep.subr.bf16.mxu1 %v24329_v62  ;;  %v24401_v62 = vld [vmem:[#allocation17 + $0xca4] ss:$8 sps:$4 sm:$0xff]  }
 0xd50   : > { %17378 = vmatpush1.bf16.msra.mxu1 %v24327_v63  ;;  %v24399_v63 = vld [vmem:[#allocation17 + $0xca0] ss:$8 sps:$4 sm:$0xff]  }
 0xd51   : > { %17379 = vmatprep.subr.bf16.mxu1 %v24332_v40  ;;  %v24404_v40 = vld [vmem:[#allocation17 + $0xcb4] ss:$8 sps:$4 sm:$0xff]  }
 0xd54   : > { %17380 = vmatpush1.bf16.msra.mxu1 %v24330_v0  ;;  %v24402_v0 = vld [vmem:[#allocation17 + $0xcb0] ss:$8 sps:$4 sm:$0xff]  }
 0xd55   : > { %17381 = vmatprep.subr.bf16.mxu1 %v24335_v50  ;;  %v24407_v50 = vld [vmem:[#allocation17 + $0xcc4] ss:$8 sps:$4 sm:$0xff]  }
 0xd58   : > { %17382 = vmatpush1.bf16.msra.mxu1 %v24333_v37  ;;  %v24405_v37 = vld [vmem:[#allocation17 + $0xcc0] ss:$8 sps:$4 sm:$0xff]  }
 0xd59   : > { %17383 = vmatprep.subr.bf16.mxu1 %v24338_v49  ;;  %v24410_v49 = vld [vmem:[#allocation17 + $0xcd4] ss:$8 sps:$4 sm:$0xff]  }
 0xd5c   : > { %17384 = vmatpush1.bf16.msra.mxu1 %v24336_v34  ;;  %v24408_v34 = vld [vmem:[#allocation17 + $0xcd0] ss:$8 sps:$4 sm:$0xff]  }
 0xd5d   : > { %17385 = vmatprep.subr.bf16.mxu1 %v24341_v36  ;;  %v24413_v36 = vld [vmem:[#allocation17 + $0xce4] ss:$8 sps:$4 sm:$0xff]  }
 0xd60   : > { %17386 = vmatpush1.bf16.msra.mxu1 %v24339_v23  ;;  %v24411_v23 = vld [vmem:[#allocation17 + $0xce0] ss:$8 sps:$4 sm:$0xff]  }
 0xd61   : > { %17387 = vmatprep.subr.bf16.mxu1 %v24344_v56  ;;  %v24416_v56 = vld [vmem:[#allocation17 + $0xcf4] ss:$8 sps:$4 sm:$0xff]  }
 0xd64   : > { %17388 = vmatpush1.bf16.msra.mxu1 %v24342_v21  ;;  %v24414_v21 = vld [vmem:[#allocation17 + $0xcf0] ss:$8 sps:$4 sm:$0xff]  }
 0xd65   : > { %17389 = vmatprep.subr.bf16.mxu1 %v24347_v59  ;;  %v13337_v59 = vrot.slane %v28388_v35, %v28219_v48  ;;  %v24438_v35 = vld [vmem:[#allocation17 + $0xd70] ss:$8 sps:$4 sm:$0xff]  }
 0xd68   : > { %17390 = vmatpush1.bf16.msra.mxu1 %v24345_v58  ;;  %v24419_v58 = vld [vmem:[#allocation17 + $0xd04] ss:$8 sps:$4 sm:$0xff]  }
 0xd69   : > { %17391 = vmatprep.subr.bf16.mxu1 %v24350_v18  ;;  %v24417_v18 = vld [vmem:[#allocation17 + $0xd00] ss:$8 sps:$4 sm:$0xff]  }
 0xd6c   : > { %17392 = vmatpush1.bf16.msra.mxu1 %v24348_v4  ;;  %v13442_v4 = vpack.c.bf16 %v13337_v59, %v13337_v59  ;;  %v24494_v59 = vld [vmem:[#allocation17 + $0xe94] ss:$8 sps:$4 sm:$0xff]  }
 0xd6d   : > { %17393 = vmatprep.subr.bf16.mxu1 %v24353_v17  ;;  %v24422_v17 = vld [vmem:[#allocation17 + $0xd14] ss:$8 sps:$4 sm:$0xff]  }
 0xd70   : > { %17394 = vmatpush1.bf16.msra.mxu1 %v24351_v30  ;;  %v13445_v30 = vpack.c.bf16 %v28325_v24, %v28325_v24  ;;  %v24432_v24 = vld [vmem:[#allocation17 + $0xd50] ss:$8 sps:$4 sm:$0xff]  }
 0xd71   : > { %17395 = vmatprep.subr.bf16.mxu1 %v24356_v41  ;;  %v24420_v41 = vld [vmem:[#allocation17 + $0xd10] ss:$8 sps:$4 sm:$0xff]  }
 0xd74   : > { %17396 = vmatpush1.bf16.msra.mxu1 %v24354_v19  ;;  %v24425_v19 = vld [vmem:[#allocation17 + $0xd24] ss:$8 sps:$4 sm:$0xff]  }
 0xd75   : > { %17397 = vmatprep.subr.bf16.mxu1 %v24359_v13  ;;  %v24423_v13 = vld [vmem:[#allocation17 + $0xd20] ss:$8 sps:$4 sm:$0xff]  }
 0xd78   : > { %17398 = vmatpush1.bf16.msra.mxu1 %v24357_v12  ;;  %v24428_v12 = vld [vmem:[#allocation17 + $0xd34] ss:$8 sps:$4 sm:$0xff]  }
 0xd79   : > { %17399 = vmatprep.subr.bf16.mxu1 %v24362_v6  ;;  %v24426_v6 = vld [vmem:[#allocation17 + $0xd30] ss:$8 sps:$4 sm:$0xff]  }
 0xd7c   : > { %17400 = vmatpush1.bf16.msra.mxu1 %v24360_v29  ;;  %v24431_v29 = vld [vmem:[#allocation17 + $0xd44] ss:$8 sps:$4 sm:$0xff]  }
 0xd7d   : > { %17401 = vmatprep.subr.bf16.mxu1 %v24365_v57  ;;  %v24429_v57 = vld [vmem:[#allocation17 + $0xd40] ss:$8 sps:$4 sm:$0xff]  }
 0xd80   : > { %17402 = vmatpush1.bf16.msra.mxu1 %v24363_v27  ;;  %v24434_v27 = vld [vmem:[#allocation17 + $0xd54] ss:$8 sps:$4 sm:$0xff]  }
 0xd81   : > { %17403 = vmatprep.subr.bf16.mxu1 %v24368_v45  ;;  %v24437_v45 = vld [vmem:[#allocation17 + $0xd64] ss:$8 sps:$4 sm:$0xff]  }
 0xd84   : > { %17404 = vmatpush1.bf16.msra.mxu1 %v24366_v26  ;;  %v24435_v26 = vld [vmem:[#allocation17 + $0xd60] ss:$8 sps:$4 sm:$0xff]  }
 0xd85   : > { %17414 = vmatprep.subr.bf16.mxu1 %v24371_v9  ;;  %v24440_v9 = vld [vmem:[#allocation17 + $0xd74] ss:$8 sps:$4 sm:$0xff]  }
 0xd87   : > { %17406 = vmatmul.mubr.bf16.vlgmr.msra.gmra.mrb[56].mxu1 %v13440_v22  ;;  %v24446_v22 = vld [vmem:[#allocation17 + $0xd94] ss:$8 sps:$4 sm:$0xff]  }
 0xd88   : > { %17415 = vmatpush1.bf16.msra.mxu1 %v24369_v8  ;;  %17446 = vmatprep.mubr.bf16.mxu1 %v13443_v51  ;;  %v24441_v8 = vld [vmem:[#allocation17 + $0xd80] ss:$8 sps:$4 sm:$0xff]   ;;  %v24449_v51 = vld [vmem:[#allocation17 + $0xda4] ss:$8 sps:$4 sm:$0xff]  }
 0xd89   : > { %17416 = vmatprep.subr.bf16.mxu1 %v24374_v28  ;;  %v24444_v28 = vld [vmem:[#allocation17 + $0xd90] ss:$8 sps:$4 sm:$0xff]  }
 0xd8c   : > { %17417 = vmatpush1.bf16.msra.mxu1 %v24372_v31  ;;  %v24447_v31 = vld [vmem:[#allocation17 + $0xda0] ss:$8 sps:$4 sm:$0xff]  }
 0xd8d   : > { %17418 = vmatprep.subr.bf16.mxu1 %v24377_v42  ;;  %v24452_v42 = vld [vmem:[#allocation17 + $0xdb4] ss:$8 sps:$4 sm:$0xff]  }
 0xd90   : > { %17419 = vmatpush1.bf16.msra.mxu1 %v24375_v7  ;;  %v24450_v7 = vld [vmem:[#allocation17 + $0xdb0] ss:$8 sps:$4 sm:$0xff]  }
 0xd91   : > { %17420 = vmatprep.subr.bf16.mxu1 %v24380_v10  ;;  %v24455_v10 = vld [vmem:[#allocation17 + $0xdc4] ss:$8 sps:$4 sm:$0xff]  }
 0xd94   : > { %17421 = vmatpush1.bf16.msra.mxu1 %v24378_v16  ;;  %v24453_v16 = vld [vmem:[#allocation17 + $0xdc0] ss:$8 sps:$4 sm:$0xff]  }
 0xd95   : > { %17422 = vmatprep.subr.bf16.mxu1 %v24383_v61  ;;  %v24458_v61 = vld [vmem:[#allocation17 + $0xdd4] ss:$8 sps:$4 sm:$0xff]  }
 0xd98   : > { %17423 = vmatpush1.bf16.msra.mxu1 %v24381_v52  ;;  %v24456_v52 = vld [vmem:[#allocation17 + $0xdd0] ss:$8 sps:$4 sm:$0xff]  }
 0xd99   : > { %17424 = vmatprep.subr.bf16.mxu1 %v24386_v55  ;;  %v24461_v55 = vld [vmem:[#allocation17 + $0xde4] ss:$8 sps:$4 sm:$0xff]  }
 0xd9c   : > { %17425 = vmatpush1.bf16.msra.mxu1 %v24384_v1  ;;  %v24459_v1 = vld [vmem:[#allocation17 + $0xde0] ss:$8 sps:$4 sm:$0xff]  }
 0xd9d   : > { %17426 = vmatprep.subr.bf16.mxu1 %v24389_v47  ;;  %v24464_v47 = vld [vmem:[#allocation17 + $0xdf4] ss:$8 sps:$4 sm:$0xff]  }
 0xda0   : > { %17427 = vmatpush1.bf16.msra.mxu1 %v24387_v5  ;;  %v24462_v5 = vld [vmem:[#allocation17 + $0xdf0] ss:$8 sps:$4 sm:$0xff]  }
 0xda1   : > { %17428 = vmatprep.subr.bf16.mxu1 %v24392_v60  ;;  %v24467_v60 = vld [vmem:[#allocation17 + $0xe04] ss:$8 sps:$4 sm:$0xff]  }
 0xda4   : > { %17429 = vmatpush1.bf16.msra.mxu1 %v24390_v14  ;;  %v24465_v14 = vld [vmem:[#allocation17 + $0xe00] ss:$8 sps:$4 sm:$0xff]  }
 0xda5   : > { %17430 = vmatprep.subr.bf16.mxu1 %v24395_v54  ;;  %v13444_v54 = vpack.c.bf16 %v28328_v11, %v28328_v11  ;;  %v24477_v11 = vld [vmem:[#allocation17 + $0xe40] ss:$8 sps:$4 sm:$0xff]  }
 0xda8   : > { %17431 = vmatpush1.bf16.msra.mxu1 %v24393_v39  ;;  %v24470_v39 = vld [vmem:[#allocation17 + $0xe14] ss:$8 sps:$4 sm:$0xff]  }
 0xda9   : > { %17432 = vmatprep.subr.bf16.mxu1 %v24398_v15  ;;  %v13447_v15 = vpack.c.bf16 %v28331_v43, %v28331_v43  ;;  %v24480_v43 = vld [vmem:[#allocation17 + $0xe50] ss:$8 sps:$4 sm:$0xff]  }
 0xdac   : > { %17433 = vmatpush1.bf16.msra.mxu1 %v24396_v32  ;;  %v24468_v32 = vld [vmem:[#allocation17 + $0xe10] ss:$8 sps:$4 sm:$0xff]  }
 0xdad   : > { %17434 = vmatprep.subr.bf16.mxu1 %v24401_v62  ;;  %v24473_v62 = vld [vmem:[#allocation17 + $0xe24] ss:$8 sps:$4 sm:$0xff]  }
 0xdb0   : > { %17435 = vmatpush1.bf16.msra.mxu1 %v24399_v63  ;;  %v24471_v63 = vld [vmem:[#allocation17 + $0xe20] ss:$8 sps:$4 sm:$0xff]  }
 0xdb1   : > { %17436 = vmatprep.subr.bf16.mxu1 %v24404_v40  ;;  %v24476_v40 = vld [vmem:[#allocation17 + $0xe34] ss:$8 sps:$4 sm:$0xff]  }
 0xdb4   : > { %17437 = vmatpush1.bf16.msra.mxu1 %v24402_v0  ;;  %v24474_v0 = vld [vmem:[#allocation17 + $0xe30] ss:$8 sps:$4 sm:$0xff]  }
 0xdb5   : > { %17438 = vmatprep.subr.bf16.mxu1 %v24407_v50  ;;  %v24479_v50 = vld [vmem:[#allocation17 + $0xe44] ss:$8 sps:$4 sm:$0xff]  }
 0xdb8   : > { %17439 = vmatpush1.bf16.msra.mxu1 %v24405_v37  ;;  %v24482_v37 = vld [vmem:[#allocation17 + $0xe54] ss:$8 sps:$4 sm:$0xff]  }
 0xdb9   : > { %17440 = vmatprep.subr.bf16.mxu1 %v24410_v49  ;;  %v24485_v49 = vld [vmem:[#allocation17 + $0xe64] ss:$8 sps:$4 sm:$0xff]  }
 0xdbc   : > { %17441 = vmatpush1.bf16.msra.mxu1 %v24408_v34  ;;  %v24483_v34 = vld [vmem:[#allocation17 + $0xe60] ss:$8 sps:$4 sm:$0xff]  }
 0xdbd   : > { %17442 = vmatprep.subr.bf16.mxu1 %v24413_v36  ;;  %v24488_v36 = vld [vmem:[#allocation17 + $0xe74] ss:$8 sps:$4 sm:$0xff]  }
 0xdc0   : > { %17443 = vmatpush1.bf16.msra.mxu1 %v24411_v23  ;;  %v24486_v23 = vld [vmem:[#allocation17 + $0xe70] ss:$8 sps:$4 sm:$0xff]  }
 0xdc1   : > { %17444 = vmatprep.subr.bf16.mxu1 %v24416_v56  ;;  %v24491_v56 = vld [vmem:[#allocation17 + $0xe84] ss:$8 sps:$4 sm:$0xff]  }
 0xdc4   : > { %17445 = vmatpush1.bf16.msra.mxu1 %v24414_v21  ;;  %v24489_v21 = vld [vmem:[#allocation17 + $0xe80] ss:$8 sps:$4 sm:$0xff]  }
 0xdc5   : > { %17455 = vmatprep.subr.bf16.mxu1 %v24419_v58  ;;  %v24492_v58 = vld [vmem:[#allocation17 + $0xe90] ss:$8 sps:$4 sm:$0xff]  }
 0xdc7   : > { %17447 = vmatmul.mubr.bf16.vlgmr.msra.gmra.mrb[56].mxu1 %v13442_v4  ;;  %v24495_v4 = vld [vmem:[#allocation17 + $0xea0] ss:$8 sps:$4 sm:$0xff]  }
 0xdc8   : > { %17456 = vmatpush1.bf16.msra.mxu1 %v24417_v18  ;;  %17487 = vmatprep.mubr.bf16.mxu1 %v13445_v30  ;;  %v24497_v18 = vld [vmem:[#allocation17 + $0xea4] ss:$8 sps:$4 sm:$0xff]   ;;  %v24498_v30 = vld [vmem:[#allocation17 + $0xeb0] ss:$8 sps:$4 sm:$0xff]  }
 0xdc9   : > { %17457 = vmatprep.subr.bf16.mxu1 %v24422_v17  ;;  %v24500_v17 = vld [vmem:[#allocation17 + $0xeb4] ss:$8 sps:$4 sm:$0xff]  }
 0xdcc   : > { %17458 = vmatpush1.bf16.msra.mxu1 %v24420_v41  ;;  %v24503_v41 = vld [vmem:[#allocation17 + $0xec4] ss:$8 sps:$4 sm:$0xff]  }
 0xdcd   : > { %17459 = vmatprep.subr.bf16.mxu1 %v24425_v19  ;;  %v24501_v19 = vld [vmem:[#allocation17 + $0xec0] ss:$8 sps:$4 sm:$0xff]  }
 0xdd0   : > { %17460 = vmatpush1.bf16.msra.mxu1 %v24423_v13  ;;  %v24506_v13 = vld [vmem:[#allocation17 + $0xed4] ss:$8 sps:$4 sm:$0xff]  }
 0xdd1   : > { %17461 = vmatprep.subr.bf16.mxu1 %v24428_v12  ;;  %v24504_v12 = vld [vmem:[#allocation17 + $0xed0] ss:$8 sps:$4 sm:$0xff]  }
 0xdd4   : > { %17462 = vmatpush1.bf16.msra.mxu1 %v24426_v6  ;;  %v24509_v6 = vld [vmem:[#allocation17 + $0xee4] ss:$8 sps:$4 sm:$0xff]  }
 0xdd5   : > { %17463 = vmatprep.subr.bf16.mxu1 %v24431_v29  ;;  %v24507_v29 = vld [vmem:[#allocation17 + $0xee0] ss:$8 sps:$4 sm:$0xff]  }
 0xdd8   : > { %17464 = vmatpush1.bf16.msra.mxu1 %v24429_v57  ;;  %v24512_v57 = vld [vmem:[#allocation17 + $0xef4] ss:$8 sps:$4 sm:$0xff]  }
 0xdd9   : > { %17465 = vmatprep.subr.bf16.mxu1 %v24434_v27  ;;  %v24510_v27 = vld [vmem:[#allocation17 + $0xef0] ss:$8 sps:$4 sm:$0xff]  }
 0xddc   : > { %17466 = vmatpush1.bf16.msra.mxu1 %v24432_v24  ;;  %v24515_v24 = vld [vmem:[#allocation17 + $0xf04] ss:$8 sps:$4 sm:$0xff]  }
 0xddd   : > { %17467 = vmatprep.subr.bf16.mxu1 %v24437_v45  ;;  %v24513_v45 = vld [vmem:[#allocation17 + $0xf00] ss:$8 sps:$4 sm:$0xff]  }
 0xde0   : > { %17468 = vmatpush1.bf16.msra.mxu1 %v24435_v26  ;;  %v13446_v26 = vpack.c.bf16 %v28334_v25, %v28334_v25  ;;  %v24525_v25 = vld [vmem:[#allocation17 + $0xf40] ss:$8 sps:$4 sm:$0xff]  }
 0xde1   : > { %17469 = vmatprep.subr.bf16.mxu1 %v24440_v9  ;;  %v24518_v9 = vld [vmem:[#allocation17 + $0xf14] ss:$8 sps:$4 sm:$0xff]  }
 0xde4   : > { %17470 = vmatpush1.bf16.msra.mxu1 %v24438_v35  ;;  %v13449_v35 = vpack.c.bf16 %v28337_v33, %v28337_v33  ;;  %v24528_v33 = vld [vmem:[#allocation17 + $0xf50] ss:$8 sps:$4 sm:$0xff]  }
 0xde5   : > { %17471 = vmatprep.subr.bf16.mxu1 %v24443_v2  ;;  %v24516_v2 = vld [vmem:[#allocation17 + $0xf10] ss:$8 sps:$4 sm:$0xff]  }
 0xde8   : > { %17472 = vmatpush1.bf16.msra.mxu1 %v24441_v8  ;;  %v24521_v8 = vld [vmem:[#allocation17 + $0xf24] ss:$8 sps:$4 sm:$0xff]  }
 0xde9   : > { %17473 = vmatprep.subr.bf16.mxu1 %v24446_v22  ;;  %v24519_v22 = vld [vmem:[#allocation17 + $0xf20] ss:$8 sps:$4 sm:$0xff]  }
 0xdec   : > { %17474 = vmatpush1.bf16.msra.mxu1 %v24444_v28  ;;  %v24524_v28 = vld [vmem:[#allocation17 + $0xf34] ss:$8 sps:$4 sm:$0xff]  }
 0xded   : > { %17475 = vmatprep.subr.bf16.mxu1 %v24449_v51  ;;  %v24522_v51 = vld [vmem:[#allocation17 + $0xf30] ss:$8 sps:$4 sm:$0xff]  }
 0xdf0   : > { %17476 = vmatpush1.bf16.msra.mxu1 %v24447_v31  ;;  %v24527_v31 = vld [vmem:[#allocation17 + $0xf44] ss:$8 sps:$4 sm:$0xff]  }
 0xdf1   : > { %17477 = vmatprep.subr.bf16.mxu1 %v24452_v42  ;;  %v24530_v42 = vld [vmem:[#allocation17 + $0xf54] ss:$8 sps:$4 sm:$0xff]  }
 0xdf4   : > { %17478 = vmatpush1.bf16.msra.mxu1 %v24450_v7  ;;  %v24533_v7 = vld [vmem:[#allocation17 + $0xf64] ss:$8 sps:$4 sm:$0xff]  }
 0xdf5   : > { %17479 = vmatprep.subr.bf16.mxu1 %v24455_v10  ;;  %v24531_v10 = vld [vmem:[#allocation17 + $0xf60] ss:$8 sps:$4 sm:$0xff]  }
 0xdf8   : > { %17480 = vmatpush1.bf16.msra.mxu1 %v24453_v16  ;;  %v24536_v16 = vld [vmem:[#allocation17 + $0xf74] ss:$8 sps:$4 sm:$0xff]  }
 0xdf9   : > { %17481 = vmatprep.subr.bf16.mxu1 %v24458_v61  ;;  %v24534_v61 = vld [vmem:[#allocation17 + $0xf70] ss:$8 sps:$4 sm:$0xff]  }
 0xdfc   : > { %17482 = vmatpush1.bf16.msra.mxu1 %v24456_v52  ;;  %v24539_v52 = vld [vmem:[#allocation17 + $0xf84] ss:$8 sps:$4 sm:$0xff]  }
 0xdfd   : > { %17483 = vmatprep.subr.bf16.mxu1 %v24461_v55  ;;  %v24537_v55 = vld [vmem:[#allocation17 + $0xf80] ss:$8 sps:$4 sm:$0xff]  }
 0xe00   : > { %17484 = vmatpush1.bf16.msra.mxu1 %v24459_v1  ;;  %v24542_v1 = vld [vmem:[#allocation17 + $0xf94] ss:$8 sps:$4 sm:$0xff]  }
 0xe01   : > { %17485 = vmatprep.subr.bf16.mxu1 %v24464_v47  ;;  %v24540_v47 = vld [vmem:[#allocation17 + $0xf90] ss:$8 sps:$4 sm:$0xff]  }
 0xe04   : > { %17486 = vmatpush1.bf16.msra.mxu1 %v24462_v5  ;;  %v24545_v5 = vld [vmem:[#allocation17 + $0xfa4] ss:$8 sps:$4 sm:$0xff]  }
 0xe05   : > { %17496 = vmatprep.subr.bf16.mxu1 %v24467_v60  ;;  %v24543_v60 = vld [vmem:[#allocation17 + $0xfa0] ss:$8 sps:$4 sm:$0xff]  }
 0xe07   : > { %17488 = vmatmul.mubr.bf16.vlgmr.msra.gmra.mrb[56].mxu1 %v13444_v54  ;;  %v24546_v54 = vld [vmem:[#allocation17 + $0xfb0] ss:$8 sps:$4 sm:$0xff]  }
 0xe08   : > { %17497 = vmatpush1.bf16.msra.mxu1 %v24465_v14  ;;  %17528 = vmatprep.mubr.bf16.mxu1 %v13447_v15  ;;  %v24548_v14 = vld [vmem:[#allocation17 + $0xfb4] ss:$8 sps:$4 sm:$0xff]   ;;  %v24549_v15 = vld [vmem:[#allocation17 + $0xfc0] ss:$8 sps:$4 sm:$0xff]  }
 0xe09   : > { %17498 = vmatprep.subr.bf16.mxu1 %v24470_v39  ;;  %v24551_v39 = vld [vmem:[#allocation17 + $0xfc4] ss:$8 sps:$4 sm:$0xff]  }
 0xe0c   : > { %17499 = vmatpush1.bf16.msra.mxu1 %v24468_v32  ;;  %v24554_v32 = vld [vmem:[#allocation17 + $0xfd4] ss:$8 sps:$4 sm:$0xff]  }
 0xe0d   : > { %17500 = vmatprep.subr.bf16.mxu1 %v24473_v62  ;;  %v24552_v62 = vld [vmem:[#allocation17 + $0xfd0] ss:$8 sps:$4 sm:$0xff]  }
 0xe10   : > { %17501 = vmatpush1.bf16.msra.mxu1 %v24471_v63  ;;  %v24557_v63 = vld [vmem:[#allocation17 + $0xfe4] ss:$8 sps:$4 sm:$0xff]  }
 0xe11   : > { %17502 = vmatprep.subr.bf16.mxu1 %v24476_v40  ;;  %v24555_v40 = vld [vmem:[#allocation17 + $0xfe0] ss:$8 sps:$4 sm:$0xff]  }
 0xe14   : > { %17503 = vmatpush1.bf16.msra.mxu1 %v24474_v0  ;;  %v24560_v0 = vld [vmem:[#allocation17 + $0xff4] ss:$8 sps:$4 sm:$0xff]  }
 0xe15   : > { %17504 = vmatprep.subr.bf16.mxu1 %v24479_v50  ;;  %v24558_v50 = vld [vmem:[#allocation17 + $0xff0] ss:$8 sps:$4 sm:$0xff]  }
 0xe18   : > { %17505 = vmatpush1.bf16.msra.mxu1 %v24477_v11  ;;  %v24563_v11 = vld [vmem:[#allocation17 + $0x1004] ss:$8 sps:$4 sm:$0xff]  }
 0xe19   : > { %17506 = vmatprep.subr.bf16.mxu1 %v24482_v37  ;;  %v28406_v37 = vld [vmem:[#allocation4 + $0x20] sm:$0xf] }
 0xe1c   : > { %17507 = vmatpush1.bf16.msra.mxu1 %v24480_v43  ;;  %v13373_v43 = vrot.slane %v28406_v37, %v28207_v20 }
 0xe1d   : > { %17508 = vmatprep.subr.bf16.mxu1 %v24485_v49  ;;  %v24561_v49 = vld [vmem:[#allocation17 + $0x1000] ss:$8 sps:$4 sm:$0xff]  }
 0xe20   : > { %17509 = vmatpush1.bf16.msra.mxu1 %v24483_v34  ;;  %v13448_v34 = vpack.c.bf16 %v28340_v53, %v28340_v53 }
 0xe21   : > { %17510 = vmatprep.subr.bf16.mxu1 %v24488_v36  ;;  %v24566_v36 = vld [vmem:[#allocation17 + $0x1014] ss:$8 sps:$4 sm:$0xff]  }
 0xe24   : > { %17511 = vmatpush1.bf16.msra.mxu1 %v24486_v23  ;;  %v13451_v23 = vpack.c.bf16 %v13373_v43, %v13373_v43  ;;  %v24587_v43 = vld [vmem:[#allocation17 + $0x1084] ss:$8 sps:$4 sm:$0xff]  }
 0xe25   : > { %17512 = vmatprep.subr.bf16.mxu1 %v24491_v56  ;;  %v24564_v56 = vld [vmem:[#allocation17 + $0x1010] ss:$8 sps:$4 sm:$0xff]  }
 0xe28   : > { %17513 = vmatpush1.bf16.msra.mxu1 %v24489_v21  ;;  %v24569_v21 = vld [vmem:[#allocation17 + $0x1024] ss:$8 sps:$4 sm:$0xff]  }
 0xe29   : > { %17514 = vmatprep.subr.bf16.mxu1 %v24494_v59  ;;  %v17678_v59 = vld [vmem:[%s28576_s11 + $0x80] sm:$0xff] }
 0xe2c   : > { %17515 = vmatpush1.bf16.msra.mxu1 %v24492_v58  ;;  %v17679_v58 = vld [vmem:[%s28576_s11 + $0x88] sm:$0xff] }
 0xe2d   : > { %17516 = vmatprep.subr.bf16.mxu1 %v24497_v18  ;;  %v17662_v18 = vld [vmem:[%s28576_s11] sm:$0xff]  ;;  %v22675_v53 = vpack.c.bf16 %v17679_v58, %v17678_v59 }
 0xe2e   : > { %v24594_v59 = vld [vmem:[#allocation17 + $0x10b0] ss:$8 sps:$4 sm:$0xff]   ;;  %v24599_v58 = vld [vmem:[#allocation17 + $0x10c4] ss:$8 sps:$4 sm:$0xff]  }
 0xe2f   : > { %22676 = vmatprep.subr.bf16.mxu0 %v22675_v53  ;;  %v24602_v53 = vld [vmem:[#allocation17 + $0x10d4] ss:$8 sps:$4 sm:$0xff]  }
 0xe30   : > { %17517 = vmatpush1.bf16.msra.mxu1 %v24495_v4  ;;  %v17663_v4 = vld [vmem:[%s28576_s11 + $0x8] sm:$0xff] }
 0xe31   : > { %17518 = vmatprep.subr.bf16.mxu1 %v24500_v17  ;;  %v17680_v17 = vld [vmem:[%s28576_s11 + $0x90] sm:$0xff] }
 0xe34   : > { %17519 = vmatpush1.bf16.msra.mxu1 %v24498_v30  ;;  %v17681_v30 = vld [vmem:[%s28576_s11 + $0x98] sm:$0xff] }
 0xe35   : > { %17520 = vmatprep.subr.bf16.mxu1 %v24503_v41  ;;  %v22677_v41 = vpack.c.bf16 %v17663_v4, %v17662_v18  ;;  %v24597_v18 = vld [vmem:[#allocation17 + $0x10c0] ss:$8 sps:$4 sm:$0xff]   ;;  %v24600_v4 = vld [vmem:[#allocation17 + $0x10d0] ss:$8 sps:$4 sm:$0xff]  }
 0xe37   : > { %22678 = vmatpush3.bf16.msra.mxu0 %v22677_v41  ;;  %v24608_v41 = vld [vmem:[#allocation17 + $0x10f4] ss:$8 sps:$4 sm:$0xff]  }
 0xe38   : > { %17521 = vmatpush1.bf16.msra.mxu1 %v24501_v19  ;;  %v22679_v19 = vpack.c.bf16 %v17681_v30, %v17680_v17  ;;  %v24605_v17 = vld [vmem:[#allocation17 + $0x10e4] ss:$8 sps:$4 sm:$0xff]   ;;  %v24603_v30 = vld [vmem:[#allocation17 + $0x10e0] ss:$8 sps:$4 sm:$0xff]  }
 0xe39   : > { %17522 = vmatprep.subr.bf16.mxu1 %v24506_v13  ;;  %v17664_v13 = vld [vmem:[%s28576_s11 + $0x10] sm:$0xff] }
 0xe3a   : > { %22680 = vmatprep.subr.bf16.mxu0 %v22679_v19  ;;  %v24606_v19 = vld [vmem:[#allocation17 + $0x10f0] ss:$8 sps:$4 sm:$0xff]  }
 0xe3c   : > { %17523 = vmatpush1.bf16.msra.mxu1 %v24504_v12  ;;  %v17665_v12 = vld [vmem:[%s28576_s11 + $0x18] sm:$0xff] }
 0xe3d   : > { %17524 = vmatprep.subr.bf16.mxu1 %v24509_v6  ;;  %v17682_v6 = vld [vmem:[%s28576_s11 + $0xa0] sm:$0xff] }
 0xe40   : > { %17525 = vmatpush1.bf16.msra.mxu1 %v24507_v29  ;;  %v17683_v29 = vld [vmem:[%s28576_s11 + $0xa8] sm:$0xff] }
 0xe41   : > { %17526 = vmatprep.subr.bf16.mxu1 %v24512_v57  ;;  %v22681_v57 = vpack.c.bf16 %v17665_v12, %v17664_v13  ;;  %v13369_v13 = vrot.slane %v28406_v37, %v28219_v48  ;;  %v24611_v12 = vld [vmem:[#allocation17 + $0x1104] ss:$8 sps:$4 sm:$0xff]   ;;  %v24618_v37 = vld [vmem:[#allocation17 + $0x1130] ss:$8 sps:$4 sm:$0xff]  }
 0xe43   : > { %22682 = vmatpush3.bf16.msra.mxu0 %v22681_v57  ;;  %v24614_v57 = vld [vmem:[#allocation17 + $0x1114] ss:$8 sps:$4 sm:$0xff]  }
 0xe44   : > { %17527 = vmatpush1.bf16.msra.mxu1 %v24510_v27  ;;  %v24567_v27 = vld [vmem:[#allocation17 + $0x1020] ss:$8 sps:$4 sm:$0xff]  }
 0xe45   : > { %17537 = vmatprep.subr.bf16.mxu1 %v24515_v24  ;;  %v22683_v24 = vpack.c.bf16 %v17683_v29, %v17682_v6  ;;  %v24609_v6 = vld [vmem:[#allocation17 + $0x1100] ss:$8 sps:$4 sm:$0xff]   ;;  %v13450_v29 = vpack.c.bf16 %v13369_v13, %v13369_v13 }
 0xe47   : > { %17529 = vmatmul.mubr.bf16.vlgmr.msra.gmra.mrb[56].mxu1 %v13446_v26  ;;  %v17667_v26 = vld [vmem:[%s28576_s11 + $0x28] sm:$0xff]  ;;  %22684 = vmatprep.subr.bf16.mxu0 %v22683_v24 }
 0xe48   : > { %17538 = vmatpush1.bf16.msra.mxu1 %v24513_v45  ;;  %17569 = vmatprep.mubr.bf16.mxu1 %v13449_v35  ;;  %v17666_v45 = vld [vmem:[%s28576_s11 + $0x20] sm:$0xff]  ;;  %v17684_v35 = vld [vmem:[%s28576_s11 + $0xb0] sm:$0xff] }
 0xe49   : > { %17539 = vmatprep.subr.bf16.mxu1 %v24518_v9  ;;  %v24572_v9 = vld [vmem:[#allocation17 + $0x1034] ss:$8 sps:$4 sm:$0xff]   ;;  %v24612_v24 = vld [vmem:[#allocation17 + $0x1110] ss:$8 sps:$4 sm:$0xff]  }
 0xe4c   : > { %17540 = vmatpush1.bf16.msra.mxu1 %v24516_v2  ;;  %v17685_v2 = vld [vmem:[%s28576_s11 + $0xb8] sm:$0xff] }
 0xe4d   : > { %17541 = vmatprep.subr.bf16.mxu1 %v24521_v8  ;;  %v22685_v8 = vpack.c.bf16 %v17667_v26, %v17666_v45  ;;  %v24617_v45 = vld [vmem:[#allocation17 + $0x1124] ss:$8 sps:$4 sm:$0xff]   ;;  %v24615_v26 = vld [vmem:[#allocation17 + $0x1120] ss:$8 sps:$4 sm:$0xff]  }
 0xe4f   : > { %22686 = vmatpush3.bf16.msra.mxu0 %v22685_v8  ;;  %v24626_v8 = vld [vmem:[#allocation17 + $0x1154] ss:$8 sps:$4 sm:$0xff]  }
 0xe50   : > { %17542 = vmatpush1.bf16.msra.mxu1 %v24519_v22  ;;  %v24570_v22 = vld [vmem:[#allocation17 + $0x1030] ss:$8 sps:$4 sm:$0xff]  }
 0xe51   : > { %17543 = vmatprep.subr.bf16.mxu1 %v24524_v28  ;;  %v22687_v28 = vpack.c.bf16 %v17685_v2, %v17684_v35  ;;  %v24623_v35 = vld [vmem:[#allocation17 + $0x1144] ss:$8 sps:$4 sm:$0xff]   ;;  %v24621_v2 = vld [vmem:[#allocation17 + $0x1140] ss:$8 sps:$4 sm:$0xff]  }
 0xe53   : > { %22688 = vmatprep.subr.bf16.mxu0 %v22687_v28  ;;  %v24627_v28 = vld [vmem:[#allocation17 + $0x1160] ss:$8 sps:$4 sm:$0xff]  }
 0xe54   : > { %17544 = vmatpush1.bf16.msra.mxu1 %v24522_v51  ;;  %v17668_v51 = vld [vmem:[%s28576_s11 + $0x30] sm:$0xff] }
 0xe55   : > { %17545 = vmatprep.subr.bf16.mxu1 %v24527_v31  ;;  %v17669_v31 = vld [vmem:[%s28576_s11 + $0x38] sm:$0xff] }
 0xe58   : > { %17546 = vmatpush1.bf16.msra.mxu1 %v24525_v25  ;;  %v24575_v25 = vld [vmem:[#allocation17 + $0x1044] ss:$8 sps:$4 sm:$0xff]  }
 0xe59   : > { %17547 = vmatprep.subr.bf16.mxu1 %v24530_v42  ;;  %v17686_v42 = vld [vmem:[%s28576_s11 + $0xc0] sm:$0xff] }
 0xe5c   : > { %17548 = vmatpush1.bf16.msra.mxu1 %v24528_v33  ;;  %v17687_v33 = vld [vmem:[%s28576_s11 + $0xc8] sm:$0xff] }
 0xe5d   : > { %17549 = vmatprep.subr.bf16.mxu1 %v24533_v7  ;;  %v22689_v7 = vpack.c.bf16 %v17669_v31, %v17668_v51  ;;  %v24632_v51 = vld [vmem:[#allocation17 + $0x1174] ss:$8 sps:$4 sm:$0xff]   ;;  %v24630_v31 = vld [vmem:[#allocation17 + $0x1170] ss:$8 sps:$4 sm:$0xff]  }
 0xe5f   : > { %22690 = vmatpush3.bf16.msra.mxu0 %v22689_v7  ;;  %v24636_v7 = vld [vmem:[#allocation17 + $0x1190] ss:$8 sps:$4 sm:$0xff]  }
 0xe60   : > { %17550 = vmatpush1.bf16.msra.mxu1 %v24531_v10  ;;  %v24573_v10 = vld [vmem:[#allocation17 + $0x1040] ss:$8 sps:$4 sm:$0xff]  }
 0xe61   : > { %17551 = vmatprep.subr.bf16.mxu1 %v24536_v16  ;;  %v22691_v16 = vpack.c.bf16 %v17687_v33, %v17686_v42  ;;  %v24633_v42 = vld [vmem:[#allocation17 + $0x1180] ss:$8 sps:$4 sm:$0xff]   ;;  %v24638_v33 = vld [vmem:[#allocation17 + $0x1194] ss:$8 sps:$4 sm:$0xff]  }
 0xe63   : > { %22692 = vmatprep.subr.bf16.mxu0 %v22691_v16  ;;  %v24639_v16 = vld [vmem:[#allocation17 + $0x11a0] ss:$8 sps:$4 sm:$0xff]  }
 0xe64   : > { %17552 = vmatpush1.bf16.msra.mxu1 %v24534_v61  ;;  %v17670_v61 = vld [vmem:[%s28576_s11 + $0x40] sm:$0xff] }
 0xe65   : > { %17553 = vmatprep.subr.bf16.mxu1 %v24539_v52  ;;  %v17671_v52 = vld [vmem:[%s28576_s11 + $0x48] sm:$0xff] }
 0xe68   : > { %17554 = vmatpush1.bf16.msra.mxu1 %v24537_v55  ;;  %v24578_v55 = vld [vmem:[#allocation17 + $0x1054] ss:$8 sps:$4 sm:$0xff]  }
 0xe69   : > { %17555 = vmatprep.subr.bf16.mxu1 %v24542_v1  ;;  %v17688_v1 = vld [vmem:[%s28576_s11 + $0xd0] sm:$0xff] }
 0xe6c   : > { %17556 = vmatpush1.bf16.msra.mxu1 %v24540_v47  ;;  %v17689_v47 = vld [vmem:[%s28576_s11 + $0xd8] sm:$0xff] }
 0xe6d   : > { %17557 = vmatprep.subr.bf16.mxu1 %v24545_v5  ;;  %v22693_v5 = vpack.c.bf16 %v17671_v52, %v17670_v61  ;;  %v24644_v61 = vld [vmem:[#allocation17 + $0x11b4] ss:$8 sps:$4 sm:$0xff]   ;;  %v24642_v52 = vld [vmem:[#allocation17 + $0x11b0] ss:$8 sps:$4 sm:$0xff]  }
 0xe6f   : > { %22694 = vmatpush3.bf16.msra.mxu0 %v22693_v5  ;;  %v24648_v5 = vld [vmem:[#allocation17 + $0x11d0] ss:$8 sps:$4 sm:$0xff]  }
 0xe70   : > { %17558 = vmatpush1.bf16.msra.mxu1 %v24543_v60  ;;  %v24576_v60 = vld [vmem:[#allocation17 + $0x1050] ss:$8 sps:$4 sm:$0xff]  }
 0xe71   : > { %17559 = vmatprep.subr.bf16.mxu1 %v24548_v14  ;;  %v22695_v14 = vpack.c.bf16 %v17689_v47, %v17688_v1  ;;  %v24645_v1 = vld [vmem:[#allocation17 + $0x11c0] ss:$8 sps:$4 sm:$0xff]   ;;  %v24650_v47 = vld [vmem:[#allocation17 + $0x11d4] ss:$8 sps:$4 sm:$0xff]  }
 0xe73   : > { %22696 = vmatprep.subr.bf16.mxu0 %v22695_v14  ;;  %v24651_v14 = vld [vmem:[#allocation17 + $0x11e0] ss:$8 sps:$4 sm:$0xff]  }
 0xe74   : > { %17560 = vmatpush1.bf16.msra.mxu1 %v24546_v54  ;;  %v17672_v54 = vld [vmem:[%s28576_s11 + $0x50] sm:$0xff] }
 0xe75   : > { %17561 = vmatprep.subr.bf16.mxu1 %v24551_v39  ;;  %v17673_v39 = vld [vmem:[%s28576_s11 + $0x58] sm:$0xff] }
 0xe78   : > { %17562 = vmatpush1.bf16.msra.mxu1 %v24549_v15  ;;  %v24581_v15 = vld [vmem:[#allocation17 + $0x1064] ss:$8 sps:$4 sm:$0xff]  }
 0xe79   : > { %17563 = vmatprep.subr.bf16.mxu1 %v24554_v32  ;;  %v17690_v32 = vld [vmem:[%s28576_s11 + $0xe0] sm:$0xff] }
 0xe7c   : > { %17564 = vmatpush1.bf16.msra.mxu1 %v24552_v62  ;;  %v17691_v62 = vld [vmem:[%s28576_s11 + $0xe8] sm:$0xff] }
 0xe7d   : > { %17565 = vmatprep.subr.bf16.mxu1 %v24557_v63  ;;  %v22697_v63 = vpack.c.bf16 %v17673_v39, %v17672_v54  ;;  %v24656_v54 = vld [vmem:[#allocation17 + $0x11f4] ss:$8 sps:$4 sm:$0xff]   ;;  %v24654_v39 = vld [vmem:[#allocation17 + $0x11f0] ss:$8 sps:$4 sm:$0xff]  }
 0xe7f   : > { %22698 = vmatpush3.bf16.msra.mxu0 %v22697_v63 }
 0xe80   : > { %17566 = vmatpush1.bf16.msra.mxu1 %v24555_v40  ;;  %v24579_v40 = vld [vmem:[#allocation17 + $0x1060] ss:$8 sps:$4 sm:$0xff]  }
 0xe81   : > { %17567 = vmatprep.subr.bf16.mxu1 %v24560_v0  ;;  %v22699_v0 = vpack.c.bf16 %v17691_v62, %v17690_v32  ;;  %v17674_v32 = vld [vmem:[%s28576_s11 + $0x60] sm:$0xff]  ;;  %v17675_v62 = vld [vmem:[%s28576_s11 + $0x68] sm:$0xff] }
 0xe82   : > { %v22701_v63 = vpack.c.bf16 %v17675_v62, %v17674_v32 }
 0xe83   : > { %22700 = vmatprep.subr.bf16.mxu0 %v22699_v0  ;;  %v17693_v0 = vld [vmem:[%s28576_s11 + $0xf8] sm:$0xff] }
 0xe84   : > { %17568 = vmatpush1.bf16.msra.mxu1 %v24558_v50  ;;  %v24584_v50 = vld [vmem:[#allocation17 + $0x1074] ss:$8 sps:$4 sm:$0xff]   ;;  %22702 = vmatpush3.bf16.msra.mxu0 %v22701_v63 }
 0xe85   : > { %17578 = vmatprep.subr.bf16.mxu1 %v24563_v11  ;;  %v24582_v11 = vld [vmem:[#allocation17 + $0x1070] ss:$8 sps:$4 sm:$0xff]  }
 0xe87   : > { %17570 = vmatmul.mubr.bf16.vlgmr.msra.gmra.mrb[56].mxu1 %v13448_v34  ;;  %v24590_v34 = vld [vmem:[#allocation17 + $0x1094] ss:$8 sps:$4 sm:$0xff]  }
 0xe88   : > { %17579 = vmatpush1.bf16.msra.mxu1 %v24561_v49  ;;  %17610 = vmatprep.mubr.bf16.mxu1 %v13451_v23  ;;  %v24585_v49 = vld [vmem:[#allocation17 + $0x1080] ss:$8 sps:$4 sm:$0xff]   ;;  %v24593_v23 = vld [vmem:[#allocation17 + $0x10a4] ss:$8 sps:$4 sm:$0xff]  }
 0xe89   : > { %17580 = vmatprep.subr.bf16.mxu1 %v24566_v36  ;;  %v24588_v36 = vld [vmem:[#allocation17 + $0x1090] ss:$8 sps:$4 sm:$0xff]  }
 0xe8c   : > { %17581 = vmatpush1.bf16.msra.mxu1 %v24564_v56  ;;  %v24591_v56 = vld [vmem:[#allocation17 + $0x10a0] ss:$8 sps:$4 sm:$0xff]  }
 0xe8d   : > { %17582 = vmatprep.subr.bf16.mxu1 %v24569_v21  ;;  %v24596_v21 = vld [vmem:[#allocation17 + $0x10b4] ss:$8 sps:$4 sm:$0xff]  }
 0xe90   : > { %17583 = vmatpush1.bf16.msra.mxu1 %v24567_v27  ;;  %v13453_v27 = vpack.c.bf16 %v28343_v3, %v28343_v3  ;;  %v24624_v3 = vld [vmem:[#allocation17 + $0x1150] ss:$8 sps:$4 sm:$0xff]  }
 0xe91   : > { %17584 = vmatprep.subr.bf16.mxu1 %v24572_v9  ;;  %v24620_v9 = vld [vmem:[#allocation17 + $0x1134] ss:$8 sps:$4 sm:$0xff]  }
 0xe94   : > { %17585 = vmatpush1.bf16.msra.mxu1 %v24570_v22  ;;  %v24629_v22 = vld [vmem:[#allocation17 + $0x1164] ss:$8 sps:$4 sm:$0xff]  }
 0xe95   : > { %17586 = vmatprep.subr.bf16.mxu1 %v24575_v25  ;;  %v24635_v25 = vld [vmem:[#allocation17 + $0x1184] ss:$8 sps:$4 sm:$0xff]  }
 0xe98   : > { %17587 = vmatpush1.bf16.msra.mxu1 %v24573_v10  ;;  %v24641_v10 = vld [vmem:[#allocation17 + $0x11a4] ss:$8 sps:$4 sm:$0xff]  }
 0xe99   : > { %17588 = vmatprep.subr.bf16.mxu1 %v24578_v55  ;;  %v24647_v55 = vld [vmem:[#allocation17 + $0x11c4] ss:$8 sps:$4 sm:$0xff]  }
 0xe9c   : > { %17589 = vmatpush1.bf16.msra.mxu1 %v24576_v60  ;;  %v24653_v60 = vld [vmem:[#allocation17 + $0x11e4] ss:$8 sps:$4 sm:$0xff]  }
 0xe9d   : > { %17590 = vmatprep.subr.bf16.mxu1 %v24581_v15  ;;  %v13452_v15 = vpack.c.bf16 %v28346_v44, %v28346_v44  ;;  %v17676_v44 = vld [vmem:[%s28576_s11 + $0x70] sm:$0xff] }
 0xea0   : > { %17591 = vmatpush1.bf16.msra.mxu1 %v24579_v40  ;;  %v17692_v40 = vld [vmem:[%s28576_s11 + $0xf0] sm:$0xff] }
 0xea1   : > { %17592 = vmatprep.subr.bf16.mxu1 %v24584_v50  ;;  %v22703_v50 = vpack.c.bf16 %v17693_v0, %v17692_v40 }
 0xea3   : > { %22704 = vmatprep.subr.bf16.mxu0 %v22703_v50 }
 0xea4   : > { %17593 = vmatpush1.bf16.msra.mxu1 %v24582_v11  ;;  %v17677_v11 = vld [vmem:[%s28576_s11 + $0x78] sm:$0xff] }
 0xea5   : > { %17594 = vmatprep.subr.bf16.mxu1 %v24587_v43  ;;  %v22705_v43 = vpack.c.bf16 %v17677_v11, %v17676_v44 }
 0xea7   : > { %22706 = vmatpush3.bf16.msra.mxu0 %v22705_v43 }
 0xea8   : > { %17595 = vmatpush1.bf16.msra.mxu1 %v24585_v49  ;;  %v14030_v49 = vld [vmem:[#allocation19] sm:$0x3] }
 0xea9   : > { %17596 = vmatprep.subr.bf16.mxu1 %v24590_v34  ;;  %v16915_v34 = vrot.slane %v14030_v49, %v28219_v48 }
 0xeac   : > { %17597 = vmatpush1.bf16.msra.mxu1 %v24588_v36  ;;  %v16919_v36 = vrot.slane %v14030_v49, %v28207_v20 }
 0xead   : > { %17598 = vmatprep.subr.bf16.mxu1 %v24593_v23  ;;  %v16957_v23 = vadd.f32 %v28360_v46, %v16915_v34 }
 0xeb0   : > { %17599 = vmatpush1.bf16.msra.mxu1 %v24591_v56  ;;  %v16959_v56 = vadd.f32 %v28362_v38, %v16919_v36 }
 0xeb1   : > { %17600 = vmatprep.subr.bf16.mxu1 %v24596_v21 }
 0xeb4   : > { %17601 = vmatpush1.bf16.msra.mxu1 %v24594_v59 }
 0xeb5   : > { %17602 = vmatprep.subr.bf16.mxu1 %v24599_v58 }
 0xeb8   : > { %17603 = vmatpush1.bf16.msra.mxu1 %v24597_v18 }
 0xeb9   : > { %17604 = vmatprep.subr.bf16.mxu1 %v24602_v53 }
 0xebc   : > { %17605 = vmatpush1.bf16.msra.mxu1 %v24600_v4 }
 0xebd   : > { %17606 = vmatprep.subr.bf16.mxu1 %v24605_v17 }
 0xec0   : > { %17607 = vmatpush1.bf16.msra.mxu1 %v24603_v30 }
 0xec1   : > { %17608 = vmatprep.subr.bf16.mxu1 %v24608_v41  ;;  %v17694_v41 = vld [vmem:[#allocation20] sm:$0x1] }
 0xec4   : > { %17609 = vmatpush1.bf16.msra.mxu1 %v24606_v19 }
 0xec5   : > { %17619 = vmatprep.subr.bf16.mxu1 %v24611_v12 }
 0xec7   : > { %17611 = vmatmul.mubr.bf16.vlgmr.msra.gmra.mrb[56].mxu1 %v13450_v29 }
 0xec8   : > { %17620 = vmatpush1.bf16.msra.mxu1 %v24609_v6  ;;  %17651 = vmatprep.mubr.bf16.mxu1 %v13453_v27 }
 0xec9   : > { %17621 = vmatprep.subr.bf16.mxu1 %v24614_v57 }
 0xecc   : > { %17622 = vmatpush1.bf16.msra.mxu1 %v24612_v24 }
 0xecd   : > { %17623 = vmatprep.subr.bf16.mxu1 %v24617_v45 }
 0xed0   : > { %17624 = vmatpush1.bf16.msra.mxu1 %v24615_v26 }
 0xed1   : > { %17625 = vmatprep.subr.bf16.mxu1 %v24620_v9 }
 0xed4   : > { %17626 = vmatpush1.bf16.msra.mxu1 %v24618_v37 }
 0xed5   : > { %17627 = vmatprep.subr.bf16.mxu1 %v24623_v35 }
 0xed8   : > { %17628 = vmatpush1.bf16.msra.mxu1 %v24621_v2 }
 0xed9   : > { %17629 = vmatprep.subr.bf16.mxu1 %v24626_v8 }
 0xedc   : > { %17630 = vmatpush1.bf16.msra.mxu1 %v24624_v3 }
 0xedd   : > { %17631 = vmatprep.subr.bf16.mxu1 %v24629_v22 }
 0xee0   : > { %17632 = vmatpush1.bf16.msra.mxu1 %v24627_v28 }
 0xee1   : > { %17633 = vmatprep.subr.bf16.mxu1 %v24632_v51 }
 0xee4   : > { %17634 = vmatpush1.bf16.msra.mxu1 %v24630_v31 }
 0xee5   : > { %17635 = vmatprep.subr.bf16.mxu1 %v24635_v25 }
 0xee8   : > { %17636 = vmatpush1.bf16.msra.mxu1 %v24633_v42 }
 0xee9   : > { %17637 = vmatprep.subr.bf16.mxu1 %v24638_v33 }
 0xeec   : > { %17638 = vmatpush1.bf16.msra.mxu1 %v24636_v7 }
 0xeed   : > { %17639 = vmatprep.subr.bf16.mxu1 %v24641_v10 }
 0xef0   : > { %17640 = vmatpush1.bf16.msra.mxu1 %v24639_v16 }
 0xef1   : > { %17641 = vmatprep.subr.bf16.mxu1 %v24644_v61 }
 0xef4   : > { %17642 = vmatpush1.bf16.msra.mxu1 %v24642_v52 }
 0xef5   : > { %17643 = vmatprep.subr.bf16.mxu1 %v24647_v55 }
 0xef8   : > { %17644 = vmatpush1.bf16.msra.mxu1 %v24645_v1 }
 0xef9   : > { %17645 = vmatprep.subr.bf16.mxu1 %v24650_v47 }
 0xefc   : > { %17646 = vmatpush1.bf16.msra.mxu1 %v24648_v5 }
 0xefd   : > { %17647 = vmatprep.subr.bf16.mxu1 %v24653_v60 }
 0xf00   : > { %17648 = vmatpush1.bf16.msra.mxu1 %v24651_v14 }
 0xf01   : > { %17649 = vmatprep.subr.bf16.mxu1 %v24656_v54 }
 0xf04   : > { %17650 = vmatpush1.bf16.msra.mxu1 %v24654_v39 }
 0xf07   : > { %17652 = vmatmul.mubr.bf16.vlgmr.msra.gmra.mrb[56].mxu1 %v13452_v15 }
 0xfda   : > { %v17653_v21 = vpop.f32.mrb[56].mxu1 }
 0xfdb   : > { %v22744_v59 = vadd.f32 %v17653_v21, %v16957_v23  ;;  %v17655_v58 = vpop.f32.mrb[57].mxu1 }
 0xfdc   : > { %v22746_v18 = vadd.f32 %v17655_v58, %v16959_v56  ;;  %v17657_v53 = vpop.f32.mrb[58].mxu1 }
 0xfdd   : > { %v17658_v4 = vpop.f32.mrb[59].mxu1  ;;  %v17660_v30 = vmax.f32 %v22744_v59, 0.0 }
 0xfde   : > { %v17661_v17 = vmax.f32 %v22746_v18, 0.0 }
 0xfe0   : > { %17759 = vmatprep.mubr.f32.mxu0 %v17661_v17 }
 0xfe1   : > { %17760 = vmatmul.mubr.f32.vlgmr.msra.gmra.mrb[112].mxu0 %v17660_v30 }
0x10b4   : > { %v20703_v48 = vpop.f32.mrb[112].mxu0 }
0x10b5   : > { %v20704_v20 = vpop.f32.mrb[113].mxu0 }
0x10b6   : > { %v20705_v46 = vadd.f32 %v20704_v20, %v20703_v48 }
0x10b8   : > { %v17762_v38 = vadd.f32 %v20705_v46, %v17694_v41 }
0x10ba   : > { %17766 = vst.msk [vmem:[%s568_s25] sm:$0x1] %vm17765_vm8, %v17762_v38 }
0x10bb   : > { %24952 = shalt.err (!%p24949_p10)
}
0x10bc   : > { %s24953_s7 = scalar_lea.hbm %s28523_s22, 16  ;;  %s24957_s17 = scalar_lea.hbm %s28739_s14, 32 }
0x10bd   : > { %p24954_p2 = scmp.ne.s32.totalorder %s28523_s22, %s24953_s7  ;;  %p24958_p7 = scmp.lt.u32.totalorder %s28523_s22, %s28739_s14 }
0x10be   : > { %p24959_p8 = scmp.lt.u32.totalorder %s24957_s17, %s24953_s7  ;;  %p24961_p13 = scmp.lt.u32.totalorder %s24953_s7, %s28523_s22 }
0x10bf   : > { %p24955_p3 = pnand %p24954_p2, %p28740_p0 }
0x10c0   : > { %p24960_p11 = por %p24959_p8, %p24958_p7 }
0x10c1   : > { %p24956_p4 = pneg %p24955_p3 }
0x10c2   : > { %p24962_p1 = por %p24961_p13, %p24960_p11 }
0x10c4   : > { %p24963_p6 = pnand %p24962_p1, %p24956_p4 }
0x10c6   : > { %24966 = shalt.err (!%p24963_p6)
}
0x10c7   : > { %23680 = dma.vmem_to_hbm [thread:$0]  (%p28740_p0), %s28525_s21, 16, %s28523_s22, %s17768_s20  }
0x10c8 PF: > { %s28741_s24 = sld [smem:[#allocation32_spill]]  ;;  %s28742_s15 = sld [smem:[#allocation30_spill]] }
0x10c9   : > { %s28743_s19 = sld [smem:[#allocation35_spill]] }
0x10ce   : > { %p23737_p5 = scmp.ge.s32.totalorder %s28741_s24, 2  ;;  %s17792_s25 = sand.u32 1, %s28742_s15  }
0x10cf   : > { %p28744_p9 = scmp.ne.s32.totalorder %s28743_s19, 0  ;;  %s17793_s3 = scalar_lea.sflag [#allocation7], %s17792_s25 }
0x10d1   : > { %p23714_p12 = pnand %p23737_p5, %p28744_p9 }
0x10d3   : > { %25008 = dma.done.wait (!%p23714_p12), %s17793_s3, 16  }
0x10d4   : > { %25010 = vsyncadd (!%p23714_p12), %s17793_s3, 4294967280  ;;  %s28745_s28 = sld [smem:[#allocation33_spill]]  ;;  %s28746_s27 = sld [smem:[#allocation31_spill]] }
0x10d5   : > { %s28747_s30 = sld [smem:[#allocation34_spill]]  ;;  %s28748_s25 = smov %s25017_s26 }
0x10da   : > { %p29_p10 = scmp.ge.s32.totalorder %s28745_s28, 4   ;;  %s28749_s26 = smov %s28746_s27 }
0x10db   : > { %s28750_s27 = smov %s28747_s30 }
0x10dc   :  { %31 = sbr.rel (!%p29_p10) target bundleno = 15 (0xf), region = 172 }
0x10e3   :  { %17797 = vsyncpa [#allocation6], 1 }
0x10e4   :  { %17799 = vsyncpa [#allocation6 + $0x1], 1 }
0x10e5   :  { %17800 = vsyncpa [#allocation9], 1 }
0x10e6   :  { %17801 = vsyncpa [#allocation12], 1 }
0x10e7   :  { %17802 = vsyncpa [#allocation15], 1 }
0x10e8   :  { %17803 = vsyncpa [#allocation18], 1 }
0x10e9   :  { %17804 = vsyncpa [#allocation21], 1 }
0x10ea   :  { %17805 = vsyncpa [#allocation7], 1 }
0x10eb   :  { %17807 = vsyncpa [#allocation7 + $0x1], 1 }

</bundles_post_ra>
